<compile_context>
chip_gen: v7x
topology: tpu7x:2x2x1
jax: 0.10.0
libtpu: 0.0.40
codegen_flags: <defaults>
</compile_context>

<pallas_src>
import math

import jax
import jax.numpy as jnp
from jax import lax
from jax.experimental import pallas as pl
from jax.experimental.pallas import tpu as pltpu


def _round_up(v, m):
    return ((v + m - 1) // m) * m


def enhanced_decoder_layer(params, x, cross, kmax, *, batch_tile=None,
                           out_dtype=jnp.float32):
    """x: [B, L, D], cross: [B, S, D].  Returns (seasonal [B,L,D], residual_trend [B,L,D])."""
    B, L, D = x.shape
    S = cross.shape[1]
    Dff = params["w1"].shape[1]
    H1 = params["dec_wp1"].shape[2]

    Bt = B if batch_tile is None else batch_tile
    assert B % Bt == 0, "batch must be divisible by batch_tile"
    assert L % 8 == 0 and S % 8 == 0, "sequence lengths must be sublane (8) aligned"

    # static decomposition geometry (largest reachable kernel size after clamping)
    k_upper = min(kmax, L // 2)                      # clip upper bound used by torch.clamp
    k_eff = max(k_upper, 3)
    k_max_odd = k_eff if (k_eff % 2 == 1) else k_eff - 1
    p_max = max(k_max_odd // 2, 1)                   # largest half-width
    ntap = 2 * p_max + 1                             # static tap-loop length
    ntap_pad = _round_up(ntap, 8)                    # sublane-padded weight rows
    ppad = _round_up(p_max, 8)                       # replicate pad (aligned writes)
    pad_rows = L + 2 * ppad
    inv_sqrt_d = 1.0 / math.sqrt(D)

    # only the first ntap_pad taps of the (kmax-long) learnable weights are reachable
    taps_full = params["dec_taps"]                   # (3, kmax, D) f32
    if ntap_pad <= kmax:
        dtw = taps_full[:, :ntap_pad, :]
    else:
        dtw = jnp.concatenate(
            [taps_full, jnp.zeros((3, ntap_pad - kmax, D), taps_full.dtype)], axis=1)

    def kernel(x_ref, cross_ref,
               wq_s_ref, wk_s_ref, wv_s_ref, wo_s_ref,
               wq_c_ref, wk_c_ref, wv_c_ref, wo_c_ref,
               w1_ref, w2_ref,
               dtw_ref, wp1_ref, bp1_ref, wp2_ref,
               bp2_ref, sc_ref,
               seas_ref, trend_ref,
               pad_ref, tr_ref):
        f32 = jnp.float32
        bf16 = jnp.bfloat16

        xb = x_ref[...]                              # (Bt, L, D) f32
        cb = cross_ref[...]                          # (Bt, S, D) f32
        xf = xb.reshape(Bt * L, D)                   # row-flattened for the MXU (L % 8 == 0)
        cf = cb.reshape(Bt * S, D)

        def proj(rows2d, w_ref):
            # bf16 operands on the MXU, f32 accumulation
            return jnp.dot(rows2d.astype(bf16), w_ref[...], preferred_element_type=f32)

        def softmax_last(s):
            s = s - jnp.max(s, axis=-1, keepdims=True)
            p = jnp.exp(s)
            return p * pl.reciprocal(jnp.sum(p, axis=-1, keepdims=True), approx=True)

        def attend(q3, k3, v3, wo_ref, scale, resid):
            # q3: (Bt, Lq, D), k3/v3: (Bt, Lk, D)
            lq = q3.shape[1]
            s = jnp.einsum('bqd,bkd->bqk', q3.astype(bf16), k3.astype(bf16),
                           preferred_element_type=f32) * inv_sqrt_d
            p = softmax_last(s)
            ctx = jnp.einsum('bqk,bkd->bqd', p.astype(bf16), v3.astype(bf16),
                             preferred_element_type=f32)
            new_x = proj(ctx.reshape(Bt * lq, D), wo_ref).reshape(Bt, lq, D)
            return resid + scale * new_x             # dropout = identity (eval mode)

        def decomp(xc, di):
            """xc: (Bt, L, D) f32 -> (seasonal, trend), each (Bt, L, D) f32."""
            for b in range(Bt):                      # Bt is small & static -> unrolled
                xc_b = xc[b]                         # (L, D)

                # ---- kernel-size predictor MLP: mean over L FIRST, then (1,D)@(D,H1) ----
                xmean = jnp.mean(xc_b, axis=0, keepdims=True)                  # (1, D)
                h = jnp.dot(xmean, wp1_ref[di], preferred_element_type=f32) + bp1_ref[di]
                h = jnp.maximum(h, 0.0)
                z = jnp.sum(h * wp2_ref[di], axis=1, keepdims=True) + bp2_ref[di]   # (1, 1)
                logit = 1.0 / (1.0 + jnp.exp(-z))
                kf = logit * float(kmax - 5) + 5.0                             # positive f32

                # torch.round (half-to-even) built from safe ops (casts trunc toward 0; kf > 0)
                r0 = (kf + 0.5).astype(jnp.int32)
                frac = kf - kf.astype(jnp.int32).astype(f32)
                r0_is_odd = (r0 - 2 * (r0.astype(f32) * 0.5).astype(jnp.int32)) == 1
                ki = r0 - jnp.where(jnp.logical_and(frac == 0.5, r0_is_odd), 1, 0)
                ki = jnp.clip(ki, 3, k_upper)
                ki = ki - jnp.where(ki == 2 * (ki.astype(f32) * 0.5).astype(jnp.int32), 1, 0)
                ki = jnp.maximum(ki, 3)                                        # odd, (1,1) i32
                pk = (ki.astype(f32) * 0.5).astype(jnp.int32)                  # == k // 2

                # ---- masked softmax over the first k taps (per feature); EXACT division ----
                w = dtw_ref[di]                                                # (ntap_pad, D)
                tap = lax.broadcasted_iota(jnp.int32, (ntap_pad, D), 0)
                valid = tap < ki
                m = jnp.max(jnp.where(valid, w, -jnp.inf), axis=0, keepdims=True)
                e = jnp.where(valid, jnp.exp(w - m), 0.0)
                wnorm = e / jnp.sum(e, axis=0, keepdims=True)

                # ---- re-center taps so the tap loop uses static slice starts ----
                # wshift[u] = wnorm[u - (p_max - p)]  (zero outside the valid window)
                uu = lax.broadcasted_iota(jnp.int32, (ntap_pad, ntap_pad), 0)
                tt = lax.broadcasted_iota(jnp.int32, (ntap_pad, ntap_pad), 1)
                sel = ((tt - uu) == (pk - p_max)).astype(f32)
                wshift = jnp.dot(sel, wnorm, preferred_element_type=f32)       # (ntap_pad, D)

                # ---- replicate padding (static, sublane-aligned writes) ----
                pad_ref[0:ppad, :] = jnp.broadcast_to(xc_b[0:1, :], (ppad, D))
                pad_ref[ppad:ppad + L, :] = xc_b
                pad_ref[ppad + L:ppad + L + ppad, :] = jnp.broadcast_to(
                    xc_b[L - 1:L, :], (ppad, D))

                # ---- static tap loop, 4 partial accumulators (VALU ILP) ----
                n_acc = min(4, ntap)
                accs = []
                for u in range(ntap):
                    win = pad_ref[pl.ds(ppad - p_max + u, L), :]               # (L, D)
                    term = wshift[u:u + 1, :] * win
                    if u < n_acc:
                        accs.append(term)
                    else:
                        accs[u % n_acc] = accs[u % n_acc] + term
                while len(accs) > 1:
                    accs = [accs[i] + accs[i + 1] if i + 1 < len(accs) else accs[i]
                            for i in range(0, len(accs), 2)]
                tr_ref[b] = accs[0]                                            # (L, D)
            t = tr_ref[...]                                                    # (Bt, L, D)
            return xc - t, t

        # --- self attention + residual, decomp1 ---
        q3 = proj(xf, wq_s_ref).reshape(Bt, L, D)
        k3 = proj(xf, wk_s_ref).reshape(Bt, L, D)
        v3 = proj(xf, wv_s_ref).reshape(Bt, L, D)
        x1 = attend(q3, k3, v3, wo_s_ref, sc_ref[0], xb)
        x1s, t = decomp(x1, 0)
        trend_acc = t

        # --- cross attention + residual, decomp2 ---
        qc = proj(x1s.reshape(Bt * L, D), wq_c_ref).reshape(Bt, L, D)
        kc = proj(cf, wk_c_ref).reshape(Bt, S, D)
        vc = proj(cf, wv_c_ref).reshape(Bt, S, D)
        x2 = attend(qc, kc, vc, wo_c_ref, sc_ref[1], x1s)
        x2s, t = decomp(x2, 1)
        trend_acc = trend_acc + t

        # --- position-wise FFN (kernel-size-1 convs == matmuls) + residual, decomp3 ---
        y = jnp.maximum(proj(x2s.reshape(Bt * L, D), w1_ref), 0.0)            # (Bt*L, Dff)
        y = proj(y, w2_ref).reshape(Bt, L, D)
        x3s, t = decomp(x2s + y, 2)
        trend_acc = trend_acc + t

        seas_ref[...] = x3s.astype(seas_ref.dtype)
        trend_ref[...] = trend_acc.astype(trend_ref.dtype)

    const2 = lambda b: (0, 0)
    const3 = lambda b: (0, 0, 0)

    # NOTE: at production weight sizes add pipeline_mode=pl.Buffered(1) to the constant-index
    # weight specs below (v7x: 64 MiB VMEM) to avoid double-buffering them.
    seas, trend = pl.pallas_call(
        kernel,
        out_shape=(jax.ShapeDtypeStruct((B, L, D), out_dtype),
                   jax.ShapeDtypeStruct((B, L, D), out_dtype)),
        grid=(B // Bt,),
        in_specs=[
            pl.BlockSpec((Bt, L, D), lambda b: (b, 0, 0)),          # x
            pl.BlockSpec((Bt, S, D), lambda b: (b, 0, 0)),          # cross
            pl.BlockSpec((D, D), const2),                           # Wq (self)
            pl.BlockSpec((D, D), const2),                           # Wk (self)
            pl.BlockSpec((D, D), const2),                           # Wv (self)
            pl.BlockSpec((D, D), const2),                           # Wo (self)
            pl.BlockSpec((D, D), const2),                           # Wq (cross)
            pl.BlockSpec((D, D), const2),                           # Wk (cross)
            pl.BlockSpec((D, D), const2),                           # Wv (cross)
            pl.BlockSpec((D, D), const2),                           # Wo (cross)
            pl.BlockSpec((D, Dff), const2),                         # conv1 (k=1)
            pl.BlockSpec((Dff, D), const2),                         # conv2 (k=1)
            pl.BlockSpec((3, ntap_pad, D), const3),                 # decomp tap weights
            pl.BlockSpec((3, D, H1), const3),                       # predictor W1^T
            pl.BlockSpec((3, 1, H1), const3),                       # predictor b1
            pl.BlockSpec((3, 1, H1), const3),                       # predictor W2
            pl.BlockSpec((3,), lambda b: (0,), memory_space=pltpu.MemorySpace.SMEM),  # b2
            pl.BlockSpec((2,), lambda b: (0,), memory_space=pltpu.MemorySpace.SMEM),  # scales
        ],
        out_specs=[
            pl.BlockSpec((Bt, L, D), lambda b: (b, 0, 0)),
            pl.BlockSpec((Bt, L, D), lambda b: (b, 0, 0)),
        ],
        scratch_shapes=[pltpu.VMEM((pad_rows, D), jnp.float32),     # replicate-pad buffer
                        pltpu.VMEM((Bt, L, D), jnp.float32)],       # per-stage trend buffer
        compiler_params=pltpu.CompilerParams(
            # On v7x, pltpu.CORE_PARALLEL on this axis is the knob if "parallel" does not
            # shard the batch blocks across the two TensorCores.
            dimension_semantics=("parallel",),
            vmem_limit_bytes=32 * 1024 * 1024),
    )(x, cross,
      params["wq_s"], params["wk_s"], params["wv_s"], params["wo_s"],
      params["wq_c"], params["wk_c"], params["wv_c"], params["wo_c"],
      params["w1"], params["w2"],
      dtw, params["dec_wp1"], params["dec_bp1"], params["dec_wp2"],
      params["dec_bp2"], params["scales"])
    return seas, trend


# ----------------------------------------------------------------------------- parameter init
def init_params(key, d_model, d_ff, kmax=50, init_k=25):
    H1 = max(d_model // 2, 4)
    keys = list(jax.random.split(key, 32))
    s = 1.0 / math.sqrt(d_model)

    def nrm(k, shape, scale, dtype):
        return (jax.random.normal(k, shape) * scale).astype(dtype)

    p = {}
    for i, name in enumerate(["wq_s", "wk_s", "wv_s", "wo_s",
                              "wq_c", "wk_c", "wv_c", "wo_c"]):
        p[name] = nrm(keys[i], (d_model, d_model), s, jnp.bfloat16)
    p["w1"] = nrm(keys[8], (d_model, d_ff), s, jnp.bfloat16)
    p["w2"] = nrm(keys[9], (d_ff, d_model), 1.0 / math.sqrt(d_ff), jnp.bfloat16)
    p["scales"] = jnp.array([0.1, 0.1], jnp.float32)      # self_attn_scale, cross_attn_scale

    b1 = 1.0 / math.sqrt(d_model)
    b2 = 1.0 / math.sqrt(H1)
    taps, wp1, bp1, wp2, bp2 = [], [], [], [], []
    ki = 10
    for _ in range(3):
        tw = jax.random.normal(keys[ki], (d_model, kmax)); ki += 1
        tw = tw.at[:, :init_k].set(1.0 / init_k)          # nn.init.constant_ on first taps
        taps.append(jnp.transpose(tw))                    # (kmax, d_model)
        wp1.append(jax.random.uniform(keys[ki], (H1, d_model), minval=-b1, maxval=b1).T); ki += 1
        bp1.append(jax.random.uniform(keys[ki], (1, H1), minval=-b1, maxval=b1)); ki += 1
        wp2.append(jax.random.uniform(keys[ki], (1, H1), minval=-b2, maxval=b2)); ki += 1
        bp2.append(jax.random.uniform(keys[ki], (1,), minval=-b2, maxval=b2)); ki += 1
    p["dec_taps"] = jnp.stack(taps).astype(jnp.float32)   # (3, kmax, d_model)
    p["dec_wp1"] = jnp.stack(wp1).astype(jnp.float32)     # (3, d_model, H1)
    p["dec_bp1"] = jnp.stack(bp1).astype(jnp.float32)     # (3, 1, H1)
    p["dec_wp2"] = jnp.stack(wp2).astype(jnp.float32)     # (3, 1, H1)
    p["dec_bp2"] = jnp.concatenate(bp2).astype(jnp.float32)  # (3,)
    return p


if __name__ == "__main__":
    B, L, S, D = 4, 32, 48, 32          # batch, target seq, cross seq, d_model
    DFF = 4 * D
    KMAX = 50
    BT = 2                              # 2 batches folded per grid step -> 2 parallel steps

    root = jax.random.PRNGKey(0)
    kx, kc, kp = jax.random.split(root, 3)
    x = jax.random.normal(kx, (B, L, D), dtype=jnp.float32)
    cross = jax.random.normal(kc, (B, S, D), dtype=jnp.float32)
    params = init_params(kp, D, DFF, kmax=KMAX, init_k=25)

    fwd = jax.jit(lambda p, a, b: enhanced_decoder_layer(p, a, b, KMAX, batch_tile=BT))
    seasonal, residual_trend = fwd(params, x, cross)
    jax.block_until_ready(seasonal)
    jax.block_until_ready(residual_trend)

    assert seasonal.shape == (B, L, D) and residual_trend.shape == (B, L, D)
    assert bool(jnp.isfinite(seasonal).all()) and bool(jnp.isfinite(residual_trend).all())
    print("KERNEL_OK")
</pallas_src>

<mosaic_0001>
module attributes {stable_mosaic.version = 11 : i64} {
  func.func @kernel(%arg0: i32, %arg1: memref<2x32x32xf32, #tpu.memory_space<vmem>>, %arg2: memref<2x48x32xf32, #tpu.memory_space<vmem>>, %arg3: memref<32x32xbf16, #tpu.memory_space<vmem>>, %arg4: memref<32x32xbf16, #tpu.memory_space<vmem>>, %arg5: memref<32x32xbf16, #tpu.memory_space<vmem>>, %arg6: memref<32x32xbf16, #tpu.memory_space<vmem>>, %arg7: memref<32x32xbf16, #tpu.memory_space<vmem>>, %arg8: memref<32x32xbf16, #tpu.memory_space<vmem>>, %arg9: memref<32x32xbf16, #tpu.memory_space<vmem>>, %arg10: memref<32x32xbf16, #tpu.memory_space<vmem>>, %arg11: memref<32x128xbf16, #tpu.memory_space<vmem>>, %arg12: memref<128x32xbf16, #tpu.memory_space<vmem>>, %arg13: memref<3x16x32xf32, #tpu.memory_space<vmem>>, %arg14: memref<3x32x16xf32, #tpu.memory_space<vmem>>, %arg15: memref<3x1x16xf32, #tpu.memory_space<vmem>>, %arg16: memref<3x1x16xf32, #tpu.memory_space<vmem>>, %arg17: memref<3xf32, #tpu.memory_space<smem>>, %arg18: memref<2xf32, #tpu.memory_space<smem>>, %arg19: memref<2x32x32xf32, #tpu.memory_space<vmem>>, %arg20: memref<2x32x32xf32, #tpu.memory_space<vmem>>, %arg21: memref<48x32xf32, #tpu.memory_space<vmem>>, %arg22: memref<2x32x32xf32, #tpu.memory_space<vmem>>) attributes {dimension_semantics = [#tpu.dimension_semantics<parallel>], iteration_bounds = array<i64: 2>, scalar_prefetch = 0 : i64, scratch_operands = 2 : i64, tpu.core_type = #tpu.core_type<tc>, window_params = [{transform_indices = @transform_0, window_bounds = array<i64: 2, 32, 32>}, {transform_indices = @transform_1, window_bounds = array<i64: 2, 48, 32>}, {pipeline_mode = #tpu.pipeline_mode<synchronous>, transform_indices = @transform_2, window_bounds = array<i64: 32, 32>}, {pipeline_mode = #tpu.pipeline_mode<synchronous>, transform_indices = @transform_3, window_bounds = array<i64: 32, 32>}, {pipeline_mode = #tpu.pipeline_mode<synchronous>, transform_indices = @transform_4, window_bounds = array<i64: 32, 32>}, {pipeline_mode = #tpu.pipeline_mode<synchronous>, transform_indices = @transform_5, window_bounds = array<i64: 32, 32>}, {pipeline_mode = #tpu.pipeline_mode<synchronous>, transform_indices = @transform_6, window_bounds = array<i64: 32, 32>}, {pipeline_mode = #tpu.pipeline_mode<synchronous>, transform_indices = @transform_7, window_bounds = array<i64: 32, 32>}, {pipeline_mode = #tpu.pipeline_mode<synchronous>, transform_indices = @transform_8, window_bounds = array<i64: 32, 32>}, {pipeline_mode = #tpu.pipeline_mode<synchronous>, transform_indices = @transform_9, window_bounds = array<i64: 32, 32>}, {pipeline_mode = #tpu.pipeline_mode<synchronous>, transform_indices = @transform_10, window_bounds = array<i64: 32, 128>}, {pipeline_mode = #tpu.pipeline_mode<synchronous>, transform_indices = @transform_11, window_bounds = array<i64: 128, 32>}, {pipeline_mode = #tpu.pipeline_mode<synchronous>, transform_indices = @transform_12, window_bounds = array<i64: 3, 16, 32>}, {pipeline_mode = #tpu.pipeline_mode<synchronous>, transform_indices = @transform_13, window_bounds = array<i64: 3, 32, 16>}, {pipeline_mode = #tpu.pipeline_mode<synchronous>, transform_indices = @transform_14, window_bounds = array<i64: 3, 1, 16>}, {pipeline_mode = #tpu.pipeline_mode<synchronous>, transform_indices = @transform_15, window_bounds = array<i64: 3, 1, 16>}, {transform_indices = @transform_16, window_bounds = array<i64: 3>}, {transform_indices = @transform_17, window_bounds = array<i64: 2>}, {transform_indices = @transform_18, window_bounds = array<i64: 2, 32, 32>}, {transform_indices = @transform_19, window_bounds = array<i64: 2, 32, 32>}]} {
    %c0 = arith.constant 0 : index
    %c0_0 = arith.constant 0 : index
    %c0_1 = arith.constant 0 : index
    %0 = vector.load %arg1[%c0, %c0_0, %c0_1] : memref<2x32x32xf32, #tpu.memory_space<vmem>>, vector<2x32x32xf32>
    %c0_2 = arith.constant 0 : index
    %c0_3 = arith.constant 0 : index
    %c0_4 = arith.constant 0 : index
    %1 = vector.load %arg2[%c0_2, %c0_3, %c0_4] : memref<2x48x32xf32, #tpu.memory_space<vmem>>, vector<2x48x32xf32>
    %2 = vector.shape_cast %0 : vector<2x32x32xf32> to vector<64x32xf32>
    %3 = vector.shape_cast %1 : vector<2x48x32xf32> to vector<96x32xf32>
    %4 = arith.truncf %2 : vector<64x32xf32> to vector<64x32xbf16>
    %c0_5 = arith.constant 0 : index
    %c0_6 = arith.constant 0 : index
    %5 = vector.load %arg3[%c0_5, %c0_6] : memref<32x32xbf16, #tpu.memory_space<vmem>>, vector<32x32xbf16>
    %cst = arith.constant dense<0.000000e+00> : vector<64x32xf32>
    %6 = tpu.matmul %4, %5, %cst {dimension_numbers = #tpu.dot_dimension_numbers<[1], [0], [0], [1], [0, 0, 1, 1], [], []>} : vector<64x32xbf16>, vector<32x32xbf16>, vector<64x32xf32> -> vector<64x32xf32>
    %7 = vector.shape_cast %6 : vector<64x32xf32> to vector<2x32x32xf32>
    %8 = arith.truncf %2 : vector<64x32xf32> to vector<64x32xbf16>
    %c0_7 = arith.constant 0 : index
    %c0_8 = arith.constant 0 : index
    %9 = vector.load %arg4[%c0_7, %c0_8] : memref<32x32xbf16, #tpu.memory_space<vmem>>, vector<32x32xbf16>
    %cst_9 = arith.constant dense<0.000000e+00> : vector<64x32xf32>
    %10 = tpu.matmul %8, %9, %cst_9 {dimension_numbers = #tpu.dot_dimension_numbers<[1], [0], [0], [1], [0, 0, 1, 1], [], []>} : vector<64x32xbf16>, vector<32x32xbf16>, vector<64x32xf32> -> vector<64x32xf32>
    %11 = vector.shape_cast %10 : vector<64x32xf32> to vector<2x32x32xf32>
    %12 = arith.truncf %2 : vector<64x32xf32> to vector<64x32xbf16>
    %c0_10 = arith.constant 0 : index
    %c0_11 = arith.constant 0 : index
    %13 = vector.load %arg5[%c0_10, %c0_11] : memref<32x32xbf16, #tpu.memory_space<vmem>>, vector<32x32xbf16>
    %cst_12 = arith.constant dense<0.000000e+00> : vector<64x32xf32>
    %14 = tpu.matmul %12, %13, %cst_12 {dimension_numbers = #tpu.dot_dimension_numbers<[1], [0], [0], [1], [0, 0, 1, 1], [], []>} : vector<64x32xbf16>, vector<32x32xbf16>, vector<64x32xf32> -> vector<64x32xf32>
    %15 = vector.shape_cast %14 : vector<64x32xf32> to vector<2x32x32xf32>
    %c0_13 = arith.constant 0 : index
    %16 = memref.load %arg18[%c0_13] : memref<2xf32, #tpu.memory_space<smem>>
    %17 = arith.truncf %7 : vector<2x32x32xf32> to vector<2x32x32xbf16>
    %18 = arith.truncf %11 : vector<2x32x32xf32> to vector<2x32x32xbf16>
    "tpu.trace_start"() <{level = 10 : i32, message = "bqd,bkd->bqk"}> : () -> ()
    %cst_14 = arith.constant dense<0.000000e+00> : vector<2x32x32xf32>
    %19 = tpu.matmul %17, %18, %cst_14 {dimension_numbers = #tpu.dot_dimension_numbers<[2], [2], [1], [1], [0, 0, 0, 1, 1, 1], [0], [0]>} : vector<2x32x32xbf16>, vector<2x32x32xbf16>, vector<2x32x32xf32> -> vector<2x32x32xf32>
    "tpu.trace_stop"() : () -> ()
    %cst_15 = arith.constant 0.176776692 : f32
    %20 = vector.broadcast %cst_15 : f32 to vector<2x32x32xf32>
    %21 = arith.mulf %19, %20 : vector<2x32x32xf32>
    %cst_16 = arith.constant dense<0xFF800000> : vector<2x32xf32>
    %22 = vector.multi_reduction <maximumf>, %21, %cst_16 [2] : vector<2x32x32xf32> to vector<2x32xf32>
    %23 = vector.shape_cast %22 : vector<2x32xf32> to vector<2x32x1xf32>
    %24 = vector.broadcast %23 : vector<2x32x1xf32> to vector<2x32x32xf32>
    %25 = arith.subf %21, %24 : vector<2x32x32xf32>
    %26 = math.exp %25 : vector<2x32x32xf32>
    %cst_17 = arith.constant dense<0.000000e+00> : vector<2x32xf32>
    %27 = vector.multi_reduction <add>, %26, %cst_17 [2] : vector<2x32x32xf32> to vector<2x32xf32>
    %28 = vector.shape_cast %27 : vector<2x32xf32> to vector<2x32x1xf32>
    %29 = tpu.reciprocal %28 {approx = true} : vector<2x32x1xf32> -> vector<2x32x1xf32>
    %30 = vector.broadcast %29 : vector<2x32x1xf32> to vector<2x32x32xf32>
    %31 = arith.mulf %26, %30 : vector<2x32x32xf32>
    %32 = arith.truncf %31 : vector<2x32x32xf32> to vector<2x32x32xbf16>
    %33 = arith.truncf %15 : vector<2x32x32xf32> to vector<2x32x32xbf16>
    "tpu.trace_start"() <{level = 10 : i32, message = "bqk,bkd->bqd"}> : () -> ()
    %cst_18 = arith.constant dense<0.000000e+00> : vector<2x32x32xf32>
    %34 = tpu.matmul %32, %33, %cst_18 {dimension_numbers = #tpu.dot_dimension_numbers<[2], [1], [1], [2], [0, 0, 0, 1, 1, 2], [0], [0]>} : vector<2x32x32xbf16>, vector<2x32x32xbf16>, vector<2x32x32xf32> -> vector<2x32x32xf32>
    "tpu.trace_stop"() : () -> ()
    %35 = vector.shape_cast %34 : vector<2x32x32xf32> to vector<64x32xf32>
    %36 = arith.truncf %35 : vector<64x32xf32> to vector<64x32xbf16>
    %c0_19 = arith.constant 0 : index
    %c0_20 = arith.constant 0 : index
    %37 = vector.load %arg6[%c0_19, %c0_20] : memref<32x32xbf16, #tpu.memory_space<vmem>>, vector<32x32xbf16>
    %cst_21 = arith.constant dense<0.000000e+00> : vector<64x32xf32>
    %38 = tpu.matmul %36, %37, %cst_21 {dimension_numbers = #tpu.dot_dimension_numbers<[1], [0], [0], [1], [0, 0, 1, 1], [], []>} : vector<64x32xbf16>, vector<32x32xbf16>, vector<64x32xf32> -> vector<64x32xf32>
    %39 = vector.shape_cast %38 : vector<64x32xf32> to vector<2x32x32xf32>
    %40 = vector.broadcast %16 : f32 to vector<2x32x32xf32>
    %41 = arith.mulf %40, %39 : vector<2x32x32xf32>
    %42 = arith.addf %0, %41 : vector<2x32x32xf32>
    %43 = vector.extract_strided_slice %42 {offsets = [0, 0, 0], sizes = [1, 32, 32], strides = [1, 1, 1]} : vector<2x32x32xf32> to vector<1x32x32xf32>
    %44 = vector.shape_cast %43 : vector<1x32x32xf32> to vector<32x32xf32>
    %cst_22 = arith.constant dense<0.000000e+00> : vector<32xf32>
    %45 = vector.multi_reduction <add>, %44, %cst_22 [0] : vector<32x32xf32> to vector<32xf32>
    %46 = vector.shape_cast %45 : vector<32xf32> to vector<1x32xf32>
    %cst_23 = arith.constant 3.200000e+01 : f32
    %47 = vector.broadcast %cst_23 : f32 to vector<1x32xf32>
    %48 = arith.divf %46, %47 : vector<1x32xf32>
    %c0_24 = arith.constant 0 : index
    %c0_25 = arith.constant 0 : index
    %c0_26 = arith.constant 0 : index
    %49 = vector.load %arg14[%c0_24, %c0_25, %c0_26] : memref<3x32x16xf32, #tpu.memory_space<vmem>>, vector<1x32x16xf32>
    %50 = vector.shape_cast %49 : vector<1x32x16xf32> to vector<32x16xf32>
    %cst_27 = arith.constant dense<0.000000e+00> : vector<1x16xf32>
    %51 = tpu.matmul %48, %50, %cst_27 {dimension_numbers = #tpu.dot_dimension_numbers<[1], [0], [0], [1], [0, 0, 1, 1], [], []>} : vector<1x32xf32>, vector<32x16xf32>, vector<1x16xf32> -> vector<1x16xf32>
    %c0_28 = arith.constant 0 : index
    %c0_29 = arith.constant 0 : index
    %c0_30 = arith.constant 0 : index
    %52 = vector.load %arg15[%c0_28, %c0_29, %c0_30] : memref<3x1x16xf32, #tpu.memory_space<vmem>>, vector<1x1x16xf32>
    %53 = vector.shape_cast %52 : vector<1x1x16xf32> to vector<1x16xf32>
    %54 = arith.addf %51, %53 : vector<1x16xf32>
    %cst_31 = arith.constant 0.000000e+00 : f32
    %55 = vector.broadcast %cst_31 : f32 to vector<1x16xf32>
    %56 = arith.maximumf %54, %55 : vector<1x16xf32>
    %c0_32 = arith.constant 0 : index
    %c0_33 = arith.constant 0 : index
    %c0_34 = arith.constant 0 : index
    %57 = vector.load %arg16[%c0_32, %c0_33, %c0_34] : memref<3x1x16xf32, #tpu.memory_space<vmem>>, vector<1x1x16xf32>
    %58 = vector.shape_cast %57 : vector<1x1x16xf32> to vector<1x16xf32>
    %59 = arith.mulf %56, %58 : vector<1x16xf32>
    %cst_35 = arith.constant dense<0.000000e+00> : vector<1xf32>
    %60 = vector.multi_reduction <add>, %59, %cst_35 [1] : vector<1x16xf32> to vector<1xf32>
    %61 = vector.shape_cast %60 : vector<1xf32> to vector<1x1xf32>
    %c0_36 = arith.constant 0 : index
    %62 = memref.load %arg17[%c0_36] : memref<3xf32, #tpu.memory_space<smem>>
    %63 = vector.broadcast %62 : f32 to vector<1x1xf32>
    %64 = arith.addf %61, %63 : vector<1x1xf32>
    %cst_37 = arith.constant 0.000000e+00 : f32
    %65 = vector.broadcast %cst_37 : f32 to vector<1x1xf32>
    %66 = arith.subf %65, %64 : vector<1x1xf32>
    %67 = math.exp %66 : vector<1x1xf32>
    %cst_38 = arith.constant 1.000000e+00 : f32
    %68 = vector.broadcast %cst_38 : f32 to vector<1x1xf32>
    %69 = arith.addf %68, %67 : vector<1x1xf32>
    %cst_39 = arith.constant 1.000000e+00 : f32
    %70 = vector.broadcast %cst_39 : f32 to vector<1x1xf32>
    %71 = arith.divf %70, %69 : vector<1x1xf32>
    %cst_40 = arith.constant 4.500000e+01 : f32
    %72 = vector.broadcast %cst_40 : f32 to vector<1x1xf32>
    %73 = arith.mulf %71, %72 : vector<1x1xf32>
    %cst_41 = arith.constant 5.000000e+00 : f32
    %74 = vector.broadcast %cst_41 : f32 to vector<1x1xf32>
    %75 = arith.addf %73, %74 : vector<1x1xf32>
    %cst_42 = arith.constant 5.000000e-01 : f32
    %76 = vector.broadcast %cst_42 : f32 to vector<1x1xf32>
    %77 = arith.addf %75, %76 : vector<1x1xf32>
    %78 = arith.fptosi %77 : vector<1x1xf32> to vector<1x1xi32>
    %79 = arith.fptosi %75 : vector<1x1xf32> to vector<1x1xi32>
    %80 = arith.sitofp %79 : vector<1x1xi32> to vector<1x1xf32>
    %81 = arith.subf %75, %80 : vector<1x1xf32>
    %82 = arith.sitofp %78 : vector<1x1xi32> to vector<1x1xf32>
    %cst_43 = arith.constant 5.000000e-01 : f32
    %83 = vector.broadcast %cst_43 : f32 to vector<1x1xf32>
    %84 = arith.mulf %82, %83 : vector<1x1xf32>
    %85 = arith.fptosi %84 : vector<1x1xf32> to vector<1x1xi32>
    %c2_i32 = arith.constant 2 : i32
    %86 = vector.broadcast %c2_i32 : i32 to vector<1x1xi32>
    %87 = arith.muli %86, %85 : vector<1x1xi32>
    %88 = arith.subi %78, %87 : vector<1x1xi32>
    %c1_i32 = arith.constant 1 : i32
    %89 = vector.broadcast %c1_i32 : i32 to vector<1x1xi32>
    %90 = arith.cmpi eq, %88, %89 : vector<1x1xi32>
    %cst_44 = arith.constant 5.000000e-01 : f32
    %91 = vector.broadcast %cst_44 : f32 to vector<1x1xf32>
    %92 = arith.cmpf oeq, %81, %91 : vector<1x1xf32>
    %93 = arith.andi %92, %90 : vector<1x1xi1>
    %c1_i32_45 = arith.constant 1 : i32
    %c0_i32 = arith.constant 0 : i32
    %94 = vector.broadcast %c1_i32_45 : i32 to vector<1x1xi32>
    %95 = vector.broadcast %c0_i32 : i32 to vector<1x1xi32>
    %96 = arith.select %93, %94, %95 : vector<1x1xi1>, vector<1x1xi32>
    %97 = arith.subi %78, %96 : vector<1x1xi32>
    %c3_i32 = arith.constant 3 : i32
    %c16_i32 = arith.constant 16 : i32
    %98 = vector.broadcast %c3_i32 : i32 to vector<1x1xi32>
    %99 = arith.maxsi %98, %97 : vector<1x1xi32>
    %100 = vector.broadcast %c16_i32 : i32 to vector<1x1xi32>
    %101 = arith.minsi %100, %99 : vector<1x1xi32>
    %102 = arith.sitofp %101 : vector<1x1xi32> to vector<1x1xf32>
    %cst_46 = arith.constant 5.000000e-01 : f32
    %103 = vector.broadcast %cst_46 : f32 to vector<1x1xf32>
    %104 = arith.mulf %102, %103 : vector<1x1xf32>
    %105 = arith.fptosi %104 : vector<1x1xf32> to vector<1x1xi32>
    %c2_i32_47 = arith.constant 2 : i32
    %106 = vector.broadcast %c2_i32_47 : i32 to vector<1x1xi32>
    %107 = arith.muli %106, %105 : vector<1x1xi32>
    %108 = arith.cmpi eq, %101, %107 : vector<1x1xi32>
    %c1_i32_48 = arith.constant 1 : i32
    %c0_i32_49 = arith.constant 0 : i32
    %109 = vector.broadcast %c1_i32_48 : i32 to vector<1x1xi32>
    %110 = vector.broadcast %c0_i32_49 : i32 to vector<1x1xi32>
    %111 = arith.select %108, %109, %110 : vector<1x1xi1>, vector<1x1xi32>
    %112 = arith.subi %101, %111 : vector<1x1xi32>
    %c3_i32_50 = arith.constant 3 : i32
    %113 = vector.broadcast %c3_i32_50 : i32 to vector<1x1xi32>
    %114 = arith.maxsi %112, %113 : vector<1x1xi32>
    %115 = arith.sitofp %114 : vector<1x1xi32> to vector<1x1xf32>
    %cst_51 = arith.constant 5.000000e-01 : f32
    %116 = vector.broadcast %cst_51 : f32 to vector<1x1xf32>
    %117 = arith.mulf %115, %116 : vector<1x1xf32>
    %118 = arith.fptosi %117 : vector<1x1xf32> to vector<1x1xi32>
    %c0_52 = arith.constant 0 : index
    %c0_53 = arith.constant 0 : index
    %c0_54 = arith.constant 0 : index
    %119 = vector.load %arg13[%c0_52, %c0_53, %c0_54] : memref<3x16x32xf32, #tpu.memory_space<vmem>>, vector<1x16x32xf32>
    %120 = vector.shape_cast %119 : vector<1x16x32xf32> to vector<16x32xf32>
    %121 = tpu.iota {dimensions = array<i32: 0>} : vector<16x32xi32>
    %122 = vector.broadcast %114 : vector<1x1xi32> to vector<16x32xi32>
    %123 = arith.cmpi slt, %121, %122 : vector<16x32xi32>
    %cst_55 = arith.constant 0xFF800000 : f32
    %124 = vector.broadcast %cst_55 : f32 to vector<16x32xf32>
    %125 = arith.select %123, %120, %124 : vector<16x32xi1>, vector<16x32xf32>
    %cst_56 = arith.constant dense<0xFF800000> : vector<32xf32>
    %126 = vector.multi_reduction <maximumf>, %125, %cst_56 [0] : vector<16x32xf32> to vector<32xf32>
    %127 = vector.shape_cast %126 : vector<32xf32> to vector<1x32xf32>
    %128 = vector.broadcast %127 : vector<1x32xf32> to vector<16x32xf32>
    %129 = arith.subf %120, %128 : vector<16x32xf32>
    %130 = math.exp %129 : vector<16x32xf32>
    %cst_57 = arith.constant 0.000000e+00 : f32
    %131 = vector.broadcast %cst_57 : f32 to vector<16x32xf32>
    %132 = arith.select %123, %130, %131 : vector<16x32xi1>, vector<16x32xf32>
    %cst_58 = arith.constant dense<0.000000e+00> : vector<32xf32>
    %133 = vector.multi_reduction <add>, %132, %cst_58 [0] : vector<16x32xf32> to vector<32xf32>
    %134 = vector.shape_cast %133 : vector<32xf32> to vector<1x32xf32>
    %135 = vector.broadcast %134 : vector<1x32xf32> to vector<16x32xf32>
    %136 = arith.divf %132, %135 : vector<16x32xf32>
    %137 = tpu.iota {dimensions = array<i32: 0>} : vector<16x16xi32>
    %138 = tpu.iota {dimensions = array<i32: 1>} : vector<16x16xi32>
    %139 = arith.subi %138, %137 : vector<16x16xi32>
    %c7_i32 = arith.constant 7 : i32
    %140 = vector.broadcast %c7_i32 : i32 to vector<1x1xi32>
    %141 = arith.subi %118, %140 : vector<1x1xi32>
    %142 = vector.broadcast %141 : vector<1x1xi32> to vector<16x16xi32>
    %143 = arith.cmpi eq, %139, %142 : vector<16x16xi32>
    %144 = arith.extui %143 : vector<16x16xi1> to vector<16x16xi32>
    %145 = arith.sitofp %144 : vector<16x16xi32> to vector<16x16xf32>
    %cst_59 = arith.constant dense<0.000000e+00> : vector<16x32xf32>
    %146 = tpu.matmul %145, %136, %cst_59 {dimension_numbers = #tpu.dot_dimension_numbers<[1], [0], [0], [1], [0, 0, 1, 1], [], []>} : vector<16x16xf32>, vector<16x32xf32>, vector<16x32xf32> -> vector<16x32xf32>
    %147 = vector.extract_strided_slice %44 {offsets = [0, 0], sizes = [1, 32], strides = [1, 1]} : vector<32x32xf32> to vector<1x32xf32>
    %148 = vector.shape_cast %147 : vector<1x32xf32> to vector<1x32xf32>
    %149 = vector.broadcast %148 : vector<1x32xf32> to vector<8x32xf32>
    %c0_60 = arith.constant 0 : index
    %c0_61 = arith.constant 0 : index
    %150 = vector.load %arg21[%c0_60, %c0_61] : memref<48x32xf32, #tpu.memory_space<vmem>>, vector<8x32xf32>
    tpu.vector_store %arg21[%c0_60, %c0_61], %149 {strides = array<i32>} : memref<48x32xf32, #tpu.memory_space<vmem>>, vector<8x32xf32>,
    %c8 = arith.constant 8 : index
    %c0_62 = arith.constant 0 : index
    %151 = vector.load %arg21[%c8, %c0_62] : memref<48x32xf32, #tpu.memory_space<vmem>>, vector<32x32xf32>
    tpu.vector_store %arg21[%c8, %c0_62], %44 {strides = array<i32>} : memref<48x32xf32, #tpu.memory_space<vmem>>, vector<32x32xf32>,
    %152 = vector.extract_strided_slice %44 {offsets = [31, 0], sizes = [1, 32], strides = [1, 1]} : vector<32x32xf32> to vector<1x32xf32>
    %153 = vector.shape_cast %152 : vector<1x32xf32> to vector<1x32xf32>
    %154 = vector.broadcast %153 : vector<1x32xf32> to vector<8x32xf32>
    %c40 = arith.constant 40 : index
    %c0_63 = arith.constant 0 : index
    %155 = vector.load %arg21[%c40, %c0_63] : memref<48x32xf32, #tpu.memory_space<vmem>>, vector<8x32xf32>
    tpu.vector_store %arg21[%c40, %c0_63], %154 {strides = array<i32>} : memref<48x32xf32, #tpu.memory_space<vmem>>, vector<8x32xf32>,
    %c1 = arith.constant 1 : index
    %c0_64 = arith.constant 0 : index
    %156 = vector.load %arg21[%c1, %c0_64] : memref<48x32xf32, #tpu.memory_space<vmem>>, vector<32x32xf32>
    %157 = vector.extract_strided_slice %146 {offsets = [0, 0], sizes = [1, 32], strides = [1, 1]} : vector<16x32xf32> to vector<1x32xf32>
    %158 = vector.broadcast %157 : vector<1x32xf32> to vector<32x32xf32>
    %159 = arith.mulf %158, %156 : vector<32x32xf32>
    %c2 = arith.constant 2 : index
    %c0_65 = arith.constant 0 : index
    %160 = vector.load %arg21[%c2, %c0_65] : memref<48x32xf32, #tpu.memory_space<vmem>>, vector<32x32xf32>
    %161 = vector.extract_strided_slice %146 {offsets = [1, 0], sizes = [1, 32], strides = [1, 1]} : vector<16x32xf32> to vector<1x32xf32>
    %162 = vector.broadcast %161 : vector<1x32xf32> to vector<32x32xf32>
    %163 = arith.mulf %162, %160 : vector<32x32xf32>
    %c3 = arith.constant 3 : index
    %c0_66 = arith.constant 0 : index
    %164 = vector.load %arg21[%c3, %c0_66] : memref<48x32xf32, #tpu.memory_space<vmem>>, vector<32x32xf32>
    %165 = vector.extract_strided_slice %146 {offsets = [2, 0], sizes = [1, 32], strides = [1, 1]} : vector<16x32xf32> to vector<1x32xf32>
    %166 = vector.broadcast %165 : vector<1x32xf32> to vector<32x32xf32>
    %167 = arith.mulf %166, %164 : vector<32x32xf32>
    %c4 = arith.constant 4 : index
    %c0_67 = arith.constant 0 : index
    %168 = vector.load %arg21[%c4, %c0_67] : memref<48x32xf32, #tpu.memory_space<vmem>>, vector<32x32xf32>
    %169 = vector.extract_strided_slice %146 {offsets = [3, 0], sizes = [1, 32], strides = [1, 1]} : vector<16x32xf32> to vector<1x32xf32>
    %170 = vector.broadcast %169 : vector<1x32xf32> to vector<32x32xf32>
    %171 = arith.mulf %170, %168 : vector<32x32xf32>
    %c5 = arith.constant 5 : index
    %c0_68 = arith.constant 0 : index
    %172 = vector.load %arg21[%c5, %c0_68] : memref<48x32xf32, #tpu.memory_space<vmem>>, vector<32x32xf32>
    %173 = vector.extract_strided_slice %146 {offsets = [4, 0], sizes = [1, 32], strides = [1, 1]} : vector<16x32xf32> to vector<1x32xf32>
    %174 = vector.broadcast %173 : vector<1x32xf32> to vector<32x32xf32>
    %175 = arith.mulf %174, %172 : vector<32x32xf32>
    %176 = arith.addf %159, %175 : vector<32x32xf32>
    %c6 = arith.constant 6 : index
    %c0_69 = arith.constant 0 : index
    %177 = vector.load %arg21[%c6, %c0_69] : memref<48x32xf32, #tpu.memory_space<vmem>>, vector<32x32xf32>
    %178 = vector.extract_strided_slice %146 {offsets = [5, 0], sizes = [1, 32], strides = [1, 1]} : vector<16x32xf32> to vector<1x32xf32>
    %179 = vector.broadcast %178 : vector<1x32xf32> to vector<32x32xf32>
    %180 = arith.mulf %179, %177 : vector<32x32xf32>
    %181 = arith.addf %163, %180 : vector<32x32xf32>
    %c7 = arith.constant 7 : index
    %c0_70 = arith.constant 0 : index
    %182 = vector.load %arg21[%c7, %c0_70] : memref<48x32xf32, #tpu.memory_space<vmem>>, vector<32x32xf32>
    %183 = vector.extract_strided_slice %146 {offsets = [6, 0], sizes = [1, 32], strides = [1, 1]} : vector<16x32xf32> to vector<1x32xf32>
    %184 = vector.broadcast %183 : vector<1x32xf32> to vector<32x32xf32>
    %185 = arith.mulf %184, %182 : vector<32x32xf32>
    %186 = arith.addf %167, %185 : vector<32x32xf32>
    %c8_71 = arith.constant 8 : index
    %c0_72 = arith.constant 0 : index
    %187 = vector.load %arg21[%c8_71, %c0_72] : memref<48x32xf32, #tpu.memory_space<vmem>>, vector<32x32xf32>
    %188 = vector.extract_strided_slice %146 {offsets = [7, 0], sizes = [1, 32], strides = [1, 1]} : vector<16x32xf32> to vector<1x32xf32>
    %189 = vector.broadcast %188 : vector<1x32xf32> to vector<32x32xf32>
    %190 = arith.mulf %189, %187 : vector<32x32xf32>
    %191 = arith.addf %171, %190 : vector<32x32xf32>
    %c9 = arith.constant 9 : index
    %c0_73 = arith.constant 0 : index
    %192 = vector.load %arg21[%c9, %c0_73] : memref<48x32xf32, #tpu.memory_space<vmem>>, vector<32x32xf32>
    %193 = vector.extract_strided_slice %146 {offsets = [8, 0], sizes = [1, 32], strides = [1, 1]} : vector<16x32xf32> to vector<1x32xf32>
    %194 = vector.broadcast %193 : vector<1x32xf32> to vector<32x32xf32>
    %195 = arith.mulf %194, %192 : vector<32x32xf32>
    %196 = arith.addf %176, %195 : vector<32x32xf32>
    %c10 = arith.constant 10 : index
    %c0_74 = arith.constant 0 : index
    %197 = vector.load %arg21[%c10, %c0_74] : memref<48x32xf32, #tpu.memory_space<vmem>>, vector<32x32xf32>
    %198 = vector.extract_strided_slice %146 {offsets = [9, 0], sizes = [1, 32], strides = [1, 1]} : vector<16x32xf32> to vector<1x32xf32>
    %199 = vector.broadcast %198 : vector<1x32xf32> to vector<32x32xf32>
    %200 = arith.mulf %199, %197 : vector<32x32xf32>
    %201 = arith.addf %181, %200 : vector<32x32xf32>
    %c11 = arith.constant 11 : index
    %c0_75 = arith.constant 0 : index
    %202 = vector.load %arg21[%c11, %c0_75] : memref<48x32xf32, #tpu.memory_space<vmem>>, vector<32x32xf32>
    %203 = vector.extract_strided_slice %146 {offsets = [10, 0], sizes = [1, 32], strides = [1, 1]} : vector<16x32xf32> to vector<1x32xf32>
    %204 = vector.broadcast %203 : vector<1x32xf32> to vector<32x32xf32>
    %205 = arith.mulf %204, %202 : vector<32x32xf32>
    %206 = arith.addf %186, %205 : vector<32x32xf32>
    %c12 = arith.constant 12 : index
    %c0_76 = arith.constant 0 : index
    %207 = vector.load %arg21[%c12, %c0_76] : memref<48x32xf32, #tpu.memory_space<vmem>>, vector<32x32xf32>
    %208 = vector.extract_strided_slice %146 {offsets = [11, 0], sizes = [1, 32], strides = [1, 1]} : vector<16x32xf32> to vector<1x32xf32>
    %209 = vector.broadcast %208 : vector<1x32xf32> to vector<32x32xf32>
    %210 = arith.mulf %209, %207 : vector<32x32xf32>
    %211 = arith.addf %191, %210 : vector<32x32xf32>
    %c13 = arith.constant 13 : index
    %c0_77 = arith.constant 0 : index
    %212 = vector.load %arg21[%c13, %c0_77] : memref<48x32xf32, #tpu.memory_space<vmem>>, vector<32x32xf32>
    %213 = vector.extract_strided_slice %146 {offsets = [12, 0], sizes = [1, 32], strides = [1, 1]} : vector<16x32xf32> to vector<1x32xf32>
    %214 = vector.broadcast %213 : vector<1x32xf32> to vector<32x32xf32>
    %215 = arith.mulf %214, %212 : vector<32x32xf32>
    %216 = arith.addf %196, %215 : vector<32x32xf32>
    %c14 = arith.constant 14 : index
    %c0_78 = arith.constant 0 : index
    %217 = vector.load %arg21[%c14, %c0_78] : memref<48x32xf32, #tpu.memory_space<vmem>>, vector<32x32xf32>
    %218 = vector.extract_strided_slice %146 {offsets = [13, 0], sizes = [1, 32], strides = [1, 1]} : vector<16x32xf32> to vector<1x32xf32>
    %219 = vector.broadcast %218 : vector<1x32xf32> to vector<32x32xf32>
    %220 = arith.mulf %219, %217 : vector<32x32xf32>
    %221 = arith.addf %201, %220 : vector<32x32xf32>
    %c15 = arith.constant 15 : index
    %c0_79 = arith.constant 0 : index
    %222 = vector.load %arg21[%c15, %c0_79] : memref<48x32xf32, #tpu.memory_space<vmem>>, vector<32x32xf32>
    %223 = vector.extract_strided_slice %146 {offsets = [14, 0], sizes = [1, 32], strides = [1, 1]} : vector<16x32xf32> to vector<1x32xf32>
    %224 = vector.broadcast %223 : vector<1x32xf32> to vector<32x32xf32>
    %225 = arith.mulf %224, %222 : vector<32x32xf32>
    %226 = arith.addf %206, %225 : vector<32x32xf32>
    %227 = arith.addf %216, %221 : vector<32x32xf32>
    %228 = arith.addf %226, %211 : vector<32x32xf32>
    %229 = arith.addf %227, %228 : vector<32x32xf32>
    %c0_80 = arith.constant 0 : index
    %c0_81 = arith.constant 0 : index
    %c0_82 = arith.constant 0 : index
    %230 = vector.load %arg22[%c0_80, %c0_81, %c0_82] : memref<2x32x32xf32, #tpu.memory_space<vmem>>, vector<1x32x32xf32>
    %231 = vector.shape_cast %230 : vector<1x32x32xf32> to vector<32x32xf32>
    %232 = vector.shape_cast %229 : vector<32x32xf32> to vector<1x32x32xf32>
    tpu.vector_store %arg22[%c0_80, %c0_81, %c0_82], %232 {strides = array<i32>} : memref<2x32x32xf32, #tpu.memory_space<vmem>>, vector<1x32x32xf32>,
    %233 = vector.extract_strided_slice %42 {offsets = [1, 0, 0], sizes = [1, 32, 32], strides = [1, 1, 1]} : vector<2x32x32xf32> to vector<1x32x32xf32>
    %234 = vector.shape_cast %233 : vector<1x32x32xf32> to vector<32x32xf32>
    %cst_83 = arith.constant dense<0.000000e+00> : vector<32xf32>
    %235 = vector.multi_reduction <add>, %234, %cst_83 [0] : vector<32x32xf32> to vector<32xf32>
    %236 = vector.shape_cast %235 : vector<32xf32> to vector<1x32xf32>
    %cst_84 = arith.constant 3.200000e+01 : f32
    %237 = vector.broadcast %cst_84 : f32 to vector<1x32xf32>
    %238 = arith.divf %236, %237 : vector<1x32xf32>
    %c0_85 = arith.constant 0 : index
    %c0_86 = arith.constant 0 : index
    %c0_87 = arith.constant 0 : index
    %239 = vector.load %arg14[%c0_85, %c0_86, %c0_87] : memref<3x32x16xf32, #tpu.memory_space<vmem>>, vector<1x32x16xf32>
    %240 = vector.shape_cast %239 : vector<1x32x16xf32> to vector<32x16xf32>
    %cst_88 = arith.constant dense<0.000000e+00> : vector<1x16xf32>
    %241 = tpu.matmul %238, %240, %cst_88 {dimension_numbers = #tpu.dot_dimension_numbers<[1], [0], [0], [1], [0, 0, 1, 1], [], []>} : vector<1x32xf32>, vector<32x16xf32>, vector<1x16xf32> -> vector<1x16xf32>
    %c0_89 = arith.constant 0 : index
    %c0_90 = arith.constant 0 : index
    %c0_91 = arith.constant 0 : index
    %242 = vector.load %arg15[%c0_89, %c0_90, %c0_91] : memref<3x1x16xf32, #tpu.memory_space<vmem>>, vector<1x1x16xf32>
    %243 = vector.shape_cast %242 : vector<1x1x16xf32> to vector<1x16xf32>
    %244 = arith.addf %241, %243 : vector<1x16xf32>
    %cst_92 = arith.constant 0.000000e+00 : f32
    %245 = vector.broadcast %cst_92 : f32 to vector<1x16xf32>
    %246 = arith.maximumf %244, %245 : vector<1x16xf32>
    %c0_93 = arith.constant 0 : index
    %c0_94 = arith.constant 0 : index
    %c0_95 = arith.constant 0 : index
    %247 = vector.load %arg16[%c0_93, %c0_94, %c0_95] : memref<3x1x16xf32, #tpu.memory_space<vmem>>, vector<1x1x16xf32>
    %248 = vector.shape_cast %247 : vector<1x1x16xf32> to vector<1x16xf32>
    %249 = arith.mulf %246, %248 : vector<1x16xf32>
    %cst_96 = arith.constant dense<0.000000e+00> : vector<1xf32>
    %250 = vector.multi_reduction <add>, %249, %cst_96 [1] : vector<1x16xf32> to vector<1xf32>
    %251 = vector.shape_cast %250 : vector<1xf32> to vector<1x1xf32>
    %c0_97 = arith.constant 0 : index
    %252 = memref.load %arg17[%c0_97] : memref<3xf32, #tpu.memory_space<smem>>
    %253 = vector.broadcast %252 : f32 to vector<1x1xf32>
    %254 = arith.addf %251, %253 : vector<1x1xf32>
    %cst_98 = arith.constant 0.000000e+00 : f32
    %255 = vector.broadcast %cst_98 : f32 to vector<1x1xf32>
    %256 = arith.subf %255, %254 : vector<1x1xf32>
    %257 = math.exp %256 : vector<1x1xf32>
    %cst_99 = arith.constant 1.000000e+00 : f32
    %258 = vector.broadcast %cst_99 : f32 to vector<1x1xf32>
    %259 = arith.addf %258, %257 : vector<1x1xf32>
    %cst_100 = arith.constant 1.000000e+00 : f32
    %260 = vector.broadcast %cst_100 : f32 to vector<1x1xf32>
    %261 = arith.divf %260, %259 : vector<1x1xf32>
    %cst_101 = arith.constant 4.500000e+01 : f32
    %262 = vector.broadcast %cst_101 : f32 to vector<1x1xf32>
    %263 = arith.mulf %261, %262 : vector<1x1xf32>
    %cst_102 = arith.constant 5.000000e+00 : f32
    %264 = vector.broadcast %cst_102 : f32 to vector<1x1xf32>
    %265 = arith.addf %263, %264 : vector<1x1xf32>
    %cst_103 = arith.constant 5.000000e-01 : f32
    %266 = vector.broadcast %cst_103 : f32 to vector<1x1xf32>
    %267 = arith.addf %265, %266 : vector<1x1xf32>
    %268 = arith.fptosi %267 : vector<1x1xf32> to vector<1x1xi32>
    %269 = arith.fptosi %265 : vector<1x1xf32> to vector<1x1xi32>
    %270 = arith.sitofp %269 : vector<1x1xi32> to vector<1x1xf32>
    %271 = arith.subf %265, %270 : vector<1x1xf32>
    %272 = arith.sitofp %268 : vector<1x1xi32> to vector<1x1xf32>
    %cst_104 = arith.constant 5.000000e-01 : f32
    %273 = vector.broadcast %cst_104 : f32 to vector<1x1xf32>
    %274 = arith.mulf %272, %273 : vector<1x1xf32>
    %275 = arith.fptosi %274 : vector<1x1xf32> to vector<1x1xi32>
    %c2_i32_105 = arith.constant 2 : i32
    %276 = vector.broadcast %c2_i32_105 : i32 to vector<1x1xi32>
    %277 = arith.muli %276, %275 : vector<1x1xi32>
    %278 = arith.subi %268, %277 : vector<1x1xi32>
    %c1_i32_106 = arith.constant 1 : i32
    %279 = vector.broadcast %c1_i32_106 : i32 to vector<1x1xi32>
    %280 = arith.cmpi eq, %278, %279 : vector<1x1xi32>
    %cst_107 = arith.constant 5.000000e-01 : f32
    %281 = vector.broadcast %cst_107 : f32 to vector<1x1xf32>
    %282 = arith.cmpf oeq, %271, %281 : vector<1x1xf32>
    %283 = arith.andi %282, %280 : vector<1x1xi1>
    %c1_i32_108 = arith.constant 1 : i32
    %c0_i32_109 = arith.constant 0 : i32
    %284 = vector.broadcast %c1_i32_108 : i32 to vector<1x1xi32>
    %285 = vector.broadcast %c0_i32_109 : i32 to vector<1x1xi32>
    %286 = arith.select %283, %284, %285 : vector<1x1xi1>, vector<1x1xi32>
    %287 = arith.subi %268, %286 : vector<1x1xi32>
    %c3_i32_110 = arith.constant 3 : i32
    %c16_i32_111 = arith.constant 16 : i32
    %288 = vector.broadcast %c3_i32_110 : i32 to vector<1x1xi32>
    %289 = arith.maxsi %288, %287 : vector<1x1xi32>
    %290 = vector.broadcast %c16_i32_111 : i32 to vector<1x1xi32>
    %291 = arith.minsi %290, %289 : vector<1x1xi32>
    %292 = arith.sitofp %291 : vector<1x1xi32> to vector<1x1xf32>
    %cst_112 = arith.constant 5.000000e-01 : f32
    %293 = vector.broadcast %cst_112 : f32 to vector<1x1xf32>
    %294 = arith.mulf %292, %293 : vector<1x1xf32>
    %295 = arith.fptosi %294 : vector<1x1xf32> to vector<1x1xi32>
    %c2_i32_113 = arith.constant 2 : i32
    %296 = vector.broadcast %c2_i32_113 : i32 to vector<1x1xi32>
    %297 = arith.muli %296, %295 : vector<1x1xi32>
    %298 = arith.cmpi eq, %291, %297 : vector<1x1xi32>
    %c1_i32_114 = arith.constant 1 : i32
    %c0_i32_115 = arith.constant 0 : i32
    %299 = vector.broadcast %c1_i32_114 : i32 to vector<1x1xi32>
    %300 = vector.broadcast %c0_i32_115 : i32 to vector<1x1xi32>
    %301 = arith.select %298, %299, %300 : vector<1x1xi1>, vector<1x1xi32>
    %302 = arith.subi %291, %301 : vector<1x1xi32>
    %c3_i32_116 = arith.constant 3 : i32
    %303 = vector.broadcast %c3_i32_116 : i32 to vector<1x1xi32>
    %304 = arith.maxsi %302, %303 : vector<1x1xi32>
    %305 = arith.sitofp %304 : vector<1x1xi32> to vector<1x1xf32>
    %cst_117 = arith.constant 5.000000e-01 : f32
    %306 = vector.broadcast %cst_117 : f32 to vector<1x1xf32>
    %307 = arith.mulf %305, %306 : vector<1x1xf32>
    %308 = arith.fptosi %307 : vector<1x1xf32> to vector<1x1xi32>
    %c0_118 = arith.constant 0 : index
    %c0_119 = arith.constant 0 : index
    %c0_120 = arith.constant 0 : index
    %309 = vector.load %arg13[%c0_118, %c0_119, %c0_120] : memref<3x16x32xf32, #tpu.memory_space<vmem>>, vector<1x16x32xf32>
    %310 = vector.shape_cast %309 : vector<1x16x32xf32> to vector<16x32xf32>
    %311 = tpu.iota {dimensions = array<i32: 0>} : vector<16x32xi32>
    %312 = vector.broadcast %304 : vector<1x1xi32> to vector<16x32xi32>
    %313 = arith.cmpi slt, %311, %312 : vector<16x32xi32>
    %cst_121 = arith.constant 0xFF800000 : f32
    %314 = vector.broadcast %cst_121 : f32 to vector<16x32xf32>
    %315 = arith.select %313, %310, %314 : vector<16x32xi1>, vector<16x32xf32>
    %cst_122 = arith.constant dense<0xFF800000> : vector<32xf32>
    %316 = vector.multi_reduction <maximumf>, %315, %cst_122 [0] : vector<16x32xf32> to vector<32xf32>
    %317 = vector.shape_cast %316 : vector<32xf32> to vector<1x32xf32>
    %318 = vector.broadcast %317 : vector<1x32xf32> to vector<16x32xf32>
    %319 = arith.subf %310, %318 : vector<16x32xf32>
    %320 = math.exp %319 : vector<16x32xf32>
    %cst_123 = arith.constant 0.000000e+00 : f32
    %321 = vector.broadcast %cst_123 : f32 to vector<16x32xf32>
    %322 = arith.select %313, %320, %321 : vector<16x32xi1>, vector<16x32xf32>
    %cst_124 = arith.constant dense<0.000000e+00> : vector<32xf32>
    %323 = vector.multi_reduction <add>, %322, %cst_124 [0] : vector<16x32xf32> to vector<32xf32>
    %324 = vector.shape_cast %323 : vector<32xf32> to vector<1x32xf32>
    %325 = vector.broadcast %324 : vector<1x32xf32> to vector<16x32xf32>
    %326 = arith.divf %322, %325 : vector<16x32xf32>
    %327 = tpu.iota {dimensions = array<i32: 0>} : vector<16x16xi32>
    %328 = tpu.iota {dimensions = array<i32: 1>} : vector<16x16xi32>
    %329 = arith.subi %328, %327 : vector<16x16xi32>
    %c7_i32_125 = arith.constant 7 : i32
    %330 = vector.broadcast %c7_i32_125 : i32 to vector<1x1xi32>
    %331 = arith.subi %308, %330 : vector<1x1xi32>
    %332 = vector.broadcast %331 : vector<1x1xi32> to vector<16x16xi32>
    %333 = arith.cmpi eq, %329, %332 : vector<16x16xi32>
    %334 = arith.extui %333 : vector<16x16xi1> to vector<16x16xi32>
    %335 = arith.sitofp %334 : vector<16x16xi32> to vector<16x16xf32>
    %cst_126 = arith.constant dense<0.000000e+00> : vector<16x32xf32>
    %336 = tpu.matmul %335, %326, %cst_126 {dimension_numbers = #tpu.dot_dimension_numbers<[1], [0], [0], [1], [0, 0, 1, 1], [], []>} : vector<16x16xf32>, vector<16x32xf32>, vector<16x32xf32> -> vector<16x32xf32>
    %337 = vector.extract_strided_slice %234 {offsets = [0, 0], sizes = [1, 32], strides = [1, 1]} : vector<32x32xf32> to vector<1x32xf32>
    %338 = vector.shape_cast %337 : vector<1x32xf32> to vector<1x32xf32>
    %339 = vector.broadcast %338 : vector<1x32xf32> to vector<8x32xf32>
    %c0_127 = arith.constant 0 : index
    %c0_128 = arith.constant 0 : index
    %340 = vector.load %arg21[%c0_127, %c0_128] : memref<48x32xf32, #tpu.memory_space<vmem>>, vector<8x32xf32>
    tpu.vector_store %arg21[%c0_127, %c0_128], %339 {strides = array<i32>} : memref<48x32xf32, #tpu.memory_space<vmem>>, vector<8x32xf32>,
    %c8_129 = arith.constant 8 : index
    %c0_130 = arith.constant 0 : index
    %341 = vector.load %arg21[%c8_129, %c0_130] : memref<48x32xf32, #tpu.memory_space<vmem>>, vector<32x32xf32>
    tpu.vector_store %arg21[%c8_129, %c0_130], %234 {strides = array<i32>} : memref<48x32xf32, #tpu.memory_space<vmem>>, vector<32x32xf32>,
    %342 = vector.extract_strided_slice %234 {offsets = [31, 0], sizes = [1, 32], strides = [1, 1]} : vector<32x32xf32> to vector<1x32xf32>
    %343 = vector.shape_cast %342 : vector<1x32xf32> to vector<1x32xf32>
    %344 = vector.broadcast %343 : vector<1x32xf32> to vector<8x32xf32>
    %c40_131 = arith.constant 40 : index
    %c0_132 = arith.constant 0 : index
    %345 = vector.load %arg21[%c40_131, %c0_132] : memref<48x32xf32, #tpu.memory_space<vmem>>, vector<8x32xf32>
    tpu.vector_store %arg21[%c40_131, %c0_132], %344 {strides = array<i32>} : memref<48x32xf32, #tpu.memory_space<vmem>>, vector<8x32xf32>,
    %c1_133 = arith.constant 1 : index
    %c0_134 = arith.constant 0 : index
    %346 = vector.load %arg21[%c1_133, %c0_134] : memref<48x32xf32, #tpu.memory_space<vmem>>, vector<32x32xf32>
    %347 = vector.extract_strided_slice %336 {offsets = [0, 0], sizes = [1, 32], strides = [1, 1]} : vector<16x32xf32> to vector<1x32xf32>
    %348 = vector.broadcast %347 : vector<1x32xf32> to vector<32x32xf32>
    %349 = arith.mulf %348, %346 : vector<32x32xf32>
    %c2_135 = arith.constant 2 : index
    %c0_136 = arith.constant 0 : index
    %350 = vector.load %arg21[%c2_135, %c0_136] : memref<48x32xf32, #tpu.memory_space<vmem>>, vector<32x32xf32>
    %351 = vector.extract_strided_slice %336 {offsets = [1, 0], sizes = [1, 32], strides = [1, 1]} : vector<16x32xf32> to vector<1x32xf32>
    %352 = vector.broadcast %351 : vector<1x32xf32> to vector<32x32xf32>
    %353 = arith.mulf %352, %350 : vector<32x32xf32>
    %c3_137 = arith.constant 3 : index
    %c0_138 = arith.constant 0 : index
    %354 = vector.load %arg21[%c3_137, %c0_138] : memref<48x32xf32, #tpu.memory_space<vmem>>, vector<32x32xf32>
    %355 = vector.extract_strided_slice %336 {offsets = [2, 0], sizes = [1, 32], strides = [1, 1]} : vector<16x32xf32> to vector<1x32xf32>
    %356 = vector.broadcast %355 : vector<1x32xf32> to vector<32x32xf32>
    %357 = arith.mulf %356, %354 : vector<32x32xf32>
    %c4_139 = arith.constant 4 : index
    %c0_140 = arith.constant 0 : index
    %358 = vector.load %arg21[%c4_139, %c0_140] : memref<48x32xf32, #tpu.memory_space<vmem>>, vector<32x32xf32>
    %359 = vector.extract_strided_slice %336 {offsets = [3, 0], sizes = [1, 32], strides = [1, 1]} : vector<16x32xf32> to vector<1x32xf32>
    %360 = vector.broadcast %359 : vector<1x32xf32> to vector<32x32xf32>
    %361 = arith.mulf %360, %358 : vector<32x32xf32>
    %c5_141 = arith.constant 5 : index
    %c0_142 = arith.constant 0 : index
    %362 = vector.load %arg21[%c5_141, %c0_142] : memref<48x32xf32, #tpu.memory_space<vmem>>, vector<32x32xf32>
    %363 = vector.extract_strided_slice %336 {offsets = [4, 0], sizes = [1, 32], strides = [1, 1]} : vector<16x32xf32> to vector<1x32xf32>
    %364 = vector.broadcast %363 : vector<1x32xf32> to vector<32x32xf32>
    %365 = arith.mulf %364, %362 : vector<32x32xf32>
    %366 = arith.addf %349, %365 : vector<32x32xf32>
    %c6_143 = arith.constant 6 : index
    %c0_144 = arith.constant 0 : index
    %367 = vector.load %arg21[%c6_143, %c0_144] : memref<48x32xf32, #tpu.memory_space<vmem>>, vector<32x32xf32>
    %368 = vector.extract_strided_slice %336 {offsets = [5, 0], sizes = [1, 32], strides = [1, 1]} : vector<16x32xf32> to vector<1x32xf32>
    %369 = vector.broadcast %368 : vector<1x32xf32> to vector<32x32xf32>
    %370 = arith.mulf %369, %367 : vector<32x32xf32>
    %371 = arith.addf %353, %370 : vector<32x32xf32>
    %c7_145 = arith.constant 7 : index
    %c0_146 = arith.constant 0 : index
    %372 = vector.load %arg21[%c7_145, %c0_146] : memref<48x32xf32, #tpu.memory_space<vmem>>, vector<32x32xf32>
    %373 = vector.extract_strided_slice %336 {offsets = [6, 0], sizes = [1, 32], strides = [1, 1]} : vector<16x32xf32> to vector<1x32xf32>
    %374 = vector.broadcast %373 : vector<1x32xf32> to vector<32x32xf32>
    %375 = arith.mulf %374, %372 : vector<32x32xf32>
    %376 = arith.addf %357, %375 : vector<32x32xf32>
    %c8_147 = arith.constant 8 : index
    %c0_148 = arith.constant 0 : index
    %377 = vector.load %arg21[%c8_147, %c0_148] : memref<48x32xf32, #tpu.memory_space<vmem>>, vector<32x32xf32>
    %378 = vector.extract_strided_slice %336 {offsets = [7, 0], sizes = [1, 32], strides = [1, 1]} : vector<16x32xf32> to vector<1x32xf32>
    %379 = vector.broadcast %378 : vector<1x32xf32> to vector<32x32xf32>
    %380 = arith.mulf %379, %377 : vector<32x32xf32>
    %381 = arith.addf %361, %380 : vector<32x32xf32>
    %c9_149 = arith.constant 9 : index
    %c0_150 = arith.constant 0 : index
    %382 = vector.load %arg21[%c9_149, %c0_150] : memref<48x32xf32, #tpu.memory_space<vmem>>, vector<32x32xf32>
    %383 = vector.extract_strided_slice %336 {offsets = [8, 0], sizes = [1, 32], strides = [1, 1]} : vector<16x32xf32> to vector<1x32xf32>
    %384 = vector.broadcast %383 : vector<1x32xf32> to vector<32x32xf32>
    %385 = arith.mulf %384, %382 : vector<32x32xf32>
    %386 = arith.addf %366, %385 : vector<32x32xf32>
    %c10_151 = arith.constant 10 : index
    %c0_152 = arith.constant 0 : index
    %387 = vector.load %arg21[%c10_151, %c0_152] : memref<48x32xf32, #tpu.memory_space<vmem>>, vector<32x32xf32>
    %388 = vector.extract_strided_slice %336 {offsets = [9, 0], sizes = [1, 32], strides = [1, 1]} : vector<16x32xf32> to vector<1x32xf32>
    %389 = vector.broadcast %388 : vector<1x32xf32> to vector<32x32xf32>
    %390 = arith.mulf %389, %387 : vector<32x32xf32>
    %391 = arith.addf %371, %390 : vector<32x32xf32>
    %c11_153 = arith.constant 11 : index
    %c0_154 = arith.constant 0 : index
    %392 = vector.load %arg21[%c11_153, %c0_154] : memref<48x32xf32, #tpu.memory_space<vmem>>, vector<32x32xf32>
    %393 = vector.extract_strided_slice %336 {offsets = [10, 0], sizes = [1, 32], strides = [1, 1]} : vector<16x32xf32> to vector<1x32xf32>
    %394 = vector.broadcast %393 : vector<1x32xf32> to vector<32x32xf32>
    %395 = arith.mulf %394, %392 : vector<32x32xf32>
    %396 = arith.addf %376, %395 : vector<32x32xf32>
    %c12_155 = arith.constant 12 : index
    %c0_156 = arith.constant 0 : index
    %397 = vector.load %arg21[%c12_155, %c0_156] : memref<48x32xf32, #tpu.memory_space<vmem>>, vector<32x32xf32>
    %398 = vector.extract_strided_slice %336 {offsets = [11, 0], sizes = [1, 32], strides = [1, 1]} : vector<16x32xf32> to vector<1x32xf32>
    %399 = vector.broadcast %398 : vector<1x32xf32> to vector<32x32xf32>
    %400 = arith.mulf %399, %397 : vector<32x32xf32>
    %401 = arith.addf %381, %400 : vector<32x32xf32>
    %c13_157 = arith.constant 13 : index
    %c0_158 = arith.constant 0 : index
    %402 = vector.load %arg21[%c13_157, %c0_158] : memref<48x32xf32, #tpu.memory_space<vmem>>, vector<32x32xf32>
    %403 = vector.extract_strided_slice %336 {offsets = [12, 0], sizes = [1, 32], strides = [1, 1]} : vector<16x32xf32> to vector<1x32xf32>
    %404 = vector.broadcast %403 : vector<1x32xf32> to vector<32x32xf32>
    %405 = arith.mulf %404, %402 : vector<32x32xf32>
    %406 = arith.addf %386, %405 : vector<32x32xf32>
    %c14_159 = arith.constant 14 : index
    %c0_160 = arith.constant 0 : index
    %407 = vector.load %arg21[%c14_159, %c0_160] : memref<48x32xf32, #tpu.memory_space<vmem>>, vector<32x32xf32>
    %408 = vector.extract_strided_slice %336 {offsets = [13, 0], sizes = [1, 32], strides = [1, 1]} : vector<16x32xf32> to vector<1x32xf32>
    %409 = vector.broadcast %408 : vector<1x32xf32> to vector<32x32xf32>
    %410 = arith.mulf %409, %407 : vector<32x32xf32>
    %411 = arith.addf %391, %410 : vector<32x32xf32>
    %c15_161 = arith.constant 15 : index
    %c0_162 = arith.constant 0 : index
    %412 = vector.load %arg21[%c15_161, %c0_162] : memref<48x32xf32, #tpu.memory_space<vmem>>, vector<32x32xf32>
    %413 = vector.extract_strided_slice %336 {offsets = [14, 0], sizes = [1, 32], strides = [1, 1]} : vector<16x32xf32> to vector<1x32xf32>
    %414 = vector.broadcast %413 : vector<1x32xf32> to vector<32x32xf32>
    %415 = arith.mulf %414, %412 : vector<32x32xf32>
    %416 = arith.addf %396, %415 : vector<32x32xf32>
    %417 = arith.addf %406, %411 : vector<32x32xf32>
    %418 = arith.addf %416, %401 : vector<32x32xf32>
    %419 = arith.addf %417, %418 : vector<32x32xf32>
    %c1_163 = arith.constant 1 : index
    %c0_164 = arith.constant 0 : index
    %c0_165 = arith.constant 0 : index
    %420 = vector.load %arg22[%c1_163, %c0_164, %c0_165] : memref<2x32x32xf32, #tpu.memory_space<vmem>>, vector<1x32x32xf32>
    %421 = vector.shape_cast %420 : vector<1x32x32xf32> to vector<32x32xf32>
    %422 = vector.shape_cast %419 : vector<32x32xf32> to vector<1x32x32xf32>
    tpu.vector_store %arg22[%c1_163, %c0_164, %c0_165], %422 {strides = array<i32>} : memref<2x32x32xf32, #tpu.memory_space<vmem>>, vector<1x32x32xf32>,
    %c0_166 = arith.constant 0 : index
    %c0_167 = arith.constant 0 : index
    %c0_168 = arith.constant 0 : index
    %423 = vector.load %arg22[%c0_166, %c0_167, %c0_168] : memref<2x32x32xf32, #tpu.memory_space<vmem>>, vector<2x32x32xf32>
    %424 = arith.subf %42, %423 : vector<2x32x32xf32>
    %425 = vector.shape_cast %424 : vector<2x32x32xf32> to vector<64x32xf32>
    %426 = arith.truncf %425 : vector<64x32xf32> to vector<64x32xbf16>
    %c0_169 = arith.constant 0 : index
    %c0_170 = arith.constant 0 : index
    %427 = vector.load %arg7[%c0_169, %c0_170] : memref<32x32xbf16, #tpu.memory_space<vmem>>, vector<32x32xbf16>
    %cst_171 = arith.constant dense<0.000000e+00> : vector<64x32xf32>
    %428 = tpu.matmul %426, %427, %cst_171 {dimension_numbers = #tpu.dot_dimension_numbers<[1], [0], [0], [1], [0, 0, 1, 1], [], []>} : vector<64x32xbf16>, vector<32x32xbf16>, vector<64x32xf32> -> vector<64x32xf32>
    %429 = vector.shape_cast %428 : vector<64x32xf32> to vector<2x32x32xf32>
    %430 = arith.truncf %3 : vector<96x32xf32> to vector<96x32xbf16>
    %c0_172 = arith.constant 0 : index
    %c0_173 = arith.constant 0 : index
    %431 = vector.load %arg8[%c0_172, %c0_173] : memref<32x32xbf16, #tpu.memory_space<vmem>>, vector<32x32xbf16>
    %cst_174 = arith.constant dense<0.000000e+00> : vector<96x32xf32>
    %432 = tpu.matmul %430, %431, %cst_174 {dimension_numbers = #tpu.dot_dimension_numbers<[1], [0], [0], [1], [0, 0, 1, 1], [], []>} : vector<96x32xbf16>, vector<32x32xbf16>, vector<96x32xf32> -> vector<96x32xf32>
    %433 = vector.shape_cast %432 : vector<96x32xf32> to vector<2x48x32xf32>
    %434 = arith.truncf %3 : vector<96x32xf32> to vector<96x32xbf16>
    %c0_175 = arith.constant 0 : index
    %c0_176 = arith.constant 0 : index
    %435 = vector.load %arg9[%c0_175, %c0_176] : memref<32x32xbf16, #tpu.memory_space<vmem>>, vector<32x32xbf16>
    %cst_177 = arith.constant dense<0.000000e+00> : vector<96x32xf32>
    %436 = tpu.matmul %434, %435, %cst_177 {dimension_numbers = #tpu.dot_dimension_numbers<[1], [0], [0], [1], [0, 0, 1, 1], [], []>} : vector<96x32xbf16>, vector<32x32xbf16>, vector<96x32xf32> -> vector<96x32xf32>
    %437 = vector.shape_cast %436 : vector<96x32xf32> to vector<2x48x32xf32>
    %c1_178 = arith.constant 1 : index
    %438 = memref.load %arg18[%c1_178] : memref<2xf32, #tpu.memory_space<smem>>
    %439 = arith.truncf %429 : vector<2x32x32xf32> to vector<2x32x32xbf16>
    %440 = arith.truncf %433 : vector<2x48x32xf32> to vector<2x48x32xbf16>
    "tpu.trace_start"() <{level = 10 : i32, message = "bqd,bkd->bqk"}> : () -> ()
    %cst_179 = arith.constant dense<0.000000e+00> : vector<2x32x48xf32>
    %441 = tpu.matmul %439, %440, %cst_179 {dimension_numbers = #tpu.dot_dimension_numbers<[2], [2], [1], [1], [0, 0, 0, 1, 1, 1], [0], [0]>} : vector<2x32x32xbf16>, vector<2x48x32xbf16>, vector<2x32x48xf32> -> vector<2x32x48xf32>
    "tpu.trace_stop"() : () -> ()
    %cst_180 = arith.constant 0.176776692 : f32
    %442 = vector.broadcast %cst_180 : f32 to vector<2x32x48xf32>
    %443 = arith.mulf %441, %442 : vector<2x32x48xf32>
    %cst_181 = arith.constant dense<0xFF800000> : vector<2x32xf32>
    %444 = vector.multi_reduction <maximumf>, %443, %cst_181 [2] : vector<2x32x48xf32> to vector<2x32xf32>
    %445 = vector.shape_cast %444 : vector<2x32xf32> to vector<2x32x1xf32>
    %446 = vector.broadcast %445 : vector<2x32x1xf32> to vector<2x32x48xf32>
    %447 = arith.subf %443, %446 : vector<2x32x48xf32>
    %448 = math.exp %447 : vector<2x32x48xf32>
    %cst_182 = arith.constant dense<0.000000e+00> : vector<2x32xf32>
    %449 = vector.multi_reduction <add>, %448, %cst_182 [2] : vector<2x32x48xf32> to vector<2x32xf32>
    %450 = vector.shape_cast %449 : vector<2x32xf32> to vector<2x32x1xf32>
    %451 = tpu.reciprocal %450 {approx = true} : vector<2x32x1xf32> -> vector<2x32x1xf32>
    %452 = vector.broadcast %451 : vector<2x32x1xf32> to vector<2x32x48xf32>
    %453 = arith.mulf %448, %452 : vector<2x32x48xf32>
    %454 = arith.truncf %453 : vector<2x32x48xf32> to vector<2x32x48xbf16>
    %455 = arith.truncf %437 : vector<2x48x32xf32> to vector<2x48x32xbf16>
    "tpu.trace_start"() <{level = 10 : i32, message = "bqk,bkd->bqd"}> : () -> ()
    %cst_183 = arith.constant dense<0.000000e+00> : vector<2x32x32xf32>
    %456 = tpu.matmul %454, %455, %cst_183 {dimension_numbers = #tpu.dot_dimension_numbers<[2], [1], [1], [2], [0, 0, 0, 1, 1, 2], [0], [0]>} : vector<2x32x48xbf16>, vector<2x48x32xbf16>, vector<2x32x32xf32> -> vector<2x32x32xf32>
    "tpu.trace_stop"() : () -> ()
    %457 = vector.shape_cast %456 : vector<2x32x32xf32> to vector<64x32xf32>
    %458 = arith.truncf %457 : vector<64x32xf32> to vector<64x32xbf16>
    %c0_184 = arith.constant 0 : index
    %c0_185 = arith.constant 0 : index
    %459 = vector.load %arg10[%c0_184, %c0_185] : memref<32x32xbf16, #tpu.memory_space<vmem>>, vector<32x32xbf16>
    %cst_186 = arith.constant dense<0.000000e+00> : vector<64x32xf32>
    %460 = tpu.matmul %458, %459, %cst_186 {dimension_numbers = #tpu.dot_dimension_numbers<[1], [0], [0], [1], [0, 0, 1, 1], [], []>} : vector<64x32xbf16>, vector<32x32xbf16>, vector<64x32xf32> -> vector<64x32xf32>
    %461 = vector.shape_cast %460 : vector<64x32xf32> to vector<2x32x32xf32>
    %462 = vector.broadcast %438 : f32 to vector<2x32x32xf32>
    %463 = arith.mulf %462, %461 : vector<2x32x32xf32>
    %464 = arith.addf %424, %463 : vector<2x32x32xf32>
    %465 = vector.extract_strided_slice %464 {offsets = [0, 0, 0], sizes = [1, 32, 32], strides = [1, 1, 1]} : vector<2x32x32xf32> to vector<1x32x32xf32>
    %466 = vector.shape_cast %465 : vector<1x32x32xf32> to vector<32x32xf32>
    %cst_187 = arith.constant dense<0.000000e+00> : vector<32xf32>
    %467 = vector.multi_reduction <add>, %466, %cst_187 [0] : vector<32x32xf32> to vector<32xf32>
    %468 = vector.shape_cast %467 : vector<32xf32> to vector<1x32xf32>
    %cst_188 = arith.constant 3.200000e+01 : f32
    %469 = vector.broadcast %cst_188 : f32 to vector<1x32xf32>
    %470 = arith.divf %468, %469 : vector<1x32xf32>
    %c1_189 = arith.constant 1 : index
    %c0_190 = arith.constant 0 : index
    %c0_191 = arith.constant 0 : index
    %471 = vector.load %arg14[%c1_189, %c0_190, %c0_191] : memref<3x32x16xf32, #tpu.memory_space<vmem>>, vector<1x32x16xf32>
    %472 = vector.shape_cast %471 : vector<1x32x16xf32> to vector<32x16xf32>
    %cst_192 = arith.constant dense<0.000000e+00> : vector<1x16xf32>
    %473 = tpu.matmul %470, %472, %cst_192 {dimension_numbers = #tpu.dot_dimension_numbers<[1], [0], [0], [1], [0, 0, 1, 1], [], []>} : vector<1x32xf32>, vector<32x16xf32>, vector<1x16xf32> -> vector<1x16xf32>
    %c1_193 = arith.constant 1 : index
    %c0_194 = arith.constant 0 : index
    %c0_195 = arith.constant 0 : index
    %474 = vector.load %arg15[%c1_193, %c0_194, %c0_195] : memref<3x1x16xf32, #tpu.memory_space<vmem>>, vector<1x1x16xf32>
    %475 = vector.shape_cast %474 : vector<1x1x16xf32> to vector<1x16xf32>
    %476 = arith.addf %473, %475 : vector<1x16xf32>
    %cst_196 = arith.constant 0.000000e+00 : f32
    %477 = vector.broadcast %cst_196 : f32 to vector<1x16xf32>
    %478 = arith.maximumf %476, %477 : vector<1x16xf32>
    %c1_197 = arith.constant 1 : index
    %c0_198 = arith.constant 0 : index
    %c0_199 = arith.constant 0 : index
    %479 = vector.load %arg16[%c1_197, %c0_198, %c0_199] : memref<3x1x16xf32, #tpu.memory_space<vmem>>, vector<1x1x16xf32>
    %480 = vector.shape_cast %479 : vector<1x1x16xf32> to vector<1x16xf32>
    %481 = arith.mulf %478, %480 : vector<1x16xf32>
    %cst_200 = arith.constant dense<0.000000e+00> : vector<1xf32>
    %482 = vector.multi_reduction <add>, %481, %cst_200 [1] : vector<1x16xf32> to vector<1xf32>
    %483 = vector.shape_cast %482 : vector<1xf32> to vector<1x1xf32>
    %c1_201 = arith.constant 1 : index
    %484 = memref.load %arg17[%c1_201] : memref<3xf32, #tpu.memory_space<smem>>
    %485 = vector.broadcast %484 : f32 to vector<1x1xf32>
    %486 = arith.addf %483, %485 : vector<1x1xf32>
    %cst_202 = arith.constant 0.000000e+00 : f32
    %487 = vector.broadcast %cst_202 : f32 to vector<1x1xf32>
    %488 = arith.subf %487, %486 : vector<1x1xf32>
    %489 = math.exp %488 : vector<1x1xf32>
    %cst_203 = arith.constant 1.000000e+00 : f32
    %490 = vector.broadcast %cst_203 : f32 to vector<1x1xf32>
    %491 = arith.addf %490, %489 : vector<1x1xf32>
    %cst_204 = arith.constant 1.000000e+00 : f32
    %492 = vector.broadcast %cst_204 : f32 to vector<1x1xf32>
    %493 = arith.divf %492, %491 : vector<1x1xf32>
    %cst_205 = arith.constant 4.500000e+01 : f32
    %494 = vector.broadcast %cst_205 : f32 to vector<1x1xf32>
    %495 = arith.mulf %493, %494 : vector<1x1xf32>
    %cst_206 = arith.constant 5.000000e+00 : f32
    %496 = vector.broadcast %cst_206 : f32 to vector<1x1xf32>
    %497 = arith.addf %495, %496 : vector<1x1xf32>
    %cst_207 = arith.constant 5.000000e-01 : f32
    %498 = vector.broadcast %cst_207 : f32 to vector<1x1xf32>
    %499 = arith.addf %497, %498 : vector<1x1xf32>
    %500 = arith.fptosi %499 : vector<1x1xf32> to vector<1x1xi32>
    %501 = arith.fptosi %497 : vector<1x1xf32> to vector<1x1xi32>
    %502 = arith.sitofp %501 : vector<1x1xi32> to vector<1x1xf32>
    %503 = arith.subf %497, %502 : vector<1x1xf32>
    %504 = arith.sitofp %500 : vector<1x1xi32> to vector<1x1xf32>
    %cst_208 = arith.constant 5.000000e-01 : f32
    %505 = vector.broadcast %cst_208 : f32 to vector<1x1xf32>
    %506 = arith.mulf %504, %505 : vector<1x1xf32>
    %507 = arith.fptosi %506 : vector<1x1xf32> to vector<1x1xi32>
    %c2_i32_209 = arith.constant 2 : i32
    %508 = vector.broadcast %c2_i32_209 : i32 to vector<1x1xi32>
    %509 = arith.muli %508, %507 : vector<1x1xi32>
    %510 = arith.subi %500, %509 : vector<1x1xi32>
    %c1_i32_210 = arith.constant 1 : i32
    %511 = vector.broadcast %c1_i32_210 : i32 to vector<1x1xi32>
    %512 = arith.cmpi eq, %510, %511 : vector<1x1xi32>
    %cst_211 = arith.constant 5.000000e-01 : f32
    %513 = vector.broadcast %cst_211 : f32 to vector<1x1xf32>
    %514 = arith.cmpf oeq, %503, %513 : vector<1x1xf32>
    %515 = arith.andi %514, %512 : vector<1x1xi1>
    %c1_i32_212 = arith.constant 1 : i32
    %c0_i32_213 = arith.constant 0 : i32
    %516 = vector.broadcast %c1_i32_212 : i32 to vector<1x1xi32>
    %517 = vector.broadcast %c0_i32_213 : i32 to vector<1x1xi32>
    %518 = arith.select %515, %516, %517 : vector<1x1xi1>, vector<1x1xi32>
    %519 = arith.subi %500, %518 : vector<1x1xi32>
    %c3_i32_214 = arith.constant 3 : i32
    %c16_i32_215 = arith.constant 16 : i32
    %520 = vector.broadcast %c3_i32_214 : i32 to vector<1x1xi32>
    %521 = arith.maxsi %520, %519 : vector<1x1xi32>
    %522 = vector.broadcast %c16_i32_215 : i32 to vector<1x1xi32>
    %523 = arith.minsi %522, %521 : vector<1x1xi32>
    %524 = arith.sitofp %523 : vector<1x1xi32> to vector<1x1xf32>
    %cst_216 = arith.constant 5.000000e-01 : f32
    %525 = vector.broadcast %cst_216 : f32 to vector<1x1xf32>
    %526 = arith.mulf %524, %525 : vector<1x1xf32>
    %527 = arith.fptosi %526 : vector<1x1xf32> to vector<1x1xi32>
    %c2_i32_217 = arith.constant 2 : i32
    %528 = vector.broadcast %c2_i32_217 : i32 to vector<1x1xi32>
    %529 = arith.muli %528, %527 : vector<1x1xi32>
    %530 = arith.cmpi eq, %523, %529 : vector<1x1xi32>
    %c1_i32_218 = arith.constant 1 : i32
    %c0_i32_219 = arith.constant 0 : i32
    %531 = vector.broadcast %c1_i32_218 : i32 to vector<1x1xi32>
    %532 = vector.broadcast %c0_i32_219 : i32 to vector<1x1xi32>
    %533 = arith.select %530, %531, %532 : vector<1x1xi1>, vector<1x1xi32>
    %534 = arith.subi %523, %533 : vector<1x1xi32>
    %c3_i32_220 = arith.constant 3 : i32
    %535 = vector.broadcast %c3_i32_220 : i32 to vector<1x1xi32>
    %536 = arith.maxsi %534, %535 : vector<1x1xi32>
    %537 = arith.sitofp %536 : vector<1x1xi32> to vector<1x1xf32>
    %cst_221 = arith.constant 5.000000e-01 : f32
    %538 = vector.broadcast %cst_221 : f32 to vector<1x1xf32>
    %539 = arith.mulf %537, %538 : vector<1x1xf32>
    %540 = arith.fptosi %539 : vector<1x1xf32> to vector<1x1xi32>
    %c1_222 = arith.constant 1 : index
    %c0_223 = arith.constant 0 : index
    %c0_224 = arith.constant 0 : index
    %541 = vector.load %arg13[%c1_222, %c0_223, %c0_224] : memref<3x16x32xf32, #tpu.memory_space<vmem>>, vector<1x16x32xf32>
    %542 = vector.shape_cast %541 : vector<1x16x32xf32> to vector<16x32xf32>
    %543 = tpu.iota {dimensions = array<i32: 0>} : vector<16x32xi32>
    %544 = vector.broadcast %536 : vector<1x1xi32> to vector<16x32xi32>
    %545 = arith.cmpi slt, %543, %544 : vector<16x32xi32>
    %cst_225 = arith.constant 0xFF800000 : f32
    %546 = vector.broadcast %cst_225 : f32 to vector<16x32xf32>
    %547 = arith.select %545, %542, %546 : vector<16x32xi1>, vector<16x32xf32>
    %cst_226 = arith.constant dense<0xFF800000> : vector<32xf32>
    %548 = vector.multi_reduction <maximumf>, %547, %cst_226 [0] : vector<16x32xf32> to vector<32xf32>
    %549 = vector.shape_cast %548 : vector<32xf32> to vector<1x32xf32>
    %550 = vector.broadcast %549 : vector<1x32xf32> to vector<16x32xf32>
    %551 = arith.subf %542, %550 : vector<16x32xf32>
    %552 = math.exp %551 : vector<16x32xf32>
    %cst_227 = arith.constant 0.000000e+00 : f32
    %553 = vector.broadcast %cst_227 : f32 to vector<16x32xf32>
    %554 = arith.select %545, %552, %553 : vector<16x32xi1>, vector<16x32xf32>
    %cst_228 = arith.constant dense<0.000000e+00> : vector<32xf32>
    %555 = vector.multi_reduction <add>, %554, %cst_228 [0] : vector<16x32xf32> to vector<32xf32>
    %556 = vector.shape_cast %555 : vector<32xf32> to vector<1x32xf32>
    %557 = vector.broadcast %556 : vector<1x32xf32> to vector<16x32xf32>
    %558 = arith.divf %554, %557 : vector<16x32xf32>
    %559 = tpu.iota {dimensions = array<i32: 0>} : vector<16x16xi32>
    %560 = tpu.iota {dimensions = array<i32: 1>} : vector<16x16xi32>
    %561 = arith.subi %560, %559 : vector<16x16xi32>
    %c7_i32_229 = arith.constant 7 : i32
    %562 = vector.broadcast %c7_i32_229 : i32 to vector<1x1xi32>
    %563 = arith.subi %540, %562 : vector<1x1xi32>
    %564 = vector.broadcast %563 : vector<1x1xi32> to vector<16x16xi32>
    %565 = arith.cmpi eq, %561, %564 : vector<16x16xi32>
    %566 = arith.extui %565 : vector<16x16xi1> to vector<16x16xi32>
    %567 = arith.sitofp %566 : vector<16x16xi32> to vector<16x16xf32>
    %cst_230 = arith.constant dense<0.000000e+00> : vector<16x32xf32>
    %568 = tpu.matmul %567, %558, %cst_230 {dimension_numbers = #tpu.dot_dimension_numbers<[1], [0], [0], [1], [0, 0, 1, 1], [], []>} : vector<16x16xf32>, vector<16x32xf32>, vector<16x32xf32> -> vector<16x32xf32>
    %569 = vector.extract_strided_slice %466 {offsets = [0, 0], sizes = [1, 32], strides = [1, 1]} : vector<32x32xf32> to vector<1x32xf32>
    %570 = vector.shape_cast %569 : vector<1x32xf32> to vector<1x32xf32>
    %571 = vector.broadcast %570 : vector<1x32xf32> to vector<8x32xf32>
    %c0_231 = arith.constant 0 : index
    %c0_232 = arith.constant 0 : index
    %572 = vector.load %arg21[%c0_231, %c0_232] : memref<48x32xf32, #tpu.memory_space<vmem>>, vector<8x32xf32>
    tpu.vector_store %arg21[%c0_231, %c0_232], %571 {strides = array<i32>} : memref<48x32xf32, #tpu.memory_space<vmem>>, vector<8x32xf32>,
    %c8_233 = arith.constant 8 : index
    %c0_234 = arith.constant 0 : index
    %573 = vector.load %arg21[%c8_233, %c0_234] : memref<48x32xf32, #tpu.memory_space<vmem>>, vector<32x32xf32>
    tpu.vector_store %arg21[%c8_233, %c0_234], %466 {strides = array<i32>} : memref<48x32xf32, #tpu.memory_space<vmem>>, vector<32x32xf32>,
    %574 = vector.extract_strided_slice %466 {offsets = [31, 0], sizes = [1, 32], strides = [1, 1]} : vector<32x32xf32> to vector<1x32xf32>
    %575 = vector.shape_cast %574 : vector<1x32xf32> to vector<1x32xf32>
    %576 = vector.broadcast %575 : vector<1x32xf32> to vector<8x32xf32>
    %c40_235 = arith.constant 40 : index
    %c0_236 = arith.constant 0 : index
    %577 = vector.load %arg21[%c40_235, %c0_236] : memref<48x32xf32, #tpu.memory_space<vmem>>, vector<8x32xf32>
    tpu.vector_store %arg21[%c40_235, %c0_236], %576 {strides = array<i32>} : memref<48x32xf32, #tpu.memory_space<vmem>>, vector<8x32xf32>,
    %c1_237 = arith.constant 1 : index
    %c0_238 = arith.constant 0 : index
    %578 = vector.load %arg21[%c1_237, %c0_238] : memref<48x32xf32, #tpu.memory_space<vmem>>, vector<32x32xf32>
    %579 = vector.extract_strided_slice %568 {offsets = [0, 0], sizes = [1, 32], strides = [1, 1]} : vector<16x32xf32> to vector<1x32xf32>
    %580 = vector.broadcast %579 : vector<1x32xf32> to vector<32x32xf32>
    %581 = arith.mulf %580, %578 : vector<32x32xf32>
    %c2_239 = arith.constant 2 : index
    %c0_240 = arith.constant 0 : index
    %582 = vector.load %arg21[%c2_239, %c0_240] : memref<48x32xf32, #tpu.memory_space<vmem>>, vector<32x32xf32>
    %583 = vector.extract_strided_slice %568 {offsets = [1, 0], sizes = [1, 32], strides = [1, 1]} : vector<16x32xf32> to vector<1x32xf32>
    %584 = vector.broadcast %583 : vector<1x32xf32> to vector<32x32xf32>
    %585 = arith.mulf %584, %582 : vector<32x32xf32>
    %c3_241 = arith.constant 3 : index
    %c0_242 = arith.constant 0 : index
    %586 = vector.load %arg21[%c3_241, %c0_242] : memref<48x32xf32, #tpu.memory_space<vmem>>, vector<32x32xf32>
    %587 = vector.extract_strided_slice %568 {offsets = [2, 0], sizes = [1, 32], strides = [1, 1]} : vector<16x32xf32> to vector<1x32xf32>
    %588 = vector.broadcast %587 : vector<1x32xf32> to vector<32x32xf32>
    %589 = arith.mulf %588, %586 : vector<32x32xf32>
    %c4_243 = arith.constant 4 : index
    %c0_244 = arith.constant 0 : index
    %590 = vector.load %arg21[%c4_243, %c0_244] : memref<48x32xf32, #tpu.memory_space<vmem>>, vector<32x32xf32>
    %591 = vector.extract_strided_slice %568 {offsets = [3, 0], sizes = [1, 32], strides = [1, 1]} : vector<16x32xf32> to vector<1x32xf32>
    %592 = vector.broadcast %591 : vector<1x32xf32> to vector<32x32xf32>
    %593 = arith.mulf %592, %590 : vector<32x32xf32>
    %c5_245 = arith.constant 5 : index
    %c0_246 = arith.constant 0 : index
    %594 = vector.load %arg21[%c5_245, %c0_246] : memref<48x32xf32, #tpu.memory_space<vmem>>, vector<32x32xf32>
    %595 = vector.extract_strided_slice %568 {offsets = [4, 0], sizes = [1, 32], strides = [1, 1]} : vector<16x32xf32> to vector<1x32xf32>
    %596 = vector.broadcast %595 : vector<1x32xf32> to vector<32x32xf32>
    %597 = arith.mulf %596, %594 : vector<32x32xf32>
    %598 = arith.addf %581, %597 : vector<32x32xf32>
    %c6_247 = arith.constant 6 : index
    %c0_248 = arith.constant 0 : index
    %599 = vector.load %arg21[%c6_247, %c0_248] : memref<48x32xf32, #tpu.memory_space<vmem>>, vector<32x32xf32>
    %600 = vector.extract_strided_slice %568 {offsets = [5, 0], sizes = [1, 32], strides = [1, 1]} : vector<16x32xf32> to vector<1x32xf32>
    %601 = vector.broadcast %600 : vector<1x32xf32> to vector<32x32xf32>
    %602 = arith.mulf %601, %599 : vector<32x32xf32>
    %603 = arith.addf %585, %602 : vector<32x32xf32>
    %c7_249 = arith.constant 7 : index
    %c0_250 = arith.constant 0 : index
    %604 = vector.load %arg21[%c7_249, %c0_250] : memref<48x32xf32, #tpu.memory_space<vmem>>, vector<32x32xf32>
    %605 = vector.extract_strided_slice %568 {offsets = [6, 0], sizes = [1, 32], strides = [1, 1]} : vector<16x32xf32> to vector<1x32xf32>
    %606 = vector.broadcast %605 : vector<1x32xf32> to vector<32x32xf32>
    %607 = arith.mulf %606, %604 : vector<32x32xf32>
    %608 = arith.addf %589, %607 : vector<32x32xf32>
    %c8_251 = arith.constant 8 : index
    %c0_252 = arith.constant 0 : index
    %609 = vector.load %arg21[%c8_251, %c0_252] : memref<48x32xf32, #tpu.memory_space<vmem>>, vector<32x32xf32>
    %610 = vector.extract_strided_slice %568 {offsets = [7, 0], sizes = [1, 32], strides = [1, 1]} : vector<16x32xf32> to vector<1x32xf32>
    %611 = vector.broadcast %610 : vector<1x32xf32> to vector<32x32xf32>
    %612 = arith.mulf %611, %609 : vector<32x32xf32>
    %613 = arith.addf %593, %612 : vector<32x32xf32>
    %c9_253 = arith.constant 9 : index
    %c0_254 = arith.constant 0 : index
    %614 = vector.load %arg21[%c9_253, %c0_254] : memref<48x32xf32, #tpu.memory_space<vmem>>, vector<32x32xf32>
    %615 = vector.extract_strided_slice %568 {offsets = [8, 0], sizes = [1, 32], strides = [1, 1]} : vector<16x32xf32> to vector<1x32xf32>
    %616 = vector.broadcast %615 : vector<1x32xf32> to vector<32x32xf32>
    %617 = arith.mulf %616, %614 : vector<32x32xf32>
    %618 = arith.addf %598, %617 : vector<32x32xf32>
    %c10_255 = arith.constant 10 : index
    %c0_256 = arith.constant 0 : index
    %619 = vector.load %arg21[%c10_255, %c0_256] : memref<48x32xf32, #tpu.memory_space<vmem>>, vector<32x32xf32>
    %620 = vector.extract_strided_slice %568 {offsets = [9, 0], sizes = [1, 32], strides = [1, 1]} : vector<16x32xf32> to vector<1x32xf32>
    %621 = vector.broadcast %620 : vector<1x32xf32> to vector<32x32xf32>
    %622 = arith.mulf %621, %619 : vector<32x32xf32>
    %623 = arith.addf %603, %622 : vector<32x32xf32>
    %c11_257 = arith.constant 11 : index
    %c0_258 = arith.constant 0 : index
    %624 = vector.load %arg21[%c11_257, %c0_258] : memref<48x32xf32, #tpu.memory_space<vmem>>, vector<32x32xf32>
    %625 = vector.extract_strided_slice %568 {offsets = [10, 0], sizes = [1, 32], strides = [1, 1]} : vector<16x32xf32> to vector<1x32xf32>
    %626 = vector.broadcast %625 : vector<1x32xf32> to vector<32x32xf32>
    %627 = arith.mulf %626, %624 : vector<32x32xf32>
    %628 = arith.addf %608, %627 : vector<32x32xf32>
    %c12_259 = arith.constant 12 : index
    %c0_260 = arith.constant 0 : index
    %629 = vector.load %arg21[%c12_259, %c0_260] : memref<48x32xf32, #tpu.memory_space<vmem>>, vector<32x32xf32>
    %630 = vector.extract_strided_slice %568 {offsets = [11, 0], sizes = [1, 32], strides = [1, 1]} : vector<16x32xf32> to vector<1x32xf32>
    %631 = vector.broadcast %630 : vector<1x32xf32> to vector<32x32xf32>
    %632 = arith.mulf %631, %629 : vector<32x32xf32>
    %633 = arith.addf %613, %632 : vector<32x32xf32>
    %c13_261 = arith.constant 13 : index
    %c0_262 = arith.constant 0 : index
    %634 = vector.load %arg21[%c13_261, %c0_262] : memref<48x32xf32, #tpu.memory_space<vmem>>, vector<32x32xf32>
    %635 = vector.extract_strided_slice %568 {offsets = [12, 0], sizes = [1, 32], strides = [1, 1]} : vector<16x32xf32> to vector<1x32xf32>
    %636 = vector.broadcast %635 : vector<1x32xf32> to vector<32x32xf32>
    %637 = arith.mulf %636, %634 : vector<32x32xf32>
    %638 = arith.addf %618, %637 : vector<32x32xf32>
    %c14_263 = arith.constant 14 : index
    %c0_264 = arith.constant 0 : index
    %639 = vector.load %arg21[%c14_263, %c0_264] : memref<48x32xf32, #tpu.memory_space<vmem>>, vector<32x32xf32>
    %640 = vector.extract_strided_slice %568 {offsets = [13, 0], sizes = [1, 32], strides = [1, 1]} : vector<16x32xf32> to vector<1x32xf32>
    %641 = vector.broadcast %640 : vector<1x32xf32> to vector<32x32xf32>
    %642 = arith.mulf %641, %639 : vector<32x32xf32>
    %643 = arith.addf %623, %642 : vector<32x32xf32>
    %c15_265 = arith.constant 15 : index
    %c0_266 = arith.constant 0 : index
    %644 = vector.load %arg21[%c15_265, %c0_266] : memref<48x32xf32, #tpu.memory_space<vmem>>, vector<32x32xf32>
    %645 = vector.extract_strided_slice %568 {offsets = [14, 0], sizes = [1, 32], strides = [1, 1]} : vector<16x32xf32> to vector<1x32xf32>
    %646 = vector.broadcast %645 : vector<1x32xf32> to vector<32x32xf32>
    %647 = arith.mulf %646, %644 : vector<32x32xf32>
    %648 = arith.addf %628, %647 : vector<32x32xf32>
    %649 = arith.addf %638, %643 : vector<32x32xf32>
    %650 = arith.addf %648, %633 : vector<32x32xf32>
    %651 = arith.addf %649, %650 : vector<32x32xf32>
    %c0_267 = arith.constant 0 : index
    %c0_268 = arith.constant 0 : index
    %c0_269 = arith.constant 0 : index
    %652 = vector.load %arg22[%c0_267, %c0_268, %c0_269] : memref<2x32x32xf32, #tpu.memory_space<vmem>>, vector<1x32x32xf32>
    %653 = vector.shape_cast %652 : vector<1x32x32xf32> to vector<32x32xf32>
    %654 = vector.shape_cast %651 : vector<32x32xf32> to vector<1x32x32xf32>
    tpu.vector_store %arg22[%c0_267, %c0_268, %c0_269], %654 {strides = array<i32>} : memref<2x32x32xf32, #tpu.memory_space<vmem>>, vector<1x32x32xf32>,
    %655 = vector.extract_strided_slice %464 {offsets = [1, 0, 0], sizes = [1, 32, 32], strides = [1, 1, 1]} : vector<2x32x32xf32> to vector<1x32x32xf32>
    %656 = vector.shape_cast %655 : vector<1x32x32xf32> to vector<32x32xf32>
    %cst_270 = arith.constant dense<0.000000e+00> : vector<32xf32>
    %657 = vector.multi_reduction <add>, %656, %cst_270 [0] : vector<32x32xf32> to vector<32xf32>
    %658 = vector.shape_cast %657 : vector<32xf32> to vector<1x32xf32>
    %cst_271 = arith.constant 3.200000e+01 : f32
    %659 = vector.broadcast %cst_271 : f32 to vector<1x32xf32>
    %660 = arith.divf %658, %659 : vector<1x32xf32>
    %c1_272 = arith.constant 1 : index
    %c0_273 = arith.constant 0 : index
    %c0_274 = arith.constant 0 : index
    %661 = vector.load %arg14[%c1_272, %c0_273, %c0_274] : memref<3x32x16xf32, #tpu.memory_space<vmem>>, vector<1x32x16xf32>
    %662 = vector.shape_cast %661 : vector<1x32x16xf32> to vector<32x16xf32>
    %cst_275 = arith.constant dense<0.000000e+00> : vector<1x16xf32>
    %663 = tpu.matmul %660, %662, %cst_275 {dimension_numbers = #tpu.dot_dimension_numbers<[1], [0], [0], [1], [0, 0, 1, 1], [], []>} : vector<1x32xf32>, vector<32x16xf32>, vector<1x16xf32> -> vector<1x16xf32>
    %c1_276 = arith.constant 1 : index
    %c0_277 = arith.constant 0 : index
    %c0_278 = arith.constant 0 : index
    %664 = vector.load %arg15[%c1_276, %c0_277, %c0_278] : memref<3x1x16xf32, #tpu.memory_space<vmem>>, vector<1x1x16xf32>
    %665 = vector.shape_cast %664 : vector<1x1x16xf32> to vector<1x16xf32>
    %666 = arith.addf %663, %665 : vector<1x16xf32>
    %cst_279 = arith.constant 0.000000e+00 : f32
    %667 = vector.broadcast %cst_279 : f32 to vector<1x16xf32>
    %668 = arith.maximumf %666, %667 : vector<1x16xf32>
    %c1_280 = arith.constant 1 : index
    %c0_281 = arith.constant 0 : index
    %c0_282 = arith.constant 0 : index
    %669 = vector.load %arg16[%c1_280, %c0_281, %c0_282] : memref<3x1x16xf32, #tpu.memory_space<vmem>>, vector<1x1x16xf32>
    %670 = vector.shape_cast %669 : vector<1x1x16xf32> to vector<1x16xf32>
    %671 = arith.mulf %668, %670 : vector<1x16xf32>
    %cst_283 = arith.constant dense<0.000000e+00> : vector<1xf32>
    %672 = vector.multi_reduction <add>, %671, %cst_283 [1] : vector<1x16xf32> to vector<1xf32>
    %673 = vector.shape_cast %672 : vector<1xf32> to vector<1x1xf32>
    %c1_284 = arith.constant 1 : index
    %674 = memref.load %arg17[%c1_284] : memref<3xf32, #tpu.memory_space<smem>>
    %675 = vector.broadcast %674 : f32 to vector<1x1xf32>
    %676 = arith.addf %673, %675 : vector<1x1xf32>
    %cst_285 = arith.constant 0.000000e+00 : f32
    %677 = vector.broadcast %cst_285 : f32 to vector<1x1xf32>
    %678 = arith.subf %677, %676 : vector<1x1xf32>
    %679 = math.exp %678 : vector<1x1xf32>
    %cst_286 = arith.constant 1.000000e+00 : f32
    %680 = vector.broadcast %cst_286 : f32 to vector<1x1xf32>
    %681 = arith.addf %680, %679 : vector<1x1xf32>
    %cst_287 = arith.constant 1.000000e+00 : f32
    %682 = vector.broadcast %cst_287 : f32 to vector<1x1xf32>
    %683 = arith.divf %682, %681 : vector<1x1xf32>
    %cst_288 = arith.constant 4.500000e+01 : f32
    %684 = vector.broadcast %cst_288 : f32 to vector<1x1xf32>
    %685 = arith.mulf %683, %684 : vector<1x1xf32>
    %cst_289 = arith.constant 5.000000e+00 : f32
    %686 = vector.broadcast %cst_289 : f32 to vector<1x1xf32>
    %687 = arith.addf %685, %686 : vector<1x1xf32>
    %cst_290 = arith.constant 5.000000e-01 : f32
    %688 = vector.broadcast %cst_290 : f32 to vector<1x1xf32>
    %689 = arith.addf %687, %688 : vector<1x1xf32>
    %690 = arith.fptosi %689 : vector<1x1xf32> to vector<1x1xi32>
    %691 = arith.fptosi %687 : vector<1x1xf32> to vector<1x1xi32>
    %692 = arith.sitofp %691 : vector<1x1xi32> to vector<1x1xf32>
    %693 = arith.subf %687, %692 : vector<1x1xf32>
    %694 = arith.sitofp %690 : vector<1x1xi32> to vector<1x1xf32>
    %cst_291 = arith.constant 5.000000e-01 : f32
    %695 = vector.broadcast %cst_291 : f32 to vector<1x1xf32>
    %696 = arith.mulf %694, %695 : vector<1x1xf32>
    %697 = arith.fptosi %696 : vector<1x1xf32> to vector<1x1xi32>
    %c2_i32_292 = arith.constant 2 : i32
    %698 = vector.broadcast %c2_i32_292 : i32 to vector<1x1xi32>
    %699 = arith.muli %698, %697 : vector<1x1xi32>
    %700 = arith.subi %690, %699 : vector<1x1xi32>
    %c1_i32_293 = arith.constant 1 : i32
    %701 = vector.broadcast %c1_i32_293 : i32 to vector<1x1xi32>
    %702 = arith.cmpi eq, %700, %701 : vector<1x1xi32>
    %cst_294 = arith.constant 5.000000e-01 : f32
    %703 = vector.broadcast %cst_294 : f32 to vector<1x1xf32>
    %704 = arith.cmpf oeq, %693, %703 : vector<1x1xf32>
    %705 = arith.andi %704, %702 : vector<1x1xi1>
    %c1_i32_295 = arith.constant 1 : i32
    %c0_i32_296 = arith.constant 0 : i32
    %706 = vector.broadcast %c1_i32_295 : i32 to vector<1x1xi32>
    %707 = vector.broadcast %c0_i32_296 : i32 to vector<1x1xi32>
    %708 = arith.select %705, %706, %707 : vector<1x1xi1>, vector<1x1xi32>
    %709 = arith.subi %690, %708 : vector<1x1xi32>
    %c3_i32_297 = arith.constant 3 : i32
    %c16_i32_298 = arith.constant 16 : i32
    %710 = vector.broadcast %c3_i32_297 : i32 to vector<1x1xi32>
    %711 = arith.maxsi %710, %709 : vector<1x1xi32>
    %712 = vector.broadcast %c16_i32_298 : i32 to vector<1x1xi32>
    %713 = arith.minsi %712, %711 : vector<1x1xi32>
    %714 = arith.sitofp %713 : vector<1x1xi32> to vector<1x1xf32>
    %cst_299 = arith.constant 5.000000e-01 : f32
    %715 = vector.broadcast %cst_299 : f32 to vector<1x1xf32>
    %716 = arith.mulf %714, %715 : vector<1x1xf32>
    %717 = arith.fptosi %716 : vector<1x1xf32> to vector<1x1xi32>
    %c2_i32_300 = arith.constant 2 : i32
    %718 = vector.broadcast %c2_i32_300 : i32 to vector<1x1xi32>
    %719 = arith.muli %718, %717 : vector<1x1xi32>
    %720 = arith.cmpi eq, %713, %719 : vector<1x1xi32>
    %c1_i32_301 = arith.constant 1 : i32
    %c0_i32_302 = arith.constant 0 : i32
    %721 = vector.broadcast %c1_i32_301 : i32 to vector<1x1xi32>
    %722 = vector.broadcast %c0_i32_302 : i32 to vector<1x1xi32>
    %723 = arith.select %720, %721, %722 : vector<1x1xi1>, vector<1x1xi32>
    %724 = arith.subi %713, %723 : vector<1x1xi32>
    %c3_i32_303 = arith.constant 3 : i32
    %725 = vector.broadcast %c3_i32_303 : i32 to vector<1x1xi32>
    %726 = arith.maxsi %724, %725 : vector<1x1xi32>
    %727 = arith.sitofp %726 : vector<1x1xi32> to vector<1x1xf32>
    %cst_304 = arith.constant 5.000000e-01 : f32
    %728 = vector.broadcast %cst_304 : f32 to vector<1x1xf32>
    %729 = arith.mulf %727, %728 : vector<1x1xf32>
    %730 = arith.fptosi %729 : vector<1x1xf32> to vector<1x1xi32>
    %c1_305 = arith.constant 1 : index
    %c0_306 = arith.constant 0 : index
    %c0_307 = arith.constant 0 : index
    %731 = vector.load %arg13[%c1_305, %c0_306, %c0_307] : memref<3x16x32xf32, #tpu.memory_space<vmem>>, vector<1x16x32xf32>
    %732 = vector.shape_cast %731 : vector<1x16x32xf32> to vector<16x32xf32>
    %733 = tpu.iota {dimensions = array<i32: 0>} : vector<16x32xi32>
    %734 = vector.broadcast %726 : vector<1x1xi32> to vector<16x32xi32>
    %735 = arith.cmpi slt, %733, %734 : vector<16x32xi32>
    %cst_308 = arith.constant 0xFF800000 : f32
    %736 = vector.broadcast %cst_308 : f32 to vector<16x32xf32>
    %737 = arith.select %735, %732, %736 : vector<16x32xi1>, vector<16x32xf32>
    %cst_309 = arith.constant dense<0xFF800000> : vector<32xf32>
    %738 = vector.multi_reduction <maximumf>, %737, %cst_309 [0] : vector<16x32xf32> to vector<32xf32>
    %739 = vector.shape_cast %738 : vector<32xf32> to vector<1x32xf32>
    %740 = vector.broadcast %739 : vector<1x32xf32> to vector<16x32xf32>
    %741 = arith.subf %732, %740 : vector<16x32xf32>
    %742 = math.exp %741 : vector<16x32xf32>
    %cst_310 = arith.constant 0.000000e+00 : f32
    %743 = vector.broadcast %cst_310 : f32 to vector<16x32xf32>
    %744 = arith.select %735, %742, %743 : vector<16x32xi1>, vector<16x32xf32>
    %cst_311 = arith.constant dense<0.000000e+00> : vector<32xf32>
    %745 = vector.multi_reduction <add>, %744, %cst_311 [0] : vector<16x32xf32> to vector<32xf32>
    %746 = vector.shape_cast %745 : vector<32xf32> to vector<1x32xf32>
    %747 = vector.broadcast %746 : vector<1x32xf32> to vector<16x32xf32>
    %748 = arith.divf %744, %747 : vector<16x32xf32>
    %749 = tpu.iota {dimensions = array<i32: 0>} : vector<16x16xi32>
    %750 = tpu.iota {dimensions = array<i32: 1>} : vector<16x16xi32>
    %751 = arith.subi %750, %749 : vector<16x16xi32>
    %c7_i32_312 = arith.constant 7 : i32
    %752 = vector.broadcast %c7_i32_312 : i32 to vector<1x1xi32>
    %753 = arith.subi %730, %752 : vector<1x1xi32>
    %754 = vector.broadcast %753 : vector<1x1xi32> to vector<16x16xi32>
    %755 = arith.cmpi eq, %751, %754 : vector<16x16xi32>
    %756 = arith.extui %755 : vector<16x16xi1> to vector<16x16xi32>
    %757 = arith.sitofp %756 : vector<16x16xi32> to vector<16x16xf32>
    %cst_313 = arith.constant dense<0.000000e+00> : vector<16x32xf32>
    %758 = tpu.matmul %757, %748, %cst_313 {dimension_numbers = #tpu.dot_dimension_numbers<[1], [0], [0], [1], [0, 0, 1, 1], [], []>} : vector<16x16xf32>, vector<16x32xf32>, vector<16x32xf32> -> vector<16x32xf32>
    %759 = vector.extract_strided_slice %656 {offsets = [0, 0], sizes = [1, 32], strides = [1, 1]} : vector<32x32xf32> to vector<1x32xf32>
    %760 = vector.shape_cast %759 : vector<1x32xf32> to vector<1x32xf32>
    %761 = vector.broadcast %760 : vector<1x32xf32> to vector<8x32xf32>
    %c0_314 = arith.constant 0 : index
    %c0_315 = arith.constant 0 : index
    %762 = vector.load %arg21[%c0_314, %c0_315] : memref<48x32xf32, #tpu.memory_space<vmem>>, vector<8x32xf32>
    tpu.vector_store %arg21[%c0_314, %c0_315], %761 {strides = array<i32>} : memref<48x32xf32, #tpu.memory_space<vmem>>, vector<8x32xf32>,
    %c8_316 = arith.constant 8 : index
    %c0_317 = arith.constant 0 : index
    %763 = vector.load %arg21[%c8_316, %c0_317] : memref<48x32xf32, #tpu.memory_space<vmem>>, vector<32x32xf32>
    tpu.vector_store %arg21[%c8_316, %c0_317], %656 {strides = array<i32>} : memref<48x32xf32, #tpu.memory_space<vmem>>, vector<32x32xf32>,
    %764 = vector.extract_strided_slice %656 {offsets = [31, 0], sizes = [1, 32], strides = [1, 1]} : vector<32x32xf32> to vector<1x32xf32>
    %765 = vector.shape_cast %764 : vector<1x32xf32> to vector<1x32xf32>
    %766 = vector.broadcast %765 : vector<1x32xf32> to vector<8x32xf32>
    %c40_318 = arith.constant 40 : index
    %c0_319 = arith.constant 0 : index
    %767 = vector.load %arg21[%c40_318, %c0_319] : memref<48x32xf32, #tpu.memory_space<vmem>>, vector<8x32xf32>
    tpu.vector_store %arg21[%c40_318, %c0_319], %766 {strides = array<i32>} : memref<48x32xf32, #tpu.memory_space<vmem>>, vector<8x32xf32>,
    %c1_320 = arith.constant 1 : index
    %c0_321 = arith.constant 0 : index
    %768 = vector.load %arg21[%c1_320, %c0_321] : memref<48x32xf32, #tpu.memory_space<vmem>>, vector<32x32xf32>
    %769 = vector.extract_strided_slice %758 {offsets = [0, 0], sizes = [1, 32], strides = [1, 1]} : vector<16x32xf32> to vector<1x32xf32>
    %770 = vector.broadcast %769 : vector<1x32xf32> to vector<32x32xf32>
    %771 = arith.mulf %770, %768 : vector<32x32xf32>
    %c2_322 = arith.constant 2 : index
    %c0_323 = arith.constant 0 : index
    %772 = vector.load %arg21[%c2_322, %c0_323] : memref<48x32xf32, #tpu.memory_space<vmem>>, vector<32x32xf32>
    %773 = vector.extract_strided_slice %758 {offsets = [1, 0], sizes = [1, 32], strides = [1, 1]} : vector<16x32xf32> to vector<1x32xf32>
    %774 = vector.broadcast %773 : vector<1x32xf32> to vector<32x32xf32>
    %775 = arith.mulf %774, %772 : vector<32x32xf32>
    %c3_324 = arith.constant 3 : index
    %c0_325 = arith.constant 0 : index
    %776 = vector.load %arg21[%c3_324, %c0_325] : memref<48x32xf32, #tpu.memory_space<vmem>>, vector<32x32xf32>
    %777 = vector.extract_strided_slice %758 {offsets = [2, 0], sizes = [1, 32], strides = [1, 1]} : vector<16x32xf32> to vector<1x32xf32>
    %778 = vector.broadcast %777 : vector<1x32xf32> to vector<32x32xf32>
    %779 = arith.mulf %778, %776 : vector<32x32xf32>
    %c4_326 = arith.constant 4 : index
    %c0_327 = arith.constant 0 : index
    %780 = vector.load %arg21[%c4_326, %c0_327] : memref<48x32xf32, #tpu.memory_space<vmem>>, vector<32x32xf32>
    %781 = vector.extract_strided_slice %758 {offsets = [3, 0], sizes = [1, 32], strides = [1, 1]} : vector<16x32xf32> to vector<1x32xf32>
    %782 = vector.broadcast %781 : vector<1x32xf32> to vector<32x32xf32>
    %783 = arith.mulf %782, %780 : vector<32x32xf32>
    %c5_328 = arith.constant 5 : index
    %c0_329 = arith.constant 0 : index
    %784 = vector.load %arg21[%c5_328, %c0_329] : memref<48x32xf32, #tpu.memory_space<vmem>>, vector<32x32xf32>
    %785 = vector.extract_strided_slice %758 {offsets = [4, 0], sizes = [1, 32], strides = [1, 1]} : vector<16x32xf32> to vector<1x32xf32>
    %786 = vector.broadcast %785 : vector<1x32xf32> to vector<32x32xf32>
    %787 = arith.mulf %786, %784 : vector<32x32xf32>
    %788 = arith.addf %771, %787 : vector<32x32xf32>
    %c6_330 = arith.constant 6 : index
    %c0_331 = arith.constant 0 : index
    %789 = vector.load %arg21[%c6_330, %c0_331] : memref<48x32xf32, #tpu.memory_space<vmem>>, vector<32x32xf32>
    %790 = vector.extract_strided_slice %758 {offsets = [5, 0], sizes = [1, 32], strides = [1, 1]} : vector<16x32xf32> to vector<1x32xf32>
    %791 = vector.broadcast %790 : vector<1x32xf32> to vector<32x32xf32>
    %792 = arith.mulf %791, %789 : vector<32x32xf32>
    %793 = arith.addf %775, %792 : vector<32x32xf32>
    %c7_332 = arith.constant 7 : index
    %c0_333 = arith.constant 0 : index
    %794 = vector.load %arg21[%c7_332, %c0_333] : memref<48x32xf32, #tpu.memory_space<vmem>>, vector<32x32xf32>
    %795 = vector.extract_strided_slice %758 {offsets = [6, 0], sizes = [1, 32], strides = [1, 1]} : vector<16x32xf32> to vector<1x32xf32>
    %796 = vector.broadcast %795 : vector<1x32xf32> to vector<32x32xf32>
    %797 = arith.mulf %796, %794 : vector<32x32xf32>
    %798 = arith.addf %779, %797 : vector<32x32xf32>
    %c8_334 = arith.constant 8 : index
    %c0_335 = arith.constant 0 : index
    %799 = vector.load %arg21[%c8_334, %c0_335] : memref<48x32xf32, #tpu.memory_space<vmem>>, vector<32x32xf32>
    %800 = vector.extract_strided_slice %758 {offsets = [7, 0], sizes = [1, 32], strides = [1, 1]} : vector<16x32xf32> to vector<1x32xf32>
    %801 = vector.broadcast %800 : vector<1x32xf32> to vector<32x32xf32>
    %802 = arith.mulf %801, %799 : vector<32x32xf32>
    %803 = arith.addf %783, %802 : vector<32x32xf32>
    %c9_336 = arith.constant 9 : index
    %c0_337 = arith.constant 0 : index
    %804 = vector.load %arg21[%c9_336, %c0_337] : memref<48x32xf32, #tpu.memory_space<vmem>>, vector<32x32xf32>
    %805 = vector.extract_strided_slice %758 {offsets = [8, 0], sizes = [1, 32], strides = [1, 1]} : vector<16x32xf32> to vector<1x32xf32>
    %806 = vector.broadcast %805 : vector<1x32xf32> to vector<32x32xf32>
    %807 = arith.mulf %806, %804 : vector<32x32xf32>
    %808 = arith.addf %788, %807 : vector<32x32xf32>
    %c10_338 = arith.constant 10 : index
    %c0_339 = arith.constant 0 : index
    %809 = vector.load %arg21[%c10_338, %c0_339] : memref<48x32xf32, #tpu.memory_space<vmem>>, vector<32x32xf32>
    %810 = vector.extract_strided_slice %758 {offsets = [9, 0], sizes = [1, 32], strides = [1, 1]} : vector<16x32xf32> to vector<1x32xf32>
    %811 = vector.broadcast %810 : vector<1x32xf32> to vector<32x32xf32>
    %812 = arith.mulf %811, %809 : vector<32x32xf32>
    %813 = arith.addf %793, %812 : vector<32x32xf32>
    %c11_340 = arith.constant 11 : index
    %c0_341 = arith.constant 0 : index
    %814 = vector.load %arg21[%c11_340, %c0_341] : memref<48x32xf32, #tpu.memory_space<vmem>>, vector<32x32xf32>
    %815 = vector.extract_strided_slice %758 {offsets = [10, 0], sizes = [1, 32], strides = [1, 1]} : vector<16x32xf32> to vector<1x32xf32>
    %816 = vector.broadcast %815 : vector<1x32xf32> to vector<32x32xf32>
    %817 = arith.mulf %816, %814 : vector<32x32xf32>
    %818 = arith.addf %798, %817 : vector<32x32xf32>
    %c12_342 = arith.constant 12 : index
    %c0_343 = arith.constant 0 : index
    %819 = vector.load %arg21[%c12_342, %c0_343] : memref<48x32xf32, #tpu.memory_space<vmem>>, vector<32x32xf32>
    %820 = vector.extract_strided_slice %758 {offsets = [11, 0], sizes = [1, 32], strides = [1, 1]} : vector<16x32xf32> to vector<1x32xf32>
    %821 = vector.broadcast %820 : vector<1x32xf32> to vector<32x32xf32>
    %822 = arith.mulf %821, %819 : vector<32x32xf32>
    %823 = arith.addf %803, %822 : vector<32x32xf32>
    %c13_344 = arith.constant 13 : index
    %c0_345 = arith.constant 0 : index
    %824 = vector.load %arg21[%c13_344, %c0_345] : memref<48x32xf32, #tpu.memory_space<vmem>>, vector<32x32xf32>
    %825 = vector.extract_strided_slice %758 {offsets = [12, 0], sizes = [1, 32], strides = [1, 1]} : vector<16x32xf32> to vector<1x32xf32>
    %826 = vector.broadcast %825 : vector<1x32xf32> to vector<32x32xf32>
    %827 = arith.mulf %826, %824 : vector<32x32xf32>
    %828 = arith.addf %808, %827 : vector<32x32xf32>
    %c14_346 = arith.constant 14 : index
    %c0_347 = arith.constant 0 : index
    %829 = vector.load %arg21[%c14_346, %c0_347] : memref<48x32xf32, #tpu.memory_space<vmem>>, vector<32x32xf32>
    %830 = vector.extract_strided_slice %758 {offsets = [13, 0], sizes = [1, 32], strides = [1, 1]} : vector<16x32xf32> to vector<1x32xf32>
    %831 = vector.broadcast %830 : vector<1x32xf32> to vector<32x32xf32>
    %832 = arith.mulf %831, %829 : vector<32x32xf32>
    %833 = arith.addf %813, %832 : vector<32x32xf32>
    %c15_348 = arith.constant 15 : index
    %c0_349 = arith.constant 0 : index
    %834 = vector.load %arg21[%c15_348, %c0_349] : memref<48x32xf32, #tpu.memory_space<vmem>>, vector<32x32xf32>
    %835 = vector.extract_strided_slice %758 {offsets = [14, 0], sizes = [1, 32], strides = [1, 1]} : vector<16x32xf32> to vector<1x32xf32>
    %836 = vector.broadcast %835 : vector<1x32xf32> to vector<32x32xf32>
    %837 = arith.mulf %836, %834 : vector<32x32xf32>
    %838 = arith.addf %818, %837 : vector<32x32xf32>
    %839 = arith.addf %828, %833 : vector<32x32xf32>
    %840 = arith.addf %838, %823 : vector<32x32xf32>
    %841 = arith.addf %839, %840 : vector<32x32xf32>
    %c1_350 = arith.constant 1 : index
    %c0_351 = arith.constant 0 : index
    %c0_352 = arith.constant 0 : index
    %842 = vector.load %arg22[%c1_350, %c0_351, %c0_352] : memref<2x32x32xf32, #tpu.memory_space<vmem>>, vector<1x32x32xf32>
    %843 = vector.shape_cast %842 : vector<1x32x32xf32> to vector<32x32xf32>
    %844 = vector.shape_cast %841 : vector<32x32xf32> to vector<1x32x32xf32>
    tpu.vector_store %arg22[%c1_350, %c0_351, %c0_352], %844 {strides = array<i32>} : memref<2x32x32xf32, #tpu.memory_space<vmem>>, vector<1x32x32xf32>,
    %c0_353 = arith.constant 0 : index
    %c0_354 = arith.constant 0 : index
    %c0_355 = arith.constant 0 : index
    %845 = vector.load %arg22[%c0_353, %c0_354, %c0_355] : memref<2x32x32xf32, #tpu.memory_space<vmem>>, vector<2x32x32xf32>
    %846 = arith.subf %464, %845 : vector<2x32x32xf32>
    %847 = arith.addf %423, %845 : vector<2x32x32xf32>
    %848 = vector.shape_cast %846 : vector<2x32x32xf32> to vector<64x32xf32>
    %849 = arith.truncf %848 : vector<64x32xf32> to vector<64x32xbf16>
    %c0_356 = arith.constant 0 : index
    %c0_357 = arith.constant 0 : index
    %850 = vector.load %arg11[%c0_356, %c0_357] : memref<32x128xbf16, #tpu.memory_space<vmem>>, vector<32x128xbf16>
    %cst_358 = arith.constant dense<0.000000e+00> : vector<64x128xf32>
    %851 = tpu.matmul %849, %850, %cst_358 {dimension_numbers = #tpu.dot_dimension_numbers<[1], [0], [0], [1], [0, 0, 1, 1], [], []>} : vector<64x32xbf16>, vector<32x128xbf16>, vector<64x128xf32> -> vector<64x128xf32>
    %cst_359 = arith.constant 0.000000e+00 : f32
    %852 = vector.broadcast %cst_359 : f32 to vector<64x128xf32>
    %853 = arith.maximumf %851, %852 : vector<64x128xf32>
    %854 = arith.truncf %853 : vector<64x128xf32> to vector<64x128xbf16>
    %c0_360 = arith.constant 0 : index
    %c0_361 = arith.constant 0 : index
    %855 = vector.load %arg12[%c0_360, %c0_361] : memref<128x32xbf16, #tpu.memory_space<vmem>>, vector<128x32xbf16>
    %cst_362 = arith.constant dense<0.000000e+00> : vector<64x32xf32>
    %856 = tpu.matmul %854, %855, %cst_362 {dimension_numbers = #tpu.dot_dimension_numbers<[1], [0], [0], [1], [0, 0, 1, 1], [], []>} : vector<64x128xbf16>, vector<128x32xbf16>, vector<64x32xf32> -> vector<64x32xf32>
    %857 = vector.shape_cast %856 : vector<64x32xf32> to vector<2x32x32xf32>
    %858 = arith.addf %846, %857 : vector<2x32x32xf32>
    %859 = vector.extract_strided_slice %858 {offsets = [0, 0, 0], sizes = [1, 32, 32], strides = [1, 1, 1]} : vector<2x32x32xf32> to vector<1x32x32xf32>
    %860 = vector.shape_cast %859 : vector<1x32x32xf32> to vector<32x32xf32>
    %cst_363 = arith.constant dense<0.000000e+00> : vector<32xf32>
    %861 = vector.multi_reduction <add>, %860, %cst_363 [0] : vector<32x32xf32> to vector<32xf32>
    %862 = vector.shape_cast %861 : vector<32xf32> to vector<1x32xf32>
    %cst_364 = arith.constant 3.200000e+01 : f32
    %863 = vector.broadcast %cst_364 : f32 to vector<1x32xf32>
    %864 = arith.divf %862, %863 : vector<1x32xf32>
    %c2_365 = arith.constant 2 : index
    %c0_366 = arith.constant 0 : index
    %c0_367 = arith.constant 0 : index
    %865 = vector.load %arg14[%c2_365, %c0_366, %c0_367] : memref<3x32x16xf32, #tpu.memory_space<vmem>>, vector<1x32x16xf32>
    %866 = vector.shape_cast %865 : vector<1x32x16xf32> to vector<32x16xf32>
    %cst_368 = arith.constant dense<0.000000e+00> : vector<1x16xf32>
    %867 = tpu.matmul %864, %866, %cst_368 {dimension_numbers = #tpu.dot_dimension_numbers<[1], [0], [0], [1], [0, 0, 1, 1], [], []>} : vector<1x32xf32>, vector<32x16xf32>, vector<1x16xf32> -> vector<1x16xf32>
    %c2_369 = arith.constant 2 : index
    %c0_370 = arith.constant 0 : index
    %c0_371 = arith.constant 0 : index
    %868 = vector.load %arg15[%c2_369, %c0_370, %c0_371] : memref<3x1x16xf32, #tpu.memory_space<vmem>>, vector<1x1x16xf32>
    %869 = vector.shape_cast %868 : vector<1x1x16xf32> to vector<1x16xf32>
    %870 = arith.addf %867, %869 : vector<1x16xf32>
    %cst_372 = arith.constant 0.000000e+00 : f32
    %871 = vector.broadcast %cst_372 : f32 to vector<1x16xf32>
    %872 = arith.maximumf %870, %871 : vector<1x16xf32>
    %c2_373 = arith.constant 2 : index
    %c0_374 = arith.constant 0 : index
    %c0_375 = arith.constant 0 : index
    %873 = vector.load %arg16[%c2_373, %c0_374, %c0_375] : memref<3x1x16xf32, #tpu.memory_space<vmem>>, vector<1x1x16xf32>
    %874 = vector.shape_cast %873 : vector<1x1x16xf32> to vector<1x16xf32>
    %875 = arith.mulf %872, %874 : vector<1x16xf32>
    %cst_376 = arith.constant dense<0.000000e+00> : vector<1xf32>
    %876 = vector.multi_reduction <add>, %875, %cst_376 [1] : vector<1x16xf32> to vector<1xf32>
    %877 = vector.shape_cast %876 : vector<1xf32> to vector<1x1xf32>
    %c2_377 = arith.constant 2 : index
    %878 = memref.load %arg17[%c2_377] : memref<3xf32, #tpu.memory_space<smem>>
    %879 = vector.broadcast %878 : f32 to vector<1x1xf32>
    %880 = arith.addf %877, %879 : vector<1x1xf32>
    %cst_378 = arith.constant 0.000000e+00 : f32
    %881 = vector.broadcast %cst_378 : f32 to vector<1x1xf32>
    %882 = arith.subf %881, %880 : vector<1x1xf32>
    %883 = math.exp %882 : vector<1x1xf32>
    %cst_379 = arith.constant 1.000000e+00 : f32
    %884 = vector.broadcast %cst_379 : f32 to vector<1x1xf32>
    %885 = arith.addf %884, %883 : vector<1x1xf32>
    %cst_380 = arith.constant 1.000000e+00 : f32
    %886 = vector.broadcast %cst_380 : f32 to vector<1x1xf32>
    %887 = arith.divf %886, %885 : vector<1x1xf32>
    %cst_381 = arith.constant 4.500000e+01 : f32
    %888 = vector.broadcast %cst_381 : f32 to vector<1x1xf32>
    %889 = arith.mulf %887, %888 : vector<1x1xf32>
    %cst_382 = arith.constant 5.000000e+00 : f32
    %890 = vector.broadcast %cst_382 : f32 to vector<1x1xf32>
    %891 = arith.addf %889, %890 : vector<1x1xf32>
    %cst_383 = arith.constant 5.000000e-01 : f32
    %892 = vector.broadcast %cst_383 : f32 to vector<1x1xf32>
    %893 = arith.addf %891, %892 : vector<1x1xf32>
    %894 = arith.fptosi %893 : vector<1x1xf32> to vector<1x1xi32>
    %895 = arith.fptosi %891 : vector<1x1xf32> to vector<1x1xi32>
    %896 = arith.sitofp %895 : vector<1x1xi32> to vector<1x1xf32>
    %897 = arith.subf %891, %896 : vector<1x1xf32>
    %898 = arith.sitofp %894 : vector<1x1xi32> to vector<1x1xf32>
    %cst_384 = arith.constant 5.000000e-01 : f32
    %899 = vector.broadcast %cst_384 : f32 to vector<1x1xf32>
    %900 = arith.mulf %898, %899 : vector<1x1xf32>
    %901 = arith.fptosi %900 : vector<1x1xf32> to vector<1x1xi32>
    %c2_i32_385 = arith.constant 2 : i32
    %902 = vector.broadcast %c2_i32_385 : i32 to vector<1x1xi32>
    %903 = arith.muli %902, %901 : vector<1x1xi32>
    %904 = arith.subi %894, %903 : vector<1x1xi32>
    %c1_i32_386 = arith.constant 1 : i32
    %905 = vector.broadcast %c1_i32_386 : i32 to vector<1x1xi32>
    %906 = arith.cmpi eq, %904, %905 : vector<1x1xi32>
    %cst_387 = arith.constant 5.000000e-01 : f32
    %907 = vector.broadcast %cst_387 : f32 to vector<1x1xf32>
    %908 = arith.cmpf oeq, %897, %907 : vector<1x1xf32>
    %909 = arith.andi %908, %906 : vector<1x1xi1>
    %c1_i32_388 = arith.constant 1 : i32
    %c0_i32_389 = arith.constant 0 : i32
    %910 = vector.broadcast %c1_i32_388 : i32 to vector<1x1xi32>
    %911 = vector.broadcast %c0_i32_389 : i32 to vector<1x1xi32>
    %912 = arith.select %909, %910, %911 : vector<1x1xi1>, vector<1x1xi32>
    %913 = arith.subi %894, %912 : vector<1x1xi32>
    %c3_i32_390 = arith.constant 3 : i32
    %c16_i32_391 = arith.constant 16 : i32
    %914 = vector.broadcast %c3_i32_390 : i32 to vector<1x1xi32>
    %915 = arith.maxsi %914, %913 : vector<1x1xi32>
    %916 = vector.broadcast %c16_i32_391 : i32 to vector<1x1xi32>
    %917 = arith.minsi %916, %915 : vector<1x1xi32>
    %918 = arith.sitofp %917 : vector<1x1xi32> to vector<1x1xf32>
    %cst_392 = arith.constant 5.000000e-01 : f32
    %919 = vector.broadcast %cst_392 : f32 to vector<1x1xf32>
    %920 = arith.mulf %918, %919 : vector<1x1xf32>
    %921 = arith.fptosi %920 : vector<1x1xf32> to vector<1x1xi32>
    %c2_i32_393 = arith.constant 2 : i32
    %922 = vector.broadcast %c2_i32_393 : i32 to vector<1x1xi32>
    %923 = arith.muli %922, %921 : vector<1x1xi32>
    %924 = arith.cmpi eq, %917, %923 : vector<1x1xi32>
    %c1_i32_394 = arith.constant 1 : i32
    %c0_i32_395 = arith.constant 0 : i32
    %925 = vector.broadcast %c1_i32_394 : i32 to vector<1x1xi32>
    %926 = vector.broadcast %c0_i32_395 : i32 to vector<1x1xi32>
    %927 = arith.select %924, %925, %926 : vector<1x1xi1>, vector<1x1xi32>
    %928 = arith.subi %917, %927 : vector<1x1xi32>
    %c3_i32_396 = arith.constant 3 : i32
    %929 = vector.broadcast %c3_i32_396 : i32 to vector<1x1xi32>
    %930 = arith.maxsi %928, %929 : vector<1x1xi32>
    %931 = arith.sitofp %930 : vector<1x1xi32> to vector<1x1xf32>
    %cst_397 = arith.constant 5.000000e-01 : f32
    %932 = vector.broadcast %cst_397 : f32 to vector<1x1xf32>
    %933 = arith.mulf %931, %932 : vector<1x1xf32>
    %934 = arith.fptosi %933 : vector<1x1xf32> to vector<1x1xi32>
    %c2_398 = arith.constant 2 : index
    %c0_399 = arith.constant 0 : index
    %c0_400 = arith.constant 0 : index
    %935 = vector.load %arg13[%c2_398, %c0_399, %c0_400] : memref<3x16x32xf32, #tpu.memory_space<vmem>>, vector<1x16x32xf32>
    %936 = vector.shape_cast %935 : vector<1x16x32xf32> to vector<16x32xf32>
    %937 = tpu.iota {dimensions = array<i32: 0>} : vector<16x32xi32>
    %938 = vector.broadcast %930 : vector<1x1xi32> to vector<16x32xi32>
    %939 = arith.cmpi slt, %937, %938 : vector<16x32xi32>
    %cst_401 = arith.constant 0xFF800000 : f32
    %940 = vector.broadcast %cst_401 : f32 to vector<16x32xf32>
    %941 = arith.select %939, %936, %940 : vector<16x32xi1>, vector<16x32xf32>
    %cst_402 = arith.constant dense<0xFF800000> : vector<32xf32>
    %942 = vector.multi_reduction <maximumf>, %941, %cst_402 [0] : vector<16x32xf32> to vector<32xf32>
    %943 = vector.shape_cast %942 : vector<32xf32> to vector<1x32xf32>
    %944 = vector.broadcast %943 : vector<1x32xf32> to vector<16x32xf32>
    %945 = arith.subf %936, %944 : vector<16x32xf32>
    %946 = math.exp %945 : vector<16x32xf32>
    %cst_403 = arith.constant 0.000000e+00 : f32
    %947 = vector.broadcast %cst_403 : f32 to vector<16x32xf32>
    %948 = arith.select %939, %946, %947 : vector<16x32xi1>, vector<16x32xf32>
    %cst_404 = arith.constant dense<0.000000e+00> : vector<32xf32>
    %949 = vector.multi_reduction <add>, %948, %cst_404 [0] : vector<16x32xf32> to vector<32xf32>
    %950 = vector.shape_cast %949 : vector<32xf32> to vector<1x32xf32>
    %951 = vector.broadcast %950 : vector<1x32xf32> to vector<16x32xf32>
    %952 = arith.divf %948, %951 : vector<16x32xf32>
    %953 = tpu.iota {dimensions = array<i32: 0>} : vector<16x16xi32>
    %954 = tpu.iota {dimensions = array<i32: 1>} : vector<16x16xi32>
    %955 = arith.subi %954, %953 : vector<16x16xi32>
    %c7_i32_405 = arith.constant 7 : i32
    %956 = vector.broadcast %c7_i32_405 : i32 to vector<1x1xi32>
    %957 = arith.subi %934, %956 : vector<1x1xi32>
    %958 = vector.broadcast %957 : vector<1x1xi32> to vector<16x16xi32>
    %959 = arith.cmpi eq, %955, %958 : vector<16x16xi32>
    %960 = arith.extui %959 : vector<16x16xi1> to vector<16x16xi32>
    %961 = arith.sitofp %960 : vector<16x16xi32> to vector<16x16xf32>
    %cst_406 = arith.constant dense<0.000000e+00> : vector<16x32xf32>
    %962 = tpu.matmul %961, %952, %cst_406 {dimension_numbers = #tpu.dot_dimension_numbers<[1], [0], [0], [1], [0, 0, 1, 1], [], []>} : vector<16x16xf32>, vector<16x32xf32>, vector<16x32xf32> -> vector<16x32xf32>
    %963 = vector.extract_strided_slice %860 {offsets = [0, 0], sizes = [1, 32], strides = [1, 1]} : vector<32x32xf32> to vector<1x32xf32>
    %964 = vector.shape_cast %963 : vector<1x32xf32> to vector<1x32xf32>
    %965 = vector.broadcast %964 : vector<1x32xf32> to vector<8x32xf32>
    %c0_407 = arith.constant 0 : index
    %c0_408 = arith.constant 0 : index
    %966 = vector.load %arg21[%c0_407, %c0_408] : memref<48x32xf32, #tpu.memory_space<vmem>>, vector<8x32xf32>
    tpu.vector_store %arg21[%c0_407, %c0_408], %965 {strides = array<i32>} : memref<48x32xf32, #tpu.memory_space<vmem>>, vector<8x32xf32>,
    %c8_409 = arith.constant 8 : index
    %c0_410 = arith.constant 0 : index
    %967 = vector.load %arg21[%c8_409, %c0_410] : memref<48x32xf32, #tpu.memory_space<vmem>>, vector<32x32xf32>
    tpu.vector_store %arg21[%c8_409, %c0_410], %860 {strides = array<i32>} : memref<48x32xf32, #tpu.memory_space<vmem>>, vector<32x32xf32>,
    %968 = vector.extract_strided_slice %860 {offsets = [31, 0], sizes = [1, 32], strides = [1, 1]} : vector<32x32xf32> to vector<1x32xf32>
    %969 = vector.shape_cast %968 : vector<1x32xf32> to vector<1x32xf32>
    %970 = vector.broadcast %969 : vector<1x32xf32> to vector<8x32xf32>
    %c40_411 = arith.constant 40 : index
    %c0_412 = arith.constant 0 : index
    %971 = vector.load %arg21[%c40_411, %c0_412] : memref<48x32xf32, #tpu.memory_space<vmem>>, vector<8x32xf32>
    tpu.vector_store %arg21[%c40_411, %c0_412], %970 {strides = array<i32>} : memref<48x32xf32, #tpu.memory_space<vmem>>, vector<8x32xf32>,
    %c1_413 = arith.constant 1 : index
    %c0_414 = arith.constant 0 : index
    %972 = vector.load %arg21[%c1_413, %c0_414] : memref<48x32xf32, #tpu.memory_space<vmem>>, vector<32x32xf32>
    %973 = vector.extract_strided_slice %962 {offsets = [0, 0], sizes = [1, 32], strides = [1, 1]} : vector<16x32xf32> to vector<1x32xf32>
    %974 = vector.broadcast %973 : vector<1x32xf32> to vector<32x32xf32>
    %975 = arith.mulf %974, %972 : vector<32x32xf32>
    %c2_415 = arith.constant 2 : index
    %c0_416 = arith.constant 0 : index
    %976 = vector.load %arg21[%c2_415, %c0_416] : memref<48x32xf32, #tpu.memory_space<vmem>>, vector<32x32xf32>
    %977 = vector.extract_strided_slice %962 {offsets = [1, 0], sizes = [1, 32], strides = [1, 1]} : vector<16x32xf32> to vector<1x32xf32>
    %978 = vector.broadcast %977 : vector<1x32xf32> to vector<32x32xf32>
    %979 = arith.mulf %978, %976 : vector<32x32xf32>
    %c3_417 = arith.constant 3 : index
    %c0_418 = arith.constant 0 : index
    %980 = vector.load %arg21[%c3_417, %c0_418] : memref<48x32xf32, #tpu.memory_space<vmem>>, vector<32x32xf32>
    %981 = vector.extract_strided_slice %962 {offsets = [2, 0], sizes = [1, 32], strides = [1, 1]} : vector<16x32xf32> to vector<1x32xf32>
    %982 = vector.broadcast %981 : vector<1x32xf32> to vector<32x32xf32>
    %983 = arith.mulf %982, %980 : vector<32x32xf32>
    %c4_419 = arith.constant 4 : index
    %c0_420 = arith.constant 0 : index
    %984 = vector.load %arg21[%c4_419, %c0_420] : memref<48x32xf32, #tpu.memory_space<vmem>>, vector<32x32xf32>
    %985 = vector.extract_strided_slice %962 {offsets = [3, 0], sizes = [1, 32], strides = [1, 1]} : vector<16x32xf32> to vector<1x32xf32>
    %986 = vector.broadcast %985 : vector<1x32xf32> to vector<32x32xf32>
    %987 = arith.mulf %986, %984 : vector<32x32xf32>
    %c5_421 = arith.constant 5 : index
    %c0_422 = arith.constant 0 : index
    %988 = vector.load %arg21[%c5_421, %c0_422] : memref<48x32xf32, #tpu.memory_space<vmem>>, vector<32x32xf32>
    %989 = vector.extract_strided_slice %962 {offsets = [4, 0], sizes = [1, 32], strides = [1, 1]} : vector<16x32xf32> to vector<1x32xf32>
    %990 = vector.broadcast %989 : vector<1x32xf32> to vector<32x32xf32>
    %991 = arith.mulf %990, %988 : vector<32x32xf32>
    %992 = arith.addf %975, %991 : vector<32x32xf32>
    %c6_423 = arith.constant 6 : index
    %c0_424 = arith.constant 0 : index
    %993 = vector.load %arg21[%c6_423, %c0_424] : memref<48x32xf32, #tpu.memory_space<vmem>>, vector<32x32xf32>
    %994 = vector.extract_strided_slice %962 {offsets = [5, 0], sizes = [1, 32], strides = [1, 1]} : vector<16x32xf32> to vector<1x32xf32>
    %995 = vector.broadcast %994 : vector<1x32xf32> to vector<32x32xf32>
    %996 = arith.mulf %995, %993 : vector<32x32xf32>
    %997 = arith.addf %979, %996 : vector<32x32xf32>
    %c7_425 = arith.constant 7 : index
    %c0_426 = arith.constant 0 : index
    %998 = vector.load %arg21[%c7_425, %c0_426] : memref<48x32xf32, #tpu.memory_space<vmem>>, vector<32x32xf32>
    %999 = vector.extract_strided_slice %962 {offsets = [6, 0], sizes = [1, 32], strides = [1, 1]} : vector<16x32xf32> to vector<1x32xf32>
    %1000 = vector.broadcast %999 : vector<1x32xf32> to vector<32x32xf32>
    %1001 = arith.mulf %1000, %998 : vector<32x32xf32>
    %1002 = arith.addf %983, %1001 : vector<32x32xf32>
    %c8_427 = arith.constant 8 : index
    %c0_428 = arith.constant 0 : index
    %1003 = vector.load %arg21[%c8_427, %c0_428] : memref<48x32xf32, #tpu.memory_space<vmem>>, vector<32x32xf32>
    %1004 = vector.extract_strided_slice %962 {offsets = [7, 0], sizes = [1, 32], strides = [1, 1]} : vector<16x32xf32> to vector<1x32xf32>
    %1005 = vector.broadcast %1004 : vector<1x32xf32> to vector<32x32xf32>
    %1006 = arith.mulf %1005, %1003 : vector<32x32xf32>
    %1007 = arith.addf %987, %1006 : vector<32x32xf32>
    %c9_429 = arith.constant 9 : index
    %c0_430 = arith.constant 0 : index
    %1008 = vector.load %arg21[%c9_429, %c0_430] : memref<48x32xf32, #tpu.memory_space<vmem>>, vector<32x32xf32>
    %1009 = vector.extract_strided_slice %962 {offsets = [8, 0], sizes = [1, 32], strides = [1, 1]} : vector<16x32xf32> to vector<1x32xf32>
    %1010 = vector.broadcast %1009 : vector<1x32xf32> to vector<32x32xf32>
    %1011 = arith.mulf %1010, %1008 : vector<32x32xf32>
    %1012 = arith.addf %992, %1011 : vector<32x32xf32>
    %c10_431 = arith.constant 10 : index
    %c0_432 = arith.constant 0 : index
    %1013 = vector.load %arg21[%c10_431, %c0_432] : memref<48x32xf32, #tpu.memory_space<vmem>>, vector<32x32xf32>
    %1014 = vector.extract_strided_slice %962 {offsets = [9, 0], sizes = [1, 32], strides = [1, 1]} : vector<16x32xf32> to vector<1x32xf32>
    %1015 = vector.broadcast %1014 : vector<1x32xf32> to vector<32x32xf32>
    %1016 = arith.mulf %1015, %1013 : vector<32x32xf32>
    %1017 = arith.addf %997, %1016 : vector<32x32xf32>
    %c11_433 = arith.constant 11 : index
    %c0_434 = arith.constant 0 : index
    %1018 = vector.load %arg21[%c11_433, %c0_434] : memref<48x32xf32, #tpu.memory_space<vmem>>, vector<32x32xf32>
    %1019 = vector.extract_strided_slice %962 {offsets = [10, 0], sizes = [1, 32], strides = [1, 1]} : vector<16x32xf32> to vector<1x32xf32>
    %1020 = vector.broadcast %1019 : vector<1x32xf32> to vector<32x32xf32>
    %1021 = arith.mulf %1020, %1018 : vector<32x32xf32>
    %1022 = arith.addf %1002, %1021 : vector<32x32xf32>
    %c12_435 = arith.constant 12 : index
    %c0_436 = arith.constant 0 : index
    %1023 = vector.load %arg21[%c12_435, %c0_436] : memref<48x32xf32, #tpu.memory_space<vmem>>, vector<32x32xf32>
    %1024 = vector.extract_strided_slice %962 {offsets = [11, 0], sizes = [1, 32], strides = [1, 1]} : vector<16x32xf32> to vector<1x32xf32>
    %1025 = vector.broadcast %1024 : vector<1x32xf32> to vector<32x32xf32>
    %1026 = arith.mulf %1025, %1023 : vector<32x32xf32>
    %1027 = arith.addf %1007, %1026 : vector<32x32xf32>
    %c13_437 = arith.constant 13 : index
    %c0_438 = arith.constant 0 : index
    %1028 = vector.load %arg21[%c13_437, %c0_438] : memref<48x32xf32, #tpu.memory_space<vmem>>, vector<32x32xf32>
    %1029 = vector.extract_strided_slice %962 {offsets = [12, 0], sizes = [1, 32], strides = [1, 1]} : vector<16x32xf32> to vector<1x32xf32>
    %1030 = vector.broadcast %1029 : vector<1x32xf32> to vector<32x32xf32>
    %1031 = arith.mulf %1030, %1028 : vector<32x32xf32>
    %1032 = arith.addf %1012, %1031 : vector<32x32xf32>
    %c14_439 = arith.constant 14 : index
    %c0_440 = arith.constant 0 : index
    %1033 = vector.load %arg21[%c14_439, %c0_440] : memref<48x32xf32, #tpu.memory_space<vmem>>, vector<32x32xf32>
    %1034 = vector.extract_strided_slice %962 {offsets = [13, 0], sizes = [1, 32], strides = [1, 1]} : vector<16x32xf32> to vector<1x32xf32>
    %1035 = vector.broadcast %1034 : vector<1x32xf32> to vector<32x32xf32>
    %1036 = arith.mulf %1035, %1033 : vector<32x32xf32>
    %1037 = arith.addf %1017, %1036 : vector<32x32xf32>
    %c15_441 = arith.constant 15 : index
    %c0_442 = arith.constant 0 : index
    %1038 = vector.load %arg21[%c15_441, %c0_442] : memref<48x32xf32, #tpu.memory_space<vmem>>, vector<32x32xf32>
    %1039 = vector.extract_strided_slice %962 {offsets = [14, 0], sizes = [1, 32], strides = [1, 1]} : vector<16x32xf32> to vector<1x32xf32>
    %1040 = vector.broadcast %1039 : vector<1x32xf32> to vector<32x32xf32>
    %1041 = arith.mulf %1040, %1038 : vector<32x32xf32>
    %1042 = arith.addf %1022, %1041 : vector<32x32xf32>
    %1043 = arith.addf %1032, %1037 : vector<32x32xf32>
    %1044 = arith.addf %1042, %1027 : vector<32x32xf32>
    %1045 = arith.addf %1043, %1044 : vector<32x32xf32>
    %c0_443 = arith.constant 0 : index
    %c0_444 = arith.constant 0 : index
    %c0_445 = arith.constant 0 : index
    %1046 = vector.load %arg22[%c0_443, %c0_444, %c0_445] : memref<2x32x32xf32, #tpu.memory_space<vmem>>, vector<1x32x32xf32>
    %1047 = vector.shape_cast %1046 : vector<1x32x32xf32> to vector<32x32xf32>
    %1048 = vector.shape_cast %1045 : vector<32x32xf32> to vector<1x32x32xf32>
    tpu.vector_store %arg22[%c0_443, %c0_444, %c0_445], %1048 {strides = array<i32>} : memref<2x32x32xf32, #tpu.memory_space<vmem>>, vector<1x32x32xf32>,
    %1049 = vector.extract_strided_slice %858 {offsets = [1, 0, 0], sizes = [1, 32, 32], strides = [1, 1, 1]} : vector<2x32x32xf32> to vector<1x32x32xf32>
    %1050 = vector.shape_cast %1049 : vector<1x32x32xf32> to vector<32x32xf32>
    %cst_446 = arith.constant dense<0.000000e+00> : vector<32xf32>
    %1051 = vector.multi_reduction <add>, %1050, %cst_446 [0] : vector<32x32xf32> to vector<32xf32>
    %1052 = vector.shape_cast %1051 : vector<32xf32> to vector<1x32xf32>
    %cst_447 = arith.constant 3.200000e+01 : f32
    %1053 = vector.broadcast %cst_447 : f32 to vector<1x32xf32>
    %1054 = arith.divf %1052, %1053 : vector<1x32xf32>
    %c2_448 = arith.constant 2 : index
    %c0_449 = arith.constant 0 : index
    %c0_450 = arith.constant 0 : index
    %1055 = vector.load %arg14[%c2_448, %c0_449, %c0_450] : memref<3x32x16xf32, #tpu.memory_space<vmem>>, vector<1x32x16xf32>
    %1056 = vector.shape_cast %1055 : vector<1x32x16xf32> to vector<32x16xf32>
    %cst_451 = arith.constant dense<0.000000e+00> : vector<1x16xf32>
    %1057 = tpu.matmul %1054, %1056, %cst_451 {dimension_numbers = #tpu.dot_dimension_numbers<[1], [0], [0], [1], [0, 0, 1, 1], [], []>} : vector<1x32xf32>, vector<32x16xf32>, vector<1x16xf32> -> vector<1x16xf32>
    %c2_452 = arith.constant 2 : index
    %c0_453 = arith.constant 0 : index
    %c0_454 = arith.constant 0 : index
    %1058 = vector.load %arg15[%c2_452, %c0_453, %c0_454] : memref<3x1x16xf32, #tpu.memory_space<vmem>>, vector<1x1x16xf32>
    %1059 = vector.shape_cast %1058 : vector<1x1x16xf32> to vector<1x16xf32>
    %1060 = arith.addf %1057, %1059 : vector<1x16xf32>
    %cst_455 = arith.constant 0.000000e+00 : f32
    %1061 = vector.broadcast %cst_455 : f32 to vector<1x16xf32>
    %1062 = arith.maximumf %1060, %1061 : vector<1x16xf32>
    %c2_456 = arith.constant 2 : index
    %c0_457 = arith.constant 0 : index
    %c0_458 = arith.constant 0 : index
    %1063 = vector.load %arg16[%c2_456, %c0_457, %c0_458] : memref<3x1x16xf32, #tpu.memory_space<vmem>>, vector<1x1x16xf32>
    %1064 = vector.shape_cast %1063 : vector<1x1x16xf32> to vector<1x16xf32>
    %1065 = arith.mulf %1062, %1064 : vector<1x16xf32>
    %cst_459 = arith.constant dense<0.000000e+00> : vector<1xf32>
    %1066 = vector.multi_reduction <add>, %1065, %cst_459 [1] : vector<1x16xf32> to vector<1xf32>
    %1067 = vector.shape_cast %1066 : vector<1xf32> to vector<1x1xf32>
    %c2_460 = arith.constant 2 : index
    %1068 = memref.load %arg17[%c2_460] : memref<3xf32, #tpu.memory_space<smem>>
    %1069 = vector.broadcast %1068 : f32 to vector<1x1xf32>
    %1070 = arith.addf %1067, %1069 : vector<1x1xf32>
    %cst_461 = arith.constant 0.000000e+00 : f32
    %1071 = vector.broadcast %cst_461 : f32 to vector<1x1xf32>
    %1072 = arith.subf %1071, %1070 : vector<1x1xf32>
    %1073 = math.exp %1072 : vector<1x1xf32>
    %cst_462 = arith.constant 1.000000e+00 : f32
    %1074 = vector.broadcast %cst_462 : f32 to vector<1x1xf32>
    %1075 = arith.addf %1074, %1073 : vector<1x1xf32>
    %cst_463 = arith.constant 1.000000e+00 : f32
    %1076 = vector.broadcast %cst_463 : f32 to vector<1x1xf32>
    %1077 = arith.divf %1076, %1075 : vector<1x1xf32>
    %cst_464 = arith.constant 4.500000e+01 : f32
    %1078 = vector.broadcast %cst_464 : f32 to vector<1x1xf32>
    %1079 = arith.mulf %1077, %1078 : vector<1x1xf32>
    %cst_465 = arith.constant 5.000000e+00 : f32
    %1080 = vector.broadcast %cst_465 : f32 to vector<1x1xf32>
    %1081 = arith.addf %1079, %1080 : vector<1x1xf32>
    %cst_466 = arith.constant 5.000000e-01 : f32
    %1082 = vector.broadcast %cst_466 : f32 to vector<1x1xf32>
    %1083 = arith.addf %1081, %1082 : vector<1x1xf32>
    %1084 = arith.fptosi %1083 : vector<1x1xf32> to vector<1x1xi32>
    %1085 = arith.fptosi %1081 : vector<1x1xf32> to vector<1x1xi32>
    %1086 = arith.sitofp %1085 : vector<1x1xi32> to vector<1x1xf32>
    %1087 = arith.subf %1081, %1086 : vector<1x1xf32>
    %1088 = arith.sitofp %1084 : vector<1x1xi32> to vector<1x1xf32>
    %cst_467 = arith.constant 5.000000e-01 : f32
    %1089 = vector.broadcast %cst_467 : f32 to vector<1x1xf32>
    %1090 = arith.mulf %1088, %1089 : vector<1x1xf32>
    %1091 = arith.fptosi %1090 : vector<1x1xf32> to vector<1x1xi32>
    %c2_i32_468 = arith.constant 2 : i32
    %1092 = vector.broadcast %c2_i32_468 : i32 to vector<1x1xi32>
    %1093 = arith.muli %1092, %1091 : vector<1x1xi32>
    %1094 = arith.subi %1084, %1093 : vector<1x1xi32>
    %c1_i32_469 = arith.constant 1 : i32
    %1095 = vector.broadcast %c1_i32_469 : i32 to vector<1x1xi32>
    %1096 = arith.cmpi eq, %1094, %1095 : vector<1x1xi32>
    %cst_470 = arith.constant 5.000000e-01 : f32
    %1097 = vector.broadcast %cst_470 : f32 to vector<1x1xf32>
    %1098 = arith.cmpf oeq, %1087, %1097 : vector<1x1xf32>
    %1099 = arith.andi %1098, %1096 : vector<1x1xi1>
    %c1_i32_471 = arith.constant 1 : i32
    %c0_i32_472 = arith.constant 0 : i32
    %1100 = vector.broadcast %c1_i32_471 : i32 to vector<1x1xi32>
    %1101 = vector.broadcast %c0_i32_472 : i32 to vector<1x1xi32>
    %1102 = arith.select %1099, %1100, %1101 : vector<1x1xi1>, vector<1x1xi32>
    %1103 = arith.subi %1084, %1102 : vector<1x1xi32>
    %c3_i32_473 = arith.constant 3 : i32
    %c16_i32_474 = arith.constant 16 : i32
    %1104 = vector.broadcast %c3_i32_473 : i32 to vector<1x1xi32>
    %1105 = arith.maxsi %1104, %1103 : vector<1x1xi32>
    %1106 = vector.broadcast %c16_i32_474 : i32 to vector<1x1xi32>
    %1107 = arith.minsi %1106, %1105 : vector<1x1xi32>
    %1108 = arith.sitofp %1107 : vector<1x1xi32> to vector<1x1xf32>
    %cst_475 = arith.constant 5.000000e-01 : f32
    %1109 = vector.broadcast %cst_475 : f32 to vector<1x1xf32>
    %1110 = arith.mulf %1108, %1109 : vector<1x1xf32>
    %1111 = arith.fptosi %1110 : vector<1x1xf32> to vector<1x1xi32>
    %c2_i32_476 = arith.constant 2 : i32
    %1112 = vector.broadcast %c2_i32_476 : i32 to vector<1x1xi32>
    %1113 = arith.muli %1112, %1111 : vector<1x1xi32>
    %1114 = arith.cmpi eq, %1107, %1113 : vector<1x1xi32>
    %c1_i32_477 = arith.constant 1 : i32
    %c0_i32_478 = arith.constant 0 : i32
    %1115 = vector.broadcast %c1_i32_477 : i32 to vector<1x1xi32>
    %1116 = vector.broadcast %c0_i32_478 : i32 to vector<1x1xi32>
    %1117 = arith.select %1114, %1115, %1116 : vector<1x1xi1>, vector<1x1xi32>
    %1118 = arith.subi %1107, %1117 : vector<1x1xi32>
    %c3_i32_479 = arith.constant 3 : i32
    %1119 = vector.broadcast %c3_i32_479 : i32 to vector<1x1xi32>
    %1120 = arith.maxsi %1118, %1119 : vector<1x1xi32>
    %1121 = arith.sitofp %1120 : vector<1x1xi32> to vector<1x1xf32>
    %cst_480 = arith.constant 5.000000e-01 : f32
    %1122 = vector.broadcast %cst_480 : f32 to vector<1x1xf32>
    %1123 = arith.mulf %1121, %1122 : vector<1x1xf32>
    %1124 = arith.fptosi %1123 : vector<1x1xf32> to vector<1x1xi32>
    %c2_481 = arith.constant 2 : index
    %c0_482 = arith.constant 0 : index
    %c0_483 = arith.constant 0 : index
    %1125 = vector.load %arg13[%c2_481, %c0_482, %c0_483] : memref<3x16x32xf32, #tpu.memory_space<vmem>>, vector<1x16x32xf32>
    %1126 = vector.shape_cast %1125 : vector<1x16x32xf32> to vector<16x32xf32>
    %1127 = tpu.iota {dimensions = array<i32: 0>} : vector<16x32xi32>
    %1128 = vector.broadcast %1120 : vector<1x1xi32> to vector<16x32xi32>
    %1129 = arith.cmpi slt, %1127, %1128 : vector<16x32xi32>
    %cst_484 = arith.constant 0xFF800000 : f32
    %1130 = vector.broadcast %cst_484 : f32 to vector<16x32xf32>
    %1131 = arith.select %1129, %1126, %1130 : vector<16x32xi1>, vector<16x32xf32>
    %cst_485 = arith.constant dense<0xFF800000> : vector<32xf32>
    %1132 = vector.multi_reduction <maximumf>, %1131, %cst_485 [0] : vector<16x32xf32> to vector<32xf32>
    %1133 = vector.shape_cast %1132 : vector<32xf32> to vector<1x32xf32>
    %1134 = vector.broadcast %1133 : vector<1x32xf32> to vector<16x32xf32>
    %1135 = arith.subf %1126, %1134 : vector<16x32xf32>
    %1136 = math.exp %1135 : vector<16x32xf32>
    %cst_486 = arith.constant 0.000000e+00 : f32
    %1137 = vector.broadcast %cst_486 : f32 to vector<16x32xf32>
    %1138 = arith.select %1129, %1136, %1137 : vector<16x32xi1>, vector<16x32xf32>
    %cst_487 = arith.constant dense<0.000000e+00> : vector<32xf32>
    %1139 = vector.multi_reduction <add>, %1138, %cst_487 [0] : vector<16x32xf32> to vector<32xf32>
    %1140 = vector.shape_cast %1139 : vector<32xf32> to vector<1x32xf32>
    %1141 = vector.broadcast %1140 : vector<1x32xf32> to vector<16x32xf32>
    %1142 = arith.divf %1138, %1141 : vector<16x32xf32>
    %1143 = tpu.iota {dimensions = array<i32: 0>} : vector<16x16xi32>
    %1144 = tpu.iota {dimensions = array<i32: 1>} : vector<16x16xi32>
    %1145 = arith.subi %1144, %1143 : vector<16x16xi32>
    %c7_i32_488 = arith.constant 7 : i32
    %1146 = vector.broadcast %c7_i32_488 : i32 to vector<1x1xi32>
    %1147 = arith.subi %1124, %1146 : vector<1x1xi32>
    %1148 = vector.broadcast %1147 : vector<1x1xi32> to vector<16x16xi32>
    %1149 = arith.cmpi eq, %1145, %1148 : vector<16x16xi32>
    %1150 = arith.extui %1149 : vector<16x16xi1> to vector<16x16xi32>
    %1151 = arith.sitofp %1150 : vector<16x16xi32> to vector<16x16xf32>
    %cst_489 = arith.constant dense<0.000000e+00> : vector<16x32xf32>
    %1152 = tpu.matmul %1151, %1142, %cst_489 {dimension_numbers = #tpu.dot_dimension_numbers<[1], [0], [0], [1], [0, 0, 1, 1], [], []>} : vector<16x16xf32>, vector<16x32xf32>, vector<16x32xf32> -> vector<16x32xf32>
    %1153 = vector.extract_strided_slice %1050 {offsets = [0, 0], sizes = [1, 32], strides = [1, 1]} : vector<32x32xf32> to vector<1x32xf32>
    %1154 = vector.shape_cast %1153 : vector<1x32xf32> to vector<1x32xf32>
    %1155 = vector.broadcast %1154 : vector<1x32xf32> to vector<8x32xf32>
    %c0_490 = arith.constant 0 : index
    %c0_491 = arith.constant 0 : index
    %1156 = vector.load %arg21[%c0_490, %c0_491] : memref<48x32xf32, #tpu.memory_space<vmem>>, vector<8x32xf32>
    tpu.vector_store %arg21[%c0_490, %c0_491], %1155 {strides = array<i32>} : memref<48x32xf32, #tpu.memory_space<vmem>>, vector<8x32xf32>,
    %c8_492 = arith.constant 8 : index
    %c0_493 = arith.constant 0 : index
    %1157 = vector.load %arg21[%c8_492, %c0_493] : memref<48x32xf32, #tpu.memory_space<vmem>>, vector<32x32xf32>
    tpu.vector_store %arg21[%c8_492, %c0_493], %1050 {strides = array<i32>} : memref<48x32xf32, #tpu.memory_space<vmem>>, vector<32x32xf32>,
    %1158 = vector.extract_strided_slice %1050 {offsets = [31, 0], sizes = [1, 32], strides = [1, 1]} : vector<32x32xf32> to vector<1x32xf32>
    %1159 = vector.shape_cast %1158 : vector<1x32xf32> to vector<1x32xf32>
    %1160 = vector.broadcast %1159 : vector<1x32xf32> to vector<8x32xf32>
    %c40_494 = arith.constant 40 : index
    %c0_495 = arith.constant 0 : index
    %1161 = vector.load %arg21[%c40_494, %c0_495] : memref<48x32xf32, #tpu.memory_space<vmem>>, vector<8x32xf32>
    tpu.vector_store %arg21[%c40_494, %c0_495], %1160 {strides = array<i32>} : memref<48x32xf32, #tpu.memory_space<vmem>>, vector<8x32xf32>,
    %c1_496 = arith.constant 1 : index
    %c0_497 = arith.constant 0 : index
    %1162 = vector.load %arg21[%c1_496, %c0_497] : memref<48x32xf32, #tpu.memory_space<vmem>>, vector<32x32xf32>
    %1163 = vector.extract_strided_slice %1152 {offsets = [0, 0], sizes = [1, 32], strides = [1, 1]} : vector<16x32xf32> to vector<1x32xf32>
    %1164 = vector.broadcast %1163 : vector<1x32xf32> to vector<32x32xf32>
    %1165 = arith.mulf %1164, %1162 : vector<32x32xf32>
    %c2_498 = arith.constant 2 : index
    %c0_499 = arith.constant 0 : index
    %1166 = vector.load %arg21[%c2_498, %c0_499] : memref<48x32xf32, #tpu.memory_space<vmem>>, vector<32x32xf32>
    %1167 = vector.extract_strided_slice %1152 {offsets = [1, 0], sizes = [1, 32], strides = [1, 1]} : vector<16x32xf32> to vector<1x32xf32>
    %1168 = vector.broadcast %1167 : vector<1x32xf32> to vector<32x32xf32>
    %1169 = arith.mulf %1168, %1166 : vector<32x32xf32>
    %c3_500 = arith.constant 3 : index
    %c0_501 = arith.constant 0 : index
    %1170 = vector.load %arg21[%c3_500, %c0_501] : memref<48x32xf32, #tpu.memory_space<vmem>>, vector<32x32xf32>
    %1171 = vector.extract_strided_slice %1152 {offsets = [2, 0], sizes = [1, 32], strides = [1, 1]} : vector<16x32xf32> to vector<1x32xf32>
    %1172 = vector.broadcast %1171 : vector<1x32xf32> to vector<32x32xf32>
    %1173 = arith.mulf %1172, %1170 : vector<32x32xf32>
    %c4_502 = arith.constant 4 : index
    %c0_503 = arith.constant 0 : index
    %1174 = vector.load %arg21[%c4_502, %c0_503] : memref<48x32xf32, #tpu.memory_space<vmem>>, vector<32x32xf32>
    %1175 = vector.extract_strided_slice %1152 {offsets = [3, 0], sizes = [1, 32], strides = [1, 1]} : vector<16x32xf32> to vector<1x32xf32>
    %1176 = vector.broadcast %1175 : vector<1x32xf32> to vector<32x32xf32>
    %1177 = arith.mulf %1176, %1174 : vector<32x32xf32>
    %c5_504 = arith.constant 5 : index
    %c0_505 = arith.constant 0 : index
    %1178 = vector.load %arg21[%c5_504, %c0_505] : memref<48x32xf32, #tpu.memory_space<vmem>>, vector<32x32xf32>
    %1179 = vector.extract_strided_slice %1152 {offsets = [4, 0], sizes = [1, 32], strides = [1, 1]} : vector<16x32xf32> to vector<1x32xf32>
    %1180 = vector.broadcast %1179 : vector<1x32xf32> to vector<32x32xf32>
    %1181 = arith.mulf %1180, %1178 : vector<32x32xf32>
    %1182 = arith.addf %1165, %1181 : vector<32x32xf32>
    %c6_506 = arith.constant 6 : index
    %c0_507 = arith.constant 0 : index
    %1183 = vector.load %arg21[%c6_506, %c0_507] : memref<48x32xf32, #tpu.memory_space<vmem>>, vector<32x32xf32>
    %1184 = vector.extract_strided_slice %1152 {offsets = [5, 0], sizes = [1, 32], strides = [1, 1]} : vector<16x32xf32> to vector<1x32xf32>
    %1185 = vector.broadcast %1184 : vector<1x32xf32> to vector<32x32xf32>
    %1186 = arith.mulf %1185, %1183 : vector<32x32xf32>
    %1187 = arith.addf %1169, %1186 : vector<32x32xf32>
    %c7_508 = arith.constant 7 : index
    %c0_509 = arith.constant 0 : index
    %1188 = vector.load %arg21[%c7_508, %c0_509] : memref<48x32xf32, #tpu.memory_space<vmem>>, vector<32x32xf32>
    %1189 = vector.extract_strided_slice %1152 {offsets = [6, 0], sizes = [1, 32], strides = [1, 1]} : vector<16x32xf32> to vector<1x32xf32>
    %1190 = vector.broadcast %1189 : vector<1x32xf32> to vector<32x32xf32>
    %1191 = arith.mulf %1190, %1188 : vector<32x32xf32>
    %1192 = arith.addf %1173, %1191 : vector<32x32xf32>
    %c8_510 = arith.constant 8 : index
    %c0_511 = arith.constant 0 : index
    %1193 = vector.load %arg21[%c8_510, %c0_511] : memref<48x32xf32, #tpu.memory_space<vmem>>, vector<32x32xf32>
    %1194 = vector.extract_strided_slice %1152 {offsets = [7, 0], sizes = [1, 32], strides = [1, 1]} : vector<16x32xf32> to vector<1x32xf32>
    %1195 = vector.broadcast %1194 : vector<1x32xf32> to vector<32x32xf32>
    %1196 = arith.mulf %1195, %1193 : vector<32x32xf32>
    %1197 = arith.addf %1177, %1196 : vector<32x32xf32>
    %c9_512 = arith.constant 9 : index
    %c0_513 = arith.constant 0 : index
    %1198 = vector.load %arg21[%c9_512, %c0_513] : memref<48x32xf32, #tpu.memory_space<vmem>>, vector<32x32xf32>
    %1199 = vector.extract_strided_slice %1152 {offsets = [8, 0], sizes = [1, 32], strides = [1, 1]} : vector<16x32xf32> to vector<1x32xf32>
    %1200 = vector.broadcast %1199 : vector<1x32xf32> to vector<32x32xf32>
    %1201 = arith.mulf %1200, %1198 : vector<32x32xf32>
    %1202 = arith.addf %1182, %1201 : vector<32x32xf32>
    %c10_514 = arith.constant 10 : index
    %c0_515 = arith.constant 0 : index
    %1203 = vector.load %arg21[%c10_514, %c0_515] : memref<48x32xf32, #tpu.memory_space<vmem>>, vector<32x32xf32>
    %1204 = vector.extract_strided_slice %1152 {offsets = [9, 0], sizes = [1, 32], strides = [1, 1]} : vector<16x32xf32> to vector<1x32xf32>
    %1205 = vector.broadcast %1204 : vector<1x32xf32> to vector<32x32xf32>
    %1206 = arith.mulf %1205, %1203 : vector<32x32xf32>
    %1207 = arith.addf %1187, %1206 : vector<32x32xf32>
    %c11_516 = arith.constant 11 : index
    %c0_517 = arith.constant 0 : index
    %1208 = vector.load %arg21[%c11_516, %c0_517] : memref<48x32xf32, #tpu.memory_space<vmem>>, vector<32x32xf32>
    %1209 = vector.extract_strided_slice %1152 {offsets = [10, 0], sizes = [1, 32], strides = [1, 1]} : vector<16x32xf32> to vector<1x32xf32>
    %1210 = vector.broadcast %1209 : vector<1x32xf32> to vector<32x32xf32>
    %1211 = arith.mulf %1210, %1208 : vector<32x32xf32>
    %1212 = arith.addf %1192, %1211 : vector<32x32xf32>
    %c12_518 = arith.constant 12 : index
    %c0_519 = arith.constant 0 : index
    %1213 = vector.load %arg21[%c12_518, %c0_519] : memref<48x32xf32, #tpu.memory_space<vmem>>, vector<32x32xf32>
    %1214 = vector.extract_strided_slice %1152 {offsets = [11, 0], sizes = [1, 32], strides = [1, 1]} : vector<16x32xf32> to vector<1x32xf32>
    %1215 = vector.broadcast %1214 : vector<1x32xf32> to vector<32x32xf32>
    %1216 = arith.mulf %1215, %1213 : vector<32x32xf32>
    %1217 = arith.addf %1197, %1216 : vector<32x32xf32>
    %c13_520 = arith.constant 13 : index
    %c0_521 = arith.constant 0 : index
    %1218 = vector.load %arg21[%c13_520, %c0_521] : memref<48x32xf32, #tpu.memory_space<vmem>>, vector<32x32xf32>
    %1219 = vector.extract_strided_slice %1152 {offsets = [12, 0], sizes = [1, 32], strides = [1, 1]} : vector<16x32xf32> to vector<1x32xf32>
    %1220 = vector.broadcast %1219 : vector<1x32xf32> to vector<32x32xf32>
    %1221 = arith.mulf %1220, %1218 : vector<32x32xf32>
    %1222 = arith.addf %1202, %1221 : vector<32x32xf32>
    %c14_522 = arith.constant 14 : index
    %c0_523 = arith.constant 0 : index
    %1223 = vector.load %arg21[%c14_522, %c0_523] : memref<48x32xf32, #tpu.memory_space<vmem>>, vector<32x32xf32>
    %1224 = vector.extract_strided_slice %1152 {offsets = [13, 0], sizes = [1, 32], strides = [1, 1]} : vector<16x32xf32> to vector<1x32xf32>
    %1225 = vector.broadcast %1224 : vector<1x32xf32> to vector<32x32xf32>
    %1226 = arith.mulf %1225, %1223 : vector<32x32xf32>
    %1227 = arith.addf %1207, %1226 : vector<32x32xf32>
    %c15_524 = arith.constant 15 : index
    %c0_525 = arith.constant 0 : index
    %1228 = vector.load %arg21[%c15_524, %c0_525] : memref<48x32xf32, #tpu.memory_space<vmem>>, vector<32x32xf32>
    %1229 = vector.extract_strided_slice %1152 {offsets = [14, 0], sizes = [1, 32], strides = [1, 1]} : vector<16x32xf32> to vector<1x32xf32>
    %1230 = vector.broadcast %1229 : vector<1x32xf32> to vector<32x32xf32>
    %1231 = arith.mulf %1230, %1228 : vector<32x32xf32>
    %1232 = arith.addf %1212, %1231 : vector<32x32xf32>
    %1233 = arith.addf %1222, %1227 : vector<32x32xf32>
    %1234 = arith.addf %1232, %1217 : vector<32x32xf32>
    %1235 = arith.addf %1233, %1234 : vector<32x32xf32>
    %c1_526 = arith.constant 1 : index
    %c0_527 = arith.constant 0 : index
    %c0_528 = arith.constant 0 : index
    %1236 = vector.load %arg22[%c1_526, %c0_527, %c0_528] : memref<2x32x32xf32, #tpu.memory_space<vmem>>, vector<1x32x32xf32>
    %1237 = vector.shape_cast %1236 : vector<1x32x32xf32> to vector<32x32xf32>
    %1238 = vector.shape_cast %1235 : vector<32x32xf32> to vector<1x32x32xf32>
    tpu.vector_store %arg22[%c1_526, %c0_527, %c0_528], %1238 {strides = array<i32>} : memref<2x32x32xf32, #tpu.memory_space<vmem>>, vector<1x32x32xf32>,
    %c0_529 = arith.constant 0 : index
    %c0_530 = arith.constant 0 : index
    %c0_531 = arith.constant 0 : index
    %1239 = vector.load %arg22[%c0_529, %c0_530, %c0_531] : memref<2x32x32xf32, #tpu.memory_space<vmem>>, vector<2x32x32xf32>
    %1240 = arith.subf %858, %1239 : vector<2x32x32xf32>
    %1241 = arith.addf %847, %1239 : vector<2x32x32xf32>
    %c0_532 = arith.constant 0 : index
    %c0_533 = arith.constant 0 : index
    %c0_534 = arith.constant 0 : index
    %1242 = vector.load %arg19[%c0_532, %c0_533, %c0_534] : memref<2x32x32xf32, #tpu.memory_space<vmem>>, vector<2x32x32xf32>
    tpu.vector_store %arg19[%c0_532, %c0_533, %c0_534], %1240 {strides = array<i32>} : memref<2x32x32xf32, #tpu.memory_space<vmem>>, vector<2x32x32xf32>,
    %c0_535 = arith.constant 0 : index
    %c0_536 = arith.constant 0 : index
    %c0_537 = arith.constant 0 : index
    %1243 = vector.load %arg20[%c0_535, %c0_536, %c0_537] : memref<2x32x32xf32, #tpu.memory_space<vmem>>, vector<2x32x32xf32>
    tpu.vector_store %arg20[%c0_535, %c0_536, %c0_537], %1241 {strides = array<i32>} : memref<2x32x32xf32, #tpu.memory_space<vmem>>, vector<2x32x32xf32>,
    return
  }
  func.func @transform_0(%arg0: i32) -> (i32, i32, i32) {
    %c0_i32 = arith.constant 0 : i32
    %c0_i32_0 = arith.constant 0 : i32
    %c0_i32_1 = arith.constant 0 : i32
    return %arg0, %c0_i32, %c0_i32_0 : i32, i32, i32
  }
  func.func @transform_1(%arg0: i32) -> (i32, i32, i32) {
    %c0_i32 = arith.constant 0 : i32
    %c0_i32_0 = arith.constant 0 : i32
    %c0_i32_1 = arith.constant 0 : i32
    return %arg0, %c0_i32, %c0_i32_0 : i32, i32, i32
  }
  func.func @transform_2(%arg0: i32) -> (i32, i32) {
    %c0_i32 = arith.constant 0 : i32
    %c0_i32_0 = arith.constant 0 : i32
    %c0_i32_1 = arith.constant 0 : i32
    return %c0_i32, %c0_i32_0 : i32, i32
  }
  func.func @transform_3(%arg0: i32) -> (i32, i32) {
    %c0_i32 = arith.constant 0 : i32
    %c0_i32_0 = arith.constant 0 : i32
    %c0_i32_1 = arith.constant 0 : i32
    return %c0_i32, %c0_i32_0 : i32, i32
  }
  func.func @transform_4(%arg0: i32) -> (i32, i32) {
    %c0_i32 = arith.constant 0 : i32
    %c0_i32_0 = arith.constant 0 : i32
    %c0_i32_1 = arith.constant 0 : i32
    return %c0_i32, %c0_i32_0 : i32, i32
  }
  func.func @transform_5(%arg0: i32) -> (i32, i32) {
    %c0_i32 = arith.constant 0 : i32
    %c0_i32_0 = arith.constant 0 : i32
    %c0_i32_1 = arith.constant 0 : i32
    return %c0_i32, %c0_i32_0 : i32, i32
  }
  func.func @transform_6(%arg0: i32) -> (i32, i32) {
    %c0_i32 = arith.constant 0 : i32
    %c0_i32_0 = arith.constant 0 : i32
    %c0_i32_1 = arith.constant 0 : i32
    return %c0_i32, %c0_i32_0 : i32, i32
  }
  func.func @transform_7(%arg0: i32) -> (i32, i32) {
    %c0_i32 = arith.constant 0 : i32
    %c0_i32_0 = arith.constant 0 : i32
    %c0_i32_1 = arith.constant 0 : i32
    return %c0_i32, %c0_i32_0 : i32, i32
  }
  func.func @transform_8(%arg0: i32) -> (i32, i32) {
    %c0_i32 = arith.constant 0 : i32
    %c0_i32_0 = arith.constant 0 : i32
    %c0_i32_1 = arith.constant 0 : i32
    return %c0_i32, %c0_i32_0 : i32, i32
  }
  func.func @transform_9(%arg0: i32) -> (i32, i32) {
    %c0_i32 = arith.constant 0 : i32
    %c0_i32_0 = arith.constant 0 : i32
    %c0_i32_1 = arith.constant 0 : i32
    return %c0_i32, %c0_i32_0 : i32, i32
  }
  func.func @transform_10(%arg0: i32) -> (i32, i32) {
    %c0_i32 = arith.constant 0 : i32
    %c0_i32_0 = arith.constant 0 : i32
    %c0_i32_1 = arith.constant 0 : i32
    return %c0_i32, %c0_i32_0 : i32, i32
  }
  func.func @transform_11(%arg0: i32) -> (i32, i32) {
    %c0_i32 = arith.constant 0 : i32
    %c0_i32_0 = arith.constant 0 : i32
    %c0_i32_1 = arith.constant 0 : i32
    return %c0_i32, %c0_i32_0 : i32, i32
  }
  func.func @transform_12(%arg0: i32) -> (i32, i32, i32) {
    %c0_i32 = arith.constant 0 : i32
    %c0_i32_0 = arith.constant 0 : i32
    %c0_i32_1 = arith.constant 0 : i32
    %c0_i32_2 = arith.constant 0 : i32
    return %c0_i32, %c0_i32_0, %c0_i32_1 : i32, i32, i32
  }
  func.func @transform_13(%arg0: i32) -> (i32, i32, i32) {
    %c0_i32 = arith.constant 0 : i32
    %c0_i32_0 = arith.constant 0 : i32
    %c0_i32_1 = arith.constant 0 : i32
    %c0_i32_2 = arith.constant 0 : i32
    return %c0_i32, %c0_i32_0, %c0_i32_1 : i32, i32, i32
  }
  func.func @transform_14(%arg0: i32) -> (i32, i32, i32) {
    %c0_i32 = arith.constant 0 : i32
    %c0_i32_0 = arith.constant 0 : i32
    %c0_i32_1 = arith.constant 0 : i32
    %c0_i32_2 = arith.constant 0 : i32
    return %c0_i32, %c0_i32_0, %c0_i32_1 : i32, i32, i32
  }
  func.func @transform_15(%arg0: i32) -> (i32, i32, i32) {
    %c0_i32 = arith.constant 0 : i32
    %c0_i32_0 = arith.constant 0 : i32
    %c0_i32_1 = arith.constant 0 : i32
    %c0_i32_2 = arith.constant 0 : i32
    return %c0_i32, %c0_i32_0, %c0_i32_1 : i32, i32, i32
  }
  func.func @transform_16(%arg0: i32) -> i32 {
    %c0_i32 = arith.constant 0 : i32
    %c0_i32_0 = arith.constant 0 : i32
    return %c0_i32 : i32
  }
  func.func @transform_17(%arg0: i32) -> i32 {
    %c0_i32 = arith.constant 0 : i32
    %c0_i32_0 = arith.constant 0 : i32
    return %c0_i32 : i32
  }
  func.func @transform_18(%arg0: i32) -> (i32, i32, i32) {
    %c0_i32 = arith.constant 0 : i32
    %c0_i32_0 = arith.constant 0 : i32
    %c0_i32_1 = arith.constant 0 : i32
    return %arg0, %c0_i32, %c0_i32_0 : i32, i32, i32
  }
  func.func @transform_19(%arg0: i32) -> (i32, i32, i32) {
    %c0_i32 = arith.constant 0 : i32
    %c0_i32_0 = arith.constant 0 : i32
    %c0_i32_1 = arith.constant 0 : i32
    return %arg0, %c0_i32, %c0_i32_0 : i32, i32, i32
  }
}

</mosaic_0001>

<bundles_post_ra>
// kernel: _lambda_.1
= control target key start
LH: loop header
LB: loop body
LE: loop exit
PB: predicated region body
PF: predicated region fallthrough
CT: control target
= control target key end

     0   :  { %s9564_s0 = inlined_call_operand.vmem [shape: f32[4,32,32], index: 0, kind: input, shape index: {}]   ;;  %s9565_s1 = inlined_call_operand.vmem [shape: f32[4,48,32], index: 1, kind: input, shape index: {}]   ;;  %s9566_s2 = inlined_call_operand.vmem [shape: bf16[32,32], index: 2, kind: input, shape index: {}]   ;;  %s9567_s3 = inlined_call_operand.vmem [shape: bf16[32,32], index: 3, kind: input, shape index: {}]   ;;  %s9568_s4 = inlined_call_operand.vmem [shape: bf16[32,32], index: 4, kind: input, shape index: {}]   ;;  %s9569_s5 = inlined_call_operand.vmem [shape: bf16[32,32], index: 5, kind: input, shape index: {}]   ;;  %s9570_s6 = inlined_call_operand.vmem [shape: bf16[32,32], index: 6, kind: input, shape index: {}]   ;;  %s9571_s7 = inlined_call_operand.vmem [shape: bf16[32,32], index: 7, kind: input, shape index: {}]   ;;  %s9572_s8 = inlined_call_operand.vmem [shape: bf16[32,32], index: 8, kind: input, shape index: {}]   ;;  %s9573_s9 = inlined_call_operand.vmem [shape: bf16[32,32], index: 9, kind: input, shape index: {}]   ;;  %s9574_s10 = inlined_call_operand.vmem [shape: bf16[32,128], index: 10, kind: input, shape index: {}]   ;;  %s9575_s11 = inlined_call_operand.vmem [shape: bf16[128,32], index: 11, kind: input, shape index: {}]   ;;  %s9576_s12 = inlined_call_operand.vmem [shape: f32[3,16,32], index: 12, kind: input, shape index: {}]   ;;  %s9577_s13 = inlined_call_operand.vmem [shape: f32[3,32,16], index: 13, kind: input, shape index: {}]   ;;  %s9578_s14 = inlined_call_operand.vmem [shape: f32[3,1,16], index: 14, kind: input, shape index: {}]   ;;  %s9579_s15 = inlined_call_operand.vmem [shape: f32[3,1,16], index: 15, kind: input, shape index: {}]   ;;  %s9580_s16 = inlined_call_operand.vmem [shape: f32[3], index: 16, kind: input, shape index: {}]   ;;  %s9581_s17 = inlined_call_operand.vmem [shape: f32[2], index: 17, kind: input, shape index: {}]   ;;  %s9582_s18 = inlined_call_operand.hbm [shape: f32[4,32,32], index: 18, kind: output, shape index: {0}]   ;;  %s9583_s19 = inlined_call_operand.hbm [shape: f32[4,32,32], index: 19, kind: output, shape index: {1}]  }
   0x1   :  { %9741 = sst [smem:[#allocation77_spill]] %s9564_s0 }
   0x2   :  { %9742 = sst [smem:[#allocation78_spill]] %s9565_s1 }
   0x3   :  { %9743 = sst [smem:[#allocation79_spill]] %s9566_s2 }
   0x4   :  { %9744 = sst [smem:[#allocation80_spill]] %s9567_s3 }
   0x5   :  { %9745 = sst [smem:[#allocation81_spill]] %s9568_s4 }
   0x6   :  { %9746 = sst [smem:[#allocation82_spill]] %s9569_s5 }
   0x7   :  { %9747 = sst [smem:[#allocation83_spill]] %s9580_s16 }
   0x8   :  { %9748 = sst [smem:[#allocation84_spill]] %s9581_s17 }
   0x9   :  { %25 = vsyncpa [#allocation6], 0 }
   0xa   :  { %26 = vsyncpa [#allocation8], 0 }
   0xb   :  { %27 = vsyncpa [#allocation5], 0 }
   0xc   :  { %29 = vsyncpa [#allocation5 + $0x1], 0 }
   0xd   :  { %30 = vsyncpa [#allocation11], 0 }
   0xe   :  { %32 = vsyncpa [#allocation11 + $0x1], 0  ;;  %s6991_s0 = smov 0   ;;  %s6993_s30 = smov 0  }
   0xf   :  { %s6995_s20 = smov 0   ;;  %s6997_s21 = smov 0  }
  0x10 LB: > { %9749 = sst [smem:[#allocation16_spill]] %s6875_s20  ;;  %s7012_s1 = sadd.s32 4294967295, %s6879_s21   ;;  %s6879_s21 = sphi %s6997_s21, %s10185_s21   ;;  %s6875_s20 = sphi %s6995_s20, %s10187_s20   ;;  %s6871_s30 = sphi %s6993_s30, %s10189_s30   ;;  %s6867_s0 = sphi %s6991_s0, %s10188_s0  }
  0x11   : > { %s5730_s22 = sadd.s32 4294967294, %s6879_s21   ;;  %s7016_s2 = sadd.s32 1, %s6879_s21  }
  0x12   : > { %9750 = sst [smem:[#allocation17_spill]] %s7016_s2  ;;  %s433_s23 = sadd.s32 1, %s6875_s20 }
  0x13   : > { %s430_s24 = ssub.s32 %s6879_s21, %s7016_s2  ;;  %p443_p0 = scmp.ne.s32.totalorder %s6875_s20, %s6871_s30 }
  0x14   : > { %p431_p1 = scmp.eq.s32.totalorder %s430_s24, 0  ;;  %p444_p2 = scmp.eq.s32.totalorder %s7012_s1, 1 }
  0x15   : > { %p449_p3 = scmp.ne.s32.totalorder %s6871_s30, %s6867_s0  ;;  %p450_p4 = scmp.eq.s32.totalorder %s5730_s22, 1 }
  0x16   : > { %s7027_s25 = scalar_select %p431_p1, %s6875_s20, %s433_s23  }
  0x17   : > { %p7029_p5 = por %p444_p2, %p443_p0  ;;  %p7033_p6 = por %p450_p4, %p449_p3 }
  0x18   : > { %9751 = sst [smem:[#allocation18_spill]] %s7027_s25  ;;  %p5731_p7 = scmp.ge.s32.totalorder %s6879_s21, 1 }
  0x19   : > { %s9752_s3 = scalar_select %p7029_p5, 1, 0 }
  0x1a   : > { %s9753_s26 = scalar_select %p7033_p6, 1, 0 }
  0x1b   : > { %p483_p8 = scmp.lt.s32.totalorder %s6879_s21, 3  ;;  %p9589_p9 = scmp.eq.s32.totalorder %s7012_s1, 0 }
  0x1c   : > { %9754 = sst [smem:[#allocation19_spill]] %s9753_s26  ;;  %s9756_s16 = sld [smem:[#allocation83_spill]] }
  0x1d   : > { %p7040_p10 = pnand %p5731_p7, %p483_p8  ;;  %s9757_s17 = sld [smem:[#allocation84_spill]] }
  0x1f   : > { %s9755_s27 = scalar_select %p7040_p10, 1, 0 }
  0x20   : > { %p6538_p11 = pneg %p7040_p10 }
  0x22   : > { %s538_s22 = sshll.u32 %s9756_s16, 4  ;;  %p7054_p12 = pnand %p9589_p9, %p6538_p11  ;;  %s539_s22 = int_to_ptr.vmem [resolvable:$true] %s538_s22 }
  0x23   : > { %s549_s25 = sshll.u32 %s9757_s17, 4  ;;  %s6747_s2 = scalar_lea.vmem %s539_s22, 16  ;;  %s550_s25 = int_to_ptr.vmem [resolvable:$true] %s549_s25 }
  0x24   : > { %p6748_p13 = scmp.ne.s32.totalorder %s539_s22, %s6747_s2  ;;  %p6749_p0 = pneg %p7054_p12 }
  0x25   : > { %p6755_p3 = scmp.lt.s32.totalorder %s539_s22, %s539_s22  ;;  %p6756_p4 = scmp.lt.s32.totalorder %s6747_s2, %s6747_s2 }
  0x26   : > { %p6750_p1 = pnand %p6749_p0, %p6748_p13 }
  0x27   : > { %p6757_p7 = por %p6756_p4, %p6755_p3 }
  0x28   : > { %p6751_p2 = pneg %p6750_p1 }
  0x2a   : > { %p6758_p8 = pnand %p6757_p7, %p6751_p2 }
  0x2c   : > { %6761 = shalt.err (!%p6758_p8)
}
  0x2d   : > { %s6881_s28 = smov [#allocation4]   ;;  %s6762_s29 = scalar_lea.vmem %s550_s25, 16 }
  0x2e   : > { %6541 = dma.vmem_to_smem (!%p7054_p12), %s539_s22, 16, %s6881_s28, [#allocation6]  }
  0x2f   : > { %p6763_p11 = scmp.ne.s32.totalorder %s550_s25, %s6762_s29  ;;  %p6770_p5 = scmp.lt.s32.totalorder %s550_s25, %s550_s25 }
  0x30   : > { %p6771_p10 = scmp.lt.s32.totalorder %s6762_s29, %s6762_s29 }
  0x31   : > { %p6765_p9 = pnand %p6763_p11, %p6749_p0 }
  0x32   : > { %p6772_p13 = por %p6771_p10, %p6770_p5 }
  0x33   : > { %p6766_p6 = pneg %p6765_p9 }
  0x35   : > { %p6773_p1 = pnand %p6772_p13, %p6766_p6 }
  0x37   : > { %6776 = shalt.err (!%p6773_p1)
}
  0x38   : > { %s6882_s23 = smov [#allocation7]   ;;  %p9759_p2 = scmp.ne.s32.totalorder %s9755_s27, 0 }
  0x39   : > { %6544 = dma.vmem_to_smem (!%p7054_p12), %s550_s25, 16, %s6882_s23, [#allocation8]  }
  0x3a   : > { %582 = sbr.rel (%p9759_p2) target bundleno = 6207 (0x183f), region = 92 }
  0x41   : > { %p9760_p3 = scmp.eq.s32.totalorder %s7012_s1, 0 }
  0x43   : > { %6850 = dma.done.wait (%p9760_p3), [#allocation6], 16   ;;  %p9761_p4 = pmov %p9760_p3 }
  0x44   : > { %p9762_p9 = pmov %p9760_p3 }
  0x45   : > { %6852 = vsyncadd (%p9761_p4), [#allocation6], 4294967280 }
  0x46   : > { %6854 = dma.done.wait (%p9762_p9), [#allocation8], 16   ;;  %p9763_p5 = pmov %p9760_p3 }
  0x48   : > { %6856 = vsyncadd (%p9763_p5), [#allocation8], 4294967280 }
  0x49   : > { %592 = sfence }
  0x4a   : > { %s9764_s20 = sld [smem:[#allocation80_spill]]  ;;  %s5740_s25 = sshll.u32 %s7012_s1, 1  ;;  %vm712_vm0 = vcmask 261120   ;;  %vm6884_vm1 = vmmov 0   ;;  %vm1507_vm2 = vcmask 122880   ;;  %vm1610_vm12 = vcmask 130048  }
  0x4b   : > { %p656_p6 = scmp.lt.s32.totalorder %s5740_s25, 3  ;;  %s9766_s16 = sld [smem:[#allocation79_spill]] }
  0x4c   : > { %s9767_s27 = sld [smem:[#allocation77_spill]]  ;;  %s9768_s4 = sld [smem:[#allocation81_spill]] }
  0x4d   : > { %s10191_s25 = smov (!%p656_p6, %s5740_s25), 3  ;;  %s9769_s5 = sld [smem:[#allocation82_spill]] }
  0x4e   : > { %s5910_s2 = sshll.u32 %s10191_s25, 5  ;;  %s7372_s23 = sld [smem:[#allocation4]] }
  0x4f   : > { %s5811_s26 = sld [smem:[#allocation7 + $0x1]]  ;;  %p10180_p12 = scmp.ne.s32.totalorder %s9752_s3, 0 }
  0x50   : > { %s9765_s24 = smov %s9764_s20  ;;  %v6597_v0 = vld [vmem:[%s9764_s20] sm:$0xff]  }
  0x51   : > { %v6598_v1 = vld [vmem:[%s9765_s24 + $0x8] sm:$0xff]   ;;  %6087 = vmatprep.subr.bf16.mxu1 %v6597_v0  ;;  %v6599_v2 = vld [vmem:[%s9766_s16] sm:$0xff]  }
  0x52   : > { %6088 = vmatpush3.bf16.msra.mxu1 %v6597_v0  ;;  %v6600_v3 = vld [vmem:[%s9766_s16 + $0x8] sm:$0xff]   ;;  %6075 = vmatprep.subr.bf16.mxu0 %v6599_v2  ;;  %s660_s28 = scalar_lea.vmem %s9767_s27, %s5910_s2  ;;  %v6601_v16 = vld [vmem:[%s9768_s4] sm:$0xff]   ;;  %s952_s27 = sld [smem:[#allocation7]] }
  0x53   : > { %6089 = vmatprep.subr.bf16.mxu1 %v6598_v1  ;;  %6076 = vmatpush3.bf16.msra.mxu0 %v6599_v2  ;;  %v7093_v4 = vld [vmem:[%s660_s28] sm:$0xff]  ;;  %v7095_v5 = vld [vmem:[%s660_s28 + $0x8] sm:$0xff]  ;;  %v7097_v6 = vld [vmem:[%s660_s28 + $0x10] sm:$0xff]  ;;  %s6465_s2 = smul.u32 48, %s10191_s25 }
  0x54   : > { %6077 = vmatprep.subr.bf16.mxu0 %v6600_v3  ;;  %v692_v7 = vpack.c.bf16 %v7095_v5, %v7093_v4  ;;  %v7101_v8 = vld [vmem:[%s660_s28 + $0x18] sm:$0xff]  ;;  %v7103_v9 = vld [vmem:[%s660_s28 + $0x20] sm:$0xff]  ;;  %v7105_v10 = vld [vmem:[%s660_s28 + $0x28] sm:$0xff] }
  0x55   : > { %v693_v11 = vpack.c.bf16 %v7101_v8, %v7097_v6  ;;  %v694_v12 = vpack.c.bf16 %v7105_v10, %v7103_v9  ;;  %v7113_v13 = vld [vmem:[%s660_s28 + $0x30] sm:$0xff]  ;;  %v7115_v14 = vld [vmem:[%s660_s28 + $0x38] sm:$0xff]  ;;  %v6602_v17 = vld [vmem:[%s9768_s4 + $0x8] sm:$0xff]   ;;  %s8974_s4 = sld [smem:[#allocation4 + $0x2]] }
  0x56   : > { %6090 = vmatpush3.bf16.msra.mxu1 %v6598_v1  ;;  %6091 = vmatprep.mubr.msk.bf16.mxu1 %vm712_vm0, %v692_v7  ;;  %v695_v15 = vpack.c.bf16 %v7115_v14, %v7113_v13 }
  0x57   : > { %6078 = vmatpush3.bf16.msra.mxu0 %v6600_v3  ;;  %6079 = vmatprep.mubr.msk.bf16.mxu0 %vm712_vm0, %v692_v7 }
  0x58   : > { %6099 = vmatprep.subr.bf16.mxu0 %v6601_v16 }
  0x59   : > { %6092 = vmatmul.mubr.msk.bf16.vlgmr.msra.gmra.mrb[0].mxu1 %vm712_vm0, %v693_v11 }
  0x5a   : > { %6080 = vmatmul.mubr.msk.bf16.vlgmr.msra.gmra.mrb[0].mxu0 %vm712_vm0, %v693_v11  ;;  %6095 = vmatprep.mubr.msk.bf16.mxu1 %vm712_vm0, %v694_v12 }
  0x5b   : > { %6083 = vmatprep.mubr.msk.bf16.mxu0 %vm712_vm0, %v694_v12  ;;  %6100 = vmatpush3.bf16.msra.mxu0 %v6601_v16 }
  0x5c   : > { %6101 = vmatprep.subr.bf16.mxu0 %v6602_v17 }
  0x5f   : > { %6102 = vmatpush3.bf16.msra.mxu0 %v6602_v17 }
  0x61   : > { %6096 = vmatmul.mubr.msk.bf16.gmra.mrb[4].mxu1 %vm712_vm0, %v695_v15 }
  0x62   : > { %6084 = vmatmul.mubr.msk.bf16.gmra.mrb[4].mxu0 %vm712_vm0, %v695_v15 }
  0x63   : > { %6103 = vmatprep.mubr.msk.bf16.mxu0 %vm712_vm0, %v692_v7 }
  0x6a   : > { %6104 = vmatmul.mubr.msk.bf16.vlgmr.msra.gmra.mrb[8].mxu0 %vm712_vm0, %v693_v11 }
  0x6b   : > { %6107 = vmatprep.mubr.msk.bf16.mxu0 %vm712_vm0, %v694_v12 }
  0x72   : > { %6108 = vmatmul.mubr.msk.bf16.gmra.mrb[12].mxu0 %vm712_vm0, %v695_v15 }
 0x12c   : > { %v6093_v18 = vpop.f32.mrb[0].mxu1 }
 0x12d   : > { %v840_v19 = vpop.f32.mrb[1].mxu1  ;;  %v6081_v20 = vpop.f32.mrb[0].mxu0 }
 0x12e   : > { %v6094_v21 = vpop.f32.mrb[2].mxu1  ;;  %v759_v22 = vpop.f32.mrb[1].mxu0 }
 0x12f   : > { %v958_v23 = vpack.c.bf16 %v6094_v21, %v6093_v18  ;;  %v843_v24 = vpop.f32.mrb[3].mxu1  ;;  %v6082_v25 = vpop.f32.mrb[2].mxu0 }
 0x130   : > { %v957_v26 = vpack.c.bf16 %v843_v24, %v840_v19  ;;  %v954_v27 = vpack.c.bf16 %v6082_v25, %v6081_v20  ;;  %v762_v28 = vpop.f32.mrb[3].mxu0 }
 0x131   : > { %v953_v29 = vpack.c.bf16 %v762_v28, %v759_v22  ;;  %v971_v43 = vsel %vm712_vm0, %v958_v23, 0 }
 0x132   : > { %v968_v30 = vsel %vm712_vm0, %v957_v26, 0  ;;  %6455 = vmatprep.subr.msk.bf16.mxu1 %vm712_vm0, %v957_v26 }
 0x133   : > { %6112 = vmatpush3.bf16.xpose.msra.mxu1 %v968_v30  ;;  %6115 = vmatprep.mubr.msk.bf16.mxu1 %vm712_vm0, %v953_v29 }
 0x134   : > { %6456 = vmatprep.subr.msk.bf16.mxu1 %vm712_vm0, %v958_v23  ;;  %v6097_v31 = vpop.f32.mrb[4].mxu1 }
 0x135   : > { %v856_v32 = vpop.f32.mrb[5].mxu1  ;;  %v6085_v33 = vpop.f32.mrb[4].mxu0 }
 0x136   : > { %v6098_v34 = vpop.f32.mrb[6].mxu1  ;;  %v775_v35 = vpop.f32.mrb[5].mxu0 }
 0x137   : > { %v960_v36 = vpack.c.bf16 %v6098_v34, %v6097_v31  ;;  %v859_v37 = vpop.f32.mrb[7].mxu1  ;;  %v6086_v38 = vpop.f32.mrb[6].mxu0 }
 0x138   : > { %v959_v39 = vpack.c.bf16 %v859_v37, %v856_v32  ;;  %v956_v40 = vpack.c.bf16 %v6086_v38, %v6085_v33  ;;  %v778_v41 = vpop.f32.mrb[7].mxu0 }
 0x139   : > { %v955_v42 = vpack.c.bf16 %v778_v41, %v775_v35  ;;  %v1032_v45 = vsel %vm712_vm0, %v960_v36, 0 }
 0x13a   : > { %v1029_v44 = vsel %vm712_vm0, %v959_v39, 0  ;;  %6457 = vmatprep.subr.msk.bf16.mxu0 %vm712_vm0, %v959_v39 }
 0x13b   : > { %6114 = vmatpush3.bf16.xpose.msra.mxu1 %v971_v43  ;;  %6120 = vmatpush3.bf16.xpose.msra.mxu0 %v1029_v44 }
 0x13c   : > { %6458 = vmatprep.subr.msk.bf16.mxu0 %vm712_vm0, %v960_v36  ;;  %6123 = vmatprep.mubr.msk.bf16.mxu0 %vm712_vm0, %v955_v42 }
 0x13d   : > { %v6105_v58 = vpop.f32.mrb[8].mxu0 }
 0x13e   : > { %v921_v59 = vpop.f32.mrb[9].mxu0 }
 0x13f   : > { %v6106_v60 = vpop.f32.mrb[10].mxu0 }
 0x140   : > { %v1184_v61 = vpack.c.bf16 %v6106_v60, %v6105_v58  ;;  %v924_v62 = vpop.f32.mrb[11].mxu0 }
 0x141   : > { %v1183_v63 = vpack.c.bf16 %v924_v62, %v921_v59 }
 0x142   : > { %6116 = vmatmul.mubr.msk.bf16.vlgmr.msra.gmra.mrb[8].mxu1 %vm712_vm0, %v954_v27 }
 0x143   : > { %6122 = vmatpush3.bf16.xpose.msra.mxu0 %v1032_v45  ;;  %6127 = vmatprep.subr.bf16.mxu1 %v1183_v63 }
 0x144   : > { %6128 = vmatpush3.bf16.msra.mxu1 %v1183_v63 }
 0x145   : > { %v6109_v0 = vpop.f32.mrb[12].mxu0  ;;  %6129 = vmatprep.subr.bf16.mxu1 %v1184_v61 }
 0x146   : > { %v937_v1 = vpop.f32.mrb[13].mxu0 }
 0x147   : > { %v6110_v2 = vpop.f32.mrb[14].mxu0 }
 0x148   : > { %v7151_v3 = vpack.c.bf16 %v6110_v2, %v6109_v0  ;;  %v940_v7 = vpop.f32.mrb[15].mxu0  ;;  %6130 = vmatpush3.bf16.msra.mxu1 %v1184_v61 }
 0x149   : > { %v7153_v11 = vpack.c.bf16 %v940_v7, %v937_v1 }
 0x14a   : > { %6124 = vmatmul.mubr.msk.bf16.vlgmr.msra.gmra.mrb[16].mxu0 %vm712_vm0, %v956_v40 }
 0x14b   : > { %6135 = vmatprep.subr.bf16.mxu1 %v7153_v11 }
 0x215   : > { %v6117_v46 = vpop.f32.mrb[8].mxu1 }
 0x216   : > { %v1085_v47 = vmul.f32 0.17677669, %v6117_v46  ;;  %v1007_v48 = vpop.f32.mrb[9].mxu1 }
 0x217   : > { %v1083_v49 = vmul.f32 0.17677669, %v1007_v48  ;;  %v6118_v50 = vpop.f32.mrb[10].mxu1 }
 0x218   : > { %v1086_v51 = vmul.f32 0.17677669, %v6118_v50  ;;  %v1010_v52 = vpop.f32.mrb[11].mxu1  ;;  %v1097_v53 = vsel %vm712_vm0, %v1085_v47, -inf }
 0x219   : > { %v1084_v54 = vmul.f32 0.17677669, %v1010_v52  ;;  %1098 = vmax.xlane.f32.xlu1 %v1097_v53  ;;  %v1091_v55 = vsel %vm712_vm0, %v1083_v49, -inf }
 0x21a   : > { %1092 = vmax.xlane.f32.xlu0 %v1091_v55  ;;  %v1100_v56 = vsel %vm712_vm0, %v1086_v51, -inf }
 0x21b   : > { %v1094_v57 = vsel %vm712_vm0, %v1084_v54, -inf }
 0x21d   : > { %1101 = vmax.xlane.f32.xlu1 %v1100_v56  ;;  %v6125_v12 = vpop.f32.mrb[16].mxu0 }
 0x21e   : > { %1095 = vmax.xlane.f32.xlu0 %v1094_v57  ;;  %v1068_v15 = vpop.f32.mrb[17].mxu0  ;;  %v1089_v38 = vmul.f32 0.17677669, %v6125_v12 }
 0x21f   : > { %v6126_v16 = vpop.f32.mrb[18].mxu0  ;;  %v1087_v33 = vmul.f32 0.17677669, %v1068_v15 }
 0x220   : > { %v1071_v17 = vpop.f32.mrb[19].mxu0  ;;  %v1090_v42 = vmul.f32 0.17677669, %v6126_v16  ;;  %v1109_v43 = vsel %vm712_vm0, %v1089_v38, -inf }
 0x221   : > { %v1103_v39 = vsel %vm712_vm0, %v1087_v33, -inf  ;;  %v1088_v40 = vmul.f32 0.17677669, %v1071_v17 }
 0x222   : > { %v1112_v45 = vsel %vm712_vm0, %v1090_v42, -inf }
 0x223   : > { %v1106_v44 = vsel %vm712_vm0, %v1088_v40, -inf }
 0x2a6   : > { %v1099_v18 = vpop.xlane.xlu1 %1098 }
 0x2a7   : > { %v1117_v19 = vsub.f32 %v1085_v47, %v1099_v18  ;;  %v1093_v20 = vpop.xlane.xlu0 %1092 }
 0x2a8   : > { %v1115_v21 = vsub.f32 %v1083_v49, %v1093_v20 }
 0x2a9   : > { %v1127_v22 = vmul.f32 1.442695, %v1117_v19 }
 0x2aa   : > { %v1123_v23 = vmul.f32 1.442695, %v1115_v21  ;;  %v1102_v24 = vpop.xlane.xlu1 %1101 }
 0x2ab   : > { %v1118_v25 = vsub.f32 %v1086_v51, %v1102_v24  ;;  %v1096_v26 = vpop.xlane.xlu0 %1095 }
 0x2ac   : > { %6623 = vpow2.f32 %v1123_v23  ;;  %v1116_v27 = vsub.f32 %v1084_v54, %v1096_v26  ;;  %v6604_v26 = vld [vmem:[%s9769_s5 + $0x8] sm:$0xff]  }
 0x2ad   : > { %6625 = vpow2.f32 %v1127_v22  ;;  %v1129_v28 = vmul.f32 1.442695, %v1118_v25 }
 0x2ae   : > { %v1125_v29 = vmul.f32 1.442695, %v1116_v27 }
 0x2b0   : > { %6627 = vpow2.f32 %v1125_v29 }
 0x2b1   : > { %6629 = vpow2.f32 %v1129_v28 }
 0x2b6   : > { %v6624_v30 = vpop.eup %6623 }
 0x2b7   : > { %v1139_v31 = vsel %vm712_vm0, %v6624_v30, 0.0  ;;  %v6626_v32 = vpop.eup %6625 }
 0x2b8   : > { %1140 = vadd.xlane.f32.xlu0 %v1139_v31  ;;  %v1145_v35 = vsel %vm712_vm0, %v6626_v32, 0.0 }
 0x2ba   : > { %v6628_v34 = vpop.eup %6627 }
 0x2bb   : > { %v1142_v36 = vsel %vm712_vm0, %v6628_v34, 0.0  ;;  %v6630_v37 = vpop.eup %6629 }
 0x2bc   : > { %1146 = vadd.xlane.f32.xlu0 %v1145_v35  ;;  %1143 = vadd.xlane.f32.xlu1 %v1142_v36  ;;  %v1148_v41 = vsel %vm712_vm0, %v6630_v37, 0.0 }
 0x2c0   : > { %1149 = vadd.xlane.f32.xlu1 %v1148_v41  ;;  %1104 = vmax.xlane.f32.xlu0 %v1103_v39 }
 0x2c4   : > { %1110 = vmax.xlane.f32.xlu0 %v1109_v43  ;;  %1107 = vmax.xlane.f32.xlu1 %v1106_v44 }
 0x2c8   : > { %1113 = vmax.xlane.f32.xlu1 %v1112_v45 }
 0x345   : > { %v1141_v46 = vpop.xlane.xlu0 %1140 }
 0x346   : > { %6631 = vrcp.f32 %v1141_v46  ;;  %v1426_v46 = vld [vmem:[%s9577_s13] sm:$0xff] }
 0x349   : > { %v1144_v47 = vpop.xlane.xlu1 %1143  ;;  %v1147_v48 = vpop.xlane.xlu0 %1146 }
 0x34a   : > { %6633 = vrcp.f32 %v1144_v47  ;;  %v1427_v47 = vld [vmem:[%s9577_s13 + $0x8] sm:$0xff] }
 0x34b   : > { %6635 = vrcp.f32 %v1147_v48  ;;  %v1428_v48 = vld [vmem:[%s9577_s13 + $0x10] sm:$0xff] }
 0x34d   : > { %v1150_v49 = vpop.xlane.xlu1 %1149  ;;  %v1105_v50 = vpop.xlane.xlu0 %1104 }
 0x34e   : > { %6637 = vrcp.f32 %v1150_v49  ;;  %v1119_v51 = vsub.f32 %v1087_v33, %v1105_v50  ;;  %v9593_v49 = vmov 0.0|0.0   ;;  %v7193_v50 = vpack.c.bf16 %v1427_v47, %v1426_v46 }
 0x350   : > { %v1131_v52 = vmul.f32 1.442695, %v1119_v51  ;;  %v6632_v55 = vpop.eup %6631  ;;  %v1429_v51 = vld [vmem:[%s9577_s13 + $0x18] sm:$0xff] }
 0x351   : > { %v1111_v53 = vpop.xlane.xlu0 %1110  ;;  %v1108_v54 = vpop.xlane.xlu1 %1107  ;;  %v1171_v62 = vmul.f32 %v6632_v55, %v6624_v30 }
 0x352   : > { %6639 = vpow2.f32 %v1131_v52  ;;  %v1121_v56 = vsub.f32 %v1089_v38, %v1111_v53  ;;  %v1120_v57 = vsub.f32 %v1088_v40, %v1108_v54  ;;  %v9595_v52 = vmov 0.0  }
 0x353   : > { %v7201_v53 = vpack.c.bf16 %v1429_v51, %v1428_v48 }
 0x354   : > { %v6634_v58 = vpop.eup %6633  ;;  %v1135_v59 = vmul.f32 1.442695, %v1121_v56  ;;  %v1133_v60 = vmul.f32 1.442695, %v1120_v57 }
 0x355   : > { %v1114_v61 = vpop.xlane.xlu1 %1113  ;;  %v1172_v63 = vmul.f32 %v6634_v58, %v6628_v34  ;;  %v6636_v0 = vpop.eup %6635 }
 0x356   : > { %6641 = vpow2.f32 %v1135_v59  ;;  %v1122_v1 = vsub.f32 %v1090_v42, %v1114_v61  ;;  %v1173_v15 = vmul.f32 %v6636_v0, %v6626_v32  ;;  %v7207_v61 = vstv %s952_s27  ;;  %s9833_s27 = sld [smem:[#allocation78_spill]] }
 0x357   : > { %6643 = vpow2.f32 %v1133_v60  ;;  %v1179_v2 = vpack.c.bf16 %v1172_v63, %v1171_v62  ;;  %v9597_v60 = vlaneseq }
 0x358   : > { %v6638_v7 = vpop.eup %6637  ;;  %v1137_v12 = vmul.f32 1.442695, %v1122_v1 }
 0x359   : > { %v1174_v16 = vmul.f32 %v6638_v7, %v6630_v37  ;;  %6131 = vmatprep.mubr.msk.bf16.mxu1 %vm712_vm0, %v1179_v2  ;;  %v7210_v62 = vshrl.u32 %v9597_v60, 7 }
 0x35a   : > { %6645 = vpow2.f32 %v1137_v12 }
 0x35b   : > { %v1180_v17 = vpack.c.bf16 %v1174_v16, %v1173_v15  ;;  %9770 = vst [vmem:[#allocation20_spill] sm:$0xff] %v7210_v62  ;;  %v7215_v7 = vsub.s32 0, %v7210_v62 }
 0x35c   : > { %v6640_v18 = vpop.eup %6639  ;;  %s7635_s28 = scalar_lea.vmem %s9833_s27, %s6465_s2  ;;  %s8256_s2 = sld [smem:[#allocation4 + $0x1]] }
 0x35d   : > { %6132 = vmatmul.mubr.msk.bf16.vlgmr.msra.gmra.mrb[12].mxu1 %vm712_vm0, %v1180_v17  ;;  %v1151_v19 = vsel %vm712_vm0, %v6640_v18, 0.0  ;;  %9771 = vst [vmem:[#allocation21_spill] sm:$0xff] %v7215_v7  ;;  %v7222_v17 = vsub.s32 7, %v7210_v62 }
 0x35e   : > { %1152 = vadd.xlane.f32.xlu0 %v1151_v19  ;;  %6136 = vmatpush3.bf16.msra.mxu1 %v7153_v11  ;;  %v6603_v11 = vld [vmem:[%s9769_s5] sm:$0xff]  }
 0x35f   : > { %6137 = vmatprep.subr.bf16.mxu1 %v7151_v3  ;;  %6143 = vmatprep.subr.bf16.mxu0 %v6603_v11  ;;  %9773 = vst [vmem:[#allocation23_spill] sm:$0xff] %v7222_v17 }
 0x360   : > { %v6642_v20 = vpop.eup %6641  ;;  %6144 = vmatpush3.bf16.msra.mxu0 %v6603_v11 }
 0x361   : > { %v6644_v21 = vpop.eup %6643  ;;  %v1157_v22 = vsel %vm712_vm0, %v6642_v20, 0.0  ;;  %6145 = vmatprep.subr.bf16.mxu0 %v6604_v26 }
 0x362   : > { %1158 = vadd.xlane.f32.xlu0 %v1157_v22  ;;  %v1154_v23 = vsel %vm712_vm0, %v6644_v21, 0.0  ;;  %6138 = vmatpush3.bf16.msra.mxu1 %v7151_v3 }
 0x363   : > { %1155 = vadd.xlane.f32.xlu1 %v1154_v23  ;;  %6395 = vmatprep.subr.bf16.mxu1 %v9593_v49 }
 0x364   : > { %v6646_v24 = vpop.eup %6645  ;;  %6146 = vmatpush3.bf16.msra.mxu0 %v6604_v26 }
 0x365   : > { %v1160_v25 = vsel %vm712_vm0, %v6646_v24, 0.0 }
 0x367   : > { %1161 = vadd.xlane.f32.xlu1 %v1160_v25 }
 0x3eb   : > { %v1153_v27 = vpop.xlane.xlu0 %1152 }
 0x3ec   : > { %6647 = vrcp.f32 %v1153_v27 }
 0x3ef   : > { %v1159_v3 = vpop.xlane.xlu0 %1158 }
 0x3f0   : > { %v1156_v28 = vpop.xlane.xlu1 %1155 }
 0x3f1   : > { %6649 = vrcp.f32 %v1156_v28 }
 0x3f2   : > { %6651 = vrcp.f32 %v1159_v3 }
 0x3f4   : > { %v1162_v29 = vpop.xlane.xlu1 %1161 }
 0x3f5   : > { %6653 = vrcp.f32 %v1162_v29 }
 0x3f6   : > { %v6648_v30 = vpop.eup %6647 }
 0x3f7   : > { %v1175_v32 = vmul.f32 %v6648_v30, %v6640_v18 }
 0x3fb   : > { %v6650_v31 = vpop.eup %6649 }
 0x3fc   : > { %v1176_v33 = vmul.f32 %v6650_v31, %v6644_v21  ;;  %v6652_v34 = vpop.eup %6651 }
 0x3fd   : > { %v1177_v37 = vmul.f32 %v6652_v34, %v6642_v20 }
 0x3fe   : > { %v1181_v35 = vpack.c.bf16 %v1176_v33, %v1175_v32 }
 0x3ff   : > { %v6654_v36 = vpop.eup %6653 }
 0x400   : > { %v1178_v38 = vmul.f32 %v6654_v36, %v6646_v24  ;;  %6139 = vmatprep.mubr.msk.bf16.mxu1 %vm712_vm0, %v1181_v35 }
 0x402   : > { %v1182_v39 = vpack.c.bf16 %v1178_v38, %v1177_v37 }
 0x404   : > { %6140 = vmatmul.mubr.msk.bf16.vlgmr.msra.gmra.mrb[16].mxu1 %vm712_vm0, %v1182_v39 }
 0x405   : > { %6163 = vmatprep.mubr.msk.f32.mxu1 %vm6884_vm1, %v9595_v52  ;;  %6397 = vmatpush3.bf16.msra.mxu1 %v7193_v50 }
 0x406   : > { %6398 = vmatprep.subr.bf16.mxu1 %v9593_v49 }
 0x409   : > { %6400 = vmatpush3.bf16.msra.mxu1 %v7201_v53 }
 0x430   : > { %v6133_v40 = vpop.f32.mrb[12].mxu1 }
 0x431   : > { %v1227_v41 = vpop.f32.mrb[13].mxu1 }
 0x432   : > { %v6134_v42 = vpop.f32.mrb[14].mxu1 }
 0x433   : > { %v1298_v43 = vpack.c.bf16 %v6134_v42, %v6133_v40  ;;  %v1230_v44 = vpop.f32.mrb[15].mxu1 }
 0x434   : > { %v1297_v45 = vpack.c.bf16 %v1230_v44, %v1227_v41 }
 0x436   : > { %6147 = vmatprep.mubr.msk.bf16.mxu0 %vm712_vm0, %v1297_v45 }
 0x437   : > { %6148 = vmatmul.mubr.msk.bf16.vlgmr.msra.gmra.mrb[20].mxu0 %vm712_vm0, %v1298_v43 }
 0x4d7   : > { %v6141_v54 = vpop.f32.mrb[16].mxu1 }
 0x4d8   : > { %v1282_v55 = vpop.f32.mrb[17].mxu1 }
 0x4d9   : > { %v6142_v56 = vpop.f32.mrb[18].mxu1 }
 0x4da   : > { %v1300_v57 = vpack.c.bf16 %v6142_v56, %v6141_v54  ;;  %v1285_v58 = vpop.f32.mrb[19].mxu1 }
 0x4db   : > { %v1299_v59 = vpack.c.bf16 %v1285_v58, %v1282_v55 }
 0x4dd   : > { %6151 = vmatprep.mubr.msk.bf16.mxu0 %vm712_vm0, %v1299_v59 }
 0x4de   : > { %6152 = vmatmul.mubr.msk.bf16.gmra.mrb[24].mxu0 %vm712_vm0, %v1300_v57 }
 0x50a   : > { %v6149_v63 = vpop.f32.mrb[20].mxu0 }
 0x50b   : > { %v1397_v0 = vmul.f32 %v6149_v63, %v7207_v61  ;;  %v1363_v1 = vpop.f32.mrb[21].mxu0 }
 0x50c   : > { %v1395_v2 = vmul.f32 %v7207_v61, %v1363_v1  ;;  %v6150_v12 = vpop.f32.mrb[22].mxu0 }
 0x50d   : > { %v7218_v15 = vadd.f32 %v1397_v0, %v7097_v6  ;;  %v1398_v16 = vmul.f32 %v6150_v12, %v7207_v61  ;;  %v1366_v18 = vpop.f32.mrb[23].mxu0 }
 0x50e   : > { %v7225_v19 = vadd.f32 %v1395_v2, %v7093_v4  ;;  %v1396_v20 = vmul.f32 %v7207_v61, %v1366_v18 }
 0x50f   : > { %9772 = vst [vmem:[#allocation22_spill] sm:$0xff] %v7218_v15  ;;  %1699 = vst.msk [vmem:[#allocation2 + $0x18] sm:$0xff] %vm712_vm0, %v7218_v15  ;;  %v7231_v21 = vadd.f32 %v1398_v16, %v7101_v8  ;;  %v1414_v24 = vsel %vm712_vm0, %v7218_v15, 0.0 }
 0x510   : > { %9774 = vst [vmem:[#allocation24_spill] sm:$0xff] %v7225_v19  ;;  %v1695_v6 = vrot.slane %v7225_v19, %v7215_v7  ;;  %1697 = vst.msk [vmem:[#allocation2 + $0x8] sm:$0xff] %vm712_vm0, %v7225_v19  ;;  %v7238_v22 = vadd.f32 %v1396_v20, %v7095_v5  ;;  %v1411_v8 = vsel %vm712_vm0, %v7225_v19, 0.0 }
 0x511   : > { %9775 = vst [vmem:[#allocation25_spill] sm:$0xff] %v7231_v21  ;;  %1700 = vst.msk [vmem:[#allocation2 + $0x20] sm:$0xff] %vm712_vm0, %v7231_v21  ;;  %v1704_v4 = vrot.slane %v7231_v21, %v7222_v17  ;;  %v1416_v11 = vsel %vm712_vm0, %v7231_v21, 0.0 }
 0x512   : > { %9776 = vst [vmem:[#allocation26_spill] sm:$0xff] %v7238_v22  ;;  %1696 = vst.msk [vmem:[#allocation2] sm:$0xff] %vm712_vm0, %v1695_v6  ;;  %v1412_v23 = vsel %vm712_vm0, %v7238_v22, 0.0 }
 0x513   : > { %1698 = vst.msk [vmem:[#allocation2 + $0x10] sm:$0xff] %vm712_vm0, %v7238_v22  ;;  %1705 = vst.msk [vmem:[#allocation2 + $0x28] sm:$0xff] %vm712_vm0, %v1704_v4  ;;  %v1413_v5 = vadd.f32 %v1412_v23, %v1411_v8 }
 0x515   : > { %v1415_v25 = vadd.f32 %v1414_v24, %v1413_v5 }
 0x516   : > { %v7277_v47 = vld [vmem:[#allocation2 + $0x18] sm:$0xff] }
 0x517   : > { %v1417_v26 = vadd.f32 %v1416_v11, %v1415_v25  ;;  %9777 = vst [vmem:[#allocation27_spill] sm:$0xff] %v7277_v47  ;;  %v7309_v6 = vld [vmem:[#allocation2 + $0x8] sm:$0xff] }
 0x518   : > { %v7258_v36 = vld [vmem:[#allocation2 + $0x19] sm:$0xff]  ;;  %9782 = vst [vmem:[#allocation32_spill] sm:$0xff] %v7309_v6 }
 0x519   : > { %v1418_v27 = vrot.slane %v1417_v26, 4  ;;  %v7260_v37 = vld [vmem:[#allocation2 + $0x1a] sm:$0xff]  ;;  %v7281_v51 = vld [vmem:[#allocation2 + $0x2] sm:$0xff] }
 0x51a   : > { %v7262_v38 = vld [vmem:[#allocation2 + $0x1b] sm:$0xff]  ;;  %v7272_v43 = vld [vmem:[#allocation2 + $0x11] sm:$0xff]  ;;  %v7283_v54 = vld [vmem:[#allocation2 + $0x3] sm:$0xff] }
 0x51b   : > { %v1419_v3 = vadd.f32 %v1418_v27, %v1417_v26  ;;  %v7264_v39 = vld [vmem:[#allocation2 + $0x1c] sm:$0xff]  ;;  %v7274_v44 = vld [vmem:[#allocation2 + $0x12] sm:$0xff]  ;;  %v7285_v55 = vld [vmem:[#allocation2 + $0x4] sm:$0xff] }
 0x51c   : > { %v7266_v40 = vld [vmem:[#allocation2 + $0x1d] sm:$0xff]  ;;  %v7287_v56 = vld [vmem:[#allocation2 + $0x5] sm:$0xff]  ;;  %v7299_v1 = vld [vmem:[#allocation2 + $0x13] sm:$0xff] }
 0x51d   : > { %v1420_v28 = vrot.slane %v1419_v3, 2  ;;  %v7268_v41 = vld [vmem:[#allocation2 + $0x1e] sm:$0xff]  ;;  %9778 = vst [vmem:[#allocation28_spill] sm:$0xff] %v7287_v56  ;;  %v7289_v57 = vld [vmem:[#allocation2 + $0x6] sm:$0xff]  ;;  %v7303_v12 = vld [vmem:[#allocation2 + $0x14] sm:$0xff] }
 0x51e   : > { %v7270_v42 = vld [vmem:[#allocation2 + $0x1f] sm:$0xff]  ;;  %9779 = vst [vmem:[#allocation29_spill] sm:$0xff] %v7289_v57  ;;  %v7291_v58 = vld [vmem:[#allocation2 + $0x7] sm:$0xff]  ;;  %v7321_v25 = vld [vmem:[#allocation2 + $0x15] sm:$0xff] }
 0x51f   : > { %v1421_v29 = vadd.f32 %v1420_v28, %v1419_v3  ;;  %v7279_v48 = vld [vmem:[#allocation2 + $0x1] sm:$0xff]  ;;  %9780 = vst [vmem:[#allocation30_spill] sm:$0xff] %v7291_v58  ;;  %v7293_v59 = vld [vmem:[#allocation2 + $0x9] sm:$0xff]  ;;  %v7323_v11 = vld [vmem:[#allocation2 + $0x16] sm:$0xff] }
 0x520   : > { %v7295_v63 = vld [vmem:[#allocation2 + $0xa] sm:$0xff]  ;;  %v7311_v4 = vld [vmem:[#allocation2 + $0x21] sm:$0xff] }
 0x521   : > { %v1422_v30 = vrot.slane %v1421_v29, 1  ;;  %v7297_v0 = vld [vmem:[#allocation2 + $0xb] sm:$0xff]  ;;  %v7313_v8 = vld [vmem:[#allocation2 + $0x22] sm:$0xff] }
 0x522   : > { %v7301_v2 = vld [vmem:[#allocation2 + $0xc] sm:$0xff]  ;;  %v7315_v23 = vld [vmem:[#allocation2 + $0x23] sm:$0xff] }
 0x523   : > { %v1423_v31 = vadd.f32 %v1422_v30, %v1421_v29  ;;  %v7317_v5 = vld [vmem:[#allocation2 + $0x24] sm:$0xff]  ;;  %v7331_v3 = vld [vmem:[#allocation2 + $0xd] sm:$0xff] }
 0x524   : > { %v7319_v24 = vld [vmem:[#allocation2 + $0x25] sm:$0xff]  ;;  %v7333_v28 = vld [vmem:[#allocation2 + $0xe] sm:$0xff] }
 0x525   : > { %v1425_v32 = vmul.f32 0.03125, %v1423_v31  ;;  %v7335_v29 = vld [vmem:[#allocation2 + $0xf] sm:$0xff]  ;;  %v7342_v31 = vld [vmem:[#allocation2 + $0x26] sm:$0xff] }
 0x527   : > { %6164 = vmatmul.mubr.msk.f32.vlgmr.msra.gmra.mrb[20].mxu1 %vm712_vm0, %v1425_v32  ;;  %v7344_v32 = vld [vmem:[#allocation2 + $0x27] sm:$0xff] }
 0x5b1   : > { %v6153_v33 = vpop.f32.mrb[24].mxu0 }
 0x5b2   : > { %v1401_v34 = vmul.f32 %v6153_v33, %v7207_v61  ;;  %v1379_v35 = vpop.f32.mrb[25].mxu0  ;;  %v7351_v33 = vld [vmem:[#allocation2 + $0x20] sm:$0xff] }
 0x5b3   : > { %v1399_v45 = vmul.f32 %v7207_v61, %v1379_v35  ;;  %v6154_v46 = vpop.f32.mrb[26].mxu0  ;;  %9786 = vst [vmem:[#allocation36_spill] sm:$0xff] %v7351_v33 }
 0x5b4   : > { %v7306_v16 = vadd.f32 %v1401_v34, %v7113_v13  ;;  %v1402_v18 = vmul.f32 %v6154_v46, %v7207_v61  ;;  %v1382_v20 = vpop.f32.mrb[27].mxu0  ;;  %v7325_v13 = vld [vmem:[#allocation2 + $0x17] sm:$0xff] }
 0x5b5   : > { %v7328_v26 = vadd.f32 %v1399_v45, %v7103_v9  ;;  %v1400_v27 = vmul.f32 %v7207_v61, %v1382_v20  ;;  %v7357_v34 = vld [vmem:[#allocation2 + $0x10] sm:$0xff] }
 0x5b6   : > { %9781 = vst [vmem:[#allocation31_spill] sm:$0xff] %v7306_v16  ;;  %v7338_v30 = vadd.f32 %v1402_v18, %v7115_v14  ;;  %2203 = vst.msk [vmem:[#allocation2 + $0x18] sm:$0xff] %vm712_vm0, %v7306_v16  ;;  %v1505_v18 = vld [vmem:[%s9579_s15] sm:$0x1] }
 0x5b7   : > { %9783 = vst [vmem:[#allocation33_spill] sm:$0xff] %v7328_v26  ;;  %v2199_v9 = vrot.slane %v7328_v26, %v7215_v7  ;;  %v7349_v61 = vadd.f32 %v1400_v27, %v7105_v10  ;;  %2201 = vst.msk [vmem:[#allocation2 + $0x8] sm:$0xff] %vm712_vm0, %v7328_v26  ;;  %v1430_v10 = vld [vmem:[%s9578_s14] sm:$0x1] }
 0x5b8   : > { %9784 = vst [vmem:[#allocation34_spill] sm:$0xff] %v7338_v30  ;;  %v2208_v14 = vrot.slane %v7338_v30, %v7222_v17  ;;  %9787 = vst [vmem:[#allocation37_spill] sm:$0xff] %v7357_v34 }
 0x5b9   : > { %9785 = vst [vmem:[#allocation35_spill] sm:$0xff] %v7349_v61  ;;  %2204 = vst.msk [vmem:[#allocation2 + $0x20] sm:$0xff] %vm712_vm0, %v7338_v30 }
 0x5ba   : > { %2200 = vst.msk [vmem:[#allocation2] sm:$0xff] %vm712_vm0, %v2199_v9  ;;  %2202 = vst.msk [vmem:[#allocation2 + $0x10] sm:$0xff] %vm712_vm0, %v7349_v61 }
 0x5bb   : > { %2209 = vst.msk [vmem:[#allocation2 + $0x28] sm:$0xff] %vm712_vm0, %v2208_v14  ;;  %v9604_v14 = vstv %s7372_s23 }
 0x5fa   : > { %v1500_v35 = vpop.f32.mrb[20].mxu1 }
 0x5fb   : > { %v1501_v45 = vadd.f32 %v1500_v35, %v1430_v10  ;;  %v6165_v46 = vpop.f32.mrb[21].mxu1 }
 0x5fd   : > { %v1504_v20 = vmax.f32 %v1501_v45, 0.0 }
 0x5ff   : > { %v1506_v27 = vmul.f32 %v1505_v18, %v1504_v20 }
 0x601   : > { %v1508_v9 = vsel %vm1507_vm2, %v1506_v27, 0.0 }
 0x602   : > { %1509 = vadd.xlane.f32.xlu0 %v1508_v9 }
 0x68f   : > { %v1510_v49 = vpop.xlane.xlu0 %1509 }
 0x690   : > { %v1513_v52 = vadd.f32 %v9604_v14, %v1510_v49 }
 0x692   : > { %v1514_v10 = vsub.f32 0.0, %v1513_v52 }
 0x694   : > { %v1515_v35 = vmul.f32 1.442695, %v1514_v10 }
 0x696   : > { %6655 = vpow2.f32 %v1515_v35 }
 0x6a0   : > { %v6656_v46 = vpop.eup %6655 }
 0x6a1   : > { %v1517_v60 = vadd.f32 1.0, %v6656_v46 }
 0x6a3   : > { %6657 = vrcp.f32 %v1517_v60  ;;  %v9602_v60 = vmov 0  }
 0x6ad   : > { %v6658_v45 = vpop.eup %6657 }
 0x6ae   : > { %v1520_v21 = vmul.f32 45.0, %v6658_v45 }
 0x6b0   : > { %v1521_v18 = vadd.f32 5.0, %v1520_v21 }
 0x6b2   : > { %v1522_v20 = vadd.f32 0.5, %v1521_v18  ;;  %v6468_v9 = vtrunc.f32 %v1521_v18 }
 0x6b4   : > { %v6466_v27 = vtrunc.f32 %v1522_v20  ;;  %v6469_v22 = vcvt.f32.s32 %v6468_v9 }
 0x6b6   : > { %v6467_v15 = vcvt.f32.s32 %v6466_v27  ;;  %v1525_v47 = vcvt.s32.f32 %v6469_v22 }
 0x6b8   : > { %v1527_v19 = vcvt.s32.f32 %v6467_v15  ;;  %v1526_v49 = vsub.f32 %v1521_v18, %v1525_v47 }
 0x6ba   : > { %v1528_v33 = vmul.f32 0.5, %v1527_v19  ;;  %vm1533_vm4 = vcmp.eq.f32.partialorder %v1526_v49, 0.5  ;;  %v7390_v49 = vld [vmem:[%s9576_s12 + $0x8] sm:$0xff] }
 0x6bb   : > { %9790 = vst [vmem:[#allocation40_spill] sm:$0xff] %v7390_v49 }
 0x6bc   : > { %v6470_v34 = vtrunc.f32 %v1528_v33 }
 0x6be   : > { %v6471_v6 = vcvt.f32.s32 %v6470_v34  ;;  %v7380_v34 = vadd.s32 8, %v7210_v62 }
 0x6c0   : > { %v1530_v52 = vmul.u32 2, %v6471_v6  ;;  %9788 = vst [vmem:[#allocation38_spill] sm:$0xff] %v7380_v34 }
 0x6c2   : > { %v1531_v10 = vsub.s32 %v6467_v15, %v1530_v52 }
 0x6c4   : > { %vm1532_vm3 = vcmp.eq.s32.totalorder %v1531_v10, 1 }
 0x6c5   : > { %vm1534_vm5 = vmand %vm1533_vm4, %vm1532_vm3 }
 0x6c6   : > { %v1535_v35 = vsel %vm1534_vm5, 1, %v9602_v60 }
 0x6c7   : > { %v1536_v21 = vsub.s32 %v6467_v15, %v1535_v35  ;;  %v7385_v15 = vld [vmem:[%s9576_s12] sm:$0xff] }
 0x6c8   : > { %9789 = vst [vmem:[#allocation39_spill] sm:$0xff] %v7385_v15 }
 0x6c9   : > { %vm1537_vm6 = vcmp.gt.s32.totalorder %v1536_v21, 3 }
 0x6ca   : > { %v1538_v46 = vsel %vm1537_vm6, %v1536_v21, 3 }
 0x6cb   : > { %vm1539_vm7 = vcmp.lt.s32.totalorder %v1538_v46, 16 }
 0x6cc   : > { %v1540_v45 = vsel %vm1539_vm7, %v1538_v46, 16 }
 0x6cd   : > { %v1541_v20 = vcvt.s32.f32 %v1540_v45 }
 0x6cf   : > { %v1542_v27 = vmul.f32 0.5, %v1541_v20 }
 0x6d1   : > { %v6472_v19 = vtrunc.f32 %v1542_v27 }
 0x6d3   : > { %v6473_v22 = vcvt.f32.s32 %v6472_v19 }
 0x6d5   : > { %v1544_v33 = vmul.u32 2, %v6473_v22 }
 0x6d7   : > { %vm1545_vm8 = vcmp.eq.s32.totalorder %v1540_v45, %v1544_v33 }
 0x6d8   : > { %v1546_v47 = vsel %vm1545_vm8, 1, %v9602_v60 }
 0x6d9   : > { %v1547_v6 = vsub.s32 %v1540_v45, %v1546_v47  ;;  %v9791_v45 = vlaneseq }
 0x6db   : > { %vm1548_vm9 = vcmp.gt.s32.totalorder %v1547_v6, 3  ;;  %v1596_v20 = vand.u32 127, %v9791_v45 }
 0x6dc   : > { %v1549_v18 = vsel %vm1548_vm9, %v1547_v6, 3 }
 0x6dd   : > { %v1550_v9 = vcvt.s32.f32 %v1549_v18  ;;  %v1561_v52 = vrot.slane %v1549_v18, %v7215_v7  ;;  %v7405_v6 = vsub.s32 %v1596_v20, %v7210_v62 }
 0x6df   : > { %v1551_v10 = vmul.f32 0.5, %v1550_v9  ;;  %vm1562_vm10 = vcmp.lt.s32.totalorder %v7210_v62, %v1561_v52  ;;  %vm1563_vm11 = vcmp.lt.s32.totalorder %v7380_v34, %v1561_v52  ;;  %9792 = vst [vmem:[#allocation41_spill] sm:$0xff] %v7405_v6 }
 0x6e0   : > { %v1564_v35 = vsel %vm1562_vm10, %v7385_v15, -inf  ;;  %v1565_v21 = vsel %vm1563_vm11, %v7390_v49, -inf }
 0x6e1   : > { %v6474_v46 = vtrunc.f32 %v1551_v10  ;;  %v1566_v27 = vsel %vm712_vm0, %v1564_v35, -inf  ;;  %v1567_v19 = vsel %vm712_vm0, %v1565_v21, -inf  ;;  %v9793_v10 = vmov 0.0  }
 0x6e2   : > { %v1568_v22 = vmax.f32 %v1566_v27, %v1567_v19 }
 0x6e3   : > { %v6475_v33 = vcvt.f32.s32 %v6474_v46 }
 0x6e4   : > { %v1569_v47 = vrot.slane %v1568_v22, 4 }
 0x6e5   : > { %v5778_v18 = vadd.s32 4294967289, %v6475_v33 }
 0x6e6   : > { %v1570_v9 = vmax.f32 %v1568_v22, %v1569_v47 }
 0x6e7   : > { %v1603_v60 = vrot.slane %v5778_v18, %v7215_v7 }
 0x6e8   : > { %v1571_v14 = vrot.slane %v1570_v9, 2 }
 0x6e9   : > { %vm1604_vm13 = vcmp.eq.s32.totalorder %v7405_v6, %v1603_v60  ;;  %v1930_v6 = vsel %vm712_vm0, %v7338_v30, 0.0 }
 0x6ea   : > { %v5779_v45 = vsel %vm1604_vm13, 1.0, %v9793_v10  ;;  %v1572_v58 = vmax.f32 %v1570_v9, %v1571_v14 }
 0x6eb   : > { %6170 = vmatprep.mubr.msk.f32.mxu1 %vm1610_vm12, %v5779_v45  ;;  %v1926_v45 = vsel %vm712_vm0, %v7349_v61, 0.0 }
 0x6ec   : > { %v1573_v35 = vrot.slane %v1572_v58, 1 }
 0x6ee   : > { %v1574_v21 = vmax.f32 %v1572_v58, %v1573_v35 }
 0x6f0   : > { %v1575_v46 = vsub.f32 %v7385_v15, %v1574_v21  ;;  %v1576_v27 = vsub.f32 %v7390_v49, %v1574_v21  ;;  %v1925_v21 = vsel %vm712_vm0, %v7328_v26, 0.0 }
 0x6f2   : > { %v1577_v19 = vmul.f32 1.442695, %v1575_v46  ;;  %v1579_v33 = vmul.f32 1.442695, %v1576_v27  ;;  %v1927_v27 = vadd.f32 %v1926_v45, %v1925_v21 }
 0x6f4   : > { %6659 = vpow2.f32 %v1577_v19 }
 0x6f5   : > { %6661 = vpow2.f32 %v1579_v33  ;;  %v1928_v33 = vsel %vm712_vm0, %v7306_v16, 0.0 }
 0x6f6   : > { %v1929_v52 = vadd.f32 %v1928_v33, %v1927_v27  ;;  %v9795_v27 = vmov 0.0|0.0  }
 0x6f8   : > { %v1931_v15 = vadd.f32 %v1930_v6, %v1929_v52 }
 0x6fe   : > { %v6660_v22 = vpop.eup %6659 }
 0x6ff   : > { %v6662_v47 = vpop.eup %6661  ;;  %v1581_v18 = vsel %vm1562_vm10, %v6660_v22, 0.0 }
 0x700   : > { %v1582_v14 = vsel %vm1563_vm11, %v6662_v47, 0.0  ;;  %v1583_v9 = vsel %vm712_vm0, %v1581_v18, 0.0 }
 0x701   : > { %v1584_v58 = vsel %vm712_vm0, %v1582_v14, 0.0 }
 0x702   : > { %v1585_v35 = vadd.f32 %v1584_v58, %v1583_v9  ;;  %v1932_v9 = vrot.slane %v1931_v15, 4 }
 0x704   : > { %v1586_v46 = vrot.slane %v1585_v35, 4  ;;  %v1933_v58 = vadd.f32 %v1932_v9, %v1931_v15  ;;  %v7447_v15 = vsub.s32 3, %v7210_v62 }
 0x706   : > { %v1587_v19 = vadd.f32 %v1586_v46, %v1585_v35  ;;  %v1934_v61 = vrot.slane %v1933_v58, 2  ;;  %v7428_v35 = vsub.s32 %v1596_v20, %v7380_v34  ;;  %9798 = vst [vmem:[#allocation45_spill] sm:$0xff] %v7447_v15 }
 0x708   : > { %v1588_v22 = vrot.slane %v1587_v19, 2  ;;  %9794 = vst [vmem:[#allocation42_spill] sm:$0xff] %v7428_v35  ;;  %v1935_v46 = vadd.f32 %v1934_v61, %v1933_v58  ;;  %vm1605_vm14 = vcmp.eq.s32.totalorder %v7428_v35, %v1603_v60  ;;  %v7441_v61 = vsub.s32 1, %v7210_v62 }
 0x709   : > { %v7444_v60 = vsub.s32 2, %v7210_v62 }
 0x70a   : > { %v1589_v47 = vadd.f32 %v1588_v22, %v1587_v19  ;;  %v1936_v6 = vrot.slane %v1935_v46, 1  ;;  %9796 = vst [vmem:[#allocation43_spill] sm:$0xff] %v7441_v61 }
 0x70b   : > { %9797 = vst [vmem:[#allocation44_spill] sm:$0xff] %v7444_v60 }
 0x70c   : > { %v1590_v49 = vrot.slane %v1589_v47, 1 }
 0x70e   : > { %v1591_v57 = vadd.f32 %v1590_v49, %v1589_v47  ;;  %v7453_v49 = vsub.s32 5, %v7210_v62 }
 0x710   : > { %6663 = vrcp.f32 %v1591_v57  ;;  %v5780_v57 = vsel %vm1605_vm14, 1.0, %v9793_v10  ;;  %9800 = vst [vmem:[#allocation47_spill] sm:$0xff] %v7453_v49  ;;  %vm2908_vm14 = vcmask 392192  }
 0x71a   : > { %v6664_v26 = vpop.eup %6663 }
 0x71b   : > { %v1593_v56 = vmul.f32 %v6664_v26, %v1581_v18  ;;  %v1594_v45 = vmul.f32 %v6664_v26, %v1582_v14 }
 0x71d   : > { %v6401_v21 = vpack.c.bf16 %v1594_v45, %v1593_v56  ;;  %v1937_v56 = vadd.f32 %v1936_v6, %v1935_v46 }
 0x71f   : > { %6402 = vmatprep.subr.bf16.mxu1 %v6401_v21  ;;  %v1938_v26 = vmul.f32 0.03125, %v1937_v56 }
 0x720   : > { %6404 = vmatpush3.bf16.msra.mxu1 %v6401_v21 }
 0x721   : > { %6405 = vmatprep.subr.bf16.mxu1 %v9795_v27 }
 0x723   : > { %6171 = vmatmul.mubr.msk.f32.vlgmr.msra.gmra.mrb[22].mxu1 %vm1610_vm12, %v5780_v57 }
 0x724   : > { %6407 = vmatpush3.bf16.msra.mxu1 %v7193_v50  ;;  %6181 = vmatprep.mubr.msk.f32.mxu1 %vm6884_vm1, %v9793_v10  ;;  %v7450_v50 = vsub.s32 4, %v7210_v62 }
 0x725   : > { %6408 = vmatprep.subr.bf16.mxu1 %v9795_v27 }
 0x726   : > { %9799 = vst [vmem:[#allocation46_spill] sm:$0xff] %v7450_v50 }
 0x728   : > { %6410 = vmatpush3.bf16.msra.mxu1 %v7201_v53  ;;  %v7456_v53 = vsub.s32 6, %v7210_v62 }
 0x72a   : > { %9801 = vst [vmem:[#allocation48_spill] sm:$0xff] %v7456_v53 }
 0x72b   : > { %6182 = vmatmul.mubr.msk.f32.vlgmr.msra.gmra.mrb[24].mxu1 %vm712_vm0, %v1938_v26 }
 0x7f6   : > { %v6172_v20 = vpop.f32.mrb[22].mxu1 }
 0x7f7   : > { %v1822_v18 = vrot.slane %v6172_v20, %v7215_v7  ;;  %v1835_v14 = vrot.slane %v6172_v20, %v7441_v61  ;;  %v1848_v19 = vrot.slane %v6172_v20, %v7444_v60  ;;  %v1861_v33 = vrot.slane %v6172_v20, %v7447_v15  ;;  %v1683_v22 = vpop.f32.mrb[23].mxu1 }
 0x7f8   : > { %v1874_v52 = vrot.slane %v6172_v20, %v7450_v50  ;;  %v1887_v47 = vrot.slane %v6172_v20, %v7453_v49  ;;  %v1900_v9 = vrot.slane %v6172_v20, %v7456_v53  ;;  %v1713_v58 = vrot.slane %v1683_v22, %v7215_v7 }
 0x7f9   : > { %v7467_v45 = vmul.f32 %v1822_v18, %v7293_v59  ;;  %v7470_v21 = vmul.f32 %v1822_v18, %v7272_v43  ;;  %v7473_v46 = vmul.f32 %v1822_v18, %v7258_v36  ;;  %v7476_v6 = vmul.f32 %v1822_v18, %v7311_v4 }
 0x7fa   : > { %v7479_v57 = vmul.f32 %v1835_v14, %v7295_v63  ;;  %v7482_v56 = vmul.f32 %v1835_v14, %v7274_v44  ;;  %v7485_v26 = vmul.f32 %v1835_v14, %v7260_v37  ;;  %v7488_v20 = vmul.f32 %v1835_v14, %v7313_v8 }
 0x7fb   : > { %v7491_v27 = vmul.f32 %v1848_v19, %v7297_v0  ;;  %v7494_v30 = vmul.f32 %v1848_v19, %v7299_v1  ;;  %v7497_v4 = vmul.f32 %v1848_v19, %v7262_v38  ;;  %v7500_v18 = vmul.f32 %v1848_v19, %v7315_v23 }
 0x7fc   : > { %v7503_v16 = vmul.f32 %v1861_v33, %v7301_v2  ;;  %v7506_v35 = vmul.f32 %v1861_v33, %v7303_v12  ;;  %v7509_v8 = vmul.f32 %v1861_v33, %v7264_v39  ;;  %v7512_v14 = vmul.f32 %v1861_v33, %v7317_v5 }
 0x7fd   : > { %v7515_v10 = vmul.f32 %v1874_v52, %v7331_v3  ;;  %v7518_v34 = vmul.f32 %v1874_v52, %v7321_v25  ;;  %v7521_v23 = vmul.f32 %v1874_v52, %v7266_v40  ;;  %v7524_v19 = vmul.f32 %v1874_v52, %v7319_v24 }
 0x7fe   : > { %v7527_v62 = vmul.f32 %v1887_v47, %v7333_v28  ;;  %v7530_v7 = vmul.f32 %v1887_v47, %v7323_v11  ;;  %v7533_v5 = vmul.f32 %v1887_v47, %v7268_v41  ;;  %v7536_v33 = vmul.f32 %v1887_v47, %v7342_v31 }
 0x7ff   : > { %9802 = vst [vmem:[#allocation49_spill] sm:$0xff] %v7515_v10  ;;  %9803 = vst [vmem:[#allocation50_spill] sm:$0xff] %v7518_v34  ;;  %v2013_v10 = vpop.f32.mrb[24].mxu1  ;;  %v7539_v34 = vmul.f32 %v1900_v9, %v7335_v29  ;;  %v7545_v24 = vmul.f32 %v1900_v9, %v7270_v42  ;;  %v7548_v52 = vmul.f32 %v1900_v9, %v7344_v32 }
 0x800   : > { %9804 = vst [vmem:[#allocation51_spill] sm:$0xff] %v7521_v23  ;;  %9805 = vst [vmem:[#allocation52_spill] sm:$0xff] %v7527_v62  ;;  %v7542_v23 = vmul.f32 %v1900_v9, %v7325_v13  ;;  %v1714_v31 = vmul.f32 %v1713_v58, %v7279_v48  ;;  %v1715_v47 = vmul.f32 %v1713_v58, %v7293_v59 }
 0x801   : > { %9806 = vst [vmem:[#allocation53_spill] sm:$0xff] %v7530_v7  ;;  %9807 = vst [vmem:[#allocation54_spill] sm:$0xff] %v7533_v5  ;;  %v1943_v5 = vld [vmem:[%s9578_s14] sm:$0x1]  ;;  %v6183_v7 = vpop.f32.mrb[25].mxu1  ;;  %v1749_v32 = vrot.slane %v1683_v22, %v7447_v15  ;;  %v1761_v9 = vrot.slane %v1683_v22, %v7450_v50  ;;  %v1809_v48 = vrot.slane %v1683_v22, %v7222_v17 }
 0x802   : > { %9808 = vst [vmem:[#allocation55_spill] sm:$0xff] %v7536_v33  ;;  %9809 = vst [vmem:[#allocation56_spill] sm:$0xff] %v7539_v34  ;;  %v1716_v34 = vmul.f32 %v1713_v58, %v7272_v43  ;;  %v1717_v33 = vmul.f32 %v1713_v58, %v7258_v36  ;;  %v1793_v7 = vrot.slane %v1683_v22, %v7456_v53 }
 0x803   : > { %9810 = vst [vmem:[#allocation57_spill] sm:$0xff] %v7542_v23  ;;  %9811 = vst [vmem:[#allocation58_spill] sm:$0xff] %v7545_v24  ;;  %v1725_v23 = vrot.slane %v1683_v22, %v7441_v61  ;;  %v1737_v24 = vrot.slane %v1683_v22, %v7444_v60  ;;  %v7564_v62 = vadd.f32 %v2013_v10, %v1943_v5  ;;  %v9814_v5 = vld [vmem:[#allocation28_spill] sm:$0xff]  ;;  %v9816_v61 = vld [vmem:[#allocation30_spill] sm:$0xff] }
 0x804   : > { %9812 = vst [vmem:[#allocation59_spill] sm:$0xff] %v7548_v52  ;;  %v1777_v52 = vrot.slane %v1683_v22, %v7453_v49  ;;  %v1750_v22 = vmul.f32 %v1749_v32, %v7285_v55  ;;  %v1751_v10 = vmul.f32 %v1749_v32, %v7301_v2 }
 0x805   : > { %9813 = vst [vmem:[#allocation60_spill] sm:$0xff] %v7564_v62  ;;  %v1726_v43 = vmul.f32 %v1725_v23, %v7281_v51  ;;  %v1727_v36 = vmul.f32 %v1725_v23, %v7295_v63  ;;  %v1728_v59 = vmul.f32 %v1725_v23, %v7274_v44  ;;  %v1729_v58 = vmul.f32 %v1725_v23, %v7260_v37  ;;  %v9815_v23 = vld [vmem:[#allocation29_spill] sm:$0xff] }
 0x806   : > { %v1738_v15 = vmul.f32 %v1737_v24, %v7283_v54  ;;  %v1739_v50 = vmul.f32 %v1737_v24, %v7297_v0  ;;  %v1740_v49 = vmul.f32 %v1737_v24, %v7299_v1  ;;  %v1741_v53 = vmul.f32 %v1737_v24, %v7262_v38  ;;  %v9818_v62 = vld [vmem:[#allocation37_spill] sm:$0xff] }
 0x807   : > { %v1752_v51 = vmul.f32 %v1749_v32, %v7303_v12  ;;  %v1753_v63 = vmul.f32 %v1749_v32, %v7264_v39  ;;  %v1762_v44 = vmul.f32 %v1761_v9, %v9814_v5  ;;  %v1763_v37 = vmul.f32 %v1761_v9, %v7331_v3 }
 0x808   : > { %v1764_v54 = vmul.f32 %v1761_v9, %v7321_v25  ;;  %v1765_v0 = vmul.f32 %v1761_v9, %v7266_v40  ;;  %v1778_v1 = vmul.f32 %v1777_v52, %v9815_v23  ;;  %v1779_v38 = vmul.f32 %v1777_v52, %v7333_v28  ;;  %v9817_v23 = vld [vmem:[#allocation32_spill] sm:$0xff] }
 0x809   : > { %v1780_v55 = vmul.f32 %v1777_v52, %v7323_v11  ;;  %v1781_v2 = vmul.f32 %v1777_v52, %v7268_v41  ;;  %v1766_v24 = vadd.f32 %v1762_v44, %v1714_v31  ;;  %v1767_v12 = vadd.f32 %v1763_v37, %v1715_v47  ;;  %v9819_v52 = vld [vmem:[#allocation27_spill] sm:$0xff] }
 0x80a   : > { %v1768_v17 = vadd.f32 %v1764_v54, %v1716_v34  ;;  %v1769_v39 = vadd.f32 %v1765_v0, %v1717_v33  ;;  %v1782_v32 = vadd.f32 %v1778_v1, %v1726_v43  ;;  %v1783_v5 = vadd.f32 %v1779_v38, %v1727_v36  ;;  %v9820_v34 = vld [vmem:[#allocation36_spill] sm:$0xff]  ;;  %v9827_v54 = vld [vmem:[#allocation55_spill] sm:$0xff]  ;;  %v9829_v1 = vld [vmem:[#allocation57_spill] sm:$0xff] }
 0x80b   : > { %v1784_v60 = vadd.f32 %v1780_v55, %v1728_v59  ;;  %v1785_v3 = vadd.f32 %v1781_v2, %v1729_v58  ;;  %v1794_v25 = vmul.f32 %v1793_v7, %v9816_v61  ;;  %v1795_v40 = vmul.f32 %v1793_v7, %v7335_v29  ;;  %v9828_v0 = vld [vmem:[#allocation56_spill] sm:$0xff]  ;;  %v9830_v38 = vld [vmem:[#allocation58_spill] sm:$0xff]  ;;  %v9831_v2 = vld [vmem:[#allocation59_spill] sm:$0xff] }
 0x80c   : > { %v1796_v9 = vmul.f32 %v1793_v7, %v7325_v13  ;;  %v1797_v28 = vmul.f32 %v1793_v7, %v7270_v42  ;;  %v1810_v11 = vmul.f32 %v1809_v48, %v9817_v23  ;;  %v1811_v41 = vmul.f32 %v1809_v48, %v9818_v62 }
 0x80d   : > { %v1812_v31 = vmul.f32 %v1809_v48, %v9819_v52  ;;  %v1813_v33 = vmul.f32 %v1809_v48, %v9820_v34  ;;  %v1798_v47 = vadd.f32 %v1794_v25, %v1738_v15  ;;  %v1799_v43 = vadd.f32 %v1795_v40, %v1739_v50 }
 0x80e   : > { %v1800_v36 = vadd.f32 %v1796_v9, %v1740_v49  ;;  %v1801_v59 = vadd.f32 %v1797_v28, %v1741_v53  ;;  %v1814_v58 = vadd.f32 %v1810_v11, %v1750_v22  ;;  %v1815_v61 = vadd.f32 %v1811_v41, %v1751_v10  ;;  %v9823_v22 = vld [vmem:[#allocation51_spill] sm:$0xff]  ;;  %v9824_v10 = vld [vmem:[#allocation52_spill] sm:$0xff]  ;;  %v2018_v9 = vld [vmem:[%s9579_s15] sm:$0x1] }
 0x80f   : > { %v1816_v44 = vadd.f32 %v1812_v31, %v1752_v51  ;;  %v1817_v29 = vadd.f32 %v1813_v33, %v1753_v63  ;;  %v1827_v13 = vadd.f32 %v7467_v45, %v1766_v24  ;;  %v1828_v42 = vadd.f32 %v7470_v21, %v1767_v12  ;;  %v9825_v51 = vld [vmem:[#allocation53_spill] sm:$0xff]  ;;  %v9826_v63 = vld [vmem:[#allocation54_spill] sm:$0xff]  ;;  %v9832_v28 = vld [vmem:[#allocation60_spill] sm:$0xff] }
 0x810   : > { %v1829_v7 = vadd.f32 %v7473_v46, %v1768_v17  ;;  %v1830_v62 = vadd.f32 %v7476_v6, %v1769_v39  ;;  %v1840_v37 = vadd.f32 %v7479_v57, %v1782_v32  ;;  %v1841_v48 = vadd.f32 %v7482_v56, %v1783_v5  ;;  %v9821_v56 = vld [vmem:[#allocation49_spill] sm:$0xff] }
 0x811   : > { %v1842_v15 = vadd.f32 %v7485_v26, %v1784_v60  ;;  %v1843_v50 = vadd.f32 %v7488_v20, %v1785_v3  ;;  %v1853_v49 = vadd.f32 %v7491_v27, %v1798_v47  ;;  %v1854_v53 = vadd.f32 %v7494_v30, %v1799_v43  ;;  %v9822_v26 = vld [vmem:[#allocation50_spill] sm:$0xff]  ;;  %v6606_v43 = vld [vmem:[%s9571_s7 + $0x8] sm:$0xff]  }
 0x812   : > { %v1855_v45 = vadd.f32 %v7497_v4, %v1800_v36  ;;  %v1856_v21 = vadd.f32 %v7500_v18, %v1801_v59  ;;  %v1866_v17 = vadd.f32 %v7503_v16, %v1814_v58  ;;  %v1867_v46 = vadd.f32 %v7506_v35, %v1815_v61  ;;  %v6605_v47 = vld [vmem:[%s9571_s7] sm:$0xff]   ;;  %v681_v59 = vld [vmem:[%s7635_s28 + $0x8] sm:$0xff]  ;;  %v682_v61 = vld [vmem:[%s7635_s28 + $0x10] sm:$0xff] }
 0x813   : > { %v1868_v6 = vadd.f32 %v7509_v8, %v1816_v44  ;;  %v1869_v57 = vadd.f32 %v7512_v14, %v1817_v29  ;;  %v1879_v60 = vadd.f32 %v9821_v56, %v1827_v13  ;;  %v1880_v20 = vadd.f32 %v9822_v26, %v1828_v42  ;;  %v680_v36 = vld [vmem:[%s7635_s28] sm:$0xff]  ;;  %6203 = vmatprep.subr.bf16.mxu0 %v6605_v47  ;;  %v683_v44 = vld [vmem:[%s7635_s28 + $0x18] sm:$0xff] }
 0x814   : > { %v1881_v27 = vadd.f32 %v9823_v22, %v1829_v7  ;;  %v1882_v30 = vadd.f32 %v7524_v19, %v1830_v62  ;;  %v1892_v4 = vadd.f32 %v9824_v10, %v1840_v37  ;;  %v1893_v18 = vadd.f32 %v9825_v51, %v1841_v48  ;;  %6204 = vmatpush3.bf16.msra.mxu0 %v6605_v47  ;;  %v684_v48 = vld [vmem:[%s7635_s28 + $0x20] sm:$0xff]  ;;  %v9846_v47 = vld [vmem:[#allocation40_spill] sm:$0xff] }
 0x815   : > { %v1894_v16 = vadd.f32 %v9826_v63, %v1842_v15  ;;  %v1895_v35 = vadd.f32 %v9827_v54, %v1843_v50  ;;  %v1905_v8 = vadd.f32 %v9828_v0, %v1853_v49  ;;  %v1906_v14 = vadd.f32 %v9829_v1, %v1854_v53  ;;  %6205 = vmatprep.subr.bf16.mxu0 %v6606_v43  ;;  %v685_v15 = vld [vmem:[%s7635_s28 + $0x28] sm:$0xff]  ;;  %v686_v49 = vld [vmem:[%s7635_s28 + $0x30] sm:$0xff]  ;;  %v687_v53 = vld [vmem:[%s7635_s28 + $0x38] sm:$0xff] }
 0x816   : > { %v1907_v55 = vadd.f32 %v9830_v38, %v1855_v45  ;;  %v1908_v24 = vadd.f32 %v9831_v2, %v1856_v21  ;;  %v1909_v12 = vadd.f32 %v1892_v4, %v1879_v60  ;;  %v1910_v39 = vadd.f32 %v1893_v18, %v1880_v20 }
 0x817   : > { %v1911_v32 = vadd.f32 %v1894_v16, %v1881_v27  ;;  %v1912_v19 = vadd.f32 %v1895_v35, %v1882_v30  ;;  %v1913_v5 = vadd.f32 %v1905_v8, %v1866_v17  ;;  %v1914_v3 = vadd.f32 %v1906_v14, %v1867_v46 }
 0x818   : > { %v1915_v25 = vadd.f32 %v1907_v55, %v1868_v6  ;;  %v1916_v40 = vadd.f32 %v1908_v24, %v1869_v57  ;;  %v2017_v23 = vmax.f32 %v9832_v28, 0.0  ;;  %v7645_v58 = vpack.c.bf16 %v681_v59, %v680_v36  ;;  %6206 = vmatpush3.bf16.msra.mxu0 %v6606_v43 }
 0x819   : > { %v1917_v11 = vadd.f32 %v1913_v5, %v1909_v12  ;;  %v1918_v41 = vadd.f32 %v1914_v3, %v1910_v39  ;;  %v7651_v29 = vpack.c.bf16 %v683_v44, %v682_v61  ;;  %v9836_v42 = vstv %s7372_s23  ;;  %v688_v12 = vld [vmem:[%s7635_s28 + $0x40] sm:$0xff]  ;;  %v689_v39 = vld [vmem:[%s7635_s28 + $0x48] sm:$0xff]  ;;  %v691_v3 = vld [vmem:[%s7635_s28 + $0x58] sm:$0xff] }
 0x81a   : > { %v1919_v52 = vadd.f32 %v1915_v25, %v1911_v32  ;;  %v1920_v31 = vadd.f32 %v1916_v40, %v1912_v19  ;;  %v2019_v34 = vmul.f32 %v2018_v9, %v2017_v23  ;;  %9834 = vst [vmem:[#allocation28_spill] sm:$0xff] %v7645_v58  ;;  %6207 = vmatprep.mubr.msk.bf16.mxu0 %vm712_vm0, %v7645_v58  ;;  %v9839_v54 = vmov 0   ;;  %v690_v32 = vld [vmem:[%s7635_s28 + $0x50] sm:$0xff]  ;;  %v9842_v23 = vld [vmem:[#allocation21_spill] sm:$0xff]  ;;  %s6887_s28 = smov [#allocation9]  }
 0x81b   : > { %1921 = vst.msk [vmem:[#allocation3] sm:$0xff] %vm712_vm0, %v1917_v11  ;;  %1922 = vst.msk [vmem:[#allocation3 + $0x8] sm:$0xff] %vm712_vm0, %v1918_v41  ;;  %6208 = vmatmul.mubr.msk.bf16.vlgmr.msra.gmra.mrb[28].mxu0 %vm712_vm0, %v7651_v29  ;;  %v7659_v50 = vpack.c.bf16 %v685_v15, %v684_v48  ;;  %v7663_v45 = vpack.c.bf16 %v687_v53, %v686_v49  ;;  %v7674_v5 = vpack.c.bf16 %v689_v39, %v688_v12  ;;  %v9847_v15 = vld [vmem:[#allocation41_spill] sm:$0xff]  ;;  %v9848_v49 = vmov 0.0   ;;  %v9851_v12 = vld [vmem:[#allocation24_spill] sm:$0xff]  ;;  %s6781_s17 = sshll.u32 %s6887_s28, 4  ;;  %s6782_s17 = int_to_ptr.vmem [resolvable:$false] %s6781_s17 }
 0x81c   : > { %1923 = vst.msk [vmem:[#allocation3 + $0x10] sm:$0xff] %vm712_vm0, %v1919_v52  ;;  %1924 = vst.msk [vmem:[#allocation3 + $0x18] sm:$0xff] %vm712_vm0, %v1920_v31  ;;  %v2020_v33 = vsel %vm1507_vm2, %v2019_v34, 0.0  ;;  %v7677_v40 = vpack.c.bf16 %v691_v3, %v690_v32  ;;  %v9843_v52 = vld [vmem:[#allocation20_spill] sm:$0xff]  ;;  %v9844_v31 = vld [vmem:[#allocation38_spill] sm:$0xff] }
 0x81d   : > { %2021 = vadd.xlane.f32.xlu1 %v2020_v33  ;;  %9835 = vst [vmem:[#allocation29_spill] sm:$0xff] %v7651_v29  ;;  %9837 = vst [vmem:[#allocation30_spill] sm:$0xff] %v7659_v50  ;;  %6211 = vmatprep.mubr.msk.bf16.mxu0 %vm712_vm0, %v7659_v50  ;;  %v9845_v34 = vld [vmem:[#allocation39_spill] sm:$0xff]  ;;  %v9853_v32 = vld [vmem:[#allocation26_spill] sm:$0xff] }
 0x81e   : > { %9838 = vst [vmem:[#allocation32_spill] sm:$0xff] %v7663_v45  ;;  %9840 = vst [vmem:[#allocation37_spill] sm:$0xff] %v7674_v5  ;;  %v9855_v3 = vld [vmem:[#allocation42_spill] sm:$0xff] }
 0x81f   : > { %9841 = vst [vmem:[#allocation27_spill] sm:$0xff] %v7677_v40 }
 0x823   : > { %6212 = vmatmul.mubr.msk.bf16.gmra.mrb[32].mxu0 %vm712_vm0, %v7663_v45  ;;  %v2400_v45 = vld [vmem:[#allocation2 + $0x27] sm:$0xff] }
 0x824   : > { %6215 = vmatprep.mubr.msk.bf16.mxu0 %vm712_vm0, %v7674_v5 }
 0x82b   : > { %6216 = vmatmul.mubr.msk.bf16.gmra.mrb[36].mxu0 %vm712_vm0, %v7677_v40 }
 0x8aa   : > { %v2022_v13 = vpop.xlane.xlu1 %2021 }
 0x8ab   : > { %v2025_v7 = vadd.f32 %v2022_v13, %v9836_v42 }
 0x8ad   : > { %v2026_v62 = vsub.f32 0.0, %v2025_v7 }
 0x8af   : > { %v2027_v37 = vmul.f32 1.442695, %v2026_v62 }
 0x8b1   : > { %6665 = vpow2.f32 %v2027_v37 }
 0x8bb   : > { %v6666_v21 = vpop.eup %6665 }
 0x8bc   : > { %v2029_v17 = vadd.f32 1.0, %v6666_v21 }
 0x8be   : > { %6667 = vrcp.f32 %v2029_v17 }
 0x8c8   : > { %v6668_v46 = vpop.eup %6667 }
 0x8c9   : > { %v2032_v6 = vmul.f32 45.0, %v6668_v46 }
 0x8cb   : > { %v2033_v57 = vadd.f32 5.0, %v2032_v6 }
 0x8cd   : > { %v2034_v56 = vadd.f32 0.5, %v2033_v57  ;;  %v6478_v26 = vtrunc.f32 %v2033_v57 }
 0x8cf   : > { %v6476_v60 = vtrunc.f32 %v2034_v56  ;;  %v6479_v22 = vcvt.f32.s32 %v6478_v26 }
 0x8d1   : > { %v6477_v20 = vcvt.f32.s32 %v6476_v60  ;;  %v2037_v10 = vcvt.s32.f32 %v6479_v22 }
 0x8d3   : > { %v2039_v27 = vcvt.s32.f32 %v6477_v20  ;;  %v2038_v18 = vsub.f32 %v2033_v57, %v2037_v10 }
 0x8d5   : > { %v2040_v30 = vmul.f32 0.5, %v2039_v27  ;;  %vm2045_vm3 = vcmp.eq.f32.partialorder %v2038_v18, 0.5 }
 0x8d7   : > { %v6480_v4 = vtrunc.f32 %v2040_v30 }
 0x8d9   : > { %v6481_v51 = vcvt.f32.s32 %v6480_v4 }
 0x8db   : > { %v2042_v63 = vmul.u32 2, %v6481_v51 }
 0x8dd   : > { %v2043_v16 = vsub.s32 %v6477_v20, %v2042_v63 }
 0x8df   : > { %vm2044_vm15 = vcmp.eq.s32.totalorder %v2043_v16, 1 }
 0x8e0   : > { %vm2046_vm4 = vmand %vm2045_vm3, %vm2044_vm15 }
 0x8e1   : > { %v2047_v35 = vsel %vm2046_vm4, 1, %v9839_v54 }
 0x8e2   : > { %v2048_v0 = vsub.s32 %v6477_v20, %v2047_v35 }
 0x8e4   : > { %vm2049_vm5 = vcmp.gt.s32.totalorder %v2048_v0, 3 }
 0x8e5   : > { %v2050_v8 = vsel %vm2049_vm5, %v2048_v0, 3 }
 0x8e6   : > { %vm2051_vm6 = vcmp.lt.s32.totalorder %v2050_v8, 16 }
 0x8e7   : > { %v2052_v1 = vsel %vm2051_vm6, %v2050_v8, 16 }
 0x8e8   : > { %v2053_v14 = vcvt.s32.f32 %v2052_v1 }
 0x8ea   : > { %v2054_v38 = vmul.f32 0.5, %v2053_v14 }
 0x8ec   : > { %v6482_v55 = vtrunc.f32 %v2054_v38  ;;  %v7706_v38 = vld [vmem:[#allocation3] sm:$0xff] }
 0x8ed   : > { %9849 = vst [vmem:[#allocation36_spill] sm:$0xff] %v7706_v38  ;;  %v7715_v39 = vsub.f32 %v9851_v12, %v7706_v38  ;;  %v9867_v12 = vld [vmem:[#allocation45_spill] sm:$0xff]  ;;  %v2361_v38 = vld [vmem:[#allocation2 + $0x24] sm:$0xff] }
 0x8ee   : > { %v6483_v2 = vcvt.f32.s32 %v6482_v55  ;;  %v7708_v55 = vld [vmem:[#allocation3 + $0x8] sm:$0xff] }
 0x8ef   : > { %9850 = vst [vmem:[#allocation49_spill] sm:$0xff] %v7708_v55  ;;  %9852 = vst [vmem:[#allocation50_spill] sm:$0xff] %v7715_v39 }
 0x8f0   : > { %v2056_v24 = vmul.u32 2, %v6483_v2 }
 0x8f2   : > { %vm2057_vm7 = vcmp.eq.s32.totalorder %v2052_v1, %v2056_v24  ;;  %v6607_v24 = vld [vmem:[%s9570_s6] sm:$0xff]  }
 0x8f3   : > { %v2058_v19 = vsel %vm2057_vm7, 1, %v9839_v54  ;;  %v2374_v54 = vld [vmem:[#allocation2 + $0x25] sm:$0xff] }
 0x8f4   : > { %v2059_v25 = vsub.s32 %v2052_v1, %v2058_v19  ;;  %v7719_v19 = vsub.f32 %v9853_v32, %v7708_v55 }
 0x8f6   : > { %vm2060_vm8 = vcmp.gt.s32.totalorder %v2059_v25, 3  ;;  %9854 = vst [vmem:[#allocation51_spill] sm:$0xff] %v7719_v19 }
 0x8f7   : > { %v2061_v9 = vsel %vm2060_vm8, %v2059_v25, 3  ;;  %v6608_v25 = vld [vmem:[%s9570_s6 + $0x8] sm:$0xff]  }
 0x8f8   : > { %v2062_v28 = vcvt.s32.f32 %v2061_v9  ;;  %v2070_v11 = vrot.slane %v2061_v9, %v9842_v23 }
 0x8fa   : > { %v2063_v41 = vmul.f32 0.5, %v2062_v28  ;;  %vm2071_vm9 = vcmp.lt.s32.totalorder %v9843_v52, %v2070_v11  ;;  %vm2072_vm10 = vcmp.lt.s32.totalorder %v9844_v31, %v2070_v11  ;;  %v2446_v28 = vpack.c.bf16 %v7719_v19, %v7715_v39  ;;  %v7728_v11 = vld [vmem:[#allocation3 + $0x10] sm:$0xff] }
 0x8fb   : > { %v2073_v33 = vsel %vm2071_vm9, %v9845_v34, -inf  ;;  %v2074_v43 = vsel %vm2072_vm10, %v9846_v47, -inf  ;;  %9856 = vst [vmem:[#allocation52_spill] sm:$0xff] %v7728_v11  ;;  %v2277_v19 = vld [vmem:[#allocation2 + $0x1e] sm:$0xff] }
 0x8fc   : > { %v6484_v36 = vtrunc.f32 %v2063_v41  ;;  %v2075_v59 = vsel %vm712_vm0, %v2073_v33, -inf  ;;  %v2076_v61 = vsel %vm712_vm0, %v2074_v43, -inf  ;;  %v7730_v41 = vld [vmem:[#allocation3 + $0x18] sm:$0xff] }
 0x8fd   : > { %v2077_v44 = vmax.f32 %v2075_v59, %v2076_v61  ;;  %9857 = vst [vmem:[#allocation53_spill] sm:$0xff] %v7730_v41  ;;  %v6209_v61 = vpop.f32.mrb[28].mxu0 }
 0x8fe   : > { %v6485_v13 = vcvt.f32.s32 %v6484_v36  ;;  %v6609_v36 = vld [vmem:[%s9572_s8] sm:$0xff]  }
 0x8ff   : > { %v2078_v42 = vrot.slane %v2077_v44, 4 }
 0x900   : > { %v5784_v7 = vadd.s32 4294967289, %v6485_v13 }
 0x901   : > { %v2079_v62 = vmax.f32 %v2077_v44, %v2078_v42  ;;  %v2617_v44 = vpop.f32.mrb[29].mxu0 }
 0x902   : > { %v2108_v37 = vrot.slane %v5784_v7, %v9842_v23  ;;  %v6210_v13 = vpop.f32.mrb[30].mxu0 }
 0x903   : > { %v2080_v48 = vrot.slane %v2079_v62, 2  ;;  %v2767_v42 = vpack.c.bf16 %v6210_v13, %v6209_v61  ;;  %v2620_v7 = vpop.f32.mrb[31].mxu0  ;;  %v9869_v61 = vld [vmem:[#allocation47_spill] sm:$0xff]  ;;  %v9870_v13 = vld [vmem:[#allocation48_spill] sm:$0xff] }
 0x904   : > { %vm2109_vm11 = vcmp.eq.s32.totalorder %v9847_v15, %v2108_v37  ;;  %vm2110_vm13 = vcmp.eq.s32.totalorder %v9855_v3, %v2108_v37  ;;  %v7839_v3 = vld [vmem:[#allocation2 + $0xe] sm:$0xff] }
 0x905   : > { %v5785_v53 = vsel %vm2109_vm11, 1.0, %v9848_v49  ;;  %v2081_v21 = vmax.f32 %v2079_v62, %v2080_v48  ;;  %v5786_v9 = vsel %vm2110_vm13, 1.0, %v9848_v49  ;;  %v2766_v62 = vpack.c.bf16 %v2620_v7, %v2617_v44  ;;  %v7867_v49 = vld [vmem:[#allocation2 + $0x17] sm:$0xff] }
 0x906   : > { %6188 = vmatprep.mubr.msk.f32.mxu1 %vm1610_vm12, %v5785_v53  ;;  %v2782_v48 = vsel %vm712_vm0, %v2767_v42, 0  ;;  %v6213_v53 = vpop.f32.mrb[32].mxu0 }
 0x907   : > { %v2082_v17 = vrot.slane %v2081_v21, 1  ;;  %v2779_v37 = vsel %vm712_vm0, %v2766_v62, 0  ;;  %6459 = vmatprep.subr.msk.bf16.mxu0 %vm712_vm0, %v2766_v62  ;;  %v7794_v62 = vld [vmem:[#allocation2 + $0xc] sm:$0xff] }
 0x908   : > { %6236 = vmatpush3.bf16.xpose.msra.mxu0 %v2779_v37  ;;  %v7796_v37 = vld [vmem:[#allocation2 + $0x14] sm:$0xff] }
 0x909   : > { %v2083_v46 = vmax.f32 %v2081_v21, %v2082_v17  ;;  %6460 = vmatprep.subr.msk.bf16.mxu0 %vm712_vm0, %v2767_v42  ;;  %v2633_v21 = vpop.f32.mrb[33].mxu0 }
 0x90a   : > { %v6214_v17 = vpop.f32.mrb[34].mxu0 }
 0x90b   : > { %v2084_v6 = vsub.f32 %v9845_v34, %v2083_v46  ;;  %v2085_v57 = vsub.f32 %v9846_v47, %v2083_v46  ;;  %v9858_v34 = vld [vmem:[#allocation22_spill] sm:$0xff]  ;;  %v9860_v47 = vld [vmem:[#allocation25_spill] sm:$0xff]  ;;  %v7752_v46 = vpack.c.bf16 %v6214_v17, %v6213_v53 }
 0x90c   : > { %v7736_v33 = vsub.f32 %v9858_v34, %v7728_v11  ;;  %v7740_v43 = vsub.f32 %v9860_v47, %v7730_v41  ;;  %v7787_v34 = vld [vmem:[#allocation2 + $0x1b] sm:$0xff] }
 0x90d   : > { %v2086_v56 = vmul.f32 1.442695, %v2084_v6  ;;  %v2088_v60 = vmul.f32 1.442695, %v2085_v57  ;;  %9862 = vst [vmem:[#allocation56_spill] sm:$0xff] %v7752_v46  ;;  %v6610_v6 = vld [vmem:[%s9572_s8 + $0x8] sm:$0xff]  }
 0x90e   : > { %9859 = vst [vmem:[#allocation54_spill] sm:$0xff] %v7736_v33  ;;  %9861 = vst [vmem:[#allocation55_spill] sm:$0xff] %v7740_v43  ;;  %v2447_v59 = vpack.c.bf16 %v7740_v43, %v7736_v33  ;;  %v2636_v57 = vpop.f32.mrb[35].mxu0  ;;  %v2322_v47 = vld [vmem:[#allocation2 + $0x21] sm:$0xff] }
 0x90f   : > { %6669 = vpow2.f32 %v2086_v56  ;;  %v2768_v56 = vpack.c.bf16 %v2636_v57, %v2633_v21  ;;  %v7809_v57 = vld [vmem:[#allocation2 + $0x1c] sm:$0xff]  ;;  %v2387_v33 = vld [vmem:[#allocation2 + $0x26] sm:$0xff] }
 0x910   : > { %6671 = vpow2.f32 %v2088_v60  ;;  %6238 = vmatpush3.bf16.xpose.msra.mxu0 %v2782_v48 }
 0x911   : > { %v2785_v60 = vsel %vm712_vm0, %v2768_v56, 0  ;;  %6461 = vmatprep.subr.msk.bf16.mxu0 %vm712_vm0, %v2768_v56  ;;  %v7811_v56 = vld [vmem:[#allocation2 + $0xd] sm:$0xff] }
 0x918   : > { %6240 = vmatpush3.bf16.xpose.msra.mxu0 %v2785_v60 }
 0x919   : > { %v6670_v26 = vpop.eup %6669 }
 0x91a   : > { %v6672_v20 = vpop.eup %6671  ;;  %v2090_v22 = vsel %vm2071_vm9, %v6670_v26, 0.0  ;;  %v6217_v26 = vpop.f32.mrb[36].mxu0 }
 0x91b   : > { %v2091_v27 = vsel %vm2072_vm10, %v6672_v20, 0.0  ;;  %v2092_v30 = vsel %vm712_vm0, %v2090_v22, 0.0  ;;  %v2649_v20 = vpop.f32.mrb[37].mxu0 }
 0x91c   : > { %v2093_v10 = vsel %vm712_vm0, %v2091_v27, 0.0 }
 0x91d   : > { %v2094_v4 = vadd.f32 %v2093_v10, %v2092_v30 }
 0x91f   : > { %v2095_v51 = vrot.slane %v2094_v4, 4 }
 0x921   : > { %v2096_v18 = vadd.f32 %v2095_v51, %v2094_v4  ;;  %v7765_v51 = vld [vmem:[#allocation2 + $0x9] sm:$0xff] }
 0x923   : > { %v2097_v63 = vrot.slane %v2096_v18, 2 }
 0x925   : > { %v2098_v16 = vadd.f32 %v2097_v63, %v2096_v18  ;;  %v7767_v18 = vld [vmem:[#allocation2 + $0x19] sm:$0xff]  ;;  %v7769_v63 = vld [vmem:[#allocation2 + $0x11] sm:$0xff] }
 0x927   : > { %v2099_v35 = vrot.slane %v2098_v16, 1 }
 0x929   : > { %v2100_v0 = vadd.f32 %v2099_v35, %v2098_v16  ;;  %v7771_v16 = vld [vmem:[#allocation2 + $0xa] sm:$0xff]  ;;  %v7773_v35 = vld [vmem:[#allocation2 + $0x12] sm:$0xff] }
 0x92b   : > { %6673 = vrcp.f32 %v2100_v0  ;;  %v7775_v0 = vld [vmem:[#allocation2 + $0x1a] sm:$0xff] }
 0x935   : > { %v6674_v8 = vpop.eup %6673 }
 0x936   : > { %v2102_v1 = vmul.f32 %v6674_v8, %v2090_v22  ;;  %v2103_v14 = vmul.f32 %v6674_v8, %v2091_v27  ;;  %v6218_v22 = vpop.f32.mrb[38].mxu0 }
 0x937   : > { %v7761_v27 = vpack.c.bf16 %v6218_v22, %v6217_v26  ;;  %v2652_v30 = vpop.f32.mrb[39].mxu0 }
 0x938   : > { %v6411_v2 = vpack.c.bf16 %v2103_v14, %v2102_v1  ;;  %v7763_v10 = vpack.c.bf16 %v2652_v30, %v2649_v20  ;;  %v9865_v1 = vld [vmem:[#allocation43_spill] sm:$0xff] }
 0x939   : > { %9863 = vst [vmem:[#allocation57_spill] sm:$0xff] %v7761_v27  ;;  %v2348_v30 = vld [vmem:[#allocation2 + $0x23] sm:$0xff] }
 0x93a   : > { %6412 = vmatprep.subr.bf16.mxu1 %v6411_v2  ;;  %9864 = vst [vmem:[#allocation58_spill] sm:$0xff] %v7763_v10 }
 0x93b   : > { %6414 = vmatpush3.bf16.msra.mxu1 %v6411_v2  ;;  %v9866_v2 = vld [vmem:[#allocation44_spill] sm:$0xff] }
 0x93c   : > { %6191 = vmatprep.subr.bf16.mxu1 %v6607_v24 }
 0x93e   : > { %6189 = vmatmul.mubr.msk.f32.vlgmr.msra.gmra.mrb[26].mxu1 %vm1610_vm12, %v5786_v9  ;;  %v7783_v9 = vld [vmem:[#allocation2 + $0xb] sm:$0xff] }
 0x93f   : > { %6192 = vmatpush3.bf16.msra.mxu1 %v6607_v24  ;;  %6195 = vmatprep.mubr.msk.bf16.mxu1 %vm712_vm0, %v2446_v28  ;;  %v7785_v28 = vld [vmem:[#allocation2 + $0x13] sm:$0xff] }
 0x940   : > { %6193 = vmatprep.subr.bf16.mxu1 %v6608_v25 }
 0x943   : > { %6194 = vmatpush3.bf16.msra.mxu1 %v6608_v25 }
 0x944   : > { %6219 = vmatprep.subr.bf16.mxu1 %v6609_v36 }
 0x946   : > { %6196 = vmatmul.mubr.msk.bf16.vlgmr.msra.gmra.mrb[28].mxu1 %vm712_vm0, %v2447_v59 }
 0x947   : > { %6220 = vmatpush3.bf16.msra.mxu1 %v6609_v36  ;;  %v9868_v36 = vld [vmem:[#allocation46_spill] sm:$0xff] }
 0x948   : > { %6221 = vmatprep.subr.bf16.mxu1 %v6610_v6 }
 0x94b   : > { %6222 = vmatpush3.bf16.msra.mxu1 %v6610_v6  ;;  %v2335_v6 = vld [vmem:[#allocation2 + $0x22] sm:$0xff] }
 0x94c   : > { %6462 = vmatprep.subr.msk.bf16.mxu1 %vm712_vm0, %v7752_v46  ;;  %v2210_v46 = vld [vmem:[#allocation2 + $0x1] sm:$0xff] }
 0xa11   : > { %v6190_v4 = vpop.f32.mrb[26].mxu1 }
 0xa12   : > { %v2326_v8 = vrot.slane %v6190_v4, %v9842_v23  ;;  %v2339_v14 = vrot.slane %v6190_v4, %v9865_v1  ;;  %v2352_v24 = vrot.slane %v6190_v4, %v9866_v2  ;;  %v2365_v32 = vrot.slane %v6190_v4, %v9867_v12  ;;  %v7781_v25 = vpop.f32.mrb[27].mxu1 }
 0xa13   : > { %v2378_v59 = vrot.slane %v6190_v4, %v9868_v36  ;;  %v2391_v44 = vrot.slane %v6190_v4, %v9869_v61  ;;  %v2404_v42 = vrot.slane %v6190_v4, %v9870_v13  ;;  %v2217_v7 = vrot.slane %v7781_v25, %v9842_v23  ;;  %v7824_v4 = vld [vmem:[#allocation2 + $0x15] sm:$0xff] }
 0xa14   : > { %v7799_v48 = vmul.f32 %v2326_v8, %v7765_v51  ;;  %v7802_v53 = vmul.f32 %v2326_v8, %v7769_v63  ;;  %v7805_v21 = vmul.f32 %v2326_v8, %v7767_v18  ;;  %v7807_v17 = vmul.f32 %v2326_v8, %v2322_v47  ;;  %v7826_v8 = vld [vmem:[#allocation2 + $0x1d] sm:$0xff] }
 0xa15   : > { %v7814_v60 = vmul.f32 %v2339_v14, %v7771_v16  ;;  %v7817_v26 = vmul.f32 %v2339_v14, %v7773_v35  ;;  %v7820_v20 = vmul.f32 %v2339_v14, %v7775_v0  ;;  %v7822_v22 = vmul.f32 %v2339_v14, %v2335_v6  ;;  %v7841_v14 = vld [vmem:[#allocation2 + $0x16] sm:$0xff] }
 0xa16   : > { %v7829_v47 = vmul.f32 %v2352_v24, %v7783_v9  ;;  %v7832_v41 = vmul.f32 %v2352_v24, %v7785_v28  ;;  %v7835_v11 = vmul.f32 %v2352_v24, %v7787_v34  ;;  %v7837_v55 = vmul.f32 %v2352_v24, %v2348_v30  ;;  %v7854_v24 = vld [vmem:[#allocation2 + $0xf] sm:$0xff] }
 0xa17   : > { %v7844_v6 = vmul.f32 %v2365_v32, %v7794_v62  ;;  %v7847_v15 = vmul.f32 %v2365_v32, %v7796_v37  ;;  %v7850_v31 = vmul.f32 %v2365_v32, %v7809_v57  ;;  %v7852_v52 = vmul.f32 %v2365_v32, %v2361_v38  ;;  %v7869_v38 = vld [vmem:[#allocation2 + $0x1f] sm:$0xff] }
 0xa18   : > { %v7857_v30 = vmul.f32 %v2378_v59, %v7811_v56  ;;  %v7860_v23 = vmul.f32 %v2378_v59, %v7824_v4  ;;  %v7863_v43 = vmul.f32 %v2378_v59, %v7826_v8  ;;  %v7865_v39 = vmul.f32 %v2378_v59, %v2374_v54 }
 0xa19   : > { %v7872_v32 = vmul.f32 %v2391_v44, %v7839_v3  ;;  %v7875_v40 = vmul.f32 %v2391_v44, %v7841_v14  ;;  %v7877_v27 = vmul.f32 %v2391_v44, %v2277_v19  ;;  %v7879_v5 = vmul.f32 %v2391_v44, %v2387_v33  ;;  %v7881_v10 = vpop.f32.mrb[28].mxu1 }
 0xa1a   : > { %9871 = vst [vmem:[#allocation59_spill] sm:$0xff] %v7860_v23  ;;  %9872 = vst [vmem:[#allocation60_spill] sm:$0xff] %v7863_v43  ;;  %v7884_v54 = vmul.f32 %v2404_v42, %v7854_v24  ;;  %v7887_v59 = vmul.f32 %v2404_v42, %v7867_v49  ;;  %v7890_v50 = vmul.f32 %v2404_v42, %v7869_v38  ;;  %v7894_v58 = vpop.f32.mrb[29].mxu1  ;;  %v2308_v23 = vld [vmem:[#allocation2 + $0x18] sm:$0xff] }
 0xa1b   : > { %9873 = vst [vmem:[#allocation39_spill] sm:$0xff] %v7865_v39  ;;  %9874 = vst [vmem:[#allocation40_spill] sm:$0xff] %v7872_v32  ;;  %v7892_v29 = vmul.f32 %v2404_v42, %v2400_v45  ;;  %v2219_v33 = vmul.f32 %v2217_v7, %v7765_v51  ;;  %v2220_v44 = vmul.f32 %v2217_v7, %v7769_v63  ;;  %v2222_v51 = vld [vmem:[#allocation2 + $0x2] sm:$0xff] }
 0xa1c   : > { %9875 = vst [vmem:[#allocation24_spill] sm:$0xff] %v7875_v40  ;;  %9876 = vst [vmem:[#allocation26_spill] sm:$0xff] %v7877_v27  ;;  %v2218_v27 = vmul.f32 %v2217_v7, %v2210_v46  ;;  %v7899_v40 = vpop.f32.mrb[30].mxu1  ;;  %v2253_v45 = vrot.slane %v7781_v25, %v9867_v12  ;;  %v2265_v46 = vrot.slane %v7781_v25, %v9868_v36  ;;  %v2246_v39 = vld [vmem:[#allocation2 + $0x4] sm:$0xff] }
 0xa1d   : > { %9877 = vst [vmem:[#allocation22_spill] sm:$0xff] %v7879_v5  ;;  %9878 = vst [vmem:[#allocation25_spill] sm:$0xff] %v7881_v10  ;;  %v2221_v5 = vmul.f32 %v2217_v7, %v7767_v18  ;;  %v7909_v42 = vpop.f32.mrb[31].mxu1  ;;  %v2281_v18 = vrot.slane %v7781_v25, %v9869_v61  ;;  %v2297_v63 = vrot.slane %v7781_v25, %v9870_v13  ;;  %v9886_v7 = vld [vmem:[#allocation23_spill] sm:$0xff] }
 0xa1e   : > { %9879 = vst [vmem:[#allocation61_spill] sm:$0xff] %v7884_v54  ;;  %9880 = vst [vmem:[#allocation62_spill] sm:$0xff] %v7887_v59  ;;  %v2229_v59 = vrot.slane %v7781_v25, %v9865_v1  ;;  %v2313_v1 = vrot.slane %v7781_v25, %v9886_v7  ;;  %v2255_v7 = vmul.f32 %v2253_v45, %v7794_v62 }
 0xa1f   : > { %9881 = vst [vmem:[#allocation63_spill] sm:$0xff] %v7890_v50  ;;  %9882 = vst [vmem:[#allocation64_spill] sm:$0xff] %v7892_v29  ;;  %v2241_v50 = vrot.slane %v7781_v25, %v9866_v2  ;;  %v2234_v29 = vld [vmem:[#allocation2 + $0x3] sm:$0xff]  ;;  %v2254_v25 = vmul.f32 %v2253_v45, %v2246_v39  ;;  %v2284_v39 = vmul.f32 %v2281_v18, %v7841_v14  ;;  %v2307_v14 = vld [vmem:[#allocation2 + $0x10] sm:$0xff] }
 0xa20   : > { %9883 = vst [vmem:[#allocation65_spill] sm:$0xff] %v7894_v58  ;;  %9884 = vst [vmem:[#allocation66_spill] sm:$0xff] %v7899_v40  ;;  %v2230_v58 = vmul.f32 %v2229_v59, %v2222_v51  ;;  %v2231_v12 = vmul.f32 %v2229_v59, %v7771_v16  ;;  %v2232_v36 = vmul.f32 %v2229_v59, %v7773_v35  ;;  %v2258_v2 = vld [vmem:[#allocation2 + $0x5] sm:$0xff] }
 0xa21   : > { %9885 = vst [vmem:[#allocation67_spill] sm:$0xff] %v7909_v42  ;;  %v2233_v42 = vmul.f32 %v2229_v59, %v7775_v0  ;;  %v2242_v54 = vmul.f32 %v2241_v50, %v2234_v29  ;;  %v2243_v61 = vmul.f32 %v2241_v50, %v7783_v9  ;;  %v2244_v32 = vmul.f32 %v2241_v50, %v7785_v28  ;;  %v2274_v59 = vld [vmem:[#allocation2 + $0x6] sm:$0xff] }
 0xa22   : > { %v2245_v13 = vmul.f32 %v2241_v50, %v7787_v34  ;;  %v2256_v51 = vmul.f32 %v2253_v45, %v7796_v37  ;;  %v2257_v16 = vmul.f32 %v2253_v45, %v7809_v57  ;;  %v2266_v35 = vmul.f32 %v2265_v46, %v2258_v2 }
 0xa23   : > { %v2267_v0 = vmul.f32 %v2265_v46, %v7811_v56  ;;  %v2268_v29 = vmul.f32 %v2265_v46, %v7824_v4  ;;  %v2269_v9 = vmul.f32 %v2265_v46, %v7826_v8  ;;  %v2282_v28 = vmul.f32 %v2281_v18, %v2274_v59  ;;  %v2290_v56 = vld [vmem:[#allocation2 + $0x7] sm:$0xff] }
 0xa24   : > { %v2283_v50 = vmul.f32 %v2281_v18, %v7839_v3  ;;  %v2285_v34 = vmul.f32 %v2281_v18, %v2277_v19  ;;  %v2270_v62 = vadd.f32 %v2266_v35, %v2218_v27  ;;  %v2288_v2 = vadd.f32 %v2284_v39, %v2232_v36  ;;  %v2306_v59 = vld [vmem:[#allocation2 + $0x8] sm:$0xff]  ;;  %v2309_v19 = vld [vmem:[#allocation2 + $0x20] sm:$0xff] }
 0xa25   : > { %v2271_v10 = vadd.f32 %v2267_v0, %v2219_v33  ;;  %v2272_v37 = vadd.f32 %v2268_v29, %v2220_v44  ;;  %v2273_v40 = vadd.f32 %v2269_v9, %v2221_v5  ;;  %v2286_v57 = vadd.f32 %v2282_v28, %v2230_v58  ;;  %v9895_v28 = vld [vmem:[#allocation62_spill] sm:$0xff] }
 0xa26   : > { %v2287_v45 = vadd.f32 %v2283_v50, %v2231_v12  ;;  %v2289_v43 = vadd.f32 %v2285_v34, %v2233_v42  ;;  %v2298_v4 = vmul.f32 %v2297_v63, %v2290_v56  ;;  %v2299_v8 = vmul.f32 %v2297_v63, %v7854_v24  ;;  %v9896_v50 = vld [vmem:[#allocation63_spill] sm:$0xff]  ;;  %v9897_v39 = vld [vmem:[#allocation64_spill] sm:$0xff] }
 0xa27   : > { %v2300_v46 = vmul.f32 %v2297_v63, %v7867_v49  ;;  %v2301_v3 = vmul.f32 %v2297_v63, %v7869_v38  ;;  %v2314_v27 = vmul.f32 %v2313_v1, %v2306_v59  ;;  %v2315_v33 = vmul.f32 %v2313_v1, %v2307_v14 }
 0xa28   : > { %v2316_v44 = vmul.f32 %v2313_v1, %v2308_v23  ;;  %v2317_v5 = vmul.f32 %v2313_v1, %v2309_v19  ;;  %v2302_v58 = vadd.f32 %v2298_v4, %v2242_v54  ;;  %v2303_v12 = vadd.f32 %v2299_v8, %v2243_v61  ;;  %v9890_v54 = vld [vmem:[#allocation40_spill] sm:$0xff] }
 0xa29   : > { %v2304_v36 = vadd.f32 %v2300_v46, %v2244_v32  ;;  %v2305_v42 = vadd.f32 %v2301_v3, %v2245_v13  ;;  %v2318_v18 = vadd.f32 %v2314_v27, %v2254_v25  ;;  %v2319_v35 = vadd.f32 %v2315_v33, %v2255_v7  ;;  %v9891_v7 = vld [vmem:[#allocation24_spill] sm:$0xff]  ;;  %v9892_v25 = vld [vmem:[#allocation26_spill] sm:$0xff]  ;;  %v9898_v46 = vld [vmem:[#allocation65_spill] sm:$0xff] }
 0xa2a   : > { %v2320_v0 = vadd.f32 %v2316_v44, %v2256_v51  ;;  %v2321_v29 = vadd.f32 %v2317_v5, %v2257_v16  ;;  %v2331_v24 = vadd.f32 %v7799_v48, %v2270_v62  ;;  %v2332_v49 = vadd.f32 %v7802_v53, %v2271_v10  ;;  %v9893_v51 = vld [vmem:[#allocation22_spill] sm:$0xff]  ;;  %v9894_v16 = vld [vmem:[#allocation61_spill] sm:$0xff]  ;;  %v9899_v3 = vld [vmem:[#allocation67_spill] sm:$0xff] }
 0xa2b   : > { %v2333_v38 = vadd.f32 %v7805_v21, %v2272_v37  ;;  %v2334_v63 = vadd.f32 %v7807_v17, %v2273_v40  ;;  %v2344_v9 = vadd.f32 %v7814_v60, %v2286_v57  ;;  %v2345_v23 = vadd.f32 %v7817_v26, %v2287_v45  ;;  %v9887_v26 = vld [vmem:[#allocation59_spill] sm:$0xff]  ;;  %v9900_v44 = vld [vmem:[#allocation66_spill] sm:$0xff]  ;;  %v9901_v5 = vld [vmem:[#allocation25_spill] sm:$0xff] }
 0xa2c   : > { %v2346_v1 = vadd.f32 %v7820_v20, %v2288_v2  ;;  %v2347_v61 = vadd.f32 %v7822_v22, %v2289_v43  ;;  %v2357_v13 = vadd.f32 %v7829_v47, %v2302_v58  ;;  %v2358_v32 = vadd.f32 %v7832_v41, %v2303_v12  ;;  %v9888_v20 = vld [vmem:[#allocation60_spill] sm:$0xff]  ;;  %v9889_v47 = vld [vmem:[#allocation39_spill] sm:$0xff] }
 0xa2d   : > { %v2359_v48 = vadd.f32 %v7835_v11, %v2304_v36  ;;  %v2360_v10 = vadd.f32 %v7837_v55, %v2305_v42  ;;  %v2370_v53 = vadd.f32 %v7844_v6, %v2318_v18  ;;  %v2371_v40 = vadd.f32 %v7847_v15, %v2319_v35  ;;  %v9906_v18 = vld [vmem:[#allocation33_spill] sm:$0xff] }
 0xa2e   : > { %v2372_v21 = vadd.f32 %v7850_v31, %v2320_v0  ;;  %v2373_v17 = vadd.f32 %v7852_v52, %v2321_v29  ;;  %v2383_v60 = vadd.f32 %v7857_v30, %v2331_v24  ;;  %v2384_v43 = vadd.f32 %v9887_v26, %v2332_v49  ;;  %v9907_v0 = vld [vmem:[#allocation35_spill] sm:$0xff] }
 0xa2f   : > { %v2385_v22 = vadd.f32 %v9888_v20, %v2333_v38  ;;  %v2386_v41 = vadd.f32 %v9889_v47, %v2334_v63  ;;  %v2396_v11 = vadd.f32 %v9890_v54, %v2344_v9  ;;  %v2397_v55 = vadd.f32 %v9891_v7, %v2345_v23  ;;  %v9909_v49 = vld [vmem:[#allocation31_spill] sm:$0xff]  ;;  %v9910_v63 = vld [vmem:[#allocation34_spill] sm:$0xff] }
 0xa30   : > { %v2398_v6 = vadd.f32 %v9892_v25, %v2346_v1  ;;  %v2399_v15 = vadd.f32 %v9893_v51, %v2347_v61  ;;  %v2409_v31 = vadd.f32 %v9894_v16, %v2357_v13  ;;  %v2410_v52 = vadd.f32 %v9895_v28, %v2358_v32  ;;  %v9911_v61 = vld [vmem:[#allocation28_spill] sm:$0xff] }
 0xa31   : > { %v2411_v30 = vadd.f32 %v9896_v50, %v2359_v48  ;;  %v2412_v34 = vadd.f32 %v9897_v39, %v2360_v10  ;;  %v2413_v62 = vadd.f32 %v2396_v11, %v2383_v60  ;;  %v2414_v37 = vadd.f32 %v2397_v55, %v2384_v43  ;;  %v9912_v13 = vld [vmem:[#allocation56_spill] sm:$0xff]  ;;  %v9913_v48 = vld [vmem:[#allocation29_spill] sm:$0xff]  ;;  %v9914_v10 = vld [vmem:[#allocation30_spill] sm:$0xff] }
 0xa32   : > { %v2415_v57 = vadd.f32 %v2398_v6, %v2385_v22  ;;  %v2416_v45 = vadd.f32 %v2399_v15, %v2386_v41  ;;  %v2417_v2 = vadd.f32 %v2409_v31, %v2370_v53  ;;  %v2418_v56 = vadd.f32 %v2410_v52, %v2371_v40  ;;  %v9915_v53 = vld [vmem:[#allocation58_spill] sm:$0xff]  ;;  %v9918_v60 = vld [vmem:[#allocation57_spill] sm:$0xff]  ;;  %v9919_v43 = vld [vmem:[#allocation27_spill] sm:$0xff] }
 0xa33   : > { %v2419_v4 = vadd.f32 %v2411_v30, %v2372_v21  ;;  %v2420_v8 = vadd.f32 %v2412_v34, %v2373_v17  ;;  %v2762_v59 = vpack.c.bf16 %v9899_v3, %v9898_v46  ;;  %v9902_v58 = vpack.c.bf16 %v9900_v44, %v9901_v5  ;;  %v9916_v21 = vld [vmem:[#allocation32_spill] sm:$0xff]  ;;  %v9917_v17 = vld [vmem:[#allocation37_spill] sm:$0xff] }
 0xa34   : > { %v2421_v14 = vadd.f32 %v2417_v2, %v2413_v62  ;;  %v2422_v19 = vadd.f32 %v2418_v56, %v2414_v37  ;;  %v2843_v32 = vsel %vm712_vm0, %v9912_v13, 0  ;;  %v2846_v40 = vsel %vm712_vm0, %v9915_v53, 0 }
 0xa35   : > { %v2423_v27 = vadd.f32 %v2419_v4, %v2415_v57  ;;  %v2424_v33 = vadd.f32 %v2420_v8, %v2416_v45  ;;  %6241 = vmatprep.mubr.msk.bf16.mxu0 %vm712_vm0, %v2762_v59  ;;  %v2849_v26 = vsel %vm712_vm0, %v9918_v60, 0 }
 0xa36   : > { %2426 = vst.msk [vmem:[#allocation3 + $0x20] sm:$0xff] %vm712_vm0, %v2421_v14  ;;  %2427 = vst.msk [vmem:[#allocation3 + $0x28] sm:$0xff] %vm712_vm0, %v2422_v19  ;;  %6242 = vmatmul.mubr.msk.bf16.vlgmr.msra.gmra.mrb[40].mxu0 %vm712_vm0, %v9902_v58 }
 0xa37   : > { %2428 = vst.msk [vmem:[#allocation3 + $0x30] sm:$0xff] %vm712_vm0, %v2423_v27  ;;  %2429 = vst.msk [vmem:[#allocation3 + $0x38] sm:$0xff] %vm712_vm0, %v2424_v33 }
 0xa3d   : > { %v7975_v12 = vld [vmem:[#allocation3 + $0x20] sm:$0xff]  ;;  %v7977_v36 = vld [vmem:[#allocation3 + $0x28] sm:$0xff] }
 0xa3e   : > { %9903 = vst [vmem:[#allocation59_spill] sm:$0xff] %v7975_v12  ;;  %9904 = vst [vmem:[#allocation60_spill] sm:$0xff] %v7977_v36  ;;  %v7979_v42 = vld [vmem:[#allocation3 + $0x30] sm:$0xff]  ;;  %v7983_v35 = vsub.f32 %v9906_v18, %v7975_v12  ;;  %v7987_v29 = vsub.f32 %v9907_v0, %v7977_v36  ;;  %v7989_v24 = vld [vmem:[#allocation3 + $0x38] sm:$0xff] }
 0xa3f   : > { %9905 = vst [vmem:[#allocation39_spill] sm:$0xff] %v7979_v42  ;;  %9908 = vst [vmem:[#allocation40_spill] sm:$0xff] %v7989_v24  ;;  %v7993_v38 = vsub.f32 %v9909_v49, %v7979_v42  ;;  %v7997_v9 = vsub.f32 %v9910_v63, %v7989_v24  ;;  %v5832_v36 = vld [vmem:[%s9579_s15 + $0x1] sm:$0x1] }
 0xa40   : > { %v2448_v23 = vpack.c.bf16 %v7987_v29, %v7983_v35 }
 0xa41   : > { %v2449_v1 = vpack.c.bf16 %v7997_v9, %v7993_v38 }
 0xa42   : > { %6199 = vmatprep.mubr.msk.bf16.mxu1 %vm712_vm0, %v2448_v23 }
 0xa43   : > { %6200 = vmatmul.mubr.msk.bf16.gmra.mrb[32].mxu1 %vm712_vm0, %v2449_v1 }
 0xa44   : > { %6223 = vmatprep.mubr.msk.bf16.mxu1 %vm712_vm0, %v9911_v61 }
 0xa4b   : > { %6224 = vmatmul.mubr.msk.bf16.vlgmr.msra.gmra.mrb[36].mxu1 %vm712_vm0, %v9913_v48 }
 0xa4c   : > { %6246 = vmatpush3.bf16.xpose.msra.mxu1 %v2843_v32  ;;  %6227 = vmatprep.mubr.msk.bf16.mxu1 %vm712_vm0, %v9914_v10 }
 0xa4d   : > { %6463 = vmatprep.subr.msk.bf16.mxu1 %vm712_vm0, %v9915_v53 }
 0xa53   : > { %6228 = vmatmul.mubr.msk.bf16.gmra.mrb[40].mxu1 %vm712_vm0, %v9916_v21 }
 0xa54   : > { %6248 = vmatpush3.bf16.xpose.msra.mxu1 %v2846_v40  ;;  %6231 = vmatprep.mubr.msk.bf16.mxu1 %vm712_vm0, %v9917_v17 }
 0xa55   : > { %6464 = vmatprep.subr.msk.bf16.mxu1 %vm712_vm0, %v9918_v60 }
 0xa5b   : > { %6232 = vmatmul.mubr.msk.bf16.gmra.mrb[44].mxu1 %vm712_vm0, %v9919_v43 }
 0xa5c   : > { %6250 = vmatpush3.bf16.xpose.msra.mxu1 %v2849_v26 }
 0xb09   : > { %v6243_v20 = vpop.f32.mrb[40].mxu0 }
 0xb0a   : > { %v2821_v22 = vpop.f32.mrb[41].mxu0  ;;  %v2902_v11 = vmul.f32 0.17677669, %v6243_v20 }
 0xb0b   : > { %v2900_v47 = vmul.f32 0.17677669, %v2821_v22  ;;  %v6244_v41 = vpop.f32.mrb[42].mxu0 }
 0xb0c   : > { %v2824_v54 = vpop.f32.mrb[43].mxu0  ;;  %v2903_v25 = vmul.f32 0.17677669, %v6244_v41  ;;  %v2915_v51 = vsel %vm2908_vm14, %v2902_v11, -inf }
 0xb0d   : > { %v2901_v7 = vmul.f32 0.17677669, %v2824_v54  ;;  %v2909_v55 = vsel %vm2908_vm14, %v2900_v47, -inf }
 0xb0e   : > { %2910 = vmax.xlane.f32.xlu0 %v2909_v55  ;;  %v2918_v15 = vsel %vm2908_vm14, %v2903_v25, -inf }
 0xb0f   : > { %v2912_v6 = vsel %vm2908_vm14, %v2901_v7, -inf }
 0xb10   : > { %2913 = vmax.xlane.f32.xlu1 %v2912_v6 }
 0xb12   : > { %2916 = vmax.xlane.f32.xlu0 %v2915_v51 }
 0xb14   : > { %2919 = vmax.xlane.f32.xlu1 %v2918_v15 }
 0xb16   : > { %v6201_v16 = vpop.f32.mrb[32].mxu1 }
 0xb17   : > { %v2528_v31 = vpop.f32.mrb[33].mxu1 }
 0xb18   : > { %v6202_v28 = vpop.f32.mrb[34].mxu1 }
 0xb19   : > { %v2765_v52 = vpack.c.bf16 %v6202_v28, %v6201_v16  ;;  %v2531_v50 = vpop.f32.mrb[35].mxu1  ;;  %v6611_v16 = vld [vmem:[%s9573_s9] sm:$0xff]  }
 0xb1a   : > { %v2764_v30 = vpack.c.bf16 %v2531_v50, %v2528_v31  ;;  %6275 = vmatprep.subr.bf16.mxu1 %v6611_v16 }
 0xb1c   : > { %6251 = vmatprep.mubr.msk.bf16.mxu1 %vm712_vm0, %v2764_v30 }
 0xb1d   : > { %6252 = vmatmul.mubr.msk.bf16.vlgmr.msra.gmra.mrb[48].mxu1 %vm712_vm0, %v2765_v52 }
 0xb1e   : > { %v6225_v39 = vpop.f32.mrb[36].mxu1  ;;  %6276 = vmatpush3.bf16.msra.mxu1 %v6611_v16 }
 0xb1f   : > { %v2714_v34 = vpop.f32.mrb[37].mxu1 }
 0xb20   : > { %v6226_v62 = vpop.f32.mrb[38].mxu1 }
 0xb21   : > { %v3002_v37 = vpack.c.bf16 %v6226_v62, %v6225_v39  ;;  %v2717_v57 = vpop.f32.mrb[39].mxu1 }
 0xb22   : > { %v3001_v45 = vpack.c.bf16 %v2717_v57, %v2714_v34 }
 0xb24   : > { %6255 = vmatprep.subr.bf16.mxu0 %v3001_v45 }
 0xb25   : > { %6256 = vmatpush3.bf16.msra.mxu0 %v3001_v45 }
 0xb26   : > { %v6229_v2 = vpop.f32.mrb[40].mxu1  ;;  %6257 = vmatprep.subr.bf16.mxu0 %v3002_v37 }
 0xb27   : > { %v2730_v56 = vpop.f32.mrb[41].mxu1 }
 0xb28   : > { %v6230_v4 = vpop.f32.mrb[42].mxu1 }
 0xb29   : > { %v8033_v8 = vpack.c.bf16 %v6230_v4, %v6229_v2  ;;  %v2733_v46 = vpop.f32.mrb[43].mxu1  ;;  %6258 = vmatpush3.bf16.msra.mxu0 %v3002_v37 }
 0xb2a   : > { %v3003_v3 = vpack.c.bf16 %v2733_v46, %v2730_v56  ;;  %v9920_v46 = vmov 0.0|0.0  }
 0xb2c   : > { %6259 = vmatprep.subr.bf16.mxu0 %v3003_v3 }
 0xb2d   : > { %6260 = vmatpush3.bf16.msra.mxu0 %v3003_v3 }
 0xb2e   : > { %v6233_v59 = vpop.f32.mrb[44].mxu1  ;;  %6265 = vmatprep.subr.bf16.mxu0 %v8033_v8 }
 0xb2f   : > { %v2746_v14 = vpop.f32.mrb[45].mxu1 }
 0xb30   : > { %v6234_v19 = vpop.f32.mrb[46].mxu1 }
 0xb31   : > { %v8035_v27 = vpack.c.bf16 %v6234_v19, %v6233_v59  ;;  %v2749_v33 = vpop.f32.mrb[47].mxu1 }
 0xb32   : > { %v8037_v44 = vpack.c.bf16 %v2749_v33, %v2746_v14 }
 0xb9b   : > { %v2911_v5 = vpop.xlane.xlu0 %2910 }
 0xb9c   : > { %v2933_v58 = vsub.f32 %v2900_v47, %v2911_v5 }
 0xb9d   : > { %v2914_v18 = vpop.xlane.xlu1 %2913 }
 0xb9e   : > { %v2941_v0 = vmul.f32 1.442695, %v2933_v58  ;;  %v2934_v49 = vsub.f32 %v2901_v7, %v2914_v18 }
 0xb9f   : > { %v2917_v63 = vpop.xlane.xlu0 %2916 }
 0xba0   : > { %6675 = vpow2.f32 %v2941_v0  ;;  %v2943_v23 = vmul.f32 1.442695, %v2934_v49  ;;  %v2935_v1 = vsub.f32 %v2902_v11, %v2917_v63 }
 0xba1   : > { %v2920_v61 = vpop.xlane.xlu1 %2919 }
 0xba2   : > { %6677 = vpow2.f32 %v2943_v23  ;;  %v2945_v13 = vmul.f32 1.442695, %v2935_v1  ;;  %v2936_v32 = vsub.f32 %v2903_v25, %v2920_v61 }
 0xba4   : > { %6679 = vpow2.f32 %v2945_v13  ;;  %v2947_v48 = vmul.f32 1.442695, %v2936_v32 }
 0xba6   : > { %6681 = vpow2.f32 %v2947_v48 }
 0xbaa   : > { %v6676_v10 = vpop.eup %6675 }
 0xbab   : > { %v2957_v53 = vsel %vm2908_vm14, %v6676_v10, 0.0 }
 0xbac   : > { %v6678_v40 = vpop.eup %6677  ;;  %2958 = vadd.xlane.f32.xlu0 %v2957_v53 }
 0xbad   : > { %v2960_v21 = vsel %vm2908_vm14, %v6678_v40, 0.0 }
 0xbae   : > { %v6680_v17 = vpop.eup %6679  ;;  %2961 = vadd.xlane.f32.xlu1 %v2960_v21 }
 0xbaf   : > { %v2963_v60 = vsel %vm2908_vm14, %v6680_v17, 0.0 }
 0xbb0   : > { %v6682_v26 = vpop.eup %6681  ;;  %2964 = vadd.xlane.f32.xlu0 %v2963_v60 }
 0xbb1   : > { %v2966_v43 = vsel %vm2908_vm14, %v6682_v26, 0.0 }
 0xbb2   : > { %2967 = vadd.xlane.f32.xlu1 %v2966_v43 }
 0xbf0   : > { %v6253_v20 = vpop.f32.mrb[48].mxu1 }
 0xbf1   : > { %v2885_v22 = vpop.f32.mrb[49].mxu1  ;;  %v2906_v11 = vmul.f32 0.17677669, %v6253_v20 }
 0xbf2   : > { %v2904_v47 = vmul.f32 0.17677669, %v2885_v22  ;;  %v6254_v41 = vpop.f32.mrb[50].mxu1 }
 0xbf3   : > { %v2888_v54 = vpop.f32.mrb[51].mxu1  ;;  %v2907_v25 = vmul.f32 0.17677669, %v6254_v41  ;;  %v2927_v51 = vsel %vm2908_vm14, %v2906_v11, -inf }
 0xbf4   : > { %v2905_v7 = vmul.f32 0.17677669, %v2888_v54  ;;  %v2921_v55 = vsel %vm2908_vm14, %v2904_v47, -inf }
 0xbf5   : > { %2922 = vmax.xlane.f32.xlu0 %v2921_v55  ;;  %v2930_v15 = vsel %vm2908_vm14, %v2907_v25, -inf }
 0xbf6   : > { %v2924_v6 = vsel %vm2908_vm14, %v2905_v7, -inf }
 0xbf7   : > { %2925 = vmax.xlane.f32.xlu1 %v2924_v6 }
 0xbf9   : > { %2928 = vmax.xlane.f32.xlu0 %v2927_v51 }
 0xbfb   : > { %2931 = vmax.xlane.f32.xlu1 %v2930_v15 }
 0xc39   : > { %v2959_v31 = vpop.xlane.xlu0 %2958 }
 0xc3a   : > { %6683 = vrcp.f32 %v2959_v31  ;;  %v9921_v31 = vmov 0.0  }
 0xc3b   : > { %v2962_v28 = vpop.xlane.xlu1 %2961 }
 0xc3c   : > { %6685 = vrcp.f32 %v2962_v28  ;;  %v5826_v28 = vld [vmem:[%s9577_s13 + $0x20] sm:$0xff] }
 0xc3d   : > { %v2965_v52 = vpop.xlane.xlu0 %2964 }
 0xc3e   : > { %6687 = vrcp.f32 %v2965_v52  ;;  %v5827_v52 = vld [vmem:[%s9577_s13 + $0x28] sm:$0xff] }
 0xc3f   : > { %v2968_v50 = vpop.xlane.xlu1 %2967 }
 0xc40   : > { %6689 = vrcp.f32 %v2968_v50  ;;  %v5828_v50 = vld [vmem:[%s9577_s13 + $0x30] sm:$0xff] }
 0xc44   : > { %v6684_v30 = vpop.eup %6683 }
 0xc45   : > { %v2989_v34 = vmul.f32 %v6684_v30, %v6676_v10  ;;  %v6612_v10 = vld [vmem:[%s9573_s9 + $0x8] sm:$0xff]   ;;  %v6416_v30 = vpack.c.bf16 %v5827_v52, %v5826_v28 }
 0xc46   : > { %v6686_v39 = vpop.eup %6685  ;;  %6277 = vmatprep.subr.bf16.mxu1 %v6612_v10 }
 0xc47   : > { %v2990_v62 = vmul.f32 %v6686_v39, %v6678_v40  ;;  %6278 = vmatpush3.bf16.msra.mxu1 %v6612_v10  ;;  %v5829_v39 = vld [vmem:[%s9577_s13 + $0x38] sm:$0xff] }
 0xc48   : > { %v6688_v37 = vpop.eup %6687  ;;  %6425 = vmatprep.subr.bf16.mxu1 %v9920_v46 }
 0xc49   : > { %v2997_v57 = vpack.c.bf16 %v2990_v62, %v2989_v34  ;;  %v2991_v2 = vmul.f32 %v6688_v37, %v6680_v17  ;;  %v6419_v34 = vpack.c.bf16 %v5829_v39, %v5828_v50  ;;  %v8087_v62 = vstv %s5811_s26  ;;  %s9206_s26 = sand.u32 1, %s6871_s30  }
 0xc4a   : > { %v6690_v45 = vpop.eup %6689  ;;  %s5738_s29 = sshll.u32 %s9206_s26, 6 }
 0xc4b   : > { %v2992_v56 = vmul.f32 %v6690_v45, %v6682_v26  ;;  %6261 = vmatprep.mubr.msk.bf16.mxu0 %vm2908_vm14, %v2997_v57  ;;  %s9221_s25 = scalar_lea.vmem [#allocation9], %s5738_s29  ;;  %s9229_s23 = scalar_lea.vmem [#allocation10], %s5738_s29 }
 0xc4c   : > { %s5602_s27 = sshll.u32 %s9229_s23, 4  ;;  %s9483_s27 = int_to_ptr.vmem [resolvable:$true] %s5602_s27 }
 0xc4d   : > { %v2998_v4 = vpack.c.bf16 %v2992_v56, %v2991_v2 }
 0xc4f   : > { %6262 = vmatmul.mubr.msk.bf16.vlgmr.msra.gmra.mrb[44].mxu0 %vm2908_vm14, %v2998_v4  ;;  %v9922_v4 = vld [vmem:[#allocation54_spill] sm:$0xff] }
 0xc50   : > { %6266 = vmatpush3.bf16.msra.mxu0 %v8033_v8 }
 0xc51   : > { %6267 = vmatprep.subr.bf16.mxu0 %v8037_v44 }
 0xc54   : > { %6268 = vmatpush3.bf16.msra.mxu0 %v8037_v44 }
 0xc55   : > { %6269 = vmatprep.subr.bf16.mxu0 %v8035_v27 }
 0xc58   : > { %6270 = vmatpush3.bf16.msra.mxu0 %v8035_v27 }
 0xc59   : > { %6415 = vmatprep.subr.bf16.mxu0 %v9920_v46 }
 0xc82   : > { %v2923_v3 = vpop.xlane.xlu0 %2922 }
 0xc83   : > { %v2937_v59 = vsub.f32 %v2904_v47, %v2923_v3 }
 0xc84   : > { %v2926_v14 = vpop.xlane.xlu1 %2925 }
 0xc85   : > { %v2949_v19 = vmul.f32 1.442695, %v2937_v59  ;;  %v2938_v33 = vsub.f32 %v2905_v7, %v2926_v14 }
 0xc86   : > { %v2929_v5 = vpop.xlane.xlu0 %2928 }
 0xc87   : > { %6691 = vpow2.f32 %v2949_v19  ;;  %v2951_v58 = vmul.f32 1.442695, %v2938_v33  ;;  %v2939_v18 = vsub.f32 %v2906_v11, %v2929_v5  ;;  %v9924_v19 = vld [vmem:[#allocation50_spill] sm:$0xff] }
 0xc88   : > { %v2932_v8 = vpop.xlane.xlu1 %2931 }
 0xc89   : > { %6693 = vpow2.f32 %v2951_v58  ;;  %v2953_v0 = vmul.f32 1.442695, %v2939_v18  ;;  %v2940_v49 = vsub.f32 %v2907_v25, %v2932_v8  ;;  %v9926_v58 = vld [vmem:[#allocation55_spill] sm:$0xff]  ;;  %v9928_v8 = vld [vmem:[#allocation21_spill] sm:$0xff] }
 0xc8b   : > { %6695 = vpow2.f32 %v2953_v0  ;;  %v2955_v44 = vmul.f32 1.442695, %v2940_v49  ;;  %v9929_v49 = vld [vmem:[#allocation51_spill] sm:$0xff] }
 0xc8d   : > { %6697 = vpow2.f32 %v2955_v44 }
 0xc91   : > { %v6692_v63 = vpop.eup %6691 }
 0xc92   : > { %v2969_v27 = vsel %vm2908_vm14, %v6692_v63, 0.0 }
 0xc93   : > { %v6694_v23 = vpop.eup %6693  ;;  %2970 = vadd.xlane.f32.xlu0 %v2969_v27 }
 0xc94   : > { %v2972_v1 = vsel %vm2908_vm14, %v6694_v23, 0.0 }
 0xc95   : > { %v6696_v61 = vpop.eup %6695  ;;  %2973 = vadd.xlane.f32.xlu1 %v2972_v1 }
 0xc96   : > { %v2975_v13 = vsel %vm2908_vm14, %v6696_v61, 0.0 }
 0xc97   : > { %v6698_v32 = vpop.eup %6697  ;;  %2976 = vadd.xlane.f32.xlu0 %v2975_v13 }
 0xc98   : > { %v2978_v48 = vsel %vm2908_vm14, %v6698_v32, 0.0 }
 0xc99   : > { %2979 = vadd.xlane.f32.xlu1 %v2978_v48 }
 0xd20   : > { %v2971_v53 = vpop.xlane.xlu0 %2970 }
 0xd21   : > { %6699 = vrcp.f32 %v2971_v53 }
 0xd22   : > { %v6263_v40 = vpop.f32.mrb[44].mxu0  ;;  %v2974_v21 = vpop.xlane.xlu1 %2973 }
 0xd23   : > { %v3047_v17 = vpop.f32.mrb[45].mxu0  ;;  %6701 = vrcp.f32 %v2974_v21 }
 0xd24   : > { %v6264_v60 = vpop.f32.mrb[46].mxu0  ;;  %v2977_v26 = vpop.xlane.xlu0 %2976 }
 0xd25   : > { %v3118_v43 = vpack.c.bf16 %v6264_v60, %v6263_v40  ;;  %v3050_v20 = vpop.f32.mrb[47].mxu0  ;;  %6703 = vrcp.f32 %v2977_v26 }
 0xd26   : > { %v3117_v22 = vpack.c.bf16 %v3050_v20, %v3047_v17  ;;  %v2980_v47 = vpop.xlane.xlu1 %2979 }
 0xd27   : > { %6705 = vrcp.f32 %v2980_v47 }
 0xd28   : > { %6279 = vmatprep.mubr.msk.bf16.mxu1 %vm712_vm0, %v3117_v22 }
 0xd29   : > { %6280 = vmatmul.mubr.msk.bf16.vlgmr.msra.gmra.mrb[52].mxu1 %vm712_vm0, %v3118_v43 }
 0xd2a   : > { %6427 = vmatpush3.bf16.msra.mxu1 %v6416_v30 }
 0xd2b   : > { %v6700_v41 = vpop.eup %6699  ;;  %6428 = vmatprep.subr.bf16.mxu1 %v9920_v46 }
 0xd2c   : > { %v2993_v11 = vmul.f32 %v6700_v41, %v6692_v63  ;;  %v9931_v63 = vld [vmem:[#allocation23_spill] sm:$0xff] }
 0xd2d   : > { %v6702_v54 = vpop.eup %6701 }
 0xd2e   : > { %v2994_v7 = vmul.f32 %v6702_v54, %v6694_v23  ;;  %6430 = vmatpush3.bf16.msra.mxu1 %v6419_v34 }
 0xd2f   : > { %v6704_v55 = vpop.eup %6703 }
 0xd30   : > { %v2999_v25 = vpack.c.bf16 %v2994_v7, %v2993_v11  ;;  %v2995_v51 = vmul.f32 %v6704_v55, %v6696_v61 }
 0xd31   : > { %v6706_v6 = vpop.eup %6705 }
 0xd32   : > { %v2996_v15 = vmul.f32 %v6706_v6, %v6698_v32  ;;  %6271 = vmatprep.mubr.msk.bf16.mxu0 %vm2908_vm14, %v2999_v25 }
 0xd34   : > { %v3000_v16 = vpack.c.bf16 %v2996_v15, %v2995_v51 }
 0xd36   : > { %6272 = vmatmul.mubr.msk.bf16.vlgmr.msra.gmra.mrb[48].mxu0 %vm2908_vm14, %v3000_v16 }
 0xd37   : > { %6295 = vmatprep.mubr.msk.f32.mxu0 %vm6884_vm1, %v9921_v31  ;;  %6417 = vmatpush3.bf16.msra.mxu0 %v6416_v30 }
 0xd38   : > { %6418 = vmatprep.subr.bf16.mxu0 %v9920_v46 }
 0xd3b   : > { %6420 = vmatpush3.bf16.msra.mxu0 %v6419_v34 }
 0xdfc   : > { %v6281_v37 = vpop.f32.mrb[52].mxu1 }
 0xdfd   : > { %v3217_v57 = vmul.f32 %v6281_v37, %v8087_v62  ;;  %v3183_v45 = vpop.f32.mrb[53].mxu1 }
 0xdfe   : > { %v3215_v2 = vmul.f32 %v8087_v62, %v3183_v45  ;;  %v6282_v56 = vpop.f32.mrb[54].mxu1 }
 0xdff   : > { %v8092_v3 = vadd.f32 %v3217_v57, %v9922_v4  ;;  %v3218_v59 = vmul.f32 %v6282_v56, %v8087_v62  ;;  %v3186_v14 = vpop.f32.mrb[55].mxu1 }
 0xe00   : > { %v8096_v33 = vadd.f32 %v3215_v2, %v9924_v19  ;;  %v3216_v5 = vmul.f32 %v8087_v62, %v3186_v14 }
 0xe01   : > { %9923 = vst [vmem:[#allocation24_spill] sm:$0xff] %v8092_v3  ;;  %3513 = vst.msk [vmem:[#allocation2 + $0x18] sm:$0xff] %vm712_vm0, %v8092_v3  ;;  %v8102_v18 = vadd.f32 %v3218_v59, %v9926_v58  ;;  %v3234_v13 = vsel %vm712_vm0, %v8092_v3, 0.0 }
 0xe02   : > { %9925 = vst [vmem:[#allocation26_spill] sm:$0xff] %v8096_v33  ;;  %v3509_v0 = vrot.slane %v8096_v33, %v9928_v8  ;;  %3511 = vst.msk [vmem:[#allocation2 + $0x8] sm:$0xff] %vm712_vm0, %v8096_v33  ;;  %v8109_v44 = vadd.f32 %v3216_v5, %v9929_v49  ;;  %v3231_v23 = vsel %vm712_vm0, %v8096_v33, 0.0 }
 0xe03   : > { %9927 = vst [vmem:[#allocation22_spill] sm:$0xff] %v8102_v18  ;;  %v3518_v27 = vrot.slane %v8102_v18, %v9931_v63  ;;  %3514 = vst.msk [vmem:[#allocation2 + $0x20] sm:$0xff] %vm712_vm0, %v8102_v18  ;;  %v3236_v48 = vsel %vm712_vm0, %v8102_v18, 0.0 }
 0xe04   : > { %9930 = vst [vmem:[#allocation61_spill] sm:$0xff] %v8109_v44  ;;  %3510 = vst.msk [vmem:[#allocation2] sm:$0xff] %vm712_vm0, %v3509_v0  ;;  %v3232_v1 = vsel %vm712_vm0, %v8109_v44, 0.0 }
 0xe05   : > { %3512 = vst.msk [vmem:[#allocation2 + $0x10] sm:$0xff] %vm712_vm0, %v8109_v44  ;;  %3519 = vst.msk [vmem:[#allocation2 + $0x28] sm:$0xff] %vm712_vm0, %v3518_v27  ;;  %v3233_v61 = vadd.f32 %v3232_v1, %v3231_v23 }
 0xe07   : > { %v3235_v32 = vadd.f32 %v3234_v13, %v3233_v61 }
 0xe08   : > { %v8158_v56 = vld [vmem:[#allocation2 + $0x18] sm:$0xff] }
 0xe09   : > { %v3237_v10 = vadd.f32 %v3236_v48, %v3235_v32  ;;  %v6273_v53 = vpop.f32.mrb[48].mxu0  ;;  %9932 = vst [vmem:[#allocation62_spill] sm:$0xff] %v8158_v56  ;;  %v8184_v13 = vld [vmem:[#allocation2 + $0x8] sm:$0xff] }
 0xe0a   : > { %v3102_v40 = vpop.f32.mrb[49].mxu0  ;;  %v8136_v16 = vld [vmem:[#allocation2 + $0x19] sm:$0xff]  ;;  %9934 = vst [vmem:[#allocation64_spill] sm:$0xff] %v8184_v13 }
 0xe0b   : > { %v3238_v21 = vrot.slane %v3237_v10, 4  ;;  %v6274_v17 = vpop.f32.mrb[50].mxu0  ;;  %v8140_v52 = vld [vmem:[#allocation2 + $0x1a] sm:$0xff] }
 0xe0c   : > { %v3120_v60 = vpack.c.bf16 %v6274_v17, %v6273_v53  ;;  %v3105_v26 = vpop.f32.mrb[51].mxu0  ;;  %v8134_v15 = vld [vmem:[#allocation2 + $0x11] sm:$0xff]  ;;  %v8144_v30 = vld [vmem:[#allocation2 + $0x1b] sm:$0xff]  ;;  %v8164_v19 = vld [vmem:[#allocation2 + $0x9] sm:$0xff] }
 0xe0d   : > { %v3239_v43 = vadd.f32 %v3238_v21, %v3237_v10  ;;  %v3119_v20 = vpack.c.bf16 %v3105_v26, %v3102_v40  ;;  %v8138_v28 = vld [vmem:[#allocation2 + $0x12] sm:$0xff]  ;;  %v8148_v34 = vld [vmem:[#allocation2 + $0x1c] sm:$0xff]  ;;  %v8166_v5 = vld [vmem:[#allocation2 + $0xa] sm:$0xff] }
 0xe0e   : > { %v8142_v50 = vld [vmem:[#allocation2 + $0x13] sm:$0xff]  ;;  %v8152_v57 = vld [vmem:[#allocation2 + $0x1d] sm:$0xff]  ;;  %v8168_v58 = vld [vmem:[#allocation2 + $0xb] sm:$0xff] }
 0xe0f   : > { %v3240_v22 = vrot.slane %v3239_v43, 2  ;;  %6283 = vmatprep.mubr.msk.bf16.mxu1 %vm712_vm0, %v3119_v20  ;;  %v8146_v39 = vld [vmem:[#allocation2 + $0x14] sm:$0xff]  ;;  %v8156_v2 = vld [vmem:[#allocation2 + $0x1e] sm:$0xff]  ;;  %v8170_v0 = vld [vmem:[#allocation2 + $0xc] sm:$0xff] }
 0xe10   : > { %6284 = vmatmul.mubr.msk.bf16.gmra.mrb[56].mxu1 %vm712_vm0, %v3120_v60  ;;  %v8150_v37 = vld [vmem:[#allocation2 + $0x15] sm:$0xff]  ;;  %v8172_v49 = vld [vmem:[#allocation2 + $0xd] sm:$0xff]  ;;  %v8182_v61 = vld [vmem:[#allocation2 + $0x1] sm:$0xff] }
 0xe11   : > { %v3241_v47 = vadd.f32 %v3240_v22, %v3239_v43  ;;  %6313 = vmatprep.mubr.msk.f32.mxu1 %vm6884_vm1, %v9921_v31  ;;  %v8154_v45 = vld [vmem:[#allocation2 + $0x16] sm:$0xff]  ;;  %v8174_v27 = vld [vmem:[#allocation2 + $0xe] sm:$0xff]  ;;  %v8190_v10 = vld [vmem:[#allocation2 + $0x21] sm:$0xff] }
 0xe12   : > { %v8176_v23 = vld [vmem:[#allocation2 + $0xf] sm:$0xff]  ;;  %v8178_v1 = vld [vmem:[#allocation2 + $0x17] sm:$0xff]  ;;  %v8192_v53 = vld [vmem:[#allocation2 + $0x22] sm:$0xff] }
 0xe13   : > { %v3242_v41 = vrot.slane %v3241_v47, 1  ;;  %v8194_v40 = vld [vmem:[#allocation2 + $0x23] sm:$0xff] }
 0xe14   : > { %v8196_v21 = vld [vmem:[#allocation2 + $0x24] sm:$0xff] }
 0xe15   : > { %v3243_v54 = vadd.f32 %v3242_v41, %v3241_v47  ;;  %v8198_v17 = vld [vmem:[#allocation2 + $0x25] sm:$0xff] }
 0xe16   : > { %v8200_v60 = vld [vmem:[#allocation2 + $0x2] sm:$0xff] }
 0xe17   : > { %v3244_v11 = vmul.f32 0.03125, %v3243_v54  ;;  %v8202_v26 = vld [vmem:[#allocation2 + $0x3] sm:$0xff] }
 0xe18   : > { %v8204_v43 = vld [vmem:[#allocation2 + $0x4] sm:$0xff] }
 0xe19   : > { %6296 = vmatmul.mubr.msk.f32.vlgmr.msra.gmra.mrb[52].mxu0 %vm712_vm0, %v3244_v11  ;;  %v8211_v20 = vld [vmem:[#allocation2 + $0x6] sm:$0xff] }
 0xe1a   : > { %v8213_v22 = vld [vmem:[#allocation2 + $0x7] sm:$0xff] }
 0xe1b   : > { %v8222_v54 = vld [vmem:[#allocation2 + $0x26] sm:$0xff] }
 0xe1c   : > { %v8224_v11 = vld [vmem:[#allocation2 + $0x27] sm:$0xff] }
 0xee3   : > { %v6285_v7 = vpop.f32.mrb[56].mxu1 }
 0xee4   : > { %v3221_v55 = vmul.f32 %v6285_v7, %v8087_v62  ;;  %v3199_v25 = vpop.f32.mrb[57].mxu1 }
 0xee5   : > { %v3219_v6 = vmul.f32 %v8087_v62, %v3199_v25  ;;  %v6286_v51 = vpop.f32.mrb[58].mxu1  ;;  %v8235_v25 = vld [vmem:[#allocation2 + $0x10] sm:$0xff] }
 0xee6   : > { %v8161_v4 = vadd.f32 %v3221_v55, %v7993_v38  ;;  %v3222_v59 = vmul.f32 %v6286_v51, %v8087_v62  ;;  %v3202_v14 = vpop.f32.mrb[59].mxu1  ;;  %v8180_v38 = vld [vmem:[#allocation2 + $0x1f] sm:$0xff]  ;;  %9939 = vst [vmem:[#allocation33_spill] sm:$0xff] %v8235_v25 }
 0xee7   : > { %v8187_v32 = vadd.f32 %v3219_v6, %v7983_v35  ;;  %v3220_v48 = vmul.f32 %v8087_v62, %v3202_v14  ;;  %v8209_v62 = vld [vmem:[#allocation2 + $0x5] sm:$0xff]  ;;  %v5830_v55 = vld [vmem:[%s9578_s14 + $0x1] sm:$0x1] }
 0xee8   : > { %9933 = vst [vmem:[#allocation63_spill] sm:$0xff] %v8161_v4  ;;  %v8207_v35 = vadd.f32 %v3222_v59, %v7997_v9  ;;  %4017 = vst.msk [vmem:[#allocation2 + $0x18] sm:$0xff] %vm712_vm0, %v8161_v4  ;;  %v8226_v9 = vld [vmem:[#allocation2 + $0x20] sm:$0xff]  ;;  %v3742_v14 = vsel %vm712_vm0, %v8161_v4, 0.0 }
 0xee9   : > { %9935 = vst [vmem:[#allocation65_spill] sm:$0xff] %v8187_v32  ;;  %v4013_v47 = vrot.slane %v8187_v32, %v9928_v8  ;;  %v8220_v41 = vadd.f32 %v3220_v48, %v7987_v29  ;;  %9938 = vst [vmem:[#allocation25_spill] sm:$0xff] %v8226_v9  ;;  %v3739_v29 = vsel %vm712_vm0, %v8187_v32, 0.0 }
 0xeea   : > { %9936 = vst [vmem:[#allocation67_spill] sm:$0xff] %v8207_v35  ;;  %4015 = vst.msk [vmem:[#allocation2 + $0x8] sm:$0xff] %vm712_vm0, %v8187_v32  ;;  %v4022_v7 = vrot.slane %v8207_v35, %v9931_v63 }
 0xeeb   : > { %9937 = vst [vmem:[#allocation66_spill] sm:$0xff] %v8220_v41  ;;  %4018 = vst.msk [vmem:[#allocation2 + $0x20] sm:$0xff] %vm712_vm0, %v8207_v35  ;;  %v3740_v6 = vsel %vm712_vm0, %v8220_v41, 0.0 }
 0xeec   : > { %4014 = vst.msk [vmem:[#allocation2] sm:$0xff] %vm712_vm0, %v4013_v47  ;;  %4016 = vst.msk [vmem:[#allocation2 + $0x10] sm:$0xff] %vm712_vm0, %v8220_v41  ;;  %v3741_v51 = vadd.f32 %v3740_v6, %v3739_v29  ;;  %v3321_v59 = vpop.f32.mrb[52].mxu0  ;;  %v3744_v47 = vsel %vm712_vm0, %v8207_v35, 0.0 }
 0xeed   : > { %4023 = vst.msk [vmem:[#allocation2 + $0x28] sm:$0xff] %vm712_vm0, %v4022_v7  ;;  %v3322_v48 = vadd.f32 %v5830_v55, %v3321_v59  ;;  %v6297_v24 = vpop.f32.mrb[53].mxu0  ;;  %v9680_v59 = vstv %s8256_s2 }
 0xeee   : > { %v3743_v42 = vadd.f32 %v3742_v14, %v3741_v51 }
 0xeef   : > { %v3325_v12 = vmax.f32 %v3322_v48, 0.0 }
 0xef0   : > { %v3745_v32 = vadd.f32 %v3744_v47, %v3743_v42 }
 0xef1   : > { %v3328_v41 = vmul.f32 %v5832_v36, %v3325_v12 }
 0xef2   : > { %v3746_v29 = vrot.slane %v3745_v32, 4 }
 0xef3   : > { %v3329_v6 = vsel %vm1507_vm2, %v3328_v41, 0.0 }
 0xef4   : > { %v3747_v7 = vadd.f32 %v3746_v29, %v3745_v32  ;;  %3330 = vadd.xlane.f32.xlu0 %v3329_v6 }
 0xef6   : > { %v3748_v18 = vrot.slane %v3747_v7, 2 }
 0xef8   : > { %v3749_v4 = vadd.f32 %v3748_v18, %v3747_v7 }
 0xefa   : > { %v3750_v55 = vrot.slane %v3749_v4, 1 }
 0xefc   : > { %v3751_v24 = vadd.f32 %v3750_v55, %v3749_v4 }
 0xefe   : > { %v3752_v51 = vmul.f32 0.03125, %v3751_v24 }
 0xf00   : > { %6314 = vmatmul.mubr.msk.f32.vlgmr.msra.gmra.mrb[60].mxu1 %vm712_vm0, %v3752_v51 }
 0xf81   : > { %v3331_v14 = vpop.xlane.xlu0 %3330 }
 0xf82   : > { %v3334_v12 = vadd.f32 %v9680_v59, %v3331_v14 }
 0xf84   : > { %v3335_v36 = vsub.f32 0.0, %v3334_v12 }
 0xf86   : > { %v3336_v42 = vmul.f32 1.442695, %v3335_v36 }
 0xf88   : > { %6707 = vpow2.f32 %v3336_v42  ;;  %v9940_v42 = vmov 0  }
 0xf92   : > { %v6708_v32 = vpop.eup %6707 }
 0xf93   : > { %v3338_v41 = vadd.f32 1.0, %v6708_v32 }
 0xf95   : > { %6709 = vrcp.f32 %v3338_v41 }
 0xf9f   : > { %v6710_v18 = vpop.eup %6709 }
 0xfa0   : > { %v3341_v48 = vmul.f32 45.0, %v6710_v18 }
 0xfa2   : > { %v3342_v4 = vadd.f32 5.0, %v3341_v48 }
 0xfa4   : > { %v3343_v47 = vadd.f32 0.5, %v3342_v4  ;;  %v6488_v6 = vtrunc.f32 %v3342_v4 }
 0xfa6   : > { %v6486_v29 = vtrunc.f32 %v3343_v47  ;;  %v6489_v55 = vcvt.f32.s32 %v6488_v6 }
 0xfa8   : > { %v6487_v7 = vcvt.f32.s32 %v6486_v29  ;;  %v3346_v35 = vcvt.s32.f32 %v6489_v55 }
 0xfaa   : > { %v3348_v24 = vcvt.s32.f32 %v6487_v7  ;;  %v3347_v14 = vsub.f32 %v3342_v4, %v3346_v35 }
 0xfac   : > { %v3349_v51 = vmul.f32 0.5, %v3348_v24  ;;  %vm3354_vm3 = vcmp.eq.f32.partialorder %v3347_v14, 0.5 }
 0xfae   : > { %v6490_v3 = vtrunc.f32 %v3349_v51  ;;  %v8271_v51 = vld [vmem:[%s9576_s12 + $0x18] sm:$0xff] }
 0xfb0   : > { %v6491_v44 = vcvt.f32.s32 %v6490_v3 }
 0xfb2   : > { %v3351_v12 = vmul.u32 2, %v6491_v44 }
 0xfb4   : > { %v3352_v36 = vsub.s32 %v6487_v7, %v3351_v12  ;;  %v5845_v12 = vld [vmem:[%s9578_s14 + $0x1] sm:$0x1] }
 0xfb6   : > { %vm3353_vm15 = vcmp.eq.s32.totalorder %v3352_v36, 1 }
 0xfb7   : > { %vm3355_vm4 = vmand %vm3354_vm3, %vm3353_vm15 }
 0xfb8   : > { %v3356_v32 = vsel %vm3355_vm4, 1, %v9940_v42 }
 0xfb9   : > { %v3357_v41 = vsub.s32 %v6487_v7, %v3356_v32  ;;  %v8266_v7 = vld [vmem:[%s9576_s12 + $0x10] sm:$0xff] }
 0xfba   : > { %v9941_v32 = vld [vmem:[#allocation20_spill] sm:$0xff] }
 0xfbb   : > { %vm3358_vm5 = vcmp.gt.s32.totalorder %v3357_v41, 3 }
 0xfbc   : > { %v3359_v18 = vsel %vm3358_vm5, %v3357_v41, 3  ;;  %v9942_v41 = vld [vmem:[#allocation38_spill] sm:$0xff] }
 0xfbd   : > { %vm3360_vm6 = vcmp.lt.s32.totalorder %v3359_v18, 16 }
 0xfbe   : > { %v3361_v48 = vsel %vm3360_vm6, %v3359_v18, 16 }
 0xfbf   : > { %v3362_v47 = vcvt.s32.f32 %v3361_v48 }
 0xfc1   : > { %v3363_v29 = vmul.f32 0.5, %v3362_v47 }
 0xfc3   : > { %v6492_v6 = vtrunc.f32 %v3363_v29 }
 0xfc5   : > { %v6493_v24 = vcvt.f32.s32 %v6492_v6 }
 0xfc7   : > { %v3365_v55 = vmul.u32 2, %v6493_v24 }
 0xfc9   : > { %vm3366_vm7 = vcmp.eq.s32.totalorder %v3361_v48, %v3365_v55 }
 0xfca   : > { %v3367_v3 = vsel %vm3366_vm7, 1, %v9940_v42 }
 0xfcb   : > { %v3368_v44 = vsub.s32 %v3361_v48, %v3367_v3 }
 0xfcd   : > { %vm3369_vm8 = vcmp.gt.s32.totalorder %v3368_v44, 3 }
 0xfce   : > { %v3370_v35 = vsel %vm3369_vm8, %v3368_v44, 3 }
 0xfcf   : > { %v3371_v4 = vcvt.s32.f32 %v3370_v35  ;;  %v3380_v14 = vrot.slane %v3370_v35, %v9928_v8  ;;  %v5847_v35 = vld [vmem:[%s9579_s15 + $0x1] sm:$0x1] }
 0xfd1   : > { %v3372_v36 = vmul.f32 0.5, %v3371_v4  ;;  %vm3381_vm9 = vcmp.lt.s32.totalorder %v9941_v32, %v3380_v14  ;;  %vm3382_vm10 = vcmp.lt.s32.totalorder %v9942_v41, %v3380_v14  ;;  %v9944_v14 = vld [vmem:[#allocation42_spill] sm:$0xff] }
 0xfd2   : > { %v3383_v18 = vsel %vm3381_vm9, %v8266_v7, -inf  ;;  %v3384_v48 = vsel %vm3382_vm10, %v8271_v51, -inf }
 0xfd3   : > { %v3827_v47 = vpop.f32.mrb[60].mxu1  ;;  %v6494_v29 = vtrunc.f32 %v3372_v36  ;;  %v3385_v6 = vsel %vm712_vm0, %v3383_v18, -inf  ;;  %v3386_v24 = vsel %vm712_vm0, %v3384_v48, -inf  ;;  %v9943_v48 = vld [vmem:[#allocation41_spill] sm:$0xff] }
 0xfd4   : > { %v3828_v55 = vadd.f32 %v5845_v12, %v3827_v47  ;;  %v6315_v3 = vpop.f32.mrb[61].mxu1  ;;  %v3387_v44 = vmax.f32 %v3385_v6, %v3386_v24 }
 0xfd5   : > { %v6495_v4 = vcvt.f32.s32 %v6494_v29 }
 0xfd6   : > { %v3831_v59 = vmax.f32 %v3828_v55, 0.0  ;;  %v3388_v33 = vrot.slane %v3387_v44, 4 }
 0xfd7   : > { %v5836_v9 = vadd.s32 4294967289, %v6495_v4 }
 0xfd8   : > { %v3833_v56 = vmul.f32 %v5847_v35, %v3831_v59  ;;  %v3389_v25 = vmax.f32 %v3387_v44, %v3388_v33 }
 0xfd9   : > { %v3418_v13 = vrot.slane %v5836_v9, %v9928_v8 }
 0xfda   : > { %v3834_v36 = vsel %vm1507_vm2, %v3833_v56, 0.0  ;;  %v3390_v18 = vrot.slane %v3389_v25, 2 }
 0xfdb   : > { %3835 = vadd.xlane.f32.xlu1 %v3834_v36  ;;  %vm3419_vm11 = vcmp.eq.s32.totalorder %v9943_v48, %v3418_v13  ;;  %vm3420_vm13 = vcmp.eq.s32.totalorder %v9944_v14, %v3418_v13 }
 0xfdc   : > { %v5837_v12 = vsel %vm3419_vm11, 1.0, %v9921_v31  ;;  %v3391_v47 = vmax.f32 %v3389_v25, %v3390_v18 }
 0xfdd   : > { %6302 = vmatprep.mubr.msk.f32.mxu0 %vm1610_vm12, %v5837_v12 }
 0xfde   : > { %v3392_v6 = vrot.slane %v3391_v47, 1 }
 0xfe0   : > { %v3393_v29 = vmax.f32 %v3391_v47, %v3392_v6 }
 0xfe2   : > { %v3394_v24 = vsub.f32 %v8266_v7, %v3393_v29  ;;  %v3395_v59 = vsub.f32 %v8271_v51, %v3393_v29 }
 0xfe4   : > { %v3396_v33 = vmul.f32 1.442695, %v3394_v24  ;;  %v3398_v55 = vmul.f32 1.442695, %v3395_v59 }
 0xfe6   : > { %6711 = vpow2.f32 %v3396_v33 }
 0xfe7   : > { %6713 = vpow2.f32 %v3398_v55 }
 0xff0   : > { %v6712_v56 = vpop.eup %6711 }
 0xff1   : > { %v6714_v9 = vpop.eup %6713  ;;  %v3400_v3 = vsel %vm3381_vm9, %v6712_v56, 0.0  ;;  %v5838_v56 = vsel %vm3420_vm13, 1.0, %v9921_v31 }
 0xff2   : > { %v3401_v25 = vsel %vm3382_vm10, %v6714_v9, 0.0  ;;  %v3402_v44 = vsel %vm712_vm0, %v3400_v3, 0.0 }
 0xff3   : > { %v3403_v35 = vsel %vm712_vm0, %v3401_v25, 0.0 }
 0xff4   : > { %v3404_v4 = vadd.f32 %v3403_v35, %v3402_v44  ;;  %v9945_v44 = vstv %s8256_s2  ;;  %s5585_s2 = sshll.u32 %s9221_s25, 4  ;;  %s9467_s2 = int_to_ptr.vmem [resolvable:$true] %s5585_s2 }
 0xff5   : > { %s6777_s22 = scalar_lea.vmem %s9467_s2, 1024  ;;  %p6784_p8 = scmp.lt.s32.totalorder %s9467_s2, %s6782_s17 }
 0xff6   : > { %v3405_v36 = vrot.slane %v3404_v4, 4  ;;  %p6778_p10 = scmp.ne.s32.totalorder %s9467_s2, %s6777_s22 }
 0xff8   : > { %v3406_v18 = vadd.f32 %v3405_v36, %v3404_v4  ;;  %p6779_p0 = pnand %p6778_p10, %p10180_p12 }
 0xffa   : > { %v3407_v12 = vrot.slane %v3406_v18, 2  ;;  %p6780_p7 = pneg %p6779_p0 }
 0xffc   : > { %v3408_v47 = vadd.f32 %v3407_v12, %v3406_v18 }
 0xffe   : > { %v3409_v6 = vrot.slane %v3408_v47, 1 }
0x1000   : > { %v3410_v29 = vadd.f32 %v3409_v6, %v3408_v47 }
0x1002   : > { %6715 = vrcp.f32 %v3410_v29 }
0x100c   : > { %v6716_v24 = vpop.eup %6715 }
0x100d   : > { %v3412_v59 = vmul.f32 %v6716_v24, %v3400_v3  ;;  %v3413_v33 = vmul.f32 %v6716_v24, %v3401_v25 }
0x100f   : > { %v6421_v55 = vpack.c.bf16 %v3413_v33, %v3412_v59  ;;  %v6613_v59 = vld [vmem:[%s9574_s10] sm:$0xff]  }
0x1010   : > { %6323 = vmatprep.subr.bf16.mxu1 %v6613_v59 }
0x1011   : > { %6422 = vmatprep.subr.bf16.mxu0 %v6421_v55  ;;  %6324 = vmatpush3.bf16.msra.mxu1 %v6613_v59 }
0x1012   : > { %6424 = vmatpush3.bf16.msra.mxu0 %v6421_v55 }
0x1015   : > { %6303 = vmatmul.mubr.msk.f32.vlgmr.msra.gmra.mrb[54].mxu0 %vm1610_vm12, %v5838_v56  ;;  %v6614_v56 = vld [vmem:[%s9574_s10 + $0x8] sm:$0xff]  }
0x1016   : > { %6325 = vmatprep.subr.bf16.mxu1 %v6614_v56 }
0x1017   : > { %6326 = vmatpush3.bf16.msra.mxu1 %v6614_v56 }
0x1018   : > { %6435 = vmatprep.subr.bf16.mxu1 %v9920_v46 }
0x1068   : > { %v3836_v9 = vpop.xlane.xlu1 %3835 }
0x1069   : > { %v3839_v35 = vadd.f32 %v3836_v9, %v9945_v44 }
0x106b   : > { %v3840_v4 = vsub.f32 0.0, %v3839_v35 }
0x106d   : > { %v3841_v36 = vmul.f32 1.442695, %v3840_v4 }
0x106f   : > { %6717 = vpow2.f32 %v3841_v36 }
0x1079   : > { %v6718_v18 = vpop.eup %6717 }
0x107a   : > { %v3843_v12 = vadd.f32 1.0, %v6718_v18 }
0x107c   : > { %6719 = vrcp.f32 %v3843_v12 }
0x1086   : > { %v6720_v3 = vpop.eup %6719 }
0x1087   : > { %v3846_v25 = vmul.f32 45.0, %v6720_v3 }
0x1089   : > { %v3847_v47 = vadd.f32 5.0, %v3846_v25 }
0x108b   : > { %v3848_v6 = vadd.f32 0.5, %v3847_v47  ;;  %v6498_v13 = vtrunc.f32 %v3847_v47 }
0x108d   : > { %v6496_v29 = vtrunc.f32 %v3848_v6  ;;  %v6499_v33 = vcvt.f32.s32 %v6498_v13 }
0x108f   : > { %v6497_v24 = vcvt.f32.s32 %v6496_v29  ;;  %v3851_v44 = vcvt.s32.f32 %v6499_v33 }
0x1091   : > { %v3853_v55 = vcvt.s32.f32 %v6497_v24  ;;  %v3852_v36 = vsub.f32 %v3847_v47, %v3851_v44 }
0x1093   : > { %v3854_v9 = vmul.f32 0.5, %v3853_v55  ;;  %vm3859_vm15 = vcmp.eq.f32.partialorder %v3852_v36, 0.5 }
0x1095   : > { %v6500_v35 = vtrunc.f32 %v3854_v9 }
0x1097   : > { %v6501_v4 = vcvt.f32.s32 %v6500_v35 }
0x1099   : > { %v3856_v18 = vmul.u32 2, %v6501_v4 }
0x109b   : > { %v3857_v12 = vsub.s32 %v6497_v24, %v3856_v18 }
0x109d   : > { %vm3858_vm14 = vcmp.eq.s32.totalorder %v3857_v12, 1 }
0x109e   : > { %vm3860_vm3 = vmand %vm3859_vm15, %vm3858_vm14 }
0x109f   : > { %v3861_v3 = vsel %vm3860_vm3, 1, %v9940_v42 }
0x10a0   : > { %v3862_v25 = vsub.s32 %v6497_v24, %v3861_v3 }
0x10a2   : > { %vm3863_vm4 = vcmp.gt.s32.totalorder %v3862_v25, 3 }
0x10a3   : > { %v3864_v6 = vsel %vm3863_vm4, %v3862_v25, 3 }
0x10a4   : > { %vm3865_vm5 = vcmp.lt.s32.totalorder %v3864_v6, 16 }
0x10a5   : > { %v3866_v29 = vsel %vm3865_vm5, %v3864_v6, 16 }
0x10a6   : > { %v3867_v13 = vcvt.s32.f32 %v3866_v29 }
0x10a8   : > { %v3868_v59 = vmul.f32 0.5, %v3867_v13 }
0x10aa   : > { %v6502_v33 = vtrunc.f32 %v3868_v59 }
0x10ac   : > { %v6503_v55 = vcvt.f32.s32 %v6502_v33 }
0x10ae   : > { %v3870_v56 = vmul.u32 2, %v6503_v55 }
0x10b0   : > { %vm3871_vm6 = vcmp.eq.s32.totalorder %v3866_v29, %v3870_v56 }
0x10b1   : > { %v3872_v47 = vsel %vm3871_vm6, 1, %v9940_v42  ;;  %v9953_v42 = vld [vmem:[#allocation47_spill] sm:$0xff] }
0x10b2   : > { %v3873_v9 = vsub.s32 %v3866_v29, %v3872_v47 }
0x10b4   : > { %vm3874_vm7 = vcmp.gt.s32.totalorder %v3873_v9, 3 }
0x10b5   : > { %v3875_v44 = vsel %vm3874_vm7, %v3873_v9, 3 }
0x10b6   : > { %v3876_v35 = vcvt.s32.f32 %v3875_v44  ;;  %v3884_v4 = vrot.slane %v3875_v44, %v9928_v8 }
0x10b8   : > { %v3877_v36 = vmul.f32 0.5, %v3876_v35  ;;  %vm3885_vm8 = vcmp.lt.s32.totalorder %v9941_v32, %v3884_v4  ;;  %vm3886_vm9 = vcmp.lt.s32.totalorder %v9942_v41, %v3884_v4  ;;  %v9952_v41 = vld [vmem:[#allocation46_spill] sm:$0xff] }
0x10b9   : > { %v3887_v24 = vsel %vm3885_vm8, %v8266_v7, -inf  ;;  %v3888_v18 = vsel %vm3886_vm9, %v8271_v51, -inf }
0x10ba   : > { %v6504_v12 = vtrunc.f32 %v3877_v36  ;;  %v3889_v3 = vsel %vm712_vm0, %v3887_v24, -inf  ;;  %v3890_v25 = vsel %vm712_vm0, %v3888_v18, -inf }
0x10bb   : > { %v3891_v6 = vmax.f32 %v3889_v3, %v3890_v25 }
0x10bc   : > { %v6505_v29 = vcvt.f32.s32 %v6504_v12 }
0x10bd   : > { %v3892_v13 = vrot.slane %v3891_v6, 4 }
0x10be   : > { %v5851_v59 = vadd.s32 4294967289, %v6505_v29 }
0x10bf   : > { %v3893_v33 = vmax.f32 %v3891_v6, %v3892_v13 }
0x10c0   : > { %v8329_v55 = vrot.slane %v5851_v59, %v9928_v8 }
0x10c1   : > { %v3894_v56 = vrot.slane %v3893_v33, 2 }
0x10c2   : > { %9946 = vst [vmem:[#allocation35_spill] sm:$0xff] %v8329_v55  ;;  %vm3923_vm10 = vcmp.eq.s32.totalorder %v9943_v48, %v8329_v55 }
0x10c3   : > { %v5852_v47 = vsel %vm3923_vm10, 1.0, %v9921_v31  ;;  %v3895_v9 = vmax.f32 %v3893_v33, %v3894_v56 }
0x10c4   : > { %6320 = vmatprep.mubr.msk.f32.mxu0 %vm1610_vm12, %v5852_v47 }
0x10c5   : > { %v3896_v44 = vrot.slane %v3895_v9, 1 }
0x10c7   : > { %v3897_v35 = vmax.f32 %v3895_v9, %v3896_v44 }
0x10c9   : > { %v3898_v36 = vsub.f32 %v8266_v7, %v3897_v35  ;;  %v3899_v24 = vsub.f32 %v8271_v51, %v3897_v35 }
0x10cb   : > { %v3900_v18 = vmul.f32 1.442695, %v3898_v36  ;;  %v3902_v12 = vmul.f32 1.442695, %v3899_v24  ;;  %v9949_v24 = vld [vmem:[#allocation43_spill] sm:$0xff] }
0x10cd   : > { %6721 = vpow2.f32 %v3900_v18  ;;  %v9950_v18 = vld [vmem:[#allocation44_spill] sm:$0xff] }
0x10ce   : > { %6723 = vpow2.f32 %v3902_v12 }
0x10d7   : > { %v6722_v3 = vpop.eup %6721 }
0x10d8   : > { %v6724_v25 = vpop.eup %6723  ;;  %v8339_v6 = vsel %vm3885_vm8, %v6722_v3, 0.0  ;;  %v9951_v3 = vld [vmem:[#allocation45_spill] sm:$0xff] }
0x10d9   : > { %9947 = vst [vmem:[#allocation31_spill] sm:$0xff] %v8339_v6  ;;  %v8343_v29 = vsel %vm3886_vm9, %v6724_v25, 0.0  ;;  %v3906_v13 = vsel %vm712_vm0, %v8339_v6, 0.0 }
0x10da   : > { %9948 = vst [vmem:[#allocation34_spill] sm:$0xff] %v8343_v29  ;;  %v3907_v7 = vsel %vm712_vm0, %v8343_v29, 0.0 }
0x10db   : > { %v3908_v51 = vadd.f32 %v3907_v7, %v3906_v13  ;;  %v9954_v7 = vld [vmem:[#allocation48_spill] sm:$0xff] }
0x10dd   : > { %v3909_v59 = vrot.slane %v3908_v51, 4 }
0x10df   : > { %v3910_v33 = vadd.f32 %v3909_v59, %v3908_v51 }
0x10e1   : > { %v3911_v56 = vrot.slane %v3910_v33, 2 }
0x10e3   : > { %v3912_v47 = vadd.f32 %v3911_v56, %v3910_v33 }
0x10e5   : > { %v3913_v9 = vrot.slane %v3912_v47, 1 }
0x10e7   : > { %v3914_v35 = vadd.f32 %v3913_v9, %v3912_v47 }
0x10e8   : > { %v6304_v44 = vpop.f32.mrb[54].mxu0 }
0x10e9   : > { %v3636_v36 = vrot.slane %v6304_v44, %v9928_v8  ;;  %v3649_v4 = vrot.slane %v6304_v44, %v9949_v24  ;;  %v3662_v12 = vrot.slane %v6304_v44, %v9950_v18  ;;  %v3675_v25 = vrot.slane %v6304_v44, %v9951_v3  ;;  %v3497_v48 = vpop.f32.mrb[55].mxu0 }
0x10ea   : > { %v3688_v32 = vrot.slane %v6304_v44, %v9952_v41  ;;  %v3701_v13 = vrot.slane %v6304_v44, %v9953_v42  ;;  %v3714_v51 = vrot.slane %v6304_v44, %v9954_v7  ;;  %v3527_v59 = vrot.slane %v3497_v48, %v9928_v8 }
0x10eb   : > { %v8358_v33 = vmul.f32 %v3636_v36, %v8164_v19  ;;  %v8361_v56 = vmul.f32 %v3636_v36, %v8134_v15  ;;  %v8364_v47 = vmul.f32 %v3636_v36, %v8136_v16  ;;  %v8367_v9 = vmul.f32 %v3636_v36, %v8190_v10 }
0x10ec   : > { %v8370_v46 = vmul.f32 %v3649_v4, %v8166_v5  ;;  %v8373_v31 = vmul.f32 %v3649_v4, %v8138_v28  ;;  %v8376_v44 = vmul.f32 %v3649_v4, %v8140_v52  ;;  %v8379_v8 = vmul.f32 %v3649_v4, %v8192_v53 }
0x10ed   : > { %v8382_v14 = vmul.f32 %v3662_v12, %v8168_v58  ;;  %v8385_v55 = vmul.f32 %v3662_v12, %v8142_v50  ;;  %v8388_v10 = vmul.f32 %v3662_v12, %v8144_v30  ;;  %v8391_v36 = vmul.f32 %v3662_v12, %v8194_v40 }
0x10ee   : > { %v8394_v29 = vmul.f32 %v3675_v25, %v8170_v0  ;;  %v8397_v6 = vmul.f32 %v3675_v25, %v8146_v39  ;;  %v8400_v53 = vmul.f32 %v3675_v25, %v8148_v34  ;;  %v8403_v4 = vmul.f32 %v3675_v25, %v8196_v21 }
0x10ef   : > { %9955 = vst [vmem:[#allocation28_spill] sm:$0xff] %v8385_v55  ;;  %9956 = vst [vmem:[#allocation56_spill] sm:$0xff] %v8388_v10  ;;  %v8406_v55 = vmul.f32 %v3688_v32, %v8172_v49  ;;  %v8409_v10 = vmul.f32 %v3688_v32, %v8150_v37  ;;  %v8412_v40 = vmul.f32 %v3688_v32, %v8152_v57  ;;  %6725 = vrcp.f32 %v3914_v35 }
0x10f0   : > { %9957 = vst [vmem:[#allocation29_spill] sm:$0xff] %v8397_v6  ;;  %9958 = vst [vmem:[#allocation30_spill] sm:$0xff] %v8400_v53  ;;  %v8415_v12 = vmul.f32 %v3688_v32, %v8198_v17  ;;  %v8418_v6 = vmul.f32 %v3701_v13, %v8174_v27  ;;  %v8421_v53 = vmul.f32 %v3701_v13, %v8154_v45 }
0x10f1   : > { %9959 = vst [vmem:[#allocation58_spill] sm:$0xff] %v8409_v10  ;;  %9960 = vst [vmem:[#allocation32_spill] sm:$0xff] %v8412_v40  ;;  %v8424_v21 = vmul.f32 %v3701_v13, %v8156_v2  ;;  %v8427_v25 = vmul.f32 %v3701_v13, %v8222_v54  ;;  %v8430_v10 = vmul.f32 %v3714_v51, %v8176_v23 }
0x10f2   : > { %9961 = vst [vmem:[#allocation37_spill] sm:$0xff] %v8418_v6  ;;  %9962 = vst [vmem:[#allocation57_spill] sm:$0xff] %v8421_v53  ;;  %v8433_v40 = vmul.f32 %v3714_v51, %v8178_v1  ;;  %v8436_v17 = vmul.f32 %v3714_v51, %v8180_v38  ;;  %v8439_v32 = vmul.f32 %v3714_v51, %v8224_v11 }
0x10f3   : > { %9963 = vst [vmem:[#allocation27_spill] sm:$0xff] %v8424_v21  ;;  %9964 = vst [vmem:[#allocation54_spill] sm:$0xff] %v8427_v25  ;;  %v3528_v53 = vmul.f32 %v3527_v59, %v8182_v61  ;;  %v3529_v6 = vmul.f32 %v3527_v59, %v8164_v19  ;;  %v3530_v21 = vmul.f32 %v3527_v59, %v8134_v15 }
0x10f4   : > { %9965 = vst [vmem:[#allocation50_spill] sm:$0xff] %v8430_v10  ;;  %9966 = vst [vmem:[#allocation55_spill] sm:$0xff] %v8433_v40  ;;  %v3531_v54 = vmul.f32 %v3527_v59, %v8136_v16  ;;  %v3539_v13 = vrot.slane %v3497_v48, %v9949_v24  ;;  %v3551_v10 = vrot.slane %v3497_v48, %v9950_v18 }
0x10f5   : > { %9967 = vst [vmem:[#allocation51_spill] sm:$0xff] %v8436_v17  ;;  %v3563_v40 = vrot.slane %v3497_v48, %v9951_v3  ;;  %v3575_v25 = vrot.slane %v3497_v48, %v9952_v41  ;;  %v3591_v17 = vrot.slane %v3497_v48, %v9953_v42  ;;  %v3607_v11 = vrot.slane %v3497_v48, %v9954_v7 }
0x10f6   : > { %v3623_v61 = vrot.slane %v3497_v48, %v9931_v63  ;;  %v3540_v19 = vmul.f32 %v3539_v13, %v8200_v60  ;;  %v3541_v15 = vmul.f32 %v3539_v13, %v8166_v5  ;;  %v3542_v16 = vmul.f32 %v3539_v13, %v8138_v28  ;;  %v9969_v63 = vld [vmem:[#allocation33_spill] sm:$0xff] }
0x10f7   : > { %v3543_v51 = vmul.f32 %v3539_v13, %v8140_v52  ;;  %v3552_v59 = vmul.f32 %v3551_v10, %v8202_v26  ;;  %v3553_v3 = vmul.f32 %v3551_v10, %v8168_v58  ;;  %v3554_v41 = vmul.f32 %v3551_v10, %v8142_v50 }
0x10f8   : > { %v3555_v42 = vmul.f32 %v3551_v10, %v8144_v30  ;;  %v3564_v7 = vmul.f32 %v3563_v40, %v8204_v43  ;;  %v3565_v48 = vmul.f32 %v3563_v40, %v8170_v0  ;;  %v3566_v60 = vmul.f32 %v3563_v40, %v8146_v39 }
0x10f9   : > { %v3567_v5 = vmul.f32 %v3563_v40, %v8148_v34  ;;  %v3576_v28 = vmul.f32 %v3575_v25, %v8209_v62  ;;  %v3577_v52 = vmul.f32 %v3575_v25, %v8172_v49  ;;  %v3578_v26 = vmul.f32 %v3575_v25, %v8150_v37 }
0x10fa   : > { %v3579_v58 = vmul.f32 %v3575_v25, %v8152_v57  ;;  %v3592_v50 = vmul.f32 %v3591_v17, %v8211_v20  ;;  %v3593_v30 = vmul.f32 %v3591_v17, %v8174_v27  ;;  %v3594_v43 = vmul.f32 %v3591_v17, %v8154_v45  ;;  %v9968_v25 = vld [vmem:[#allocation64_spill] sm:$0xff] }
0x10fb   : > { %v3595_v0 = vmul.f32 %v3591_v17, %v8156_v2  ;;  %v3580_v35 = vadd.f32 %v3576_v28, %v3528_v53  ;;  %v3581_v39 = vadd.f32 %v3577_v52, %v3529_v6  ;;  %v3582_v10 = vadd.f32 %v3578_v26, %v3530_v21  ;;  %v9970_v53 = vld [vmem:[#allocation62_spill] sm:$0xff]  ;;  %v9971_v21 = vld [vmem:[#allocation25_spill] sm:$0xff] }
0x10fc   : > { %v3583_v34 = vadd.f32 %v3579_v58, %v3531_v54  ;;  %v3596_v40 = vadd.f32 %v3592_v50, %v3540_v19  ;;  %v3597_v62 = vadd.f32 %v3593_v30, %v3541_v15  ;;  %v3598_v13 = vadd.f32 %v3594_v43, %v3542_v16  ;;  %v6726_v54 = vpop.eup %6725  ;;  %v9976_v58 = vld [vmem:[#allocation58_spill] sm:$0xff]  ;;  %v9977_v50 = vld [vmem:[#allocation32_spill] sm:$0xff]  ;;  %v9978_v43 = vld [vmem:[#allocation37_spill] sm:$0xff] }
0x10fd   : > { %v3599_v49 = vadd.f32 %v3595_v0, %v3543_v51  ;;  %v3608_v37 = vmul.f32 %v3607_v11, %v8213_v22  ;;  %v3609_v57 = vmul.f32 %v3607_v11, %v8176_v23  ;;  %v3610_v20 = vmul.f32 %v3607_v11, %v8178_v1 }
0x10fe   : > { %v3611_v27 = vmul.f32 %v3607_v11, %v8180_v38  ;;  %v3624_v45 = vmul.f32 %v3623_v61, %v9968_v25  ;;  %v3625_v2 = vmul.f32 %v3623_v61, %v9969_v63  ;;  %v3626_v6 = vmul.f32 %v3623_v61, %v9970_v53 }
0x10ff   : > { %v3627_v17 = vmul.f32 %v3623_v61, %v9971_v21  ;;  %v3612_v19 = vadd.f32 %v3608_v37, %v3552_v59  ;;  %v3613_v15 = vadd.f32 %v3609_v57, %v3553_v3  ;;  %v3614_v16 = vadd.f32 %v3610_v20, %v3554_v41 }
0x1100   : > { %v3615_v51 = vadd.f32 %v3611_v27, %v3555_v42  ;;  %v3628_v22 = vadd.f32 %v3624_v45, %v3564_v7  ;;  %v3629_v28 = vadd.f32 %v3625_v2, %v3565_v48  ;;  %v3630_v23 = vadd.f32 %v3626_v6, %v3566_v60  ;;  %v9972_v7 = vld [vmem:[#allocation28_spill] sm:$0xff]  ;;  %v9974_v60 = vld [vmem:[#allocation29_spill] sm:$0xff]  ;;  %v9985_v6 = vld [vmem:[#allocation31_spill] sm:$0xff] }
0x1101   : > { %v3631_v52 = vadd.f32 %v3627_v17, %v3567_v5  ;;  %v3641_v1 = vadd.f32 %v8358_v33, %v3580_v35  ;;  %v3642_v38 = vadd.f32 %v8361_v56, %v3581_v39  ;;  %v3643_v11 = vadd.f32 %v8364_v47, %v3582_v10  ;;  %v9973_v48 = vld [vmem:[#allocation56_spill] sm:$0xff]  ;;  %v9975_v5 = vld [vmem:[#allocation30_spill] sm:$0xff]  ;;  %v9979_v35 = vld [vmem:[#allocation57_spill] sm:$0xff] }
0x1102   : > { %v3644_v63 = vadd.f32 %v8367_v9, %v3583_v34  ;;  %v3654_v26 = vadd.f32 %v8370_v46, %v3596_v40  ;;  %v3655_v61 = vadd.f32 %v8373_v31, %v3597_v62  ;;  %v3656_v3 = vadd.f32 %v8376_v44, %v3598_v13  ;;  %v9980_v39 = vld [vmem:[#allocation27_spill] sm:$0xff]  ;;  %v9981_v10 = vld [vmem:[#allocation54_spill] sm:$0xff] }
0x1103   : > { %v3657_v42 = vadd.f32 %v8379_v8, %v3599_v49  ;;  %v3667_v41 = vadd.f32 %v8382_v14, %v3612_v19  ;;  %v3668_v59 = vadd.f32 %v9972_v7, %v3613_v15  ;;  %v3669_v33 = vadd.f32 %v9973_v48, %v3614_v16  ;;  %v9982_v40 = vld [vmem:[#allocation50_spill] sm:$0xff]  ;;  %v9983_v13 = vld [vmem:[#allocation55_spill] sm:$0xff]  ;;  %v9998_v48 = vld [vmem:[#allocation24_spill] sm:$0xff] }
0x1104   : > { %v3670_v56 = vadd.f32 %v8391_v36, %v3615_v51  ;;  %v3680_v47 = vadd.f32 %v8394_v29, %v3628_v22  ;;  %v3681_v9 = vadd.f32 %v9974_v60, %v3629_v28  ;;  %v3682_v46 = vadd.f32 %v9975_v5, %v3630_v23  ;;  %v9984_v49 = vld [vmem:[#allocation51_spill] sm:$0xff]  ;;  %v9986_v17 = vld [vmem:[#allocation34_spill] sm:$0xff]  ;;  %v6618_v5 = vld [vmem:[%s9575_s11 + $0x18] sm:$0xff]  }
0x1105   : > { %v3683_v31 = vadd.f32 %v8403_v4, %v3631_v52  ;;  %v3693_v44 = vadd.f32 %v8406_v55, %v3641_v1  ;;  %v3694_v8 = vadd.f32 %v9976_v58, %v3642_v38  ;;  %v3695_v14 = vadd.f32 %v9977_v50, %v3643_v11  ;;  %v9987_v23 = vld [vmem:[#allocation35_spill] sm:$0xff]  ;;  %v6617_v11 = vld [vmem:[%s9575_s11 + $0x10] sm:$0xff]   ;;  %v6622_v58 = vld [vmem:[%s9575_s11 + $0x38] sm:$0xff]  }
0x1106   : > { %v3696_v30 = vadd.f32 %v8415_v12, %v3644_v63  ;;  %v3706_v0 = vadd.f32 %v9978_v43, %v3654_v26  ;;  %v3707_v36 = vadd.f32 %v9979_v35, %v3655_v61  ;;  %v3708_v29 = vadd.f32 %v9980_v39, %v3656_v3  ;;  %v6616_v52 = vld [vmem:[%s9575_s11 + $0x8] sm:$0xff]   ;;  %v9993_v3 = vld [vmem:[#allocation26_spill] sm:$0xff]  ;;  %v10002_v35 = vld [vmem:[#allocation21_spill] sm:$0xff] }
0x1107   : > { %v3709_v34 = vadd.f32 %v9981_v10, %v3657_v42  ;;  %v3719_v62 = vadd.f32 %v9982_v40, %v3667_v41  ;;  %v3720_v4 = vadd.f32 %v9983_v13, %v3668_v59  ;;  %v3721_v55 = vadd.f32 %v9984_v49, %v3669_v33  ;;  %v9995_v41 = vld [vmem:[#allocation61_spill] sm:$0xff]  ;;  %v8578_v43 = vld [vmem:[#allocation2 + $0xa] sm:$0xff] }
0x1108   : > { %v3722_v37 = vadd.f32 %v8439_v32, %v3670_v56  ;;  %v3723_v57 = vadd.f32 %v3706_v0, %v3693_v44  ;;  %v3724_v20 = vadd.f32 %v3707_v36, %v3694_v8  ;;  %v3725_v27 = vadd.f32 %v3708_v29, %v3695_v14  ;;  %v6615_v32 = vld [vmem:[%s9575_s11] sm:$0xff]   ;;  %v6621_v44 = vld [vmem:[%s9575_s11 + $0x30] sm:$0xff]  }
0x1109   : > { %v3726_v12 = vadd.f32 %v3709_v34, %v3696_v30  ;;  %v3727_v25 = vadd.f32 %v3719_v62, %v3680_v47  ;;  %v3728_v45 = vadd.f32 %v3720_v4, %v3681_v9  ;;  %v3729_v2 = vadd.f32 %v3721_v55, %v3682_v46  ;;  %v10000_v56 = vld [vmem:[#allocation22_spill] sm:$0xff]  ;;  %v8574_v14 = vld [vmem:[#allocation2 + $0x9] sm:$0xff]  ;;  %v8576_v30 = vld [vmem:[#allocation2 + $0x11] sm:$0xff] }
0x110a   : > { %v3730_v53 = vadd.f32 %v3722_v37, %v3683_v31  ;;  %v3916_v21 = vmul.f32 %v6726_v54, %v9985_v6  ;;  %v3917_v19 = vmul.f32 %v6726_v54, %v9986_v17  ;;  %v9988_v54 = vld [vmem:[#allocation42_spill] sm:$0xff]  ;;  %v9989_v1 = vmov 0.0   ;;  %v6620_v31 = vld [vmem:[%s9575_s11 + $0x28] sm:$0xff]   ;;  %v8587_v34 = vld [vmem:[#allocation2 + $0x12] sm:$0xff] }
0x110b   : > { %v3731_v15 = vadd.f32 %v3727_v25, %v3723_v57  ;;  %v3732_v16 = vadd.f32 %v3728_v45, %v3724_v20  ;;  %v3733_v51 = vadd.f32 %v3729_v2, %v3725_v27  ;;  %vm3924_vm11 = vcmp.eq.s32.totalorder %v9988_v54, %v9987_v23  ;;  %v6619_v46 = vld [vmem:[%s9575_s11 + $0x20] sm:$0xff]   ;;  %v8589_v40 = vld [vmem:[#allocation2 + $0xb] sm:$0xff]  ;;  %v8591_v62 = vld [vmem:[#allocation2 + $0x13] sm:$0xff] }
0x110c   : > { %v3734_v22 = vadd.f32 %v3730_v53, %v3726_v12  ;;  %v6431_v28 = vpack.c.bf16 %v3917_v19, %v3916_v21  ;;  %v5853_v38 = vsel %vm3924_vm11, 1.0, %v9989_v1  ;;  %v8572_v50 = vld [vmem:[#allocation2 + $0x19] sm:$0xff]  ;;  %v10005_v57 = vld [vmem:[#allocation47_spill] sm:$0xff]  ;;  %v10006_v27 = vld [vmem:[#allocation48_spill] sm:$0xff] }
0x110d   : > { %3737 = vst.msk [vmem:[#allocation3 + $0x10] sm:$0xff] %vm712_vm0, %v3733_v51  ;;  %3735 = vst.msk [vmem:[#allocation3] sm:$0xff] %vm712_vm0, %v3731_v15  ;;  %v8580_v0 = vld [vmem:[#allocation2 + $0x1a] sm:$0xff]  ;;  %v8599_v25 = vld [vmem:[#allocation2 + $0xc] sm:$0xff] }
0x110e   : > { %3738 = vst.msk [vmem:[#allocation3 + $0x18] sm:$0xff] %vm712_vm0, %v3734_v22  ;;  %3736 = vst.msk [vmem:[#allocation3 + $0x8] sm:$0xff] %vm712_vm0, %v3732_v16  ;;  %6432 = vmatprep.subr.bf16.mxu0 %v6431_v28  ;;  %v8593_v13 = vld [vmem:[#allocation2 + $0x1b] sm:$0xff]  ;;  %v8616_v15 = vld [vmem:[#allocation2 + $0xd] sm:$0xff] }
0x110f   : > { %6434 = vmatpush3.bf16.msra.mxu0 %v6431_v28  ;;  %v10003_v4 = vld [vmem:[#allocation45_spill] sm:$0xff]  ;;  %v10004_v55 = vld [vmem:[#allocation46_spill] sm:$0xff] }
0x1110   : > { %6335 = vmatprep.subr.bf16.mxu0 %v6615_v32  ;;  %v8601_v45 = vld [vmem:[#allocation2 + $0x14] sm:$0xff]  ;;  %v4136_v2 = vld [vmem:[#allocation2 + $0x21] sm:$0xff] }
0x1111   : > { %v8614_v19 = vld [vmem:[#allocation2 + $0x1c] sm:$0xff] }
0x1112   : > { %6321 = vmatmul.mubr.msk.f32.vlgmr.msra.gmra.mrb[56].mxu0 %vm1610_vm12, %v5853_v38  ;;  %v4149_v51 = vld [vmem:[#allocation2 + $0x22] sm:$0xff]  ;;  %v8629_v23 = vld [vmem:[#allocation2 + $0x15] sm:$0xff] }
0x1113   : > { %6336 = vmatpush3.bf16.msra.mxu0 %v6615_v32 }
0x1114   : > { %v8527_v63 = vld [vmem:[#allocation3] sm:$0xff]  ;;  %v8531_v61 = vld [vmem:[#allocation3 + $0x10] sm:$0xff]  ;;  %6337 = vmatprep.subr.bf16.mxu0 %v6616_v52 }
0x1115   : > { %9990 = vst [vmem:[#allocation64_spill] sm:$0xff] %v8527_v63  ;;  %v8529_v26 = vld [vmem:[#allocation3 + $0x8] sm:$0xff]  ;;  %9992 = vst [vmem:[#allocation62_spill] sm:$0xff] %v8531_v61  ;;  %v8535_v42 = vsub.f32 %v9993_v3, %v8527_v63  ;;  %v8541_v59 = vld [vmem:[#allocation3 + $0x18] sm:$0xff]  ;;  %v8545_v33 = vsub.f32 %v9998_v48, %v8531_v61 }
0x1116   : > { %9991 = vst [vmem:[#allocation33_spill] sm:$0xff] %v8529_v26  ;;  %v8539_v7 = vsub.f32 %v9995_v41, %v8529_v26  ;;  %9997 = vst [vmem:[#allocation56_spill] sm:$0xff] %v8541_v59  ;;  %v8549_v47 = vsub.f32 %v10000_v56, %v8541_v59  ;;  %v8644_v56 = vld [vmem:[#allocation2 + $0xe] sm:$0xff]  ;;  %v8674_v59 = vld [vmem:[#allocation2 + $0x1f] sm:$0xff] }
0x1117   : > { %9994 = vst [vmem:[#allocation25_spill] sm:$0xff] %v8535_v42  ;;  %9999 = vst [vmem:[#allocation29_spill] sm:$0xff] %v8545_v33  ;;  %6338 = vmatpush3.bf16.msra.mxu0 %v6616_v52  ;;  %v8631_v52 = vld [vmem:[#allocation2 + $0x1d] sm:$0xff]  ;;  %v4201_v26 = vld [vmem:[#allocation2 + $0x26] sm:$0xff] }
0x1118   : > { %9996 = vst [vmem:[#allocation28_spill] sm:$0xff] %v8539_v7  ;;  %10001 = vst [vmem:[#allocation30_spill] sm:$0xff] %v8549_v47  ;;  %v4267_v60 = vpack.c.bf16 %v8539_v7, %v8535_v42  ;;  %v4268_v9 = vpack.c.bf16 %v8549_v47, %v8545_v33  ;;  %6339 = vmatprep.subr.bf16.mxu0 %v6617_v11  ;;  %v4024_v42 = vld [vmem:[#allocation2 + $0x1] sm:$0xff] }
0x111a   : > { %6327 = vmatprep.mubr.msk.bf16.mxu1 %vm712_vm0, %v4267_v60  ;;  %v8646_v60 = vld [vmem:[#allocation2 + $0x16] sm:$0xff] }
0x111b   : > { %6328 = vmatmul.mubr.msk.bf16.vlgmr.msra.gmra.mrb[64].mxu1 %vm712_vm0, %v4268_v9  ;;  %6340 = vmatpush3.bf16.msra.mxu0 %v6617_v11  ;;  %v4162_v11 = vld [vmem:[#allocation2 + $0x23] sm:$0xff] }
0x111c   : > { %6341 = vmatprep.subr.bf16.mxu0 %v6618_v5 }
0x111f   : > { %6342 = vmatpush3.bf16.msra.mxu0 %v6618_v5  ;;  %v4175_v5 = vld [vmem:[#allocation2 + $0x24] sm:$0xff] }
0x1120   : > { %6343 = vmatprep.subr.bf16.mxu0 %v6619_v46 }
0x1123   : > { %6344 = vmatpush3.bf16.msra.mxu0 %v6619_v46 }
0x1124   : > { %6345 = vmatprep.subr.bf16.mxu0 %v6620_v31 }
0x1127   : > { %6346 = vmatpush3.bf16.msra.mxu0 %v6620_v31 }
0x1128   : > { %6347 = vmatprep.subr.bf16.mxu0 %v6621_v44 }
0x112b   : > { %6348 = vmatpush3.bf16.msra.mxu0 %v6621_v44 }
0x112c   : > { %6349 = vmatprep.subr.bf16.mxu0 %v6622_v58 }
0x112f   : > { %6350 = vmatpush3.bf16.msra.mxu0 %v6622_v58  ;;  %v4091_v58 = vld [vmem:[#allocation2 + $0x1e] sm:$0xff] }
0x11e5   : > { %v6322_v8 = vpop.f32.mrb[56].mxu0 }
0x11e6   : > { %v4140_v36 = vrot.slane %v6322_v8, %v10002_v35  ;;  %v4153_v39 = vrot.slane %v6322_v8, %v9949_v24  ;;  %v4166_v29 = vrot.slane %v6322_v8, %v9950_v18  ;;  %v8585_v10 = vpop.f32.mrb[57].mxu0  ;;  %v4179_v49 = vrot.slane %v6322_v8, %v10003_v4 }
0x11e7   : > { %v4192_v37 = vrot.slane %v6322_v8, %v10004_v55  ;;  %v4205_v20 = vrot.slane %v6322_v8, %v10005_v57  ;;  %v4218_v12 = vrot.slane %v6322_v8, %v10006_v27  ;;  %v4031_v17 = vrot.slane %v8585_v10, %v10002_v35  ;;  %v8659_v8 = vld [vmem:[#allocation2 + $0xf] sm:$0xff]  ;;  %v4214_v35 = vld [vmem:[#allocation2 + $0x27] sm:$0xff] }
0x11e8   : > { %v8604_v53 = vmul.f32 %v4140_v36, %v8574_v14  ;;  %v8607_v6 = vmul.f32 %v4140_v36, %v8576_v30  ;;  %v8610_v21 = vmul.f32 %v4140_v36, %v8572_v50  ;;  %v8618_v16 = vmul.f32 %v4140_v36, %v4136_v2 }
0x11e9   : > { %v8621_v22 = vmul.f32 %v4153_v39, %v8578_v43  ;;  %v8624_v28 = vmul.f32 %v4153_v39, %v8587_v34  ;;  %v8627_v32 = vmul.f32 %v4153_v39, %v8580_v0  ;;  %v8633_v38 = vmul.f32 %v4153_v39, %v4149_v51  ;;  %v4188_v39 = vld [vmem:[#allocation2 + $0x25] sm:$0xff] }
0x11ea   : > { %v8636_v3 = vmul.f32 %v4166_v29, %v8589_v40  ;;  %v8639_v41 = vmul.f32 %v4166_v29, %v8591_v62  ;;  %v8642_v48 = vmul.f32 %v4166_v29, %v8593_v13  ;;  %v8648_v9 = vmul.f32 %v4166_v29, %v4162_v11  ;;  %v8672_v11 = vld [vmem:[#allocation2 + $0x17] sm:$0xff] }
0x11eb   : > { %v8651_v46 = vmul.f32 %v4179_v49, %v8599_v25  ;;  %v8654_v31 = vmul.f32 %v4179_v49, %v8601_v45  ;;  %v8657_v44 = vmul.f32 %v4179_v49, %v8614_v19  ;;  %v8661_v36 = vmul.f32 %v4179_v49, %v4175_v5 }
0x11ec   : > { %v8664_v2 = vmul.f32 %v4192_v37, %v8616_v15  ;;  %v8667_v29 = vmul.f32 %v4192_v37, %v8629_v23  ;;  %v8670_v51 = vmul.f32 %v4192_v37, %v8631_v52  ;;  %v8676_v61 = vmul.f32 %v4192_v37, %v4188_v39 }
0x11ed   : > { %v8679_v49 = vmul.f32 %v4205_v20, %v8644_v56  ;;  %v8682_v5 = vmul.f32 %v4205_v20, %v8646_v60  ;;  %v8684_v63 = vmul.f32 %v4205_v20, %v4091_v58  ;;  %v8688_v7 = vmul.f32 %v4205_v20, %v4201_v26 }
0x11ee   : > { %10007 = vst [vmem:[#allocation58_spill] sm:$0xff] %v8667_v29  ;;  %10008 = vst [vmem:[#allocation32_spill] sm:$0xff] %v8670_v51  ;;  %v8686_v54 = vpop.f32.mrb[64].mxu1  ;;  %v8691_v47 = vmul.f32 %v4218_v12, %v8659_v8  ;;  %v8694_v37 = vmul.f32 %v4218_v12, %v8672_v11  ;;  %v8697_v39 = vmul.f32 %v4218_v12, %v8674_v59  ;;  %v4122_v29 = vld [vmem:[#allocation2 + $0x18] sm:$0xff] }
0x11ef   : > { %10009 = vst [vmem:[#allocation37_spill] sm:$0xff] %v8676_v61  ;;  %10010 = vst [vmem:[#allocation57_spill] sm:$0xff] %v8679_v49  ;;  %v8699_v33 = vpop.f32.mrb[65].mxu1  ;;  %v8701_v1 = vmul.f32 %v4218_v12, %v4214_v35  ;;  %v4034_v26 = vmul.f32 %v4031_v17, %v8576_v30  ;;  %v4095_v30 = vrot.slane %v8585_v10, %v10005_v57  ;;  %v10022_v12 = vld [vmem:[#allocation23_spill] sm:$0xff] }
0x11f0   : > { %10011 = vst [vmem:[#allocation27_spill] sm:$0xff] %v8682_v5  ;;  %10012 = vst [vmem:[#allocation54_spill] sm:$0xff] %v8684_v63  ;;  %v4032_v63 = vmul.f32 %v4031_v17, %v4024_v42  ;;  %v8705_v20 = vpop.f32.mrb[66].mxu1  ;;  %v4036_v42 = vld [vmem:[#allocation2 + $0x2] sm:$0xff] }
0x11f1   : > { %10013 = vst [vmem:[#allocation50_spill] sm:$0xff] %v8686_v54  ;;  %10014 = vst [vmem:[#allocation55_spill] sm:$0xff] %v8688_v7  ;;  %v4033_v54 = vmul.f32 %v4031_v17, %v8574_v14  ;;  %v8714_v35 = vpop.f32.mrb[67].mxu1  ;;  %v4079_v14 = vrot.slane %v8585_v10, %v10004_v55  ;;  %v4060_v5 = vld [vmem:[#allocation2 + $0x4] sm:$0xff] }
0x11f2   : > { %10015 = vst [vmem:[#allocation51_spill] sm:$0xff] %v8691_v47  ;;  %10016 = vst [vmem:[#allocation31_spill] sm:$0xff] %v8694_v37  ;;  %v4035_v47 = vmul.f32 %v4031_v17, %v8572_v50  ;;  %v4043_v37 = vrot.slane %v8585_v10, %v9949_v24  ;;  %v4111_v50 = vrot.slane %v8585_v10, %v10006_v27 }
0x11f3   : > { %10017 = vst [vmem:[#allocation34_spill] sm:$0xff] %v8697_v39  ;;  %10018 = vst [vmem:[#allocation35_spill] sm:$0xff] %v8699_v33  ;;  %v4055_v39 = vrot.slane %v8585_v10, %v9950_v18  ;;  %v4067_v33 = vrot.slane %v8585_v10, %v10003_v4  ;;  %v4127_v17 = vrot.slane %v8585_v10, %v10022_v12 }
0x11f4   : > { %10019 = vst [vmem:[#allocation26_spill] sm:$0xff] %v8701_v1  ;;  %10020 = vst [vmem:[#allocation61_spill] sm:$0xff] %v8705_v20  ;;  %v4044_v24 = vmul.f32 %v4043_v37, %v4036_v42  ;;  %v4045_v18 = vmul.f32 %v4043_v37, %v8578_v43  ;;  %v4046_v4 = vmul.f32 %v4043_v37, %v8587_v34  ;;  %v4048_v20 = vld [vmem:[#allocation2 + $0x3] sm:$0xff] }
0x11f5   : > { %10021 = vst [vmem:[#allocation24_spill] sm:$0xff] %v8714_v35  ;;  %v4047_v35 = vmul.f32 %v4043_v37, %v8580_v0  ;;  %v4056_v1 = vmul.f32 %v4055_v39, %v4048_v20  ;;  %v4057_v55 = vmul.f32 %v4055_v39, %v8589_v40  ;;  %v4058_v7 = vmul.f32 %v4055_v39, %v8591_v62  ;;  %v4072_v42 = vld [vmem:[#allocation2 + $0x5] sm:$0xff] }
0x11f6   : > { %v4059_v57 = vmul.f32 %v4055_v39, %v8593_v13  ;;  %v4068_v27 = vmul.f32 %v4067_v33, %v4060_v5  ;;  %v4069_v49 = vmul.f32 %v4067_v33, %v8599_v25  ;;  %v4070_v10 = vmul.f32 %v4067_v33, %v8601_v45  ;;  %v4088_v20 = vld [vmem:[#allocation2 + $0x6] sm:$0xff] }
0x11f7   : > { %v4071_v43 = vmul.f32 %v4067_v33, %v8614_v19  ;;  %v4080_v34 = vmul.f32 %v4079_v14, %v4072_v42  ;;  %v4081_v0 = vmul.f32 %v4079_v14, %v8616_v15  ;;  %v4082_v37 = vmul.f32 %v4079_v14, %v8629_v23  ;;  %v4104_v15 = vld [vmem:[#allocation2 + $0x7] sm:$0xff] }
0x11f8   : > { %v4083_v40 = vmul.f32 %v4079_v14, %v8631_v52  ;;  %v4096_v62 = vmul.f32 %v4095_v30, %v4088_v20  ;;  %v4097_v13 = vmul.f32 %v4095_v30, %v8644_v56  ;;  %v4098_v5 = vmul.f32 %v4095_v30, %v8646_v60  ;;  %v4120_v20 = vld [vmem:[#allocation2 + $0x8] sm:$0xff]  ;;  %v4121_v60 = vld [vmem:[#allocation2 + $0x10] sm:$0xff] }
0x11f9   : > { %v4099_v39 = vmul.f32 %v4095_v30, %v4091_v58  ;;  %v4084_v25 = vadd.f32 %v4080_v34, %v4032_v63  ;;  %v4085_v12 = vadd.f32 %v4081_v0, %v4033_v54  ;;  %v4086_v45 = vadd.f32 %v4082_v37, %v4034_v26  ;;  %v4123_v58 = vld [vmem:[#allocation2 + $0x20] sm:$0xff] }
0x11fa   : > { %v4087_v61 = vadd.f32 %v4083_v40, %v4035_v47  ;;  %v4100_v33 = vadd.f32 %v4096_v62, %v4044_v24  ;;  %v4101_v19 = vadd.f32 %v4097_v13, %v4045_v18  ;;  %v4102_v42 = vadd.f32 %v4098_v5, %v4046_v4  ;;  %v10031_v62 = vld [vmem:[#allocation31_spill] sm:$0xff]  ;;  %v10032_v13 = vld [vmem:[#allocation34_spill] sm:$0xff] }
0x11fb   : > { %v4103_v51 = vadd.f32 %v4099_v39, %v4047_v35  ;;  %v4112_v23 = vmul.f32 %v4111_v50, %v4104_v15  ;;  %v4113_v52 = vmul.f32 %v4111_v50, %v8659_v8  ;;  %v4114_v14 = vmul.f32 %v4111_v50, %v8672_v11  ;;  %v10033_v5 = vld [vmem:[#allocation26_spill] sm:$0xff] }
0x11fc   : > { %v4115_v56 = vmul.f32 %v4111_v50, %v8674_v59  ;;  %v4128_v63 = vmul.f32 %v4127_v17, %v4120_v20  ;;  %v4129_v54 = vmul.f32 %v4127_v17, %v4121_v60  ;;  %v4130_v26 = vmul.f32 %v4127_v17, %v4122_v29  ;;  %v10035_v20 = vld [vmem:[#allocation35_spill] sm:$0xff] }
0x11fd   : > { %v4131_v47 = vmul.f32 %v4127_v17, %v4123_v58  ;;  %v4116_v24 = vadd.f32 %v4112_v23, %v4056_v1  ;;  %v4117_v18 = vadd.f32 %v4113_v52, %v4057_v55  ;;  %v4118_v4 = vadd.f32 %v4114_v14, %v4058_v7  ;;  %v10028_v17 = vld [vmem:[#allocation54_spill] sm:$0xff]  ;;  %v10036_v58 = vld [vmem:[#allocation61_spill] sm:$0xff] }
0x11fe   : > { %v4119_v35 = vadd.f32 %v4115_v56, %v4059_v57  ;;  %v4132_v30 = vadd.f32 %v4128_v63, %v4068_v27  ;;  %v4133_v34 = vadd.f32 %v4129_v54, %v4069_v49  ;;  %v4134_v0 = vadd.f32 %v4130_v26, %v4070_v10  ;;  %v10026_v49 = vld [vmem:[#allocation57_spill] sm:$0xff]  ;;  %v10029_v10 = vld [vmem:[#allocation55_spill] sm:$0xff]  ;;  %v10034_v14 = vld [vmem:[#allocation50_spill] sm:$0xff] }
0x11ff   : > { %v4135_v37 = vadd.f32 %v4131_v47, %v4071_v43  ;;  %v4145_v8 = vadd.f32 %v8604_v53, %v4084_v25  ;;  %v4146_v11 = vadd.f32 %v8607_v6, %v4085_v12  ;;  %v4147_v59 = vadd.f32 %v8610_v21, %v4086_v45  ;;  %v10027_v12 = vld [vmem:[#allocation27_spill] sm:$0xff]  ;;  %v10037_v54 = vld [vmem:[#allocation24_spill] sm:$0xff] }
0x1200   : > { %v4148_v50 = vadd.f32 %v8618_v16, %v4087_v61  ;;  %v4158_v40 = vadd.f32 %v8621_v22, %v4100_v33  ;;  %v4159_v29 = vadd.f32 %v8624_v28, %v4101_v19  ;;  %v4160_v1 = vadd.f32 %v8627_v32, %v4102_v42  ;;  %v10023_v28 = vld [vmem:[#allocation58_spill] sm:$0xff]  ;;  %v10030_v43 = vld [vmem:[#allocation51_spill] sm:$0xff] }
0x1201   : > { %v4161_v7 = vadd.f32 %v8633_v38, %v4103_v51  ;;  %v4171_v55 = vadd.f32 %v8636_v3, %v4116_v24  ;;  %v4172_v57 = vadd.f32 %v8639_v41, %v4117_v18  ;;  %v4173_v27 = vadd.f32 %v8642_v48, %v4118_v4  ;;  %v10024_v38 = vld [vmem:[#allocation32_spill] sm:$0xff]  ;;  %v10025_v51 = vld [vmem:[#allocation37_spill] sm:$0xff] }
0x1202   : > { %v4174_v53 = vadd.f32 %v8648_v9, %v4119_v35  ;;  %v4184_v6 = vadd.f32 %v8651_v46, %v4132_v30  ;;  %v4185_v61 = vadd.f32 %v8654_v31, %v4133_v34  ;;  %v4186_v21 = vadd.f32 %v8657_v44, %v4134_v0 }
0x1203   : > { %v4187_v16 = vadd.f32 %v8661_v36, %v4135_v37  ;;  %v4197_v22 = vadd.f32 %v8664_v2, %v4145_v8  ;;  %v4198_v32 = vadd.f32 %v10023_v28, %v4146_v11  ;;  %v4199_v3 = vadd.f32 %v10024_v38, %v4147_v59  ;;  %v10041_v8 = vld [vmem:[#allocation65_spill] sm:$0xff]  ;;  %v10042_v59 = vld [vmem:[#allocation66_spill] sm:$0xff] }
0x1204   : > { %v4200_v41 = vadd.f32 %v10025_v51, %v4148_v50  ;;  %v4210_v48 = vadd.f32 %v10026_v49, %v4158_v40  ;;  %v4211_v9 = vadd.f32 %v10027_v12, %v4159_v29  ;;  %v4212_v46 = vadd.f32 %v10028_v17, %v4160_v1  ;;  %v10044_v29 = vld [vmem:[#allocation63_spill] sm:$0xff]  ;;  %v5873_v28 = vld [vmem:[%s9577_s13 + $0x58] sm:$0xff] }
0x1205   : > { %v4213_v31 = vadd.f32 %v10029_v10, %v4161_v7  ;;  %v4223_v44 = vadd.f32 %v10030_v43, %v4171_v55  ;;  %v4224_v36 = vadd.f32 %v10031_v62, %v4172_v57  ;;  %v4225_v2 = vadd.f32 %v10032_v13, %v4173_v27  ;;  %v10045_v7 = vld [vmem:[#allocation67_spill] sm:$0xff]  ;;  %v10050_v49 = vld [vmem:[#allocation25_spill] sm:$0xff]  ;;  %v10055_v43 = vld [vmem:[#allocation28_spill] sm:$0xff] }
0x1206   : > { %v4226_v39 = vadd.f32 %v10033_v5, %v4174_v53  ;;  %v4227_v25 = vadd.f32 %v4210_v48, %v4197_v22  ;;  %v4228_v45 = vadd.f32 %v4211_v9, %v4198_v32  ;;  %v4229_v33 = vadd.f32 %v4212_v46, %v4199_v3  ;;  %v5872_v22 = vld [vmem:[%s9577_s13 + $0x50] sm:$0xff]  ;;  %v10048_v3 = vld [vmem:[#allocation29_spill] sm:$0xff]  ;;  %v10052_v9 = vld [vmem:[#allocation30_spill] sm:$0xff] }
0x1207   : > { %v4230_v19 = vadd.f32 %v4213_v31, %v4200_v41  ;;  %v4231_v42 = vadd.f32 %v4223_v44, %v4184_v6  ;;  %v4232_v15 = vadd.f32 %v4224_v36, %v4185_v61  ;;  %v4233_v23 = vadd.f32 %v4225_v2, %v4186_v21  ;;  %v5870_v6 = vld [vmem:[%s9577_s13 + $0x40] sm:$0xff]  ;;  %v5871_v61 = vld [vmem:[%s9577_s13 + $0x48] sm:$0xff]  ;;  %v10054_v10 = vld [vmem:[#allocation21_spill] sm:$0xff] }
0x1208   : > { %v4234_v52 = vadd.f32 %v4226_v39, %v4187_v16  ;;  %v4366_v56 = vmax.f32 %v10034_v14, 0.0  ;;  %v4364_v60 = vmax.f32 %v10035_v20, 0.0  ;;  %v4367_v63 = vmax.f32 %v10036_v58, 0.0  ;;  %v10057_v62 = vld [vmem:[#allocation23_spill] sm:$0xff] }
0x1209   : > { %v4365_v26 = vmax.f32 %v10037_v54, 0.0  ;;  %v4235_v47 = vadd.f32 %v4231_v42, %v4227_v25  ;;  %v4236_v24 = vadd.f32 %v4232_v15, %v4228_v45  ;;  %v4237_v18 = vadd.f32 %v4233_v23, %v4229_v33 }
0x120a   : > { %v4238_v4 = vadd.f32 %v4234_v52, %v4230_v19  ;;  %v4373_v35 = vpack.c.bf16 %v4367_v63, %v4366_v56  ;;  %v10046_v53 = vmov 0.0   ;;  %v8815_v21 = vpack.c.bf16 %v5871_v61, %v5870_v6 }
0x120b   : > { %v4372_v30 = vpack.c.bf16 %v4365_v26, %v4364_v60  ;;  %4239 = vst.msk [vmem:[#allocation3 + $0x20] sm:$0xff] %vm712_vm0, %v4235_v47  ;;  %4240 = vst.msk [vmem:[#allocation3 + $0x28] sm:$0xff] %vm712_vm0, %v4236_v24  ;;  %v10047_v16 = vmov 0.0|0.0   ;;  %v8825_v32 = vpack.c.bf16 %v5873_v28, %v5872_v22 }
0x120c   : > { %4241 = vst.msk [vmem:[#allocation3 + $0x30] sm:$0xff] %vm712_vm0, %v4237_v18  ;;  %4242 = vst.msk [vmem:[#allocation3 + $0x38] sm:$0xff] %vm712_vm0, %v4238_v4  ;;  %6437 = vmatpush3.bf16.msra.mxu1 %v8815_v21 }
0x120d   : > { %6351 = vmatprep.mubr.bf16.mxu0 %v4372_v30  ;;  %6438 = vmatprep.subr.bf16.mxu1 %v10047_v16 }
0x120e   : > { %6352 = vmatmul.mubr.bf16.vlgmr.msra.gmra.mrb[60].mxu0 %v4373_v35 }
0x1210   : > { %6440 = vmatpush3.bf16.msra.mxu1 %v8825_v32 }
0x1212   : > { %v8777_v34 = vld [vmem:[#allocation3 + $0x20] sm:$0xff]  ;;  %v8779_v0 = vld [vmem:[#allocation3 + $0x28] sm:$0xff] }
0x1213   : > { %10038 = vst [vmem:[#allocation22_spill] sm:$0xff] %v8777_v34  ;;  %10039 = vst [vmem:[#allocation58_spill] sm:$0xff] %v8779_v0  ;;  %v8781_v37 = vld [vmem:[#allocation3 + $0x30] sm:$0xff]  ;;  %v8785_v11 = vsub.f32 %v10041_v8, %v8777_v34  ;;  %v8789_v50 = vsub.f32 %v10042_v59, %v8779_v0  ;;  %v8791_v40 = vld [vmem:[#allocation3 + $0x38] sm:$0xff] }
0x1214   : > { %10040 = vst [vmem:[#allocation32_spill] sm:$0xff] %v8781_v37  ;;  %10043 = vst [vmem:[#allocation37_spill] sm:$0xff] %v8791_v40  ;;  %v8795_v1 = vsub.f32 %v10044_v29, %v8781_v37  ;;  %v8799_v55 = vsub.f32 %v10045_v7, %v8791_v40 }
0x1215   : > { %v4269_v57 = vpack.c.bf16 %v8789_v50, %v8785_v11 }
0x1216   : > { %v4270_v27 = vpack.c.bf16 %v8799_v55, %v8795_v1 }
0x1217   : > { %6331 = vmatprep.mubr.msk.bf16.mxu1 %vm712_vm0, %v4269_v57 }
0x1218   : > { %6332 = vmatmul.mubr.msk.bf16.gmra.mrb[68].mxu1 %vm712_vm0, %v4270_v27 }
0x1219   : > { %6367 = vmatprep.mubr.msk.f32.mxu1 %vm6884_vm1, %v10046_v53 }
0x12e1   : > { %v6353_v38 = vpop.f32.mrb[60].mxu0 }
0x12e2   : > { %v8829_v51 = vadd.f32 %v6353_v38, %v10048_v3  ;;  %v4474_v41 = vpop.f32.mrb[61].mxu0 }
0x12e3   : > { %v8832_v48 = vadd.f32 %v4474_v41, %v10050_v49  ;;  %v6354_v12 = vpop.f32.mrb[62].mxu0 }
0x12e4   : > { %10049 = vst [vmem:[#allocation57_spill] sm:$0xff] %v8829_v51  ;;  %4795 = vst.msk [vmem:[#allocation2 + $0x18] sm:$0xff] %vm712_vm0, %v8829_v51  ;;  %v8837_v17 = vadd.f32 %v6354_v12, %v10052_v9  ;;  %v4477_v46 = vpop.f32.mrb[63].mxu0  ;;  %v4516_v39 = vsel %vm712_vm0, %v8829_v51, 0.0 }
0x12e5   : > { %10051 = vst [vmem:[#allocation27_spill] sm:$0xff] %v8832_v48  ;;  %v4791_v31 = vrot.slane %v8832_v48, %v10054_v10  ;;  %4793 = vst.msk [vmem:[#allocation2 + $0x8] sm:$0xff] %vm712_vm0, %v8832_v48  ;;  %v8844_v44 = vadd.f32 %v4477_v46, %v10055_v43  ;;  %v4513_v13 = vsel %vm712_vm0, %v8832_v48, 0.0 }
0x12e6   : > { %10053 = vst [vmem:[#allocation54_spill] sm:$0xff] %v8837_v17  ;;  %v4800_v36 = vrot.slane %v8837_v17, %v10057_v62  ;;  %4796 = vst.msk [vmem:[#allocation2 + $0x20] sm:$0xff] %vm712_vm0, %v8837_v17  ;;  %v4518_v45 = vsel %vm712_vm0, %v8837_v17, 0.0 }
0x12e7   : > { %10056 = vst [vmem:[#allocation55_spill] sm:$0xff] %v8844_v44  ;;  %4792 = vst.msk [vmem:[#allocation2] sm:$0xff] %vm712_vm0, %v4791_v31  ;;  %v4514_v2 = vsel %vm712_vm0, %v8844_v44, 0.0 }
0x12e8   : > { %4794 = vst.msk [vmem:[#allocation2 + $0x10] sm:$0xff] %vm712_vm0, %v8844_v44  ;;  %4801 = vst.msk [vmem:[#allocation2 + $0x28] sm:$0xff] %vm712_vm0, %v4800_v36  ;;  %v4515_v5 = vadd.f32 %v4514_v2, %v4513_v13 }
0x12ea   : > { %v4517_v25 = vadd.f32 %v4516_v39, %v4515_v5 }
0x12eb   : > { %v6333_v19 = vpop.f32.mrb[68].mxu1  ;;  %v8887_v3 = vld [vmem:[#allocation2 + $0x18] sm:$0xff] }
0x12ec   : > { %v4519_v33 = vadd.f32 %v4518_v45, %v4517_v25  ;;  %v4349_v42 = vpop.f32.mrb[69].mxu1  ;;  %v4370_v52 = vmax.f32 %v6333_v19, 0.0  ;;  %10058 = vst [vmem:[#allocation51_spill] sm:$0xff] %v8887_v3  ;;  %v8912_v39 = vld [vmem:[#allocation2 + $0x8] sm:$0xff] }
0x12ed   : > { %v6334_v23 = vpop.f32.mrb[70].mxu1  ;;  %v4368_v60 = vmax.f32 %v4349_v42, 0.0  ;;  %v8865_v8 = vld [vmem:[#allocation2 + $0x19] sm:$0xff]  ;;  %10060 = vst [vmem:[#allocation34_spill] sm:$0xff] %v8912_v39 }
0x12ee   : > { %v4520_v15 = vrot.slane %v4519_v33, 4  ;;  %v4371_v14 = vmax.f32 %v6334_v23, 0.0  ;;  %v4352_v56 = vpop.f32.mrb[71].mxu1  ;;  %v8869_v29 = vld [vmem:[#allocation2 + $0x1a] sm:$0xff] }
0x12ef   : > { %v4369_v58 = vmax.f32 %v4352_v56, 0.0  ;;  %v8863_v30 = vld [vmem:[#allocation2 + $0x11] sm:$0xff]  ;;  %v8873_v57 = vld [vmem:[#allocation2 + $0x1b] sm:$0xff]  ;;  %v8892_v12 = vld [vmem:[#allocation2 + $0x9] sm:$0xff] }
0x12f0   : > { %v4521_v20 = vadd.f32 %v4520_v15, %v4519_v33  ;;  %v4375_v63 = vpack.c.bf16 %v4371_v14, %v4370_v52  ;;  %v8867_v59 = vld [vmem:[#allocation2 + $0x12] sm:$0xff]  ;;  %v8877_v6 = vld [vmem:[#allocation2 + $0x1c] sm:$0xff]  ;;  %v8894_v9 = vld [vmem:[#allocation2 + $0xa] sm:$0xff] }
0x12f1   : > { %v4374_v26 = vpack.c.bf16 %v4369_v58, %v4368_v60  ;;  %v8871_v7 = vld [vmem:[#allocation2 + $0x13] sm:$0xff]  ;;  %v8881_v22 = vld [vmem:[#allocation2 + $0x1d] sm:$0xff]  ;;  %v8896_v46 = vld [vmem:[#allocation2 + $0xb] sm:$0xff] }
0x12f2   : > { %v4522_v54 = vrot.slane %v4521_v20, 2  ;;  %v8875_v27 = vld [vmem:[#allocation2 + $0x14] sm:$0xff]  ;;  %v8885_v38 = vld [vmem:[#allocation2 + $0x1e] sm:$0xff]  ;;  %v8898_v31 = vld [vmem:[#allocation2 + $0xc] sm:$0xff] }
0x12f3   : > { %6355 = vmatprep.mubr.bf16.mxu0 %v4374_v26  ;;  %v8879_v61 = vld [vmem:[#allocation2 + $0x15] sm:$0xff]  ;;  %v8900_v43 = vld [vmem:[#allocation2 + $0xd] sm:$0xff]  ;;  %v8908_v5 = vld [vmem:[#allocation2 + $0x1f] sm:$0xff] }
0x12f4   : > { %v4523_v47 = vadd.f32 %v4522_v54, %v4521_v20  ;;  %6356 = vmatmul.mubr.bf16.gmra.mrb[64].mxu0 %v4375_v63  ;;  %v8883_v28 = vld [vmem:[#allocation2 + $0x16] sm:$0xff]  ;;  %v8902_v36 = vld [vmem:[#allocation2 + $0xe] sm:$0xff]  ;;  %v8917_v33 = vld [vmem:[#allocation2 + $0x21] sm:$0xff] }
0x12f5   : > { %v8904_v13 = vld [vmem:[#allocation2 + $0xf] sm:$0xff]  ;;  %v8906_v2 = vld [vmem:[#allocation2 + $0x17] sm:$0xff]  ;;  %v8919_v19 = vld [vmem:[#allocation2 + $0x22] sm:$0xff] }
0x12f6   : > { %v4524_v24 = vrot.slane %v4523_v47, 1  ;;  %v8921_v42 = vld [vmem:[#allocation2 + $0x23] sm:$0xff] }
0x12f7   : > { %v8923_v15 = vld [vmem:[#allocation2 + $0x24] sm:$0xff] }
0x12f8   : > { %v4525_v18 = vadd.f32 %v4524_v24, %v4523_v47  ;;  %v8925_v23 = vld [vmem:[#allocation2 + $0x25] sm:$0xff] }
0x12f9   : > { %v8927_v52 = vld [vmem:[#allocation2 + $0x2] sm:$0xff] }
0x12fa   : > { %v4526_v4 = vmul.f32 0.03125, %v4525_v18  ;;  %v8929_v14 = vld [vmem:[#allocation2 + $0x3] sm:$0xff] }
0x12fb   : > { %v8931_v56 = vld [vmem:[#allocation2 + $0x4] sm:$0xff] }
0x12fc   : > { %6368 = vmatmul.mubr.msk.f32.vlgmr.msra.gmra.mrb[62].mxu1 %vm712_vm0, %v4526_v4  ;;  %v8936_v60 = vld [vmem:[#allocation2 + $0x5] sm:$0xff]  ;;  %v5874_v4 = vld [vmem:[%s9578_s14 + $0x2] sm:$0x1] }
0x12fd   : > { %10063 = vst [vmem:[#allocation35_spill] sm:$0xff] %v8936_v60  ;;  %v8938_v58 = vld [vmem:[#allocation2 + $0x6] sm:$0xff] }
0x12fe   : > { %10064 = vst [vmem:[#allocation61_spill] sm:$0xff] %v8938_v58  ;;  %v8940_v63 = vld [vmem:[#allocation2 + $0x7] sm:$0xff] }
0x12ff   : > { %10065 = vst [vmem:[#allocation24_spill] sm:$0xff] %v8940_v63  ;;  %v8949_v47 = vld [vmem:[#allocation2 + $0x26] sm:$0xff] }
0x1300   : > { %v8953_v24 = vld [vmem:[#allocation2 + $0x20] sm:$0xff] }
0x1301   : > { %10067 = vst [vmem:[#allocation66_spill] sm:$0xff] %v8953_v24 }
0x13c7   : > { %v6357_v35 = vpop.f32.mrb[64].mxu0 }
0x13c8   : > { %v8890_v41 = vadd.f32 %v6357_v35, %v8795_v1  ;;  %v4490_v49 = vpop.f32.mrb[65].mxu0  ;;  %v8910_v1 = vld [vmem:[#allocation2 + $0x1] sm:$0xff]  ;;  %v8962_v35 = vld [vmem:[#allocation2 + $0x10] sm:$0xff] }
0x13c9   : > { %v8915_v25 = vadd.f32 %v4490_v49, %v8785_v11  ;;  %v6358_v45 = vpop.f32.mrb[66].mxu0  ;;  %10068 = vst [vmem:[#allocation63_spill] sm:$0xff] %v8962_v35 }
0x13ca   : > { %10059 = vst [vmem:[#allocation31_spill] sm:$0xff] %v8890_v41  ;;  %v8934_v11 = vadd.f32 %v6358_v45, %v8799_v55  ;;  %v4493_v20 = vpop.f32.mrb[67].mxu0  ;;  %5299 = vst.msk [vmem:[#allocation2 + $0x18] sm:$0xff] %vm712_vm0, %v8890_v41  ;;  %v8951_v55 = vld [vmem:[#allocation2 + $0x27] sm:$0xff] }
0x13cb   : > { %10061 = vst [vmem:[#allocation26_spill] sm:$0xff] %v8915_v25  ;;  %v5295_v54 = vrot.slane %v8915_v25, %v10054_v10  ;;  %v8947_v26 = vadd.f32 %v4493_v20, %v8789_v50  ;;  %5297 = vst.msk [vmem:[#allocation2 + $0x8] sm:$0xff] %vm712_vm0, %v8915_v25  ;;  %v5876_v20 = vld [vmem:[%s9579_s15 + $0x2] sm:$0x1] }
0x13cc   : > { %10062 = vst [vmem:[#allocation50_spill] sm:$0xff] %v8934_v11  ;;  %v5304_v18 = vrot.slane %v8934_v11, %v10057_v62  ;;  %5300 = vst.msk [vmem:[#allocation2 + $0x20] sm:$0xff] %vm712_vm0, %v8934_v11 }
0x13cd   : > { %10066 = vst [vmem:[#allocation65_spill] sm:$0xff] %v8947_v26  ;;  %5296 = vst.msk [vmem:[#allocation2] sm:$0xff] %vm712_vm0, %v5295_v54  ;;  %v9720_v54 = vstv %s8974_s4 }
0x13ce   : > { %5298 = vst.msk [vmem:[#allocation2 + $0x10] sm:$0xff] %vm712_vm0, %v8947_v26  ;;  %5305 = vst.msk [vmem:[#allocation2 + $0x28] sm:$0xff] %vm712_vm0, %v5304_v18 }
0x13cf   : > { %v4603_v50 = vpop.f32.mrb[62].mxu1 }
0x13d0   : > { %v4604_v49 = vadd.f32 %v5874_v4, %v4603_v50  ;;  %v6369_v45 = vpop.f32.mrb[63].mxu1 }
0x13d2   : > { %v4607_v40 = vmax.f32 %v4604_v49, 0.0 }
0x13d4   : > { %v4610_v37 = vmul.f32 %v5876_v20, %v4607_v40 }
0x13d6   : > { %v4611_v0 = vsel %vm1507_vm2, %v4610_v37, 0.0 }
0x13d7   : > { %4612 = vadd.xlane.f32.xlu0 %v4611_v0 }
0x1464   : > { %v4613_v34 = vpop.xlane.xlu0 %4612 }
0x1465   : > { %v4616_v17 = vadd.f32 %v9720_v54, %v4613_v34  ;;  %v10074_v54 = vld [vmem:[#allocation41_spill] sm:$0xff] }
0x1467   : > { %v4617_v18 = vsub.f32 0.0, %v4616_v17 }
0x1469   : > { %v4618_v4 = vmul.f32 1.442695, %v4617_v18 }
0x146b   : > { %6727 = vpow2.f32 %v4618_v4  ;;  %v10069_v4 = vmov 0  }
0x1475   : > { %v6728_v50 = vpop.eup %6727 }
0x1476   : > { %v4620_v45 = vadd.f32 1.0, %v6728_v50 }
0x1478   : > { %6729 = vrcp.f32 %v4620_v45 }
0x1482   : > { %v6730_v51 = vpop.eup %6729 }
0x1483   : > { %v4623_v49 = vmul.f32 45.0, %v6730_v51 }
0x1485   : > { %v4624_v40 = vadd.f32 5.0, %v4623_v49 }
0x1487   : > { %v4625_v20 = vadd.f32 0.5, %v4624_v40  ;;  %v6508_v0 = vtrunc.f32 %v4624_v40 }
0x1489   : > { %v6506_v37 = vtrunc.f32 %v4625_v20  ;;  %v6509_v48 = vcvt.f32.s32 %v6508_v0 }
0x148b   : > { %v6507_v44 = vcvt.f32.s32 %v6506_v37  ;;  %v4628_v35 = vcvt.s32.f32 %v6509_v48 }
0x148d   : > { %v4630_v24 = vcvt.s32.f32 %v6507_v44  ;;  %v4629_v34 = vsub.f32 %v4624_v40, %v4628_v35  ;;  %v8989_v40 = vld [vmem:[%s9576_s12 + $0x28] sm:$0xff] }
0x148e   : > { %10071 = vst [vmem:[#allocation29_spill] sm:$0xff] %v8989_v40 }
0x148f   : > { %v4631_v3 = vmul.f32 0.5, %v4630_v24  ;;  %vm4636_vm14 = vcmp.eq.f32.partialorder %v4629_v34, 0.5 }
0x1491   : > { %v6510_v39 = vtrunc.f32 %v4631_v3 }
0x1493   : > { %v6511_v63 = vcvt.f32.s32 %v6510_v39 }
0x1495   : > { %v4633_v17 = vmul.u32 2, %v6511_v63 }
0x1497   : > { %v4634_v18 = vsub.s32 %v6507_v44, %v4633_v17 }
0x1499   : > { %vm4635_vm13 = vcmp.eq.s32.totalorder %v4634_v18, 1  ;;  %v10072_v18 = vld [vmem:[#allocation20_spill] sm:$0xff] }
0x149a   : > { %vm4637_vm15 = vmand %vm4636_vm14, %vm4635_vm13 }
0x149b   : > { %v4638_v50 = vsel %vm4637_vm15, 1, %v10069_v4 }
0x149c   : > { %v4639_v51 = vsub.s32 %v6507_v44, %v4638_v50  ;;  %v8984_v44 = vld [vmem:[%s9576_s12 + $0x20] sm:$0xff] }
0x149d   : > { %10070 = vst [vmem:[#allocation67_spill] sm:$0xff] %v8984_v44  ;;  %v10073_v50 = vld [vmem:[#allocation38_spill] sm:$0xff] }
0x149e   : > { %vm4640_vm3 = vcmp.gt.s32.totalorder %v4639_v51, 3 }
0x149f   : > { %v4641_v45 = vsel %vm4640_vm3, %v4639_v51, 3 }
0x14a0   : > { %vm4642_vm4 = vcmp.lt.s32.totalorder %v4641_v45, 16 }
0x14a1   : > { %v4643_v49 = vsel %vm4642_vm4, %v4641_v45, 16 }
0x14a2   : > { %v4644_v20 = vcvt.s32.f32 %v4643_v49 }
0x14a4   : > { %v4645_v37 = vmul.f32 0.5, %v4644_v20 }
0x14a6   : > { %v6512_v0 = vtrunc.f32 %v4645_v37 }
0x14a8   : > { %v6513_v24 = vcvt.f32.s32 %v6512_v0 }
0x14aa   : > { %v4647_v48 = vmul.u32 2, %v6513_v24 }
0x14ac   : > { %vm4648_vm5 = vcmp.eq.s32.totalorder %v4643_v49, %v4647_v48 }
0x14ad   : > { %v4649_v3 = vsel %vm4648_vm5, 1, %v10069_v4 }
0x14ae   : > { %v4650_v39 = vsub.s32 %v4643_v49, %v4649_v3 }
0x14b0   : > { %vm4651_vm6 = vcmp.gt.s32.totalorder %v4650_v39, 3 }
0x14b1   : > { %v4652_v63 = vsel %vm4651_vm6, %v4650_v39, 3 }
0x14b2   : > { %v4653_v35 = vcvt.s32.f32 %v4652_v63  ;;  %v4662_v34 = vrot.slane %v4652_v63, %v10054_v10 }
0x14b4   : > { %v4654_v17 = vmul.f32 0.5, %v4653_v35  ;;  %vm4663_vm7 = vcmp.lt.s32.totalorder %v10072_v18, %v4662_v34  ;;  %vm4664_vm8 = vcmp.lt.s32.totalorder %v10073_v50, %v4662_v34 }
0x14b5   : > { %v4665_v51 = vsel %vm4663_vm7, %v8984_v44, -inf  ;;  %v4666_v45 = vsel %vm4664_vm8, %v8989_v40, -inf }
0x14b6   : > { %v6514_v49 = vtrunc.f32 %v4654_v17  ;;  %v4667_v20 = vsel %vm712_vm0, %v4665_v51, -inf  ;;  %v4668_v37 = vsel %vm712_vm0, %v4666_v45, -inf }
0x14b7   : > { %v4669_v0 = vmax.f32 %v4667_v20, %v4668_v37 }
0x14b8   : > { %v6515_v24 = vcvt.f32.s32 %v6514_v49 }
0x14b9   : > { %v4670_v48 = vrot.slane %v4669_v0, 4 }
0x14ba   : > { %v5880_v3 = vadd.s32 4294967289, %v6515_v24 }
0x14bb   : > { %v4671_v39 = vmax.f32 %v4669_v0, %v4670_v48 }
0x14bc   : > { %v4700_v63 = vrot.slane %v5880_v3, %v10054_v10  ;;  %v5022_v3 = vsel %vm712_vm0, %v8947_v26, 0.0 }
0x14bd   : > { %v4672_v35 = vrot.slane %v4671_v39, 2 }
0x14be   : > { %vm4701_vm9 = vcmp.eq.s32.totalorder %v10074_v54, %v4700_v63 }
0x14bf   : > { %v5881_v4 = vsel %vm4701_vm9, 1.0, %v10046_v53  ;;  %v4673_v58 = vmax.f32 %v4671_v39, %v4672_v35  ;;  %v5021_v39 = vsel %vm712_vm0, %v8915_v25, 0.0 }
0x14c0   : > { %6374 = vmatprep.mubr.msk.f32.mxu1 %vm1610_vm12, %v5881_v4 }
0x14c1   : > { %v4674_v17 = vrot.slane %v4673_v58, 1 }
0x14c3   : > { %v4675_v60 = vmax.f32 %v4673_v58, %v4674_v17  ;;  %v5023_v17 = vadd.f32 %v5022_v3, %v5021_v39 }
0x14c5   : > { %v4676_v51 = vsub.f32 %v8984_v44, %v4675_v60  ;;  %v4677_v45 = vsub.f32 %v8989_v40, %v4675_v60 }
0x14c7   : > { %v4678_v49 = vmul.f32 1.442695, %v4676_v51  ;;  %v4680_v20 = vmul.f32 1.442695, %v4677_v45  ;;  %v5024_v45 = vsel %vm712_vm0, %v8890_v41, 0.0 }
0x14c8   : > { %v5025_v34 = vadd.f32 %v5024_v45, %v5023_v17  ;;  %v10078_v45 = vld [vmem:[#allocation45_spill] sm:$0xff] }
0x14c9   : > { %6731 = vpow2.f32 %v4678_v49 }
0x14ca   : > { %6733 = vpow2.f32 %v4680_v20 }
0x14d3   : > { %v6732_v37 = vpop.eup %6731 }
0x14d4   : > { %v6734_v0 = vpop.eup %6733  ;;  %v4682_v24 = vsel %vm4663_vm7, %v6732_v37, 0.0  ;;  %v5026_v37 = vsel %vm712_vm0, %v8934_v11, 0.0 }
0x14d5   : > { %v4683_v48 = vsel %vm4664_vm8, %v6734_v0, 0.0  ;;  %v4684_v4 = vsel %vm712_vm0, %v4682_v24, 0.0  ;;  %v5027_v54 = vadd.f32 %v5026_v37, %v5025_v34  ;;  %v10079_v34 = vld [vmem:[#allocation46_spill] sm:$0xff]  ;;  %v10080_v37 = vld [vmem:[#allocation47_spill] sm:$0xff] }
0x14d6   : > { %v4685_v58 = vsel %vm712_vm0, %v4683_v48, 0.0 }
0x14d7   : > { %v4686_v60 = vadd.f32 %v4685_v58, %v4684_v4  ;;  %v5028_v4 = vrot.slane %v5027_v54, 4 }
0x14d9   : > { %v4687_v35 = vrot.slane %v4686_v60, 4  ;;  %v5029_v58 = vadd.f32 %v5028_v4, %v5027_v54 }
0x14db   : > { %v4688_v51 = vadd.f32 %v4687_v35, %v4686_v60  ;;  %v5030_v26 = vrot.slane %v5029_v58, 2  ;;  %v10075_v35 = vld [vmem:[#allocation42_spill] sm:$0xff] }
0x14dc   : > { %vm4702_vm10 = vcmp.eq.s32.totalorder %v10075_v35, %v4700_v63 }
0x14dd   : > { %v4689_v49 = vrot.slane %v4688_v51, 2  ;;  %v5031_v60 = vadd.f32 %v5030_v26, %v5029_v58 }
0x14df   : > { %v4690_v20 = vadd.f32 %v4689_v49, %v4688_v51  ;;  %v5032_v17 = vrot.slane %v5031_v60, 1  ;;  %v5882_v51 = vsel %vm4702_vm10, 1.0, %v10046_v53 }
0x14e1   : > { %v4691_v0 = vrot.slane %v4690_v20, 1 }
0x14e3   : > { %v4692_v40 = vadd.f32 %v4691_v0, %v4690_v20  ;;  %v10081_v0 = vld [vmem:[#allocation48_spill] sm:$0xff] }
0x14e5   : > { %6735 = vrcp.f32 %v4692_v40  ;;  %v10076_v40 = vld [vmem:[#allocation43_spill] sm:$0xff] }
0x14ef   : > { %v6736_v25 = vpop.eup %6735 }
0x14f0   : > { %v4694_v44 = vmul.f32 %v6736_v25, %v4682_v24  ;;  %v4695_v3 = vmul.f32 %v6736_v25, %v4683_v48  ;;  %v5033_v25 = vadd.f32 %v5032_v17, %v5031_v60  ;;  %v10077_v24 = vld [vmem:[#allocation44_spill] sm:$0xff] }
0x14f2   : > { %v6441_v39 = vpack.c.bf16 %v4695_v3, %v4694_v44  ;;  %v5034_v26 = vmul.f32 0.03125, %v5033_v25 }
0x14f4   : > { %6442 = vmatprep.subr.bf16.mxu1 %v6441_v39 }
0x14f5   : > { %6444 = vmatpush3.bf16.msra.mxu1 %v6441_v39 }
0x14f6   : > { %6445 = vmatprep.subr.bf16.mxu1 %v10047_v16 }
0x14f8   : > { %6375 = vmatmul.mubr.msk.f32.vlgmr.msra.gmra.mrb[72].mxu1 %vm1610_vm12, %v5882_v51 }
0x14f9   : > { %6447 = vmatpush3.bf16.msra.mxu1 %v8815_v21  ;;  %6385 = vmatprep.mubr.msk.f32.mxu1 %vm6884_vm1, %v10046_v53 }
0x14fa   : > { %6448 = vmatprep.subr.bf16.mxu1 %v10047_v16 }
0x14fd   : > { %6450 = vmatpush3.bf16.msra.mxu1 %v8825_v32 }
0x1500   : > { %6386 = vmatmul.mubr.msk.f32.vlgmr.msra.gmra.mrb[74].mxu1 %vm712_vm0, %v5034_v26 }
0x15cb   : > { %v6376_v54 = vpop.f32.mrb[72].mxu1 }
0x15cc   : > { %v4918_v44 = vrot.slane %v6376_v54, %v10054_v10  ;;  %v4931_v63 = vrot.slane %v6376_v54, %v10076_v40  ;;  %v4944_v48 = vrot.slane %v6376_v54, %v10077_v24  ;;  %v4957_v21 = vrot.slane %v6376_v54, %v10078_v45  ;;  %v4779_v49 = vpop.f32.mrb[73].mxu1 }
0x15cd   : > { %v4970_v20 = vrot.slane %v6376_v54, %v10079_v34  ;;  %v4983_v16 = vrot.slane %v6376_v54, %v10080_v37  ;;  %v4996_v4 = vrot.slane %v6376_v54, %v10081_v0  ;;  %v4809_v32 = vrot.slane %v4779_v49, %v10054_v10 }
0x15ce   : > { %v9041_v58 = vmul.f32 %v4918_v44, %v8892_v12  ;;  %v9044_v3 = vmul.f32 %v4918_v44, %v8863_v30  ;;  %v9047_v60 = vmul.f32 %v4918_v44, %v8865_v8  ;;  %v9050_v39 = vmul.f32 %v4918_v44, %v8917_v33 }
0x15cf   : > { %v9053_v17 = vmul.f32 %v4931_v63, %v8894_v9  ;;  %v9056_v51 = vmul.f32 %v4931_v63, %v8867_v59  ;;  %v9059_v25 = vmul.f32 %v4931_v63, %v8869_v29  ;;  %v9062_v26 = vmul.f32 %v4931_v63, %v8919_v19 }
0x15d0   : > { %v9065_v54 = vmul.f32 %v4944_v48, %v8896_v46  ;;  %v9068_v11 = vmul.f32 %v4944_v48, %v8871_v7  ;;  %v9071_v33 = vmul.f32 %v4944_v48, %v8873_v57  ;;  %v9074_v44 = vmul.f32 %v4944_v48, %v8921_v42 }
0x15d1   : > { %v9077_v41 = vmul.f32 %v4957_v21, %v8898_v31  ;;  %v9080_v35 = vmul.f32 %v4957_v21, %v8875_v27  ;;  %v9083_v19 = vmul.f32 %v4957_v21, %v8877_v6  ;;  %v9086_v63 = vmul.f32 %v4957_v21, %v8923_v15 }
0x15d2   : > { %v9089_v53 = vmul.f32 %v4970_v20, %v8900_v43  ;;  %v9092_v50 = vmul.f32 %v4970_v20, %v8879_v61  ;;  %v9095_v42 = vmul.f32 %v4970_v20, %v8881_v22  ;;  %v9098_v48 = vmul.f32 %v4970_v20, %v8925_v23 }
0x15d3   : > { %v9101_v18 = vmul.f32 %v4983_v16, %v8902_v36  ;;  %v9104_v10 = vmul.f32 %v4983_v16, %v8883_v28  ;;  %v9107_v15 = vmul.f32 %v4983_v16, %v8885_v38  ;;  %v9110_v21 = vmul.f32 %v4983_v16, %v8949_v47 }
0x15d4   : > { %10082 = vst [vmem:[#allocation25_spill] sm:$0xff] %v9089_v53  ;;  %10083 = vst [vmem:[#allocation30_spill] sm:$0xff] %v9092_v50  ;;  %v5109_v53 = vpop.f32.mrb[74].mxu1  ;;  %v9113_v50 = vmul.f32 %v4996_v4, %v8904_v13  ;;  %v9119_v23 = vmul.f32 %v4996_v4, %v8908_v5  ;;  %v9122_v20 = vmul.f32 %v4996_v4, %v8951_v55 }
0x15d5   : > { %10084 = vst [vmem:[#allocation28_spill] sm:$0xff] %v9095_v42  ;;  %10085 = vst [vmem:[#allocation68_spill] sm:$0xff] %v9101_v18  ;;  %v9116_v42 = vmul.f32 %v4996_v4, %v8906_v2  ;;  %v4810_v47 = vmul.f32 %v4809_v32, %v8910_v1  ;;  %v4811_v16 = vmul.f32 %v4809_v32, %v8892_v12 }
0x15d6   : > { %10086 = vst [vmem:[#allocation69_spill] sm:$0xff] %v9104_v10  ;;  %10087 = vst [vmem:[#allocation70_spill] sm:$0xff] %v9107_v15  ;;  %v5889_v15 = vld [vmem:[%s9578_s14 + $0x2] sm:$0x1]  ;;  %v6387_v10 = vpop.f32.mrb[75].mxu1  ;;  %v4845_v55 = vrot.slane %v4779_v49, %v10078_v45  ;;  %v4857_v4 = vrot.slane %v4779_v49, %v10079_v34  ;;  %v4905_v1 = vrot.slane %v4779_v49, %v10057_v62 }
0x15d7   : > { %10088 = vst [vmem:[#allocation71_spill] sm:$0xff] %v9110_v21  ;;  %10089 = vst [vmem:[#allocation72_spill] sm:$0xff] %v9113_v50  ;;  %v4812_v50 = vmul.f32 %v4809_v32, %v8863_v30  ;;  %v4813_v21 = vmul.f32 %v4809_v32, %v8865_v8  ;;  %v4889_v10 = vrot.slane %v4779_v49, %v10081_v0 }
0x15d8   : > { %10090 = vst [vmem:[#allocation73_spill] sm:$0xff] %v9116_v42  ;;  %10091 = vst [vmem:[#allocation74_spill] sm:$0xff] %v9119_v23  ;;  %v4821_v42 = vrot.slane %v4779_v49, %v10076_v40  ;;  %v4833_v23 = vrot.slane %v4779_v49, %v10077_v24  ;;  %v9138_v18 = vadd.f32 %v5889_v15, %v5109_v53  ;;  %v10094_v15 = vld [vmem:[#allocation35_spill] sm:$0xff]  ;;  %v10096_v40 = vld [vmem:[#allocation24_spill] sm:$0xff] }
0x15d9   : > { %10092 = vst [vmem:[#allocation75_spill] sm:$0xff] %v9122_v20  ;;  %v4873_v20 = vrot.slane %v4779_v49, %v10080_v37  ;;  %v4846_v49 = vmul.f32 %v4845_v55, %v8931_v56  ;;  %v4847_v53 = vmul.f32 %v4845_v55, %v8898_v31 }
0x15da   : > { %10093 = vst [vmem:[#allocation76_spill] sm:$0xff] %v9138_v18  ;;  %v4822_v30 = vmul.f32 %v4821_v42, %v8927_v52  ;;  %v4823_v8 = vmul.f32 %v4821_v42, %v8894_v9  ;;  %v4824_v12 = vmul.f32 %v4821_v42, %v8867_v59  ;;  %v4825_v32 = vmul.f32 %v4821_v42, %v8869_v29  ;;  %v10095_v42 = vld [vmem:[#allocation61_spill] sm:$0xff]  ;;  %v10098_v18 = vld [vmem:[#allocation63_spill] sm:$0xff] }
0x15db   : > { %v4834_v45 = vmul.f32 %v4833_v23, %v8929_v14  ;;  %v4835_v34 = vmul.f32 %v4833_v23, %v8896_v46  ;;  %v4836_v37 = vmul.f32 %v4833_v23, %v8871_v7  ;;  %v4837_v0 = vmul.f32 %v4833_v23, %v8873_v57 }
0x15dc   : > { %v4848_v52 = vmul.f32 %v4845_v55, %v8875_v27  ;;  %v4849_v9 = vmul.f32 %v4845_v55, %v8877_v6  ;;  %v4858_v59 = vmul.f32 %v4857_v4, %v10094_v15  ;;  %v4859_v29 = vmul.f32 %v4857_v4, %v8900_v43 }
0x15dd   : > { %v4860_v14 = vmul.f32 %v4857_v4, %v8879_v61  ;;  %v4861_v46 = vmul.f32 %v4857_v4, %v8881_v22  ;;  %v4874_v7 = vmul.f32 %v4873_v20, %v10095_v42  ;;  %v4875_v57 = vmul.f32 %v4873_v20, %v8902_v36  ;;  %v10097_v42 = vld [vmem:[#allocation34_spill] sm:$0xff] }
0x15de   : > { %v4876_v56 = vmul.f32 %v4873_v20, %v8883_v28  ;;  %v4877_v31 = vmul.f32 %v4873_v20, %v8885_v38  ;;  %v4862_v23 = vadd.f32 %v4858_v59, %v4810_v47  ;;  %v4863_v27 = vadd.f32 %v4859_v29, %v4811_v16  ;;  %v10099_v20 = vld [vmem:[#allocation51_spill] sm:$0xff] }
0x15df   : > { %v4864_v62 = vadd.f32 %v4860_v14, %v4812_v50  ;;  %v4865_v6 = vadd.f32 %v4861_v46, %v4813_v21  ;;  %v4878_v55 = vadd.f32 %v4874_v7, %v4822_v30  ;;  %v4879_v15 = vadd.f32 %v4875_v57, %v4823_v8  ;;  %v10100_v50 = vld [vmem:[#allocation66_spill] sm:$0xff]  ;;  %v10107_v14 = vld [vmem:[#allocation71_spill] sm:$0xff]  ;;  %v10108_v46 = vld [vmem:[#allocation72_spill] sm:$0xff] }
0x15e0   : > { %v4880_v24 = vadd.f32 %v4876_v56, %v4824_v12  ;;  %v4881_v43 = vadd.f32 %v4877_v31, %v4825_v32  ;;  %v4890_v61 = vmul.f32 %v4889_v10, %v10096_v40  ;;  %v4891_v22 = vmul.f32 %v4889_v10, %v8904_v13  ;;  %v10109_v7 = vld [vmem:[#allocation73_spill] sm:$0xff]  ;;  %v10110_v57 = vld [vmem:[#allocation74_spill] sm:$0xff]  ;;  %v10111_v31 = vld [vmem:[#allocation75_spill] sm:$0xff] }
0x15e1   : > { %v4892_v4 = vmul.f32 %v4889_v10, %v8906_v2  ;;  %v4893_v36 = vmul.f32 %v4889_v10, %v8908_v5  ;;  %v4906_v28 = vmul.f32 %v4905_v1, %v10097_v42  ;;  %v4907_v38 = vmul.f32 %v4905_v1, %v10098_v18 }
0x15e2   : > { %v4908_v47 = vmul.f32 %v4905_v1, %v10099_v20  ;;  %v4909_v21 = vmul.f32 %v4905_v1, %v10100_v50  ;;  %v4894_v16 = vadd.f32 %v4890_v61, %v4834_v45  ;;  %v4895_v30 = vadd.f32 %v4891_v22, %v4835_v34 }
0x15e3   : > { %v4896_v8 = vadd.f32 %v4892_v4, %v4836_v37  ;;  %v4897_v12 = vadd.f32 %v4893_v36, %v4837_v0  ;;  %v4910_v32 = vadd.f32 %v4906_v28, %v4846_v49  ;;  %v4911_v40 = vadd.f32 %v4907_v38, %v4847_v53  ;;  %v10103_v49 = vld [vmem:[#allocation28_spill] sm:$0xff]  ;;  %v5891_v4 = vld [vmem:[%s9579_s15 + $0x2] sm:$0x1] }
0x15e4   : > { %v4912_v59 = vadd.f32 %v4908_v47, %v4848_v52  ;;  %v4913_v13 = vadd.f32 %v4909_v21, %v4849_v9  ;;  %v4923_v2 = vadd.f32 %v9041_v58, %v4862_v23  ;;  %v4924_v5 = vadd.f32 %v9044_v3, %v4863_v27  ;;  %v10104_v53 = vld [vmem:[#allocation68_spill] sm:$0xff]  ;;  %v10105_v52 = vld [vmem:[#allocation69_spill] sm:$0xff]  ;;  %v10106_v9 = vld [vmem:[#allocation70_spill] sm:$0xff] }
0x15e5   : > { %v4925_v10 = vadd.f32 %v9047_v60, %v4864_v62  ;;  %v4926_v18 = vadd.f32 %v9050_v39, %v4865_v6  ;;  %v4936_v29 = vadd.f32 %v9053_v17, %v4878_v55  ;;  %v4937_v1 = vadd.f32 %v9056_v51, %v4879_v15  ;;  %v10101_v51 = vld [vmem:[#allocation25_spill] sm:$0xff]  ;;  %v10112_v36 = vld [vmem:[#allocation76_spill] sm:$0xff] }
0x15e6   : > { %v4938_v45 = vadd.f32 %v9059_v25, %v4880_v24  ;;  %v4939_v34 = vadd.f32 %v9062_v26, %v4881_v43  ;;  %v4949_v37 = vadd.f32 %v9065_v54, %v4894_v16  ;;  %v4950_v0 = vadd.f32 %v9068_v11, %v4895_v30  ;;  %v10102_v25 = vld [vmem:[#allocation30_spill] sm:$0xff]  ;;  %v10113_v16 = vld [vmem:[#allocation36_spill] sm:$0xff] }
0x15e7   : > { %v4951_v58 = vadd.f32 %v9071_v33, %v4896_v8  ;;  %v4952_v3 = vadd.f32 %v9074_v44, %v4897_v12  ;;  %v4962_v62 = vadd.f32 %v9077_v41, %v4910_v32  ;;  %v4963_v60 = vadd.f32 %v9080_v35, %v4911_v40  ;;  %v10114_v30 = vld [vmem:[#allocation64_spill] sm:$0xff]  ;;  %v10115_v12 = vld [vmem:[#allocation49_spill] sm:$0xff] }
0x15e8   : > { %v4964_v39 = vadd.f32 %v9083_v19, %v4912_v59  ;;  %v4965_v17 = vadd.f32 %v9086_v63, %v4913_v13  ;;  %v4975_v24 = vadd.f32 %v10101_v51, %v4923_v2  ;;  %v4976_v26 = vadd.f32 %v10102_v25, %v4924_v5  ;;  %v10116_v32 = vld [vmem:[#allocation33_spill] sm:$0xff]  ;;  %v10117_v59 = vld [vmem:[#allocation52_spill] sm:$0xff]  ;;  %v10118_v13 = vld [vmem:[#allocation62_spill] sm:$0xff] }
0x15e9   : > { %v4977_v54 = vadd.f32 %v10103_v49, %v4925_v10  ;;  %v4978_v11 = vadd.f32 %v9098_v48, %v4926_v18  ;;  %v4988_v33 = vadd.f32 %v10104_v53, %v4936_v29  ;;  %v4989_v44 = vadd.f32 %v10105_v52, %v4937_v1  ;;  %v10119_v5 = vld [vmem:[#allocation53_spill] sm:$0xff]  ;;  %v10120_v10 = vld [vmem:[#allocation56_spill] sm:$0xff] }
0x15ea   : > { %v4990_v41 = vadd.f32 %v10106_v9, %v4938_v45  ;;  %v4991_v35 = vadd.f32 %v10107_v14, %v4939_v34  ;;  %v5001_v19 = vadd.f32 %v10108_v46, %v4949_v37  ;;  %v5002_v63 = vadd.f32 %v10109_v7, %v4950_v0  ;;  %v10121_v37 = vld [vmem:[#allocation27_spill] sm:$0xff] }
0x15eb   : > { %v5003_v56 = vadd.f32 %v10110_v57, %v4951_v58  ;;  %v5004_v23 = vadd.f32 %v10111_v31, %v4952_v3  ;;  %v5005_v27 = vadd.f32 %v4988_v33, %v4975_v24  ;;  %v5006_v6 = vadd.f32 %v4989_v44, %v4976_v26  ;;  %v10122_v58 = vld [vmem:[#allocation55_spill] sm:$0xff] }
0x15ec   : > { %v5007_v55 = vadd.f32 %v4990_v41, %v4977_v54  ;;  %v5008_v48 = vadd.f32 %v4991_v35, %v4978_v11  ;;  %v5009_v15 = vadd.f32 %v5001_v19, %v4962_v62  ;;  %v5010_v43 = vadd.f32 %v5002_v63, %v4963_v60  ;;  %v10123_v62 = vld [vmem:[#allocation57_spill] sm:$0xff] }
0x15ed   : > { %v5011_v61 = vadd.f32 %v5003_v56, %v4964_v39  ;;  %v5012_v22 = vadd.f32 %v5004_v23, %v4965_v17  ;;  %v5113_v42 = vmax.f32 %v10112_v36, 0.0  ;;  %v4259_v8 = vadd.f32 %v10114_v30, %v10113_v16  ;;  %v10124_v17 = vld [vmem:[#allocation54_spill] sm:$0xff]  ;;  %v10127_v30 = vld [vmem:[#allocation21_spill] sm:$0xff] }
0x15ee   : > { %v5013_v28 = vadd.f32 %v5009_v15, %v5005_v27  ;;  %v5014_v38 = vadd.f32 %v5010_v43, %v5006_v6  ;;  %v4260_v40 = vadd.f32 %v10116_v32, %v10115_v12  ;;  %v4261_v2 = vadd.f32 %v10118_v13, %v10117_v59  ;;  %v10128_v32 = vld [vmem:[#allocation20_spill] sm:$0xff]  ;;  %v10130_v59 = vld [vmem:[#allocation67_spill] sm:$0xff] }
0x15ef   : > { %v5015_v20 = vadd.f32 %v5011_v61, %v5007_v55  ;;  %v5016_v47 = vadd.f32 %v5012_v22, %v5008_v48  ;;  %v5115_v50 = vmul.f32 %v5891_v4, %v5113_v42  ;;  %v4262_v18 = vadd.f32 %v10120_v10, %v10119_v5 }
0x15f0   : > { %5017 = vst.msk [vmem:[#allocation3] sm:$0xff] %vm712_vm0, %v5013_v28  ;;  %5018 = vst.msk [vmem:[#allocation3 + $0x8] sm:$0xff] %vm712_vm0, %v5014_v38  ;;  %v10125_v54 = vstv %s8974_s4  ;;  %v10126_v15 = vmov 0   ;;  %s5912_s4 = sshll.u32 %s7012_s1, 10 }
0x15f1   : > { %5019 = vst.msk [vmem:[#allocation3 + $0x10] sm:$0xff] %vm712_vm0, %v5015_v20  ;;  %5020 = vst.msk [vmem:[#allocation3 + $0x18] sm:$0xff] %vm712_vm0, %v5016_v47  ;;  %v5116_v21 = vsel %vm1507_vm2, %v5115_v50, 0.0  ;;  %s9461_s20 = scalar_lea.hbm %s9582_s18, %s5912_s4  ;;  %s9481_s29 = scalar_lea.hbm %s9583_s19, %s5912_s4 }
0x15f2   : > { %5117 = vadd.xlane.f32.xlu1 %v5116_v21  ;;  %s6783_s4 = scalar_lea.vmem %s6782_s17, 2048 }
0x15f3   : > { %p6785_p11 = scmp.lt.s32.totalorder %s6783_s4, %s6777_s22 }
0x15f5   : > { %p6786_p13 = por %p6785_p11, %p6784_p8 }
0x15f7   : > { %v5525_v29 = vld [vmem:[#allocation3] sm:$0xff]  ;;  %v5526_v1 = vld [vmem:[#allocation3 + $0x8] sm:$0xff]  ;;  %p6787_p1 = pnand %p6786_p13, %p6780_p7 }
0x15f8   : > { %v5527_v45 = vld [vmem:[#allocation3 + $0x10] sm:$0xff]  ;;  %v5528_v34 = vld [vmem:[#allocation3 + $0x18] sm:$0xff]  ;;  %v5533_v0 = vsub.f32 %v10121_v37, %v5525_v29  ;;  %v5534_v3 = vsub.f32 %v10122_v58, %v5526_v1  ;;  %v5541_v39 = vadd.f32 %v5525_v29, %v4259_v8  ;;  %v5542_v24 = vadd.f32 %v5526_v1, %v4260_v40 }
0x15f9   : > { %v5535_v60 = vsub.f32 %v10123_v62, %v5527_v45  ;;  %v5536_v51 = vsub.f32 %v10124_v17, %v5528_v34  ;;  %v5543_v25 = vadd.f32 %v5527_v45, %v4261_v2  ;;  %v5544_v26 = vadd.f32 %v5528_v34, %v4262_v18  ;;  %v10129_v40 = vld [vmem:[#allocation38_spill] sm:$0xff]  ;;  %v10131_v2 = vld [vmem:[#allocation29_spill] sm:$0xff] }
0x15fa   : > { %5549 = vst.msk [vmem:[%s9221_s25] sm:$0xff] %vm712_vm0, %v5533_v0  ;;  %5550 = vst.msk [vmem:[%s9221_s25 + $0x8] sm:$0xff] %vm712_vm0, %v5534_v3  ;;  %v10132_v62 = vld [vmem:[#allocation41_spill] sm:$0xff] }
0x15fb   : > { %5551 = vst.msk [vmem:[%s9221_s25 + $0x10] sm:$0xff] %vm712_vm0, %v5535_v60  ;;  %5557 = vst.msk [vmem:[%s9229_s23] sm:$0xff] %vm712_vm0, %v5541_v39  ;;  %v10133_v60 = vmov 0.0  }
0x15fc   : > { %5552 = vst.msk [vmem:[%s9221_s25 + $0x18] sm:$0xff] %vm712_vm0, %v5536_v51  ;;  %5558 = vst.msk [vmem:[%s9229_s23 + $0x8] sm:$0xff] %vm712_vm0, %v5542_v24 }
0x15fd   : > { %5559 = vst.msk [vmem:[%s9229_s23 + $0x10] sm:$0xff] %vm712_vm0, %v5543_v25  ;;  %5560 = vst.msk [vmem:[%s9229_s23 + $0x18] sm:$0xff] %vm712_vm0, %v5544_v26 }
0x167f   : > { %v5118_v49 = vpop.xlane.xlu1 %5117 }
0x1680   : > { %v5121_v11 = vadd.f32 %v5118_v49, %v10125_v54 }
0x1682   : > { %v5122_v53 = vsub.f32 0.0, %v5121_v11 }
0x1684   : > { %v5123_v33 = vmul.f32 1.442695, %v5122_v53 }
0x1686   : > { %6737 = vpow2.f32 %v5123_v33 }
0x1690   : > { %v6738_v52 = vpop.eup %6737 }
0x1691   : > { %v5125_v44 = vadd.f32 1.0, %v6738_v52 }
0x1693   : > { %6739 = vrcp.f32 %v5125_v44 }
0x169d   : > { %v6740_v9 = vpop.eup %6739 }
0x169e   : > { %v5128_v41 = vmul.f32 45.0, %v6740_v9 }
0x16a0   : > { %v5129_v14 = vadd.f32 5.0, %v5128_v41 }
0x16a2   : > { %v5130_v35 = vadd.f32 0.5, %v5129_v14  ;;  %v6518_v19 = vtrunc.f32 %v5129_v14 }
0x16a4   : > { %v6516_v46 = vtrunc.f32 %v5130_v35  ;;  %v6519_v63 = vcvt.f32.s32 %v6518_v19 }
0x16a6   : > { %v6517_v7 = vcvt.f32.s32 %v6516_v46  ;;  %v5133_v31 = vcvt.s32.f32 %v6519_v63 }
0x16a8   : > { %v5135_v57 = vcvt.s32.f32 %v6517_v7  ;;  %v5134_v6 = vsub.f32 %v5129_v14, %v5133_v31 }
0x16aa   : > { %v5136_v56 = vmul.f32 0.5, %v5135_v57  ;;  %vm5141_vm2 = vcmp.eq.f32.partialorder %v5134_v6, 0.5 }
0x16ac   : > { %v6520_v23 = vtrunc.f32 %v5136_v56 }
0x16ae   : > { %v6521_v27 = vcvt.f32.s32 %v6520_v23 }
0x16b0   : > { %v5138_v55 = vmul.u32 2, %v6521_v27  ;;  %v10134_v27 = vld [vmem:[#allocation42_spill] sm:$0xff] }
0x16b2   : > { %v5139_v48 = vsub.s32 %v6517_v7, %v5138_v55 }
0x16b4   : > { %vm5140_vm1 = vcmp.eq.s32.totalorder %v5139_v48, 1  ;;  %v9271_v48 = vld [vmem:[#allocation2 + $0x19] sm:$0xff] }
0x16b5   : > { %vm5142_vm11 = vmand %vm5141_vm2, %vm5140_vm1 }
0x16b6   : > { %v5143_v43 = vsel %vm5142_vm11, 1, %v10126_v15 }
0x16b7   : > { %v5144_v61 = vsub.s32 %v6517_v7, %v5143_v43  ;;  %v9275_v43 = vld [vmem:[#allocation2 + $0x11] sm:$0xff] }
0x16b9   : > { %vm5145_vm13 = vcmp.gt.s32.totalorder %v5144_v61, 3 }
0x16ba   : > { %v5146_v22 = vsel %vm5145_vm13, %v5144_v61, 3  ;;  %v9277_v61 = vld [vmem:[#allocation2 + $0xa] sm:$0xff] }
0x16bb   : > { %vm5147_vm14 = vcmp.lt.s32.totalorder %v5146_v22, 16 }
0x16bc   : > { %v5148_v4 = vsel %vm5147_vm14, %v5146_v22, 16  ;;  %v9279_v22 = vld [vmem:[#allocation2 + $0x1a] sm:$0xff] }
0x16bd   : > { %v5149_v36 = vcvt.s32.f32 %v5148_v4 }
0x16bf   : > { %v5150_v42 = vmul.f32 0.5, %v5149_v36  ;;  %v10135_v36 = vld [vmem:[#allocation43_spill] sm:$0xff] }
0x16c1   : > { %v6522_v28 = vtrunc.f32 %v5150_v42 }
0x16c3   : > { %v6523_v38 = vcvt.f32.s32 %v6522_v28  ;;  %v10136_v28 = vld [vmem:[#allocation44_spill] sm:$0xff] }
0x16c5   : > { %v5152_v20 = vmul.u32 2, %v6523_v38 }
0x16c7   : > { %vm5153_vm15 = vcmp.eq.s32.totalorder %v5148_v4, %v5152_v20 }
0x16c8   : > { %v5154_v47 = vsel %vm5153_vm15, 1, %v10126_v15  ;;  %v9273_v15 = vld [vmem:[#allocation2 + $0x9] sm:$0xff] }
0x16c9   : > { %v5155_v50 = vsub.s32 %v5148_v4, %v5154_v47  ;;  %v9286_v47 = vld [vmem:[#allocation2 + $0x12] sm:$0xff] }
0x16cb   : > { %vm5156_vm3 = vcmp.gt.s32.totalorder %v5155_v50, 3 }
0x16cc   : > { %v5157_v21 = vsel %vm5156_vm3, %v5155_v50, 3  ;;  %v9288_v50 = vld [vmem:[#allocation2 + $0xb] sm:$0xff] }
0x16cd   : > { %v5158_v16 = vcvt.s32.f32 %v5157_v21  ;;  %v5166_v8 = vrot.slane %v5157_v21, %v10127_v30  ;;  %v9290_v21 = vld [vmem:[#allocation2 + $0x13] sm:$0xff] }
0x16cf   : > { %v5159_v12 = vmul.f32 0.5, %v5158_v16  ;;  %vm5167_vm4 = vcmp.lt.s32.totalorder %v10128_v32, %v5166_v8  ;;  %vm5168_vm5 = vcmp.lt.s32.totalorder %v10129_v40, %v5166_v8  ;;  %v9292_v16 = vld [vmem:[#allocation2 + $0x1b] sm:$0xff] }
0x16d0   : > { %v5169_v13 = vsel %vm5167_vm4, %v10130_v59, -inf  ;;  %v5170_v5 = vsel %vm5168_vm5, %v10131_v2, -inf  ;;  %v10137_v8 = vld [vmem:[#allocation45_spill] sm:$0xff]  ;;  %v10138_v32 = vld [vmem:[#allocation46_spill] sm:$0xff] }
0x16d1   : > { %v6524_v10 = vtrunc.f32 %v5159_v12  ;;  %v5171_v18 = vsel %vm712_vm0, %v5169_v13, -inf  ;;  %v5172_v29 = vsel %vm712_vm0, %v5170_v5, -inf }
0x16d2   : > { %v5173_v1 = vmax.f32 %v5171_v18, %v5172_v29  ;;  %v9300_v18 = vld [vmem:[#allocation2 + $0x14] sm:$0xff]  ;;  %v5418_v29 = vld [vmem:[#allocation2 + $0x21] sm:$0xff] }
0x16d3   : > { %v6525_v45 = vcvt.f32.s32 %v6524_v10  ;;  %v9298_v10 = vld [vmem:[#allocation2 + $0xc] sm:$0xff] }
0x16d4   : > { %v5174_v34 = vrot.slane %v5173_v1, 4 }
0x16d5   : > { %v5895_v37 = vadd.s32 4294967289, %v6525_v45 }
0x16d6   : > { %v5175_v0 = vmax.f32 %v5173_v1, %v5174_v34 }
0x16d7   : > { %v5204_v58 = vrot.slane %v5895_v37, %v10127_v30 }
0x16d8   : > { %v5176_v3 = vrot.slane %v5175_v0, 2 }
0x16d9   : > { %vm5205_vm6 = vcmp.eq.s32.totalorder %v10132_v62, %v5204_v58  ;;  %vm5206_vm7 = vcmp.eq.s32.totalorder %v10134_v27, %v5204_v58  ;;  %v9315_v58 = vld [vmem:[#allocation2 + $0xd] sm:$0xff]  ;;  %v5431_v62 = vld [vmem:[#allocation2 + $0x22] sm:$0xff] }
0x16da   : > { %v5896_v39 = vsel %vm5205_vm6, 1.0, %v10133_v60  ;;  %v5177_v17 = vmax.f32 %v5175_v0, %v5176_v3  ;;  %v5897_v6 = vsel %vm5206_vm7, 1.0, %v10133_v60  ;;  %v9313_v0 = vld [vmem:[#allocation2 + $0x1c] sm:$0xff]  ;;  %v5483_v27 = vld [vmem:[#allocation2 + $0x26] sm:$0xff] }
0x16db   : > { %6392 = vmatprep.mubr.msk.f32.mxu1 %vm1610_vm12, %v5896_v39 }
0x16dc   : > { %v5178_v51 = vrot.slane %v5177_v17, 1 }
0x16de   : > { %v5179_v24 = vmax.f32 %v5177_v17, %v5178_v51  ;;  %v9328_v51 = vld [vmem:[#allocation2 + $0x15] sm:$0xff] }
0x16e0   : > { %v5180_v25 = vsub.f32 %v10130_v59, %v5179_v24  ;;  %v5181_v26 = vsub.f32 %v10131_v2, %v5179_v24  ;;  %v10139_v59 = vld [vmem:[#allocation47_spill] sm:$0xff]  ;;  %v10140_v2 = vld [vmem:[#allocation48_spill] sm:$0xff]  ;;  %v9330_v24 = vld [vmem:[#allocation2 + $0x1d] sm:$0xff] }
0x16e2   : > { %v5182_v49 = vmul.f32 1.442695, %v5180_v25  ;;  %v5184_v54 = vmul.f32 1.442695, %v5181_v26  ;;  %v5444_v25 = vld [vmem:[#allocation2 + $0x23] sm:$0xff] }
0x16e4   : > { %6741 = vpow2.f32 %v5182_v49 }
0x16e5   : > { %6743 = vpow2.f32 %v5184_v54 }
0x16ee   : > { %v6742_v11 = vpop.eup %6741 }
0x16ef   : > { %v6744_v53 = vpop.eup %6743  ;;  %v5186_v33 = vsel %vm5167_vm4, %v6742_v11, 0.0  ;;  %v5371_v11 = vld [vmem:[#allocation2 + $0xe] sm:$0xff] }
0x16f0   : > { %v5187_v52 = vsel %vm5168_vm5, %v6744_v53, 0.0  ;;  %v5188_v44 = vsel %vm712_vm0, %v5186_v33, 0.0  ;;  %v5372_v53 = vld [vmem:[#allocation2 + $0x16] sm:$0xff] }
0x16f1   : > { %v5189_v9 = vsel %vm712_vm0, %v5187_v52, 0.0 }
0x16f2   : > { %v5190_v41 = vadd.f32 %v5189_v9, %v5188_v44 }
0x16f4   : > { %v5191_v14 = vrot.slane %v5190_v41, 4 }
0x16f6   : > { %v5192_v35 = vadd.f32 %v5191_v14, %v5190_v41  ;;  %v5373_v14 = vld [vmem:[#allocation2 + $0x1e] sm:$0xff] }
0x16f8   : > { %v5193_v46 = vrot.slane %v5192_v35, 2 }
0x16fa   : > { %v5194_v19 = vadd.f32 %v5193_v46, %v5192_v35  ;;  %v9354_v35 = vld [vmem:[#allocation2 + $0xf] sm:$0xff] }
0x16fc   : > { %v5195_v7 = vrot.slane %v5194_v19, 1 }
0x16fe   : > { %v5196_v63 = vadd.f32 %v5195_v7, %v5194_v19  ;;  %v5470_v19 = vld [vmem:[#allocation2 + $0x25] sm:$0xff] }
0x1700   : > { %6745 = vrcp.f32 %v5196_v63 }
0x170a   : > { %v6746_v57 = vpop.eup %6745 }
0x170b   : > { %v5198_v56 = vmul.f32 %v6746_v57, %v5186_v33  ;;  %v5199_v31 = vmul.f32 %v6746_v57, %v5187_v52  ;;  %v5457_v52 = vld [vmem:[#allocation2 + $0x24] sm:$0xff] }
0x170d   : > { %v6451_v23 = vpack.c.bf16 %v5199_v31, %v5198_v56  ;;  %v5388_v56 = vld [vmem:[#allocation2 + $0x17] sm:$0xff]  ;;  %v5389_v31 = vld [vmem:[#allocation2 + $0x1f] sm:$0xff] }
0x170f   : > { %6452 = vmatprep.subr.bf16.mxu1 %v6451_v23 }
0x1710   : > { %6454 = vmatpush3.bf16.msra.mxu1 %v6451_v23 }
0x1713   : > { %6393 = vmatmul.mubr.msk.f32.vlgmr.msra.gmra.mrb[76].mxu1 %vm1610_vm12, %v5897_v6 }
0x17e6   : > { %v6394_v55 = vpop.f32.mrb[76].mxu1 }
0x17e7   : > { %v5422_v4 = vrot.slane %v6394_v55, %v10127_v30  ;;  %v5435_v42 = vrot.slane %v6394_v55, %v10135_v36  ;;  %v5448_v38 = vrot.slane %v6394_v55, %v10136_v28  ;;  %v9284_v20 = vpop.f32.mrb[77].mxu1  ;;  %v5461_v12 = vrot.slane %v6394_v55, %v10137_v8 }
0x17e8   : > { %v5474_v40 = vrot.slane %v6394_v55, %v10138_v32  ;;  %v5487_v13 = vrot.slane %v6394_v55, %v10139_v59  ;;  %v5500_v5 = vrot.slane %v6394_v55, %v10140_v2  ;;  %v5313_v37 = vrot.slane %v9284_v20, %v10127_v30 }
0x17e9   : > { %v9303_v1 = vmul.f32 %v5422_v4, %v9273_v15  ;;  %v9306_v45 = vmul.f32 %v5422_v4, %v9275_v43  ;;  %v9309_v34 = vmul.f32 %v5422_v4, %v9271_v48  ;;  %v9317_v3 = vmul.f32 %v5422_v4, %v5418_v29 }
0x17ea   : > { %v9320_v60 = vmul.f32 %v5435_v42, %v9277_v61  ;;  %v9323_v39 = vmul.f32 %v5435_v42, %v9286_v47  ;;  %v9326_v17 = vmul.f32 %v5435_v42, %v9279_v22  ;;  %v9332_v30 = vmul.f32 %v5435_v42, %v5431_v62 }
0x17eb   : > { %v9335_v26 = vmul.f32 %v5448_v38, %v9288_v50  ;;  %v9338_v49 = vmul.f32 %v5448_v38, %v9290_v21  ;;  %v9341_v54 = vmul.f32 %v5448_v38, %v9292_v16  ;;  %v9343_v33 = vmul.f32 %v5448_v38, %v5444_v25  ;;  %v5496_v38 = vld [vmem:[#allocation2 + $0x27] sm:$0xff] }
0x17ec   : > { %v9346_v44 = vmul.f32 %v5461_v12, %v9298_v10  ;;  %v9349_v9 = vmul.f32 %v5461_v12, %v9300_v18  ;;  %v9352_v41 = vmul.f32 %v5461_v12, %v9313_v0  ;;  %v9356_v46 = vmul.f32 %v5461_v12, %v5457_v52  ;;  %v5306_v25 = vld [vmem:[#allocation2 + $0x1] sm:$0xff] }
0x17ed   : > { %v9359_v7 = vmul.f32 %v5474_v40, %v9315_v58  ;;  %v9362_v63 = vmul.f32 %v5474_v40, %v9328_v51  ;;  %v9365_v57 = vmul.f32 %v5474_v40, %v9330_v24  ;;  %v9367_v23 = vmul.f32 %v5474_v40, %v5470_v19 }
0x17ee   : > { %10141 = vst [vmem:[#allocation35_spill] sm:$0xff] %v9356_v46  ;;  %v9369_v6 = vmul.f32 %v5487_v13, %v5371_v11  ;;  %v9371_v55 = vmul.f32 %v5487_v13, %v5372_v53  ;;  %v9373_v4 = vmul.f32 %v5487_v13, %v5373_v14  ;;  %v9375_v42 = vmul.f32 %v5487_v13, %v5483_v27 }
0x17ef   : > { %10142 = vst [vmem:[#allocation61_spill] sm:$0xff] %v9359_v7  ;;  %10143 = vst [vmem:[#allocation24_spill] sm:$0xff] %v9362_v63  ;;  %v9378_v12 = vmul.f32 %v5500_v5, %v9354_v35  ;;  %v9380_v29 = vmul.f32 %v5500_v5, %v5388_v56  ;;  %v9382_v62 = vmul.f32 %v5500_v5, %v5389_v31  ;;  %v5404_v7 = vld [vmem:[#allocation2 + $0x18] sm:$0xff] }
0x17f0   : > { %10144 = vst [vmem:[#allocation34_spill] sm:$0xff] %v9365_v57  ;;  %10145 = vst [vmem:[#allocation63_spill] sm:$0xff] %v9367_v23  ;;  %v9384_v40 = vmul.f32 %v5500_v5, %v5496_v38  ;;  %v5314_v52 = vmul.f32 %v5313_v37, %v5306_v25  ;;  %v5315_v19 = vmul.f32 %v5313_v37, %v9273_v15  ;;  %v5330_v25 = vld [vmem:[#allocation2 + $0x3] sm:$0xff] }
0x17f1   : > { %10146 = vst [vmem:[#allocation51_spill] sm:$0xff] %v9369_v6  ;;  %10147 = vst [vmem:[#allocation66_spill] sm:$0xff] %v9371_v55  ;;  %v5316_v55 = vmul.f32 %v5313_v37, %v9275_v43  ;;  %v5325_v13 = vrot.slane %v9284_v20, %v10135_v36  ;;  %v5337_v27 = vrot.slane %v9284_v20, %v10136_v28 }
0x17f2   : > { %10148 = vst [vmem:[#allocation25_spill] sm:$0xff] %v9373_v4  ;;  %10149 = vst [vmem:[#allocation30_spill] sm:$0xff] %v9375_v42  ;;  %v5317_v4 = vmul.f32 %v5313_v37, %v9271_v48  ;;  %v5361_v5 = vrot.slane %v9284_v20, %v10138_v32  ;;  %v5377_v15 = vrot.slane %v9284_v20, %v10139_v59  ;;  %v10154_v48 = vld [vmem:[#allocation23_spill] sm:$0xff] }
0x17f3   : > { %10150 = vst [vmem:[#allocation28_spill] sm:$0xff] %v9378_v12  ;;  %10151 = vst [vmem:[#allocation68_spill] sm:$0xff] %v9380_v29  ;;  %v5349_v29 = vrot.slane %v9284_v20, %v10137_v8  ;;  %v5393_v43 = vrot.slane %v9284_v20, %v10140_v2  ;;  %v5409_v37 = vrot.slane %v9284_v20, %v10154_v48  ;;  %v5342_v42 = vld [vmem:[#allocation2 + $0x4] sm:$0xff] }
0x17f4   : > { %10152 = vst [vmem:[#allocation69_spill] sm:$0xff] %v9382_v62  ;;  %10153 = vst [vmem:[#allocation70_spill] sm:$0xff] %v9384_v40  ;;  %v5318_v62 = vld [vmem:[#allocation2 + $0x2] sm:$0xff]  ;;  %v5327_v38 = vmul.f32 %v5325_v13, %v9277_v61  ;;  %v5328_v28 = vmul.f32 %v5325_v13, %v9286_v47  ;;  %v5329_v8 = vmul.f32 %v5325_v13, %v9279_v22 }
0x17f5   : > { %v5326_v36 = vmul.f32 %v5325_v13, %v5318_v62  ;;  %v5338_v40 = vmul.f32 %v5337_v27, %v5330_v25  ;;  %v5339_v32 = vmul.f32 %v5337_v27, %v9288_v50  ;;  %v5340_v12 = vmul.f32 %v5337_v27, %v9290_v21  ;;  %v5354_v62 = vld [vmem:[#allocation2 + $0x5] sm:$0xff] }
0x17f6   : > { %v5341_v59 = vmul.f32 %v5337_v27, %v9292_v16  ;;  %v5350_v2 = vmul.f32 %v5349_v29, %v5342_v42  ;;  %v5351_v6 = vmul.f32 %v5349_v29, %v9298_v10  ;;  %v5352_v20 = vmul.f32 %v5349_v29, %v9300_v18  ;;  %v5370_v48 = vld [vmem:[#allocation2 + $0x6] sm:$0xff] }
0x17f7   : > { %v5353_v61 = vmul.f32 %v5349_v29, %v9313_v0  ;;  %v5362_v47 = vmul.f32 %v5361_v5, %v5354_v62  ;;  %v5363_v22 = vmul.f32 %v5361_v5, %v9315_v58  ;;  %v5364_v13 = vmul.f32 %v5361_v5, %v9328_v51  ;;  %v5386_v62 = vld [vmem:[#allocation2 + $0x7] sm:$0xff] }
0x17f8   : > { %v5365_v50 = vmul.f32 %v5361_v5, %v9330_v24  ;;  %v5378_v21 = vmul.f32 %v5377_v15, %v5370_v48  ;;  %v5379_v25 = vmul.f32 %v5377_v15, %v5371_v11  ;;  %v5380_v16 = vmul.f32 %v5377_v15, %v5372_v53  ;;  %v5402_v5 = vld [vmem:[#allocation2 + $0x8] sm:$0xff]  ;;  %v5403_v48 = vld [vmem:[#allocation2 + $0x10] sm:$0xff]  ;;  %v5405_v11 = vld [vmem:[#allocation2 + $0x20] sm:$0xff] }
0x17f9   : > { %v5381_v27 = vmul.f32 %v5377_v15, %v5373_v14  ;;  %v5366_v42 = vadd.f32 %v5362_v47, %v5314_v52  ;;  %v5367_v23 = vadd.f32 %v5363_v22, %v5315_v19  ;;  %v5368_v10 = vadd.f32 %v5364_v13, %v5316_v55 }
0x17fa   : > { %v5369_v57 = vadd.f32 %v5365_v50, %v5317_v4  ;;  %v5382_v18 = vadd.f32 %v5378_v21, %v5326_v36  ;;  %v5383_v63 = vadd.f32 %v5379_v25, %v5327_v38  ;;  %v5384_v0 = vadd.f32 %v5380_v16, %v5328_v28  ;;  %v10164_v13 = vld [vmem:[#allocation28_spill] sm:$0xff] }
0x17fb   : > { %v5385_v29 = vadd.f32 %v5381_v27, %v5329_v8  ;;  %v5394_v58 = vmul.f32 %v5393_v43, %v5386_v62  ;;  %v5395_v51 = vmul.f32 %v5393_v43, %v9354_v35  ;;  %v5396_v46 = vmul.f32 %v5393_v43, %v5388_v56  ;;  %v10165_v50 = vld [vmem:[#allocation68_spill] sm:$0xff]  ;;  %v10166_v25 = vld [vmem:[#allocation69_spill] sm:$0xff]  ;;  %v10167_v27 = vld [vmem:[#allocation70_spill] sm:$0xff] }
0x17fc   : > { %v5397_v24 = vmul.f32 %v5393_v43, %v5389_v31  ;;  %v5410_v53 = vmul.f32 %v5409_v37, %v5402_v5  ;;  %v5411_v14 = vmul.f32 %v5409_v37, %v5403_v48  ;;  %v5412_v52 = vmul.f32 %v5409_v37, %v5404_v7 }
0x17fd   : > { %v5413_v19 = vmul.f32 %v5409_v37, %v5405_v11  ;;  %v5398_v55 = vadd.f32 %v5394_v58, %v5338_v40  ;;  %v5399_v4 = vadd.f32 %v5395_v51, %v5339_v32  ;;  %v5400_v15 = vadd.f32 %v5396_v46, %v5340_v12  ;;  %v10158_v37 = vld [vmem:[#allocation34_spill] sm:$0xff]  ;;  %v10159_v32 = vld [vmem:[#allocation63_spill] sm:$0xff] }
0x17fe   : > { %v5401_v36 = vadd.f32 %v5397_v24, %v5341_v59  ;;  %v5414_v38 = vadd.f32 %v5410_v53, %v5350_v2  ;;  %v5415_v28 = vadd.f32 %v5411_v14, %v5351_v6  ;;  %v5416_v8 = vadd.f32 %v5412_v52, %v5352_v20  ;;  %v10160_v59 = vld [vmem:[#allocation51_spill] sm:$0xff]  ;;  %v10161_v2 = vld [vmem:[#allocation66_spill] sm:$0xff]  ;;  %v10162_v20 = vld [vmem:[#allocation25_spill] sm:$0xff] }
0x17ff   : > { %v5417_v47 = vadd.f32 %v5413_v19, %v5353_v61  ;;  %v5427_v22 = vadd.f32 %v9303_v1, %v5366_v42  ;;  %v5428_v35 = vadd.f32 %v9306_v45, %v5367_v23  ;;  %v5429_v56 = vadd.f32 %v9309_v34, %v5368_v10  ;;  %v10157_v23 = vld [vmem:[#allocation24_spill] sm:$0xff]  ;;  %v10163_v61 = vld [vmem:[#allocation30_spill] sm:$0xff]  ;;  %v10168_v14 = vld [vmem:[#allocation59_spill] sm:$0xff] }
0x1800   : > { %v5430_v31 = vadd.f32 %v9317_v3, %v5369_v57  ;;  %v5440_v43 = vadd.f32 %v9320_v60, %v5382_v18  ;;  %v5441_v7 = vadd.f32 %v9323_v39, %v5383_v63  ;;  %v5442_v40 = vadd.f32 %v9326_v17, %v5384_v0  ;;  %v10155_v57 = vld [vmem:[#allocation35_spill] sm:$0xff]  ;;  %v10156_v63 = vld [vmem:[#allocation61_spill] sm:$0xff]  ;;  %v10169_v52 = vld [vmem:[#allocation22_spill] sm:$0xff] }
0x1801   : > { %v5443_v46 = vadd.f32 %v9332_v30, %v5385_v29  ;;  %v5453_v6 = vadd.f32 %v9335_v26, %v5398_v55  ;;  %v5454_v12 = vadd.f32 %v9338_v49, %v5399_v4  ;;  %v5455_v1 = vadd.f32 %v9341_v54, %v5400_v15  ;;  %v10170_v55 = vld [vmem:[#allocation60_spill] sm:$0xff]  ;;  %v10171_v4 = vld [vmem:[#allocation58_spill] sm:$0xff] }
0x1802   : > { %v5456_v45 = vadd.f32 %v9343_v33, %v5401_v36  ;;  %v5466_v34 = vadd.f32 %v9346_v44, %v5414_v38  ;;  %v5467_v3 = vadd.f32 %v9349_v9, %v5415_v28  ;;  %v5468_v60 = vadd.f32 %v9352_v41, %v5416_v8  ;;  %v10172_v36 = vld [vmem:[#allocation39_spill] sm:$0xff]  ;;  %v10173_v38 = vld [vmem:[#allocation32_spill] sm:$0xff] }
0x1803   : > { %v5469_v39 = vadd.f32 %v10155_v57, %v5417_v47  ;;  %v5479_v17 = vadd.f32 %v10156_v63, %v5427_v22  ;;  %v5480_v30 = vadd.f32 %v10157_v23, %v5428_v35  ;;  %v5481_v26 = vadd.f32 %v10158_v37, %v5429_v56  ;;  %v10174_v8 = vld [vmem:[#allocation40_spill] sm:$0xff]  ;;  %v10175_v47 = vld [vmem:[#allocation37_spill] sm:$0xff] }
0x1804   : > { %v5482_v49 = vadd.f32 %v10159_v32, %v5430_v31  ;;  %v5492_v54 = vadd.f32 %v10160_v59, %v5440_v43  ;;  %v5493_v33 = vadd.f32 %v10161_v2, %v5441_v7  ;;  %v5494_v44 = vadd.f32 %v10162_v20, %v5442_v40  ;;  %v10176_v7 = vld [vmem:[#allocation26_spill] sm:$0xff] }
0x1805   : > { %v5495_v9 = vadd.f32 %v10163_v61, %v5443_v46  ;;  %v5505_v41 = vadd.f32 %v10164_v13, %v5453_v6  ;;  %v5506_v21 = vadd.f32 %v10165_v50, %v5454_v12  ;;  %v5507_v16 = vadd.f32 %v10166_v25, %v5455_v1  ;;  %v10177_v46 = vld [vmem:[#allocation65_spill] sm:$0xff]  ;;  %v10178_v12 = vld [vmem:[#allocation31_spill] sm:$0xff] }
0x1806   : > { %v5508_v42 = vadd.f32 %v10167_v27, %v5456_v45  ;;  %v5509_v10 = vadd.f32 %v5492_v54, %v5479_v17  ;;  %v5510_v18 = vadd.f32 %v5493_v33, %v5480_v30  ;;  %v5511_v0 = vadd.f32 %v5494_v44, %v5481_v26 }
0x1807   : > { %v5512_v29 = vadd.f32 %v5495_v9, %v5482_v49  ;;  %v5513_v62 = vadd.f32 %v5505_v41, %v5466_v34  ;;  %v5514_v58 = vadd.f32 %v5506_v21, %v5467_v3  ;;  %v5515_v51 = vadd.f32 %v5507_v16, %v5468_v60  ;;  %v10179_v34 = vld [vmem:[#allocation50_spill] sm:$0xff] }
0x1808   : > { %v5516_v24 = vadd.f32 %v5508_v42, %v5469_v39  ;;  %v4263_v19 = vadd.f32 %v10169_v52, %v10168_v14  ;;  %v4264_v15 = vadd.f32 %v10171_v4, %v10170_v55  ;;  %v4265_v28 = vadd.f32 %v10173_v38, %v10172_v36 }
0x1809   : > { %v5517_v5 = vadd.f32 %v5513_v62, %v5509_v10  ;;  %v5518_v48 = vadd.f32 %v5514_v58, %v5510_v18  ;;  %v5519_v11 = vadd.f32 %v5515_v51, %v5511_v0  ;;  %v4266_v22 = vadd.f32 %v10175_v47, %v10174_v8 }
0x180a   : > { %v5520_v53 = vadd.f32 %v5516_v24, %v5512_v29 }
0x180b   : > { %5521 = vst.msk [vmem:[#allocation3 + $0x20] sm:$0xff] %vm712_vm0, %v5517_v5  ;;  %5522 = vst.msk [vmem:[#allocation3 + $0x28] sm:$0xff] %vm712_vm0, %v5518_v48 }
0x180c   : > { %5523 = vst.msk [vmem:[#allocation3 + $0x30] sm:$0xff] %vm712_vm0, %v5519_v11  ;;  %5524 = vst.msk [vmem:[#allocation3 + $0x38] sm:$0xff] %vm712_vm0, %v5520_v53 }
0x1812   : > { %v5529_v35 = vld [vmem:[#allocation3 + $0x20] sm:$0xff]  ;;  %v5530_v56 = vld [vmem:[#allocation3 + $0x28] sm:$0xff] }
0x1813   : > { %v5531_v31 = vld [vmem:[#allocation3 + $0x30] sm:$0xff]  ;;  %v5532_v43 = vld [vmem:[#allocation3 + $0x38] sm:$0xff]  ;;  %v5537_v40 = vsub.f32 %v10176_v7, %v5529_v35  ;;  %v5538_v6 = vsub.f32 %v10177_v46, %v5530_v56  ;;  %v5545_v45 = vadd.f32 %v5529_v35, %v4263_v19  ;;  %v5546_v60 = vadd.f32 %v5530_v56, %v4264_v15 }
0x1814   : > { %v5539_v1 = vsub.f32 %v10178_v12, %v5531_v31  ;;  %v5540_v3 = vsub.f32 %v10179_v34, %v5532_v43  ;;  %v5547_v57 = vadd.f32 %v5531_v31, %v4265_v28  ;;  %v5548_v39 = vadd.f32 %v5532_v43, %v4266_v22 }
0x1815   : > { %5553 = vst.msk [vmem:[%s9221_s25 + $0x20] sm:$0xff] %vm712_vm0, %v5537_v40  ;;  %5554 = vst.msk [vmem:[%s9221_s25 + $0x28] sm:$0xff] %vm712_vm0, %v5538_v6 }
0x1816   : > { %5555 = vst.msk [vmem:[%s9221_s25 + $0x30] sm:$0xff] %vm712_vm0, %v5539_v1  ;;  %5561 = vst.msk [vmem:[%s9229_s23 + $0x20] sm:$0xff] %vm712_vm0, %v5545_v45 }
0x1817   : > { %5556 = vst.msk [vmem:[%s9221_s25 + $0x38] sm:$0xff] %vm712_vm0, %v5540_v3  ;;  %5562 = vst.msk [vmem:[%s9229_s23 + $0x28] sm:$0xff] %vm712_vm0, %v5546_v60 }
0x1818   : > { %5563 = vst.msk [vmem:[%s9229_s23 + $0x30] sm:$0xff] %vm712_vm0, %v5547_v57  ;;  %5564 = vst.msk [vmem:[%s9229_s23 + $0x38] sm:$0xff] %vm712_vm0, %v5548_v39 }
0x1819   : > { %6790 = shalt.err (!%p6787_p1)
}
0x181a   : > { %s6791_s25 = scalar_lea.hbm %s9461_s20, 1024  ;;  %s6795_s28 = scalar_lea.hbm %s9582_s18, 2048 }
0x181b   : > { %p6792_p2 = scmp.ne.s32.totalorder %s9461_s20, %s6791_s25  ;;  %p6796_p9 = scmp.lt.u32.totalorder %s9461_s20, %s9582_s18 }
0x181c   : > { %p6797_p5 = scmp.lt.u32.totalorder %s6795_s28, %s6791_s25  ;;  %p6799_p10 = scmp.lt.u32.totalorder %s6791_s25, %s9461_s20 }
0x181d   : > { %p6793_p3 = pnand %p6792_p2, %p10180_p12 }
0x181e   : > { %p6798_p6 = por %p6797_p5, %p6796_p9 }
0x181f   : > { %p6794_p4 = pneg %p6793_p3 }
0x1820   : > { %p6800_p0 = por %p6799_p10, %p6798_p6 }
0x1822   : > { %p6801_p7 = pnand %p6800_p0, %p6794_p4 }
0x1824   : > { %6804 = shalt.err (!%p6801_p7)
}
0x1825   : > { %s6888_s22 = smov 128   ;;  %s6889_s1 = smov 8  }
0x1826   : > { %s10181_s5 = scalar_lea.sflag [#allocation5], %s9206_s26  ;;  %s6805_s25 = scalar_lea.vmem %s9483_s27, 1024 }
0x1827   : > { %6534 = dma.vmem_to_hbm [thread:$0]  (%p10180_p12), %s9467_s2, 1024, %s9461_s20, %s10181_s5, %s6888_s22, %s6888_s22, %s6889_s1  }
0x1828   : > { %p6806_p8 = scmp.ne.s32.totalorder %s9483_s27, %s6805_s25  ;;  %s6890_s23 = smov [#allocation10]  }
0x1829   : > { %s6809_s28 = sshll.u32 %s6890_s23, 4  ;;  %s6810_s28 = int_to_ptr.vmem [resolvable:$false] %s6809_s28 }
0x182a   : > { %p6807_p11 = pnand %p6806_p8, %p10180_p12  ;;  %s6811_s17 = scalar_lea.vmem %s6810_s28, 2048 }
0x182b   : > { %p6812_p1 = scmp.lt.s32.totalorder %s9483_s27, %s6810_s28  ;;  %p6813_p2 = scmp.lt.s32.totalorder %s6811_s17, %s6805_s25 }
0x182c   : > { %p6808_p13 = pneg %p6807_p11 }
0x182d   : > { %p6814_p3 = por %p6813_p2, %p6812_p1 }
0x182f   : > { %p6815_p4 = pnand %p6814_p3, %p6808_p13 }
0x1831   : > { %6818 = shalt.err (!%p6815_p4)
}
0x1832   : > { %s6819_s2 = scalar_lea.hbm %s9481_s29, 1024  ;;  %s6823_s23 = scalar_lea.hbm %s9583_s19, 2048 }
0x1833   : > { %p6820_p9 = scmp.ne.s32.totalorder %s9481_s29, %s6819_s2  ;;  %p6824_p10 = scmp.lt.u32.totalorder %s9481_s29, %s9583_s19 }
0x1834   : > { %p6825_p0 = scmp.lt.u32.totalorder %s6823_s23, %s6819_s2  ;;  %p6827_p8 = scmp.lt.u32.totalorder %s6819_s2, %s9481_s29 }
0x1835   : > { %p6821_p5 = pnand %p6820_p9, %p10180_p12 }
0x1836   : > { %p6826_p7 = por %p6825_p0, %p6824_p10 }
0x1837   : > { %p6822_p6 = pneg %p6821_p5 }
0x1838   : > { %p6828_p11 = por %p6827_p8, %p6826_p7 }
0x183a   : > { %p6829_p13 = pnand %p6828_p11, %p6822_p6 }
0x183c   : > { %6832 = shalt.err (!%p6829_p13)
}
0x183d   : > { %s10182_s25 = scalar_lea.sflag [#allocation11], %s9206_s26 }
0x183e   : > { %6535 = dma.vmem_to_hbm [thread:$0]  (%p10180_p12), %s9483_s27, 1024, %s9481_s29, %s10182_s25, %s6888_s22, %s6888_s22, %s6889_s1  }
0x183f PF: > { %s10183_s4 = sld [smem:[#allocation19_spill]]  ;;  %p6556_p1 = scmp.ge.s32.totalorder %s6879_s21, 2 }
0x1840   : > { %s5617_s17 = sand.u32 1, %s6867_s0  }
0x1841   : > { %s5618_s2 = scalar_lea.sflag [#allocation5], %s5617_s17 }
0x1845   : > { %p10184_p2 = scmp.ne.s32.totalorder %s10183_s4, 0 }
0x1847   : > { %p6546_p3 = pnand %p6556_p1, %p10184_p2 }
0x1849   : > { %6858 = dma.done.wait (!%p6546_p3), %s5618_s2, 1024  }
0x184a   : > { %6860 = vsyncadd (!%p6546_p3), %s5618_s2, 4294966272  ;;  %s5627_s3 = scalar_lea.sflag [#allocation11], %s5617_s17 }
0x184b   : > { %6862 = dma.done.wait (!%p6546_p3), %s5627_s3, 1024  }
0x184c   : > { %6864 = vsyncadd (!%p6546_p3), %s5627_s3, 4294966272  ;;  %s10185_s21 = sld [smem:[#allocation17_spill]]  ;;  %s10186_s26 = sld [smem:[#allocation16_spill]] }
0x184d   : > { %s10187_s20 = sld [smem:[#allocation18_spill]]  ;;  %s10188_s0 = smov %s6871_s30 }
0x1852   : > { %p35_p12 = scmp.ge.s32.totalorder %s10185_s21, 4   ;;  %s10189_s30 = smov %s10186_s26 }
0x1854   :  { %37 = sbr.rel (!%p35_p12) target bundleno = 16 (0x10), region = 165 }
0x185b   :  { %5632 = vsyncpa [#allocation5], 1 }
0x185c   :  { %5634 = vsyncpa [#allocation5 + $0x1], 1 }
0x185d   :  { %5635 = vsyncpa [#allocation11], 1 }
0x185e   :  { %5637 = vsyncpa [#allocation11 + $0x1], 1 }
0x185f   :  { %5638 = vsyncpa [#allocation6], 1 }
0x1860   :  { %5640 = vsyncpa [#allocation6 + $0x1], 1 }
0x1861   :  { %5641 = vsyncpa [#allocation8], 1 }

</bundles_post_ra>
